<compile_context>
chip_gen: v6e
topology: v6e:2x2x1
jax: 0.10.0
libtpu: 0.0.40
codegen_flags: <defaults>
</compile_context>

<pallas_src>
import functools
import math

import jax
import jax.numpy as jnp
from jax.experimental import pallas as pl
from jax.experimental.pallas import tpu as pltpu


def _softmax_lastdim(a):
    """Row softmax in f32; the divide goes to the (otherwise idle) EUP slot."""
    m = jnp.max(a, axis=-1, keepdims=True)
    e = jnp.exp(a - m)
    return e * pl.reciprocal(jnp.sum(e, axis=-1, keepdims=True), approx=True)


def scam_kernel(xl_ref, xr_ref,
                wl1_ref, bl1_ref, wr1_ref, br1_ref,
                wl2_ref, bl2_ref, wr2_ref, br2_ref,
                beta_ref, gamma_ref,
                o_ref, *, rows, width):
    # xl_ref / xr_ref / o_ref: (rows*width, C) slab == `rows` independent
    # (batch, image-row) pairs, each a (width, C) token sequence.
    xl = xl_ref[...]                       # (R*W, C) f32 (kept f32 for residual)
    xr = xr_ref[...]
    xl_b = xl.astype(jnp.bfloat16)
    xr_b = xr.astype(jnp.bfloat16)

    # 1x1 convs == per-pixel linear layers: one big (R*W, C) @ (C, C) MXU
    # matmul each (weights pre-transposed to (C_in, C_out); `scale` pre-folded
    # into wl1/bl1 by the wrapper).  Biases are added once to the whole slab.
    def proj(x_b, w_ref, b_ref):
        w = w_ref[...].astype(jnp.bfloat16)
        return jnp.dot(x_b, w, preferred_element_type=jnp.float32) + b_ref[...]

    q_l = proj(xl_b, wl1_ref, bl1_ref)     # (R*W, C), already * scale
    q_r = proj(xr_b, wr1_ref, br1_ref)
    v_l = proj(xl_b, wl2_ref, bl2_ref)
    v_r = proj(xr_b, wr2_ref, br2_ref)

    c = q_l.shape[-1]
    # Split the leading dim back into (rows, width): layout-preserving reshape
    # when width % 8 == 0 (vreg sublane alignment; holds for typical widths).
    q_l3 = q_l.reshape(rows, width, c).astype(jnp.bfloat16)
    q_r3 = q_r.reshape(rows, width, c).astype(jnp.bfloat16)
    v_l3 = v_l.reshape(rows, width, c).astype(jnp.bfloat16)
    v_r3 = v_r.reshape(rows, width, c).astype(jnp.bfloat16)

    # attn  [r, w, v] = sum_c q_l[r, w, c] * q_r[r, v, c]   (scale folded in)
    # attn_t[r, v, w] = sum_c q_r[r, v, c] * q_l[r, w, c]   (== attn^T, computed
    #   directly on the MXU instead of materializing an XLU transpose)
    attn = jnp.einsum('rwc,rvc->rwv', q_l3, q_r3,
                      preferred_element_type=jnp.float32)      # (R, W, W) f32
    attn_t = jnp.einsum('rvc,rwc->rvw', q_r3, q_l3,
                        preferred_element_type=jnp.float32)    # (R, W, W) f32

    p_r2l = _softmax_lastdim(attn).astype(jnp.bfloat16)
    p_l2r = _softmax_lastdim(attn_t).astype(jnp.bfloat16)

    f_r2l = jnp.einsum('rwv,rvc->rwc', p_r2l, v_r3,
                       preferred_element_type=jnp.float32)     # (R, W, C) f32
    f_l2r = jnp.einsum('rvw,rwc->rvc', p_l2r, v_l3,
                       preferred_element_type=jnp.float32)     # (R, W, C) f32

    out = (xl + xr
           + f_r2l.reshape(rows * width, c) * beta_ref[...]
           + f_l2r.reshape(rows * width, c) * gamma_ref[...])
    o_ref[...] = out.astype(o_ref.dtype)


def _choose_rows(bh, w, c, budget_bytes=8 << 20, max_rows=256):
    """Largest row-block R whose in-kernel working set fits the VMEM budget."""
    itemsize = 4  # f32
    # 2 inputs + 1 output (double-buffered) + 4 projection temps, per row
    per_row = (3 * 2 + 4) * w * c * itemsize
    # attn + attn_t + probability temps (~3 f32-equivalent (W, W) tiles)
    per_row += 3 * w * w * itemsize
    r = max(1, min(bh, max_rows, budget_bytes // max(per_row, 1)))
    if r >= bh:
        return bh
    # Keep the second-to-last block dim (r*w) a multiple of 8 (sublane tile).
    step = 8 // math.gcd(w, 8)
    r = max(step, (r // step) * step)
    return bh if r >= bh else r


def scam_forward_nhwc(xl_nhwc, xr_nhwc, params):
    """Core entry point: (B, H, W, C) in / out -- no layout transposes needed."""
    B, H, W, C = xl_nhwc.shape
    scale = float(C) ** (-0.5)
    (wl1, bl1, wr1, br1, wl2, bl2, wr2, br2, beta, gamma) = params

    # Fold the attention scale into the left query projection (tiny one-time
    # param transform instead of a (W, W)-sized multiply per block).
    wl1_s = wl1 * scale
    bl1_s = bl1 * scale

    bh = B * H
    rows = _choose_rows(bh, W, C)
    nblk = pl.cdiv(bh, rows)

    xl2 = xl_nhwc.reshape(bh * W, C)   # free row-major reshape
    xr2 = xr_nhwc.reshape(bh * W, C)

    x_spec = pl.BlockSpec((rows * W, C), lambda i: (i, 0))
    w_spec = pl.BlockSpec((C, C), lambda i: (0, 0))
    v_spec = pl.BlockSpec((1, C), lambda i: (0, 0))

    out2 = pl.pallas_call(
        functools.partial(scam_kernel, rows=rows, width=W),
        out_shape=jax.ShapeDtypeStruct((bh * W, C), xl_nhwc.dtype),
        grid=(nblk,),
        in_specs=[x_spec, x_spec,
                  w_spec, v_spec, w_spec, v_spec,
                  w_spec, v_spec, w_spec, v_spec,
                  v_spec, v_spec],
        out_specs=x_spec,
        compiler_params=pltpu.CompilerParams(
            # parallel row-block axis -> sharded across v7x's 2 TensorCores
            dimension_semantics=("parallel",),
            vmem_limit_bytes=32 * 1024 * 1024),
    )(xl2, xr2, wl1_s, bl1_s, wr1, br1, wl2, bl2, wr2, br2, beta, gamma)

    return out2.reshape(B, H, W, C)


def scam_forward(x_l, x_r, params):
    """NCHW wrapper matching the PyTorch module interface.

    One layout conversion per direction (the transpose is fused with the
    flattening reshape).  Callers that already hold NHWC data should use
    scam_forward_nhwc directly and skip both transposes.
    """
    xl_nhwc = jnp.transpose(x_l, (0, 2, 3, 1))
    xr_nhwc = jnp.transpose(x_r, (0, 2, 3, 1))
    out = scam_forward_nhwc(xl_nhwc, xr_nhwc, params)
    return jnp.transpose(out, (0, 3, 1, 2))


def scam_reference(x_l, x_r, params):
    """Pure-JAX f32 reference mirroring the PyTorch forward (verification)."""
    B, C, H, W = x_l.shape
    scale = float(C) ** (-0.5)
    (wl1, bl1, wr1, br1, wl2, bl2, wr2, br2, beta, gamma) = params
    xl = jnp.transpose(x_l, (0, 2, 3, 1))   # (B, H, W, C)
    xr = jnp.transpose(x_r, (0, 2, 3, 1))
    q_l = xl @ wl1 + bl1
    q_r = xr @ wr1 + br1
    v_l = xl @ wl2 + bl2
    v_r = xr @ wr2 + br2
    attn = jnp.einsum('bhwc,bhvc->bhwv', q_l, q_r) * scale
    f_r2l = jax.nn.softmax(attn, axis=-1) @ v_r
    f_l2r = jax.nn.softmax(jnp.swapaxes(attn, -1, -2), axis=-1) @ v_l
    out = xl + xr + f_r2l * beta + f_l2r * gamma
    return jnp.transpose(out, (0, 3, 1, 2))


def init_params(key, c):
    """Deterministic synthetic parameters matching the module's shapes.

    Conv2d(c, c, 1) weight is (c_out, c_in, 1, 1) in PyTorch; here stored
    pre-transposed as (c_in, c_out) so the kernel does `x @ W + b`.
    Biases / beta / gamma stored as (1, c) for a 2-D TPU-friendly layout.
    beta/gamma are zeros in __init__; we use small random values so the
    attention path actually contributes in the test.
    """
    ks = jax.random.split(key, 10)
    bound = 1.0 / (c ** 0.5)

    def conv_w(k):
        return jax.random.uniform(k, (c, c), jnp.float32, -bound, bound)

    def conv_b(k):
        return jax.random.uniform(k, (1, c), jnp.float32, -bound, bound)

    wl1, bl1 = conv_w(ks[0]), conv_b(ks[1])
    wr1, br1 = conv_w(ks[2]), conv_b(ks[3])
    wl2, bl2 = conv_w(ks[4]), conv_b(ks[5])
    wr2, br2 = conv_w(ks[6]), conv_b(ks[7])
    beta = 0.1 * jax.random.normal(ks[8], (1, c), jnp.float32)
    gamma = 0.1 * jax.random.normal(ks[9], (1, c), jnp.float32)
    return (wl1, bl1, wr1, br1, wl2, bl2, wr2, br2, beta, gamma)


if __name__ == "__main__":
    B, C, H, W = 2, 4, 16, 16
    key = jax.random.PRNGKey(0)
    k_xl, k_xr, k_p = jax.random.split(key, 3)

    x_l = jax.random.normal(k_xl, (B, C, H, W), jnp.float32)
    x_r = jax.random.normal(k_xr, (B, C, H, W), jnp.float32)
    params = init_params(k_p, C)

    out = scam_forward(x_l, x_r, params)
    jax.block_until_ready(out)

    ref = scam_reference(x_l, x_r, params)
    assert out.shape == (B, C, H, W), out.shape
    # bf16 MXU operands + approx reciprocal => compare at bf16-level tolerance.
    max_err = float(jnp.max(jnp.abs(out - ref)))
    assert jnp.allclose(out, ref, atol=2e-2, rtol=2e-2), (
        f"mismatch vs reference: max abs err = {max_err}")

    print("KERNEL_OK")
</pallas_src>

<mosaic_0001>
module attributes {stable_mosaic.version = 11 : i64} {
  func.func @scam_kernel(%arg0: i32, %arg1: memref<512x4xf32, #tpu.memory_space<vmem>>, %arg2: memref<512x4xf32, #tpu.memory_space<vmem>>, %arg3: memref<4x4xf32, #tpu.memory_space<vmem>>, %arg4: memref<1x4xf32, #tpu.memory_space<vmem>>, %arg5: memref<4x4xf32, #tpu.memory_space<vmem>>, %arg6: memref<1x4xf32, #tpu.memory_space<vmem>>, %arg7: memref<4x4xf32, #tpu.memory_space<vmem>>, %arg8: memref<1x4xf32, #tpu.memory_space<vmem>>, %arg9: memref<4x4xf32, #tpu.memory_space<vmem>>, %arg10: memref<1x4xf32, #tpu.memory_space<vmem>>, %arg11: memref<1x4xf32, #tpu.memory_space<vmem>>, %arg12: memref<1x4xf32, #tpu.memory_space<vmem>>, %arg13: memref<512x4xf32, #tpu.memory_space<vmem>>) attributes {dimension_semantics = [#tpu.dimension_semantics<parallel>], iteration_bounds = array<i64: 1>, scalar_prefetch = 0 : i64, scratch_operands = 0 : i64, tpu.core_type = #tpu.core_type<tc>, window_params = [{transform_indices = @transform_0, window_bounds = array<i64: 512, 4>}, {transform_indices = @transform_1, window_bounds = array<i64: 512, 4>}, {pipeline_mode = #tpu.pipeline_mode<synchronous>, transform_indices = @transform_2, window_bounds = array<i64: 4, 4>}, {pipeline_mode = #tpu.pipeline_mode<synchronous>, transform_indices = @transform_3, window_bounds = array<i64: 1, 4>}, {pipeline_mode = #tpu.pipeline_mode<synchronous>, transform_indices = @transform_4, window_bounds = array<i64: 4, 4>}, {pipeline_mode = #tpu.pipeline_mode<synchronous>, transform_indices = @transform_5, window_bounds = array<i64: 1, 4>}, {pipeline_mode = #tpu.pipeline_mode<synchronous>, transform_indices = @transform_6, window_bounds = array<i64: 4, 4>}, {pipeline_mode = #tpu.pipeline_mode<synchronous>, transform_indices = @transform_7, window_bounds = array<i64: 1, 4>}, {pipeline_mode = #tpu.pipeline_mode<synchronous>, transform_indices = @transform_8, window_bounds = array<i64: 4, 4>}, {pipeline_mode = #tpu.pipeline_mode<synchronous>, transform_indices = @transform_9, window_bounds = array<i64: 1, 4>}, {pipeline_mode = #tpu.pipeline_mode<synchronous>, transform_indices = @transform_10, window_bounds = array<i64: 1, 4>}, {pipeline_mode = #tpu.pipeline_mode<synchronous>, transform_indices = @transform_11, window_bounds = array<i64: 1, 4>}, {transform_indices = @transform_12, window_bounds = array<i64: 512, 4>}]} {
    %c0 = arith.constant 0 : index
    %c0_0 = arith.constant 0 : index
    %0 = vector.load %arg1[%c0, %c0_0] : memref<512x4xf32, #tpu.memory_space<vmem>>, vector<512x4xf32>
    %c0_1 = arith.constant 0 : index
    %c0_2 = arith.constant 0 : index
    %1 = vector.load %arg2[%c0_1, %c0_2] : memref<512x4xf32, #tpu.memory_space<vmem>>, vector<512x4xf32>
    %2 = arith.truncf %0 : vector<512x4xf32> to vector<512x4xbf16>
    %3 = arith.truncf %1 : vector<512x4xf32> to vector<512x4xbf16>
    %c0_3 = arith.constant 0 : index
    %c0_4 = arith.constant 0 : index
    %4 = vector.load %arg3[%c0_3, %c0_4] : memref<4x4xf32, #tpu.memory_space<vmem>>, vector<4x4xf32>
    %5 = arith.truncf %4 : vector<4x4xf32> to vector<4x4xbf16>
    %cst = arith.constant dense<0.000000e+00> : vector<512x4xf32>
    %6 = tpu.matmul %2, %5, %cst {dimension_numbers = #tpu.dot_dimension_numbers<[1], [0], [0], [1], [0, 0, 1, 1], [], []>} : vector<512x4xbf16>, vector<4x4xbf16>, vector<512x4xf32> -> vector<512x4xf32>
    %c0_5 = arith.constant 0 : index
    %c0_6 = arith.constant 0 : index
    %7 = vector.load %arg4[%c0_5, %c0_6] : memref<1x4xf32, #tpu.memory_space<vmem>>, vector<1x4xf32>
    %8 = vector.broadcast %7 : vector<1x4xf32> to vector<512x4xf32>
    %9 = arith.addf %6, %8 : vector<512x4xf32>
    %c0_7 = arith.constant 0 : index
    %c0_8 = arith.constant 0 : index
    %10 = vector.load %arg5[%c0_7, %c0_8] : memref<4x4xf32, #tpu.memory_space<vmem>>, vector<4x4xf32>
    %11 = arith.truncf %10 : vector<4x4xf32> to vector<4x4xbf16>
    %cst_9 = arith.constant dense<0.000000e+00> : vector<512x4xf32>
    %12 = tpu.matmul %3, %11, %cst_9 {dimension_numbers = #tpu.dot_dimension_numbers<[1], [0], [0], [1], [0, 0, 1, 1], [], []>} : vector<512x4xbf16>, vector<4x4xbf16>, vector<512x4xf32> -> vector<512x4xf32>
    %c0_10 = arith.constant 0 : index
    %c0_11 = arith.constant 0 : index
    %13 = vector.load %arg6[%c0_10, %c0_11] : memref<1x4xf32, #tpu.memory_space<vmem>>, vector<1x4xf32>
    %14 = vector.broadcast %13 : vector<1x4xf32> to vector<512x4xf32>
    %15 = arith.addf %12, %14 : vector<512x4xf32>
    %c0_12 = arith.constant 0 : index
    %c0_13 = arith.constant 0 : index
    %16 = vector.load %arg7[%c0_12, %c0_13] : memref<4x4xf32, #tpu.memory_space<vmem>>, vector<4x4xf32>
    %17 = arith.truncf %16 : vector<4x4xf32> to vector<4x4xbf16>
    %cst_14 = arith.constant dense<0.000000e+00> : vector<512x4xf32>
    %18 = tpu.matmul %2, %17, %cst_14 {dimension_numbers = #tpu.dot_dimension_numbers<[1], [0], [0], [1], [0, 0, 1, 1], [], []>} : vector<512x4xbf16>, vector<4x4xbf16>, vector<512x4xf32> -> vector<512x4xf32>
    %c0_15 = arith.constant 0 : index
    %c0_16 = arith.constant 0 : index
    %19 = vector.load %arg8[%c0_15, %c0_16] : memref<1x4xf32, #tpu.memory_space<vmem>>, vector<1x4xf32>
    %20 = vector.broadcast %19 : vector<1x4xf32> to vector<512x4xf32>
    %21 = arith.addf %18, %20 : vector<512x4xf32>
    %c0_17 = arith.constant 0 : index
    %c0_18 = arith.constant 0 : index
    %22 = vector.load %arg9[%c0_17, %c0_18] : memref<4x4xf32, #tpu.memory_space<vmem>>, vector<4x4xf32>
    %23 = arith.truncf %22 : vector<4x4xf32> to vector<4x4xbf16>
    %cst_19 = arith.constant dense<0.000000e+00> : vector<512x4xf32>
    %24 = tpu.matmul %3, %23, %cst_19 {dimension_numbers = #tpu.dot_dimension_numbers<[1], [0], [0], [1], [0, 0, 1, 1], [], []>} : vector<512x4xbf16>, vector<4x4xbf16>, vector<512x4xf32> -> vector<512x4xf32>
    %c0_20 = arith.constant 0 : index
    %c0_21 = arith.constant 0 : index
    %25 = vector.load %arg10[%c0_20, %c0_21] : memref<1x4xf32, #tpu.memory_space<vmem>>, vector<1x4xf32>
    %26 = vector.broadcast %25 : vector<1x4xf32> to vector<512x4xf32>
    %27 = arith.addf %24, %26 : vector<512x4xf32>
    %28 = vector.shape_cast %9 : vector<512x4xf32> to vector<32x16x4xf32>
    %29 = arith.truncf %28 : vector<32x16x4xf32> to vector<32x16x4xbf16>
    %30 = vector.shape_cast %15 : vector<512x4xf32> to vector<32x16x4xf32>
    %31 = arith.truncf %30 : vector<32x16x4xf32> to vector<32x16x4xbf16>
    %32 = vector.shape_cast %21 : vector<512x4xf32> to vector<32x16x4xf32>
    %33 = arith.truncf %32 : vector<32x16x4xf32> to vector<32x16x4xbf16>
    %34 = vector.shape_cast %27 : vector<512x4xf32> to vector<32x16x4xf32>
    %35 = arith.truncf %34 : vector<32x16x4xf32> to vector<32x16x4xbf16>
    "tpu.trace_start"() <{level = 10 : i32, message = "rwc,rvc->rwv"}> : () -> ()
    %cst_22 = arith.constant dense<0.000000e+00> : vector<32x16x16xf32>
    %36 = tpu.matmul %29, %31, %cst_22 {dimension_numbers = #tpu.dot_dimension_numbers<[2], [2], [1], [1], [0, 0, 0, 1, 1, 1], [0], [0]>} : vector<32x16x4xbf16>, vector<32x16x4xbf16>, vector<32x16x16xf32> -> vector<32x16x16xf32>
    "tpu.trace_stop"() : () -> ()
    "tpu.trace_start"() <{level = 10 : i32, message = "rvc,rwc->rvw"}> : () -> ()
    %cst_23 = arith.constant dense<0.000000e+00> : vector<32x16x16xf32>
    %37 = tpu.matmul %31, %29, %cst_23 {dimension_numbers = #tpu.dot_dimension_numbers<[2], [2], [1], [1], [0, 0, 0, 1, 1, 1], [0], [0]>} : vector<32x16x4xbf16>, vector<32x16x4xbf16>, vector<32x16x16xf32> -> vector<32x16x16xf32>
    "tpu.trace_stop"() : () -> ()
    %cst_24 = arith.constant dense<0xFF800000> : vector<32x16xf32>
    %38 = vector.multi_reduction <maximumf>, %36, %cst_24 [2] : vector<32x16x16xf32> to vector<32x16xf32>
    %39 = vector.shape_cast %38 : vector<32x16xf32> to vector<32x16x1xf32>
    %40 = vector.broadcast %39 : vector<32x16x1xf32> to vector<32x16x16xf32>
    %41 = arith.subf %36, %40 : vector<32x16x16xf32>
    %42 = math.exp %41 : vector<32x16x16xf32>
    %cst_25 = arith.constant dense<0.000000e+00> : vector<32x16xf32>
    %43 = vector.multi_reduction <add>, %42, %cst_25 [2] : vector<32x16x16xf32> to vector<32x16xf32>
    %44 = vector.shape_cast %43 : vector<32x16xf32> to vector<32x16x1xf32>
    %45 = tpu.reciprocal %44 {approx = true} : vector<32x16x1xf32> -> vector<32x16x1xf32>
    %46 = vector.broadcast %45 : vector<32x16x1xf32> to vector<32x16x16xf32>
    %47 = arith.mulf %42, %46 : vector<32x16x16xf32>
    %48 = arith.truncf %47 : vector<32x16x16xf32> to vector<32x16x16xbf16>
    %cst_26 = arith.constant dense<0xFF800000> : vector<32x16xf32>
    %49 = vector.multi_reduction <maximumf>, %37, %cst_26 [2] : vector<32x16x16xf32> to vector<32x16xf32>
    %50 = vector.shape_cast %49 : vector<32x16xf32> to vector<32x16x1xf32>
    %51 = vector.broadcast %50 : vector<32x16x1xf32> to vector<32x16x16xf32>
    %52 = arith.subf %37, %51 : vector<32x16x16xf32>
    %53 = math.exp %52 : vector<32x16x16xf32>
    %cst_27 = arith.constant dense<0.000000e+00> : vector<32x16xf32>
    %54 = vector.multi_reduction <add>, %53, %cst_27 [2] : vector<32x16x16xf32> to vector<32x16xf32>
    %55 = vector.shape_cast %54 : vector<32x16xf32> to vector<32x16x1xf32>
    %56 = tpu.reciprocal %55 {approx = true} : vector<32x16x1xf32> -> vector<32x16x1xf32>
    %57 = vector.broadcast %56 : vector<32x16x1xf32> to vector<32x16x16xf32>
    %58 = arith.mulf %53, %57 : vector<32x16x16xf32>
    %59 = arith.truncf %58 : vector<32x16x16xf32> to vector<32x16x16xbf16>
    "tpu.trace_start"() <{level = 10 : i32, message = "rwv,rvc->rwc"}> : () -> ()
    %cst_28 = arith.constant dense<0.000000e+00> : vector<32x16x4xf32>
    %60 = tpu.matmul %48, %35, %cst_28 {dimension_numbers = #tpu.dot_dimension_numbers<[2], [1], [1], [2], [0, 0, 0, 1, 1, 2], [0], [0]>} : vector<32x16x16xbf16>, vector<32x16x4xbf16>, vector<32x16x4xf32> -> vector<32x16x4xf32>
    "tpu.trace_stop"() : () -> ()
    "tpu.trace_start"() <{level = 10 : i32, message = "rvw,rwc->rvc"}> : () -> ()
    %cst_29 = arith.constant dense<0.000000e+00> : vector<32x16x4xf32>
    %61 = tpu.matmul %59, %33, %cst_29 {dimension_numbers = #tpu.dot_dimension_numbers<[2], [1], [1], [2], [0, 0, 0, 1, 1, 2], [0], [0]>} : vector<32x16x16xbf16>, vector<32x16x4xbf16>, vector<32x16x4xf32> -> vector<32x16x4xf32>
    "tpu.trace_stop"() : () -> ()
    %62 = arith.addf %0, %1 : vector<512x4xf32>
    %63 = vector.shape_cast %60 : vector<32x16x4xf32> to vector<512x4xf32>
    %c0_30 = arith.constant 0 : index
    %c0_31 = arith.constant 0 : index
    %64 = vector.load %arg11[%c0_30, %c0_31] : memref<1x4xf32, #tpu.memory_space<vmem>>, vector<1x4xf32>
    %65 = vector.broadcast %64 : vector<1x4xf32> to vector<512x4xf32>
    %66 = arith.mulf %63, %65 : vector<512x4xf32>
    %67 = arith.addf %62, %66 : vector<512x4xf32>
    %68 = vector.shape_cast %61 : vector<32x16x4xf32> to vector<512x4xf32>
    %c0_32 = arith.constant 0 : index
    %c0_33 = arith.constant 0 : index
    %69 = vector.load %arg12[%c0_32, %c0_33] : memref<1x4xf32, #tpu.memory_space<vmem>>, vector<1x4xf32>
    %70 = vector.broadcast %69 : vector<1x4xf32> to vector<512x4xf32>
    %71 = arith.mulf %68, %70 : vector<512x4xf32>
    %72 = arith.addf %67, %71 : vector<512x4xf32>
    %c0_34 = arith.constant 0 : index
    %c0_35 = arith.constant 0 : index
    %73 = vector.load %arg13[%c0_34, %c0_35] : memref<512x4xf32, #tpu.memory_space<vmem>>, vector<512x4xf32>
    tpu.vector_store %arg13[%c0_34, %c0_35], %72 {strides = array<i32>} : memref<512x4xf32, #tpu.memory_space<vmem>>, vector<512x4xf32>,
    return
  }
  func.func @transform_0(%arg0: i32) -> (i32, i32) {
    %c0_i32 = arith.constant 0 : i32
    %c0_i32_0 = arith.constant 0 : i32
    return %arg0, %c0_i32 : i32, i32
  }
  func.func @transform_1(%arg0: i32) -> (i32, i32) {
    %c0_i32 = arith.constant 0 : i32
    %c0_i32_0 = arith.constant 0 : i32
    return %arg0, %c0_i32 : i32, i32
  }
  func.func @transform_2(%arg0: i32) -> (i32, i32) {
    %c0_i32 = arith.constant 0 : i32
    %c0_i32_0 = arith.constant 0 : i32
    %c0_i32_1 = arith.constant 0 : i32
    return %c0_i32, %c0_i32_0 : i32, i32
  }
  func.func @transform_3(%arg0: i32) -> (i32, i32) {
    %c0_i32 = arith.constant 0 : i32
    %c0_i32_0 = arith.constant 0 : i32
    %c0_i32_1 = arith.constant 0 : i32
    return %c0_i32, %c0_i32_0 : i32, i32
  }
  func.func @transform_4(%arg0: i32) -> (i32, i32) {
    %c0_i32 = arith.constant 0 : i32
    %c0_i32_0 = arith.constant 0 : i32
    %c0_i32_1 = arith.constant 0 : i32
    return %c0_i32, %c0_i32_0 : i32, i32
  }
  func.func @transform_5(%arg0: i32) -> (i32, i32) {
    %c0_i32 = arith.constant 0 : i32
    %c0_i32_0 = arith.constant 0 : i32
    %c0_i32_1 = arith.constant 0 : i32
    return %c0_i32, %c0_i32_0 : i32, i32
  }
  func.func @transform_6(%arg0: i32) -> (i32, i32) {
    %c0_i32 = arith.constant 0 : i32
    %c0_i32_0 = arith.constant 0 : i32
    %c0_i32_1 = arith.constant 0 : i32
    return %c0_i32, %c0_i32_0 : i32, i32
  }
  func.func @transform_7(%arg0: i32) -> (i32, i32) {
    %c0_i32 = arith.constant 0 : i32
    %c0_i32_0 = arith.constant 0 : i32
    %c0_i32_1 = arith.constant 0 : i32
    return %c0_i32, %c0_i32_0 : i32, i32
  }
  func.func @transform_8(%arg0: i32) -> (i32, i32) {
    %c0_i32 = arith.constant 0 : i32
    %c0_i32_0 = arith.constant 0 : i32
    %c0_i32_1 = arith.constant 0 : i32
    return %c0_i32, %c0_i32_0 : i32, i32
  }
  func.func @transform_9(%arg0: i32) -> (i32, i32) {
    %c0_i32 = arith.constant 0 : i32
    %c0_i32_0 = arith.constant 0 : i32
    %c0_i32_1 = arith.constant 0 : i32
    return %c0_i32, %c0_i32_0 : i32, i32
  }
  func.func @transform_10(%arg0: i32) -> (i32, i32) {
    %c0_i32 = arith.constant 0 : i32
    %c0_i32_0 = arith.constant 0 : i32
    %c0_i32_1 = arith.constant 0 : i32
    return %c0_i32, %c0_i32_0 : i32, i32
  }
  func.func @transform_11(%arg0: i32) -> (i32, i32) {
    %c0_i32 = arith.constant 0 : i32
    %c0_i32_0 = arith.constant 0 : i32
    %c0_i32_1 = arith.constant 0 : i32
    return %c0_i32, %c0_i32_0 : i32, i32
  }
  func.func @transform_12(%arg0: i32) -> (i32, i32) {
    %c0_i32 = arith.constant 0 : i32
    %c0_i32_0 = arith.constant 0 : i32
    return %arg0, %c0_i32 : i32, i32
  }
}

</mosaic_0001>

<bundles_post_ra>
// kernel: tpu_custom_call.1
= control target key start
LH: loop header
LB: loop body
LE: loop exit
PB: predicated region body
PF: predicated region fallthrough
CT: control target
= control target key end

     0   :  { %vm340_vm0 = vcmask 1041408   ;;  %vm243_vm1 = vcmask 31744   ;;  %vm11597_vm2 = vmmov 0   ;;  %vm4576_vm3 = vcmask 130048   ;;  %s17064_s2 = inlined_call_operand.vmem [shape: f32[4,4], index: 2, kind: input, shape index: {}]   ;;  %s17065_s4 = inlined_call_operand.vmem [shape: f32[4,4], index: 4, kind: input, shape index: {}]   ;;  %s17066_s0 = inlined_call_operand.vmem [shape: f32[512,4], index: 0, kind: input, shape index: {}]   ;;  %s17067_s1 = inlined_call_operand.vmem [shape: f32[512,4], index: 1, kind: input, shape index: {}]   ;;  %s17068_s6 = inlined_call_operand.vmem [shape: f32[4,4], index: 6, kind: input, shape index: {}]   ;;  %s17069_s8 = inlined_call_operand.vmem [shape: f32[4,4], index: 8, kind: input, shape index: {}]   ;;  %s17070_s5 = inlined_call_operand.vmem [shape: f32[1,4], index: 5, kind: input, shape index: {}]   ;;  %s17071_s3 = inlined_call_operand.vmem [shape: f32[1,4], index: 3, kind: input, shape index: {}]   ;;  %s17072_s9 = inlined_call_operand.vmem [shape: f32[1,4], index: 9, kind: input, shape index: {}]   ;;  %s17073_s7 = inlined_call_operand.vmem [shape: f32[1,4], index: 7, kind: input, shape index: {}]   ;;  %s17074_s10 = inlined_call_operand.vmem [shape: f32[1,4], index: 10, kind: input, shape index: {}]   ;;  %s17075_s11 = inlined_call_operand.vmem [shape: f32[1,4], index: 11, kind: input, shape index: {}]   ;;  %s17076_s12 = inlined_call_operand.vmem [shape: f32[512,4], index: 12, kind: output, shape index: {}]  }
   0x1   :  { %v234_v0 = vld [vmem:[%s17064_s2] sm:$0xf]  ;;  %v43_v5 = vld [vmem:[%s17066_s0 + $0x8] sm:$0xff]  ;;  %v44_v12 = vld [vmem:[%s17066_s0 + $0x10] sm:$0xff] }
   0x2   :  { %v633_v1 = vld [vmem:[%s17065_s4] sm:$0xf]  ;;  %v235_v3 = vpack.c.bf16 %v234_v0, %v234_v0  ;;  %v107_v7 = vld [vmem:[%s17067_s1 + $0x8] sm:$0xff]  ;;  %v45_v13 = vld [vmem:[%s17066_s0 + $0x18] sm:$0xff] }
   0x3   :  { %v42_v2 = vld [vmem:[%s17066_s0] sm:$0xff]  ;;  %v634_v4 = vpack.c.bf16 %v633_v1, %v633_v1  ;;  %v11687_v11 = vadd.f32 %v107_v7, %v43_v5  ;;  %v108_v14 = vld [vmem:[%s17067_s1 + $0x10] sm:$0xff]  ;;  %v11702_v17 = vpack.c.bf16 %v45_v13, %v44_v12  ;;  %v109_v18 = vld [vmem:[%s17067_s1 + $0x18] sm:$0xff] }
   0x4   :  { %v106_v6 = vld [vmem:[%s17067_s1] sm:$0xff]  ;;  %v11681_v8 = vpack.c.bf16 %v43_v5, %v42_v2  ;;  %10949 = vmatprep.subr.msk.bf16.mxu0 %vm340_vm0, %v235_v3  ;;  %v342_v15 = vsel %vm340_vm0, %v235_v3, 0  ;;  %v47_v20 = vld [vmem:[%s17066_s0 + $0x28] sm:$0xff]  ;;  %v11713_v21 = vpack.c.bf16 %v109_v18, %v108_v14  ;;  %v48_v26 = vld [vmem:[%s17066_s0 + $0x30] sm:$0xff] }
   0x5   :  { %v11683_v9 = vpack.c.bf16 %v107_v7, %v106_v6  ;;  %v11685_v10 = vadd.f32 %v106_v6, %v42_v2  ;;  %17418 = vst [vmem:[#allocation3_spill] sm:$0xff] %v11687_v11  ;;  %10950 = vmatprep.subr.msk.bf16.mxu1 %vm340_vm0, %v634_v4  ;;  %v739_v16 = vsel %vm340_vm0, %v634_v4, 0  ;;  %v46_v19 = vld [vmem:[%s17066_s0 + $0x20] sm:$0xff]  ;;  %9918 = vmatpush3.bf16.msra.mxu0 %v342_v15  ;;  %v111_v24 = vld [vmem:[%s17067_s1 + $0x28] sm:$0xff]  ;;  %v49_v27 = vld [vmem:[%s17066_s0 + $0x38] sm:$0xff] }
   0x6   :  { %9984 = vmatpush3.bf16.msra.mxu1 %v739_v16  ;;  %v11715_v22 = vpack.c.bf16 %v47_v20, %v46_v19  ;;  %v110_v23 = vld [vmem:[%s17067_s1 + $0x20] sm:$0xff]  ;;  %9919 = vmatprep.mubr.msk.bf16.mxu0 %vm243_vm1, %v11681_v8  ;;  %v112_v28 = vld [vmem:[%s17067_s1 + $0x30] sm:$0xff]  ;;  %v113_v29 = vld [vmem:[%s17067_s1 + $0x38] sm:$0xff]  ;;  %v11761_v34 = vpack.c.bf16 %v49_v27, %v48_v26 }
   0x7   :  { %17417 = vst [vmem:[#allocation2_spill] sm:$0xff] %v11685_v10  ;;  %9985 = vmatprep.mubr.msk.bf16.mxu1 %vm243_vm1, %v11683_v9  ;;  %v11727_v25 = vpack.c.bf16 %v111_v24, %v110_v23  ;;  %v50_v30 = vld [vmem:[%s17066_s0 + $0x40] sm:$0xff]  ;;  %v51_v31 = vld [vmem:[%s17066_s0 + $0x48] sm:$0xff]  ;;  %v11763_v35 = vpack.c.bf16 %v113_v29, %v112_v28  ;;  %v52_v38 = vld [vmem:[%s17066_s0 + $0x50] sm:$0xff] }
   0x8   :  { %9920 = vmatmul.mubr.msk.bf16.vlgmr.msra.gmra.mxu0 %vm243_vm1, %v11702_v17  ;;  %v114_v32 = vld [vmem:[%s17067_s1 + $0x40] sm:$0xff]  ;;  %v115_v33 = vld [vmem:[%s17067_s1 + $0x48] sm:$0xff]  ;;  %v11765_v36 = vpack.c.bf16 %v51_v31, %v50_v30  ;;  %v53_v39 = vld [vmem:[%s17066_s0 + $0x58] sm:$0xff] }
   0x9   :  { %9986 = vmatmul.mubr.msk.bf16.vlgmr.msra.gmra.mxu1 %vm243_vm1, %v11713_v21  ;;  %9923 = vmatprep.mubr.msk.bf16.mxu0 %vm243_vm1, %v11715_v22  ;;  %v11767_v37 = vpack.c.bf16 %v115_v33, %v114_v32  ;;  %v116_v40 = vld [vmem:[%s17067_s1 + $0x50] sm:$0xff]  ;;  %v117_v41 = vld [vmem:[%s17067_s1 + $0x58] sm:$0xff]  ;;  %v54_v42 = vld [vmem:[%s17066_s0 + $0x60] sm:$0xff]  ;;  %v11801_v46 = vpack.c.bf16 %v53_v39, %v52_v38 }
   0xa   :  { %9989 = vmatprep.mubr.msk.bf16.mxu1 %vm243_vm1, %v11727_v25  ;;  %v55_v43 = vld [vmem:[%s17066_s0 + $0x68] sm:$0xff]  ;;  %v118_v44 = vld [vmem:[%s17067_s1 + $0x60] sm:$0xff]  ;;  %v11803_v47 = vpack.c.bf16 %v117_v41, %v116_v40  ;;  %v56_v50 = vld [vmem:[%s17066_s0 + $0x70] sm:$0xff] }
   0xb   :  { %v119_v45 = vld [vmem:[%s17067_s1 + $0x68] sm:$0xff]  ;;  %v11805_v48 = vpack.c.bf16 %v55_v43, %v54_v42  ;;  %v57_v51 = vld [vmem:[%s17066_s0 + $0x78] sm:$0xff]  ;;  %v120_v52 = vld [vmem:[%s17067_s1 + $0x70] sm:$0xff] }
   0xc   :  { %v11807_v49 = vpack.c.bf16 %v119_v45, %v118_v44  ;;  %v121_v53 = vld [vmem:[%s17067_s1 + $0x78] sm:$0xff]  ;;  %v58_v54 = vld [vmem:[%s17066_s0 + $0x80] sm:$0xff]  ;;  %v59_v55 = vld [vmem:[%s17066_s0 + $0x88] sm:$0xff]  ;;  %v11841_v58 = vpack.c.bf16 %v57_v51, %v56_v50 }
   0xd   :  { %v122_v56 = vld [vmem:[%s17067_s1 + $0x80] sm:$0xff]  ;;  %v123_v57 = vld [vmem:[%s17067_s1 + $0x88] sm:$0xff]  ;;  %v11843_v59 = vpack.c.bf16 %v121_v53, %v120_v52  ;;  %v11848_v61 = vpack.c.bf16 %v59_v55, %v58_v54  ;;  %v60_v3 = vld [vmem:[%s17066_s0 + $0x90] sm:$0xff] }
   0xe   :  { %v1030_v60 = vld [vmem:[%s17068_s6] sm:$0xf]  ;;  %v11850_v62 = vpack.c.bf16 %v123_v57, %v122_v56  ;;  %v61_v4 = vld [vmem:[%s17066_s0 + $0x98] sm:$0xff]  ;;  %v124_v5 = vld [vmem:[%s17067_s1 + $0x90] sm:$0xff] }
   0xf   :  { %v1031_v63 = vpack.c.bf16 %v1030_v60, %v1030_v60  ;;  %v1331_v0 = vld [vmem:[%s17069_s8] sm:$0xf]  ;;  %v125_v6 = vld [vmem:[%s17067_s1 + $0x98] sm:$0xff]  ;;  %v63_v13 = vld [vmem:[%s17066_s0 + $0xa8] sm:$0xff]  ;;  %v11891_v16 = vpack.c.bf16 %v61_v4, %v60_v3 }
  0x10   :  { %9924 = vmatmul.mubr.msk.bf16.gmra.mxu0 %vm243_vm1, %v11761_v34  ;;  %v1332_v2 = vpack.c.bf16 %v1331_v0, %v1331_v0  ;;  %v62_v7 = vld [vmem:[%s17066_s0 + $0xa0] sm:$0xff]  ;;  %v127_v15 = vld [vmem:[%s17067_s1 + $0xa8] sm:$0xff]  ;;  %v11893_v18 = vpack.c.bf16 %v125_v6, %v124_v5  ;;  %v64_v23 = vld [vmem:[%s17066_s0 + $0xb0] sm:$0xff] }
  0x11   :  { %9990 = vmatmul.mubr.msk.bf16.gmra.mxu1 %vm243_vm1, %v11763_v35  ;;  %9927 = vmatprep.mubr.msk.bf16.mxu0 %vm243_vm1, %v11765_v36  ;;  %v1040_v1 = vsel %vm340_vm0, %v1031_v63, 0  ;;  %v126_v14 = vld [vmem:[%s17067_s1 + $0xa0] sm:$0xff]  ;;  %v11895_v19 = vpack.c.bf16 %v63_v13, %v62_v7  ;;  %v65_v24 = vld [vmem:[%s17066_s0 + $0xb8] sm:$0xff]  ;;  %v128_v26 = vld [vmem:[%s17067_s1 + $0xb0] sm:$0xff] }
  0x12   :  { %9993 = vmatprep.mubr.msk.bf16.mxu1 %vm243_vm1, %v11767_v37  ;;  %10951 = vmatprep.subr.msk.bf16.mxu0 %vm340_vm0, %v1031_v63  ;;  %v1341_v12 = vsel %vm340_vm0, %v1332_v2, 0  ;;  %v11897_v20 = vpack.c.bf16 %v127_v15, %v126_v14  ;;  %v129_v27 = vld [vmem:[%s17067_s1 + $0xb8] sm:$0xff]  ;;  %v66_v28 = vld [vmem:[%s17066_s0 + $0xc0] sm:$0xff]  ;;  %v67_v29 = vld [vmem:[%s17066_s0 + $0xc8] sm:$0xff]  ;;  %v11931_v32 = vpack.c.bf16 %v65_v24, %v64_v23 }
  0x13   :  { %10050 = vmatpush3.bf16.msra.mxu0 %v1040_v1  ;;  %10952 = vmatprep.subr.msk.bf16.mxu1 %vm340_vm0, %v1332_v2  ;;  %v130_v30 = vld [vmem:[%s17067_s1 + $0xc0] sm:$0xff]  ;;  %v131_v31 = vld [vmem:[%s17067_s1 + $0xc8] sm:$0xff]  ;;  %v11933_v33 = vpack.c.bf16 %v129_v27, %v128_v26  ;;  %v11935_v38 = vpack.c.bf16 %v67_v29, %v66_v28  ;;  %v68_v40 = vld [vmem:[%s17066_s0 + $0xd0] sm:$0xff] }
  0x14   :  { %10116 = vmatpush3.bf16.msra.mxu1 %v1341_v12  ;;  %v11937_v39 = vpack.c.bf16 %v131_v31, %v130_v30  ;;  %v69_v41 = vld [vmem:[%s17066_s0 + $0xd8] sm:$0xff]  ;;  %v132_v42 = vld [vmem:[%s17067_s1 + $0xd0] sm:$0xff]  ;;  %v70_v44 = vld [vmem:[%s17066_s0 + $0xe0] sm:$0xff] }
  0x15   :  { %v133_v43 = vld [vmem:[%s17067_s1 + $0xd8] sm:$0xff]  ;;  %v71_v45 = vld [vmem:[%s17066_s0 + $0xe8] sm:$0xff]  ;;  %v134_v50 = vld [vmem:[%s17067_s1 + $0xe0] sm:$0xff]  ;;  %v11971_v52 = vpack.c.bf16 %v69_v41, %v68_v40 }
  0x16   :  { %v135_v51 = vld [vmem:[%s17067_s1 + $0xe8] sm:$0xff]  ;;  %v11973_v53 = vpack.c.bf16 %v133_v43, %v132_v42  ;;  %v11975_v54 = vpack.c.bf16 %v71_v45, %v70_v44  ;;  %v72_v56 = vld [vmem:[%s17066_s0 + $0xf0] sm:$0xff]  ;;  %v73_v57 = vld [vmem:[%s17066_s0 + $0xf8] sm:$0xff] }
  0x17   :  { %v11977_v55 = vpack.c.bf16 %v135_v51, %v134_v50  ;;  %v136_v60 = vld [vmem:[%s17067_s1 + $0xf0] sm:$0xff]  ;;  %v137_v63 = vld [vmem:[%s17067_s1 + $0xf8] sm:$0xff]  ;;  %v74_v0 = vld [vmem:[%s17066_s0 + $0x100] sm:$0xff]  ;;  %v12011_v4 = vpack.c.bf16 %v73_v57, %v72_v56 }
  0x18   :  { %9928 = vmatmul.mubr.msk.bf16.gmra.mxu0 %vm243_vm1, %v11801_v46  ;;  %v75_v1 = vld [vmem:[%s17066_s0 + $0x108] sm:$0xff]  ;;  %v138_v2 = vld [vmem:[%s17067_s1 + $0x100] sm:$0xff]  ;;  %v12013_v5 = vpack.c.bf16 %v137_v63, %v136_v60  ;;  %v76_v12 = vld [vmem:[%s17066_s0 + $0x110] sm:$0xff] }
  0x19   :  { %9994 = vmatmul.mubr.msk.bf16.gmra.mxu1 %vm243_vm1, %v11803_v47  ;;  %9931 = vmatprep.mubr.msk.bf16.mxu0 %vm243_vm1, %v11805_v48  ;;  %v139_v3 = vld [vmem:[%s17067_s1 + $0x108] sm:$0xff]  ;;  %v12015_v6 = vpack.c.bf16 %v75_v1, %v74_v0  ;;  %v77_v13 = vld [vmem:[%s17066_s0 + $0x118] sm:$0xff]  ;;  %v140_v14 = vld [vmem:[%s17067_s1 + $0x110] sm:$0xff] }
  0x1a   :  { %9997 = vmatprep.mubr.msk.bf16.mxu1 %vm243_vm1, %v11807_v49  ;;  %v12017_v7 = vpack.c.bf16 %v139_v3, %v138_v2  ;;  %v141_v15 = vld [vmem:[%s17067_s1 + $0x118] sm:$0xff]  ;;  %v78_v23 = vld [vmem:[%s17066_s0 + $0x120] sm:$0xff]  ;;  %v79_v24 = vld [vmem:[%s17066_s0 + $0x128] sm:$0xff]  ;;  %v12051_v28 = vpack.c.bf16 %v77_v13, %v76_v12 }
  0x1b   :  { %v142_v26 = vld [vmem:[%s17067_s1 + $0x120] sm:$0xff]  ;;  %v143_v27 = vld [vmem:[%s17067_s1 + $0x128] sm:$0xff]  ;;  %v12053_v29 = vpack.c.bf16 %v141_v15, %v140_v14  ;;  %v12055_v30 = vpack.c.bf16 %v79_v24, %v78_v23  ;;  %v80_v40 = vld [vmem:[%s17066_s0 + $0x130] sm:$0xff]  ;;  %v17077_v23 = vmov 0.0  }
  0x1c   :  { %v12057_v31 = vpack.c.bf16 %v143_v27, %v142_v26  ;;  %v81_v41 = vld [vmem:[%s17066_s0 + $0x138] sm:$0xff]  ;;  %v144_v42 = vld [vmem:[%s17067_s1 + $0x130] sm:$0xff]  ;;  %v82_v44 = vld [vmem:[%s17066_s0 + $0x140] sm:$0xff]  ;;  %10187 = vmatprep.subr.bf16.mxu1 %v17077_v23  ;;  %10181 = vmatprep.subr.bf16.mxu0 %v17077_v23 }
  0x1d   :  { %v145_v43 = vld [vmem:[%s17067_s1 + $0x138] sm:$0xff]  ;;  %v83_v45 = vld [vmem:[%s17066_s0 + $0x148] sm:$0xff]  ;;  %v146_v50 = vld [vmem:[%s17067_s1 + $0x140] sm:$0xff]  ;;  %v12091_v56 = vpack.c.bf16 %v81_v41, %v80_v40 }
  0x1e   :  { %v147_v51 = vld [vmem:[%s17067_s1 + $0x148] sm:$0xff]  ;;  %v12093_v57 = vpack.c.bf16 %v145_v43, %v144_v42  ;;  %v12095_v60 = vpack.c.bf16 %v83_v45, %v82_v44  ;;  %v84_v0 = vld [vmem:[%s17066_s0 + $0x150] sm:$0xff]  ;;  %v85_v1 = vld [vmem:[%s17066_s0 + $0x158] sm:$0xff] }
  0x1f   :  { %v12097_v63 = vpack.c.bf16 %v147_v51, %v146_v50  ;;  %v148_v2 = vld [vmem:[%s17067_s1 + $0x150] sm:$0xff]  ;;  %v149_v3 = vld [vmem:[%s17067_s1 + $0x158] sm:$0xff]  ;;  %v86_v12 = vld [vmem:[%s17066_s0 + $0x160] sm:$0xff]  ;;  %v12133_v24 = vpack.c.bf16 %v85_v1, %v84_v0 }
  0x20   :  { %9932 = vmatmul.mubr.msk.bf16.gmra.mxu0 %vm243_vm1, %v11841_v58  ;;  %v87_v13 = vld [vmem:[%s17066_s0 + $0x168] sm:$0xff]  ;;  %v150_v14 = vld [vmem:[%s17067_s1 + $0x160] sm:$0xff]  ;;  %v12135_v26 = vpack.c.bf16 %v149_v3, %v148_v2  ;;  %v88_v41 = vld [vmem:[%s17066_s0 + $0x170] sm:$0xff] }
  0x21   :  { %9998 = vmatmul.mubr.msk.bf16.gmra.mxu1 %vm243_vm1, %v11843_v59  ;;  %9935 = vmatprep.mubr.msk.bf16.mxu0 %vm243_vm1, %v11848_v61  ;;  %v151_v15 = vld [vmem:[%s17067_s1 + $0x168] sm:$0xff]  ;;  %v12137_v27 = vpack.c.bf16 %v87_v13, %v86_v12  ;;  %v89_v42 = vld [vmem:[%s17066_s0 + $0x178] sm:$0xff]  ;;  %v152_v43 = vld [vmem:[%s17067_s1 + $0x170] sm:$0xff] }
  0x22   :  { %10001 = vmatprep.mubr.msk.bf16.mxu1 %vm243_vm1, %v11850_v62  ;;  %v12139_v40 = vpack.c.bf16 %v151_v15, %v150_v14  ;;  %v153_v44 = vld [vmem:[%s17067_s1 + $0x178] sm:$0xff]  ;;  %v90_v45 = vld [vmem:[%s17066_s0 + $0x180] sm:$0xff]  ;;  %v91_v50 = vld [vmem:[%s17066_s0 + $0x188] sm:$0xff]  ;;  %v12173_v1 = vpack.c.bf16 %v89_v42, %v88_v41 }
  0x23   :  { %v154_v51 = vld [vmem:[%s17067_s1 + $0x180] sm:$0xff]  ;;  %v155_v0 = vld [vmem:[%s17067_s1 + $0x188] sm:$0xff]  ;;  %v12175_v2 = vpack.c.bf16 %v153_v44, %v152_v43  ;;  %v12177_v3 = vpack.c.bf16 %v91_v50, %v90_v45  ;;  %v92_v13 = vld [vmem:[%s17066_s0 + $0x190] sm:$0xff] }
  0x24   :  { %v12179_v12 = vpack.c.bf16 %v155_v0, %v154_v51  ;;  %v93_v14 = vld [vmem:[%s17066_s0 + $0x198] sm:$0xff]  ;;  %v156_v15 = vld [vmem:[%s17067_s1 + $0x190] sm:$0xff]  ;;  %v94_v42 = vld [vmem:[%s17066_s0 + $0x1a0] sm:$0xff] }
  0x25   :  { %v157_v41 = vld [vmem:[%s17067_s1 + $0x198] sm:$0xff]  ;;  %v95_v43 = vld [vmem:[%s17066_s0 + $0x1a8] sm:$0xff]  ;;  %v158_v44 = vld [vmem:[%s17067_s1 + $0x1a0] sm:$0xff]  ;;  %v12213_v50 = vpack.c.bf16 %v93_v14, %v92_v13 }
  0x26   :  { %v159_v45 = vld [vmem:[%s17067_s1 + $0x1a8] sm:$0xff]  ;;  %v12215_v51 = vpack.c.bf16 %v157_v41, %v156_v15  ;;  %v12217_v0 = vpack.c.bf16 %v95_v43, %v94_v42  ;;  %v96_v11 = vld [vmem:[%s17066_s0 + $0x1b0] sm:$0xff]  ;;  %v97_v13 = vld [vmem:[%s17066_s0 + $0x1b8] sm:$0xff] }
  0x27   :  { %v12219_v23 = vpack.c.bf16 %v159_v45, %v158_v44  ;;  %v160_v14 = vld [vmem:[%s17067_s1 + $0x1b0] sm:$0xff]  ;;  %v161_v15 = vld [vmem:[%s17067_s1 + $0x1b8] sm:$0xff]  ;;  %v98_v41 = vld [vmem:[%s17066_s0 + $0x1c0] sm:$0xff]  ;;  %v12253_v45 = vpack.c.bf16 %v97_v13, %v96_v11 }
  0x28   :  { %9936 = vmatmul.mubr.msk.bf16.gmra.mxu0 %vm243_vm1, %v11891_v16  ;;  %17419 = vst [vmem:[#allocation4_spill] sm:$0xff] %v12215_v51  ;;  %17420 = vst [vmem:[#allocation5_spill] sm:$0xff] %v12217_v0  ;;  %v99_v42 = vld [vmem:[%s17066_s0 + $0x1c8] sm:$0xff]  ;;  %v162_v43 = vld [vmem:[%s17067_s1 + $0x1c0] sm:$0xff]  ;;  %v12255_v10 = vpack.c.bf16 %v161_v15, %v160_v14 }
  0x29   :  { %10002 = vmatmul.mubr.msk.bf16.gmra.mxu1 %vm243_vm1, %v11893_v18  ;;  %9939 = vmatprep.mubr.msk.bf16.mxu0 %vm243_vm1, %v11895_v19  ;;  %17421 = vst [vmem:[#allocation6_spill] sm:$0xff] %v12219_v23  ;;  %v163_v44 = vld [vmem:[%s17067_s1 + $0x1c8] sm:$0xff]  ;;  %17422 = vst [vmem:[#allocation7_spill] sm:$0xff] %v12253_v45  ;;  %v101_v11 = vld [vmem:[%s17066_s0 + $0x1d8] sm:$0xff] }
  0x2a   :  { %10005 = vmatprep.mubr.msk.bf16.mxu1 %vm243_vm1, %v11897_v20  ;;  %17423 = vst [vmem:[#allocation8_spill] sm:$0xff] %v12255_v10  ;;  %v164_v13 = vld [vmem:[%s17067_s1 + $0x1d0] sm:$0xff]  ;;  %v165_v14 = vld [vmem:[%s17067_s1 + $0x1d8] sm:$0xff]  ;;  %v102_v15 = vld [vmem:[%s17066_s0 + $0x1e0] sm:$0xff] }
  0x30   :  { %9940 = vmatmul.mubr.msk.bf16.gmra.mxu0 %vm243_vm1, %v11931_v32 }
  0x31   :  { %10006 = vmatmul.mubr.msk.bf16.gmra.mxu1 %vm243_vm1, %v11933_v33  ;;  %9943 = vmatprep.mubr.msk.bf16.mxu0 %vm243_vm1, %v11935_v38 }
  0x32   :  { %10009 = vmatprep.mubr.msk.bf16.mxu1 %vm243_vm1, %v11937_v39 }
  0x38   :  { %9944 = vmatmul.mubr.msk.bf16.gmra.mxu0 %vm243_vm1, %v11971_v52 }
  0x39   :  { %10010 = vmatmul.mubr.msk.bf16.gmra.mxu1 %vm243_vm1, %v11973_v53  ;;  %9947 = vmatprep.mubr.msk.bf16.mxu0 %vm243_vm1, %v11975_v54 }
  0x3a   :  { %10013 = vmatprep.mubr.msk.bf16.mxu1 %vm243_vm1, %v11977_v55 }
  0x40   :  { %9948 = vmatmul.mubr.msk.bf16.gmra.mxu0 %vm243_vm1, %v12011_v4 }
  0x41   :  { %10014 = vmatmul.mubr.msk.bf16.gmra.mxu1 %vm243_vm1, %v12013_v5  ;;  %9951 = vmatprep.mubr.msk.bf16.mxu0 %vm243_vm1, %v12015_v6 }
  0x42   :  { %10017 = vmatprep.mubr.msk.bf16.mxu1 %vm243_vm1, %v12017_v7 }
  0x48   :  { %9952 = vmatmul.mubr.msk.bf16.gmra.mxu0 %vm243_vm1, %v12051_v28 }
  0x49   :  { %10018 = vmatmul.mubr.msk.bf16.gmra.mxu1 %vm243_vm1, %v12053_v29  ;;  %9955 = vmatprep.mubr.msk.bf16.mxu0 %vm243_vm1, %v12055_v30 }
  0x4a   :  { %10021 = vmatprep.mubr.msk.bf16.mxu1 %vm243_vm1, %v12057_v31 }
  0x50   :  { %9956 = vmatmul.mubr.msk.bf16.gmra.mxu0 %vm243_vm1, %v12091_v56 }
  0x51   :  { %10022 = vmatmul.mubr.msk.bf16.gmra.mxu1 %vm243_vm1, %v12093_v57  ;;  %9959 = vmatprep.mubr.msk.bf16.mxu0 %vm243_vm1, %v12095_v60 }
  0x52   :  { %10025 = vmatprep.mubr.msk.bf16.mxu1 %vm243_vm1, %v12097_v63 }
  0x58   :  { %9960 = vmatmul.mubr.msk.bf16.gmra.mxu0 %vm243_vm1, %v12133_v24 }
  0x59   :  { %10026 = vmatmul.mubr.msk.bf16.gmra.mxu1 %vm243_vm1, %v12135_v26  ;;  %9963 = vmatprep.mubr.msk.bf16.mxu0 %vm243_vm1, %v12137_v27 }
  0x5a   :  { %10029 = vmatprep.mubr.msk.bf16.mxu1 %vm243_vm1, %v12139_v40 }
  0x60   :  { %9964 = vmatmul.mubr.msk.bf16.gmra.mxu0 %vm243_vm1, %v12173_v1 }
  0x61   :  { %10030 = vmatmul.mubr.msk.bf16.gmra.mxu1 %vm243_vm1, %v12175_v2  ;;  %9967 = vmatprep.mubr.msk.bf16.mxu0 %vm243_vm1, %v12177_v3 }
  0x62   :  { %10033 = vmatprep.mubr.msk.bf16.mxu1 %vm243_vm1, %v12179_v12 }
  0x68   :  { %9968 = vmatmul.mubr.msk.bf16.gmra.mxu0 %vm243_vm1, %v12213_v50 }
  0x69   :  { %10034 = vmatmul.mubr.msk.bf16.gmra.mxu1 %vm243_vm1, %v12215_v51  ;;  %9971 = vmatprep.mubr.msk.bf16.mxu0 %vm243_vm1, %v12217_v0  ;;  %v12259_v0 = vpack.c.bf16 %v163_v44, %v162_v43  ;;  %v100_v51 = vld [vmem:[%s17066_s0 + $0x1d0] sm:$0xff]  ;;  %v167_v43 = vld [vmem:[%s17067_s1 + $0x1e8] sm:$0xff] }
  0x6a   :  { %10037 = vmatprep.mubr.msk.bf16.mxu1 %vm243_vm1, %v12219_v23  ;;  %v12257_v23 = vpack.c.bf16 %v99_v42, %v98_v41  ;;  %v103_v41 = vld [vmem:[%s17066_s0 + $0x1e8] sm:$0xff]  ;;  %v166_v42 = vld [vmem:[%s17067_s1 + $0x1e0] sm:$0xff]  ;;  %v12293_v44 = vpack.c.bf16 %v101_v11, %v100_v51  ;;  %v105_v51 = vld [vmem:[%s17066_s0 + $0x1f8] sm:$0xff] }
  0x6b   :  { %17425 = vst [vmem:[#allocation10_spill] sm:$0xff] %v12259_v0  ;;  %v168_v11 = vld [vmem:[%s17067_s1 + $0x1f0] sm:$0xff] }
  0x6c   :  { %17424 = vst [vmem:[#allocation9_spill] sm:$0xff] %v12257_v23 }
  0x70   :  { %9972 = vmatmul.mubr.msk.bf16.gmra.mxu0 %vm243_vm1, %v12253_v45  ;;  %v104_v45 = vld [vmem:[%s17066_s0 + $0x1f0] sm:$0xff] }
  0x71   :  { %10038 = vmatmul.mubr.msk.bf16.gmra.mxu1 %vm243_vm1, %v12255_v10  ;;  %9975 = vmatprep.mubr.msk.bf16.mxu0 %vm243_vm1, %v12257_v23  ;;  %v12297_v23 = vpack.c.bf16 %v103_v41, %v102_v15  ;;  %v12299_v10 = vpack.c.bf16 %v167_v43, %v166_v42 }
  0x72   :  { %10041 = vmatprep.mubr.msk.bf16.mxu1 %vm243_vm1, %v12259_v0  ;;  %v12295_v0 = vpack.c.bf16 %v165_v14, %v164_v13  ;;  %v169_v13 = vld [vmem:[%s17067_s1 + $0x1f8] sm:$0xff]  ;;  %v12321_v14 = vpack.c.bf16 %v105_v51, %v104_v45  ;;  %v17432_v51 = vld [vmem:[#allocation7_spill] sm:$0xff] }
  0x73   :  { %v12323_v15 = vpack.c.bf16 %v169_v13, %v168_v11  ;;  %v17433_v11 = vld [vmem:[#allocation8_spill] sm:$0xff]  ;;  %v17434_v13 = vld [vmem:[#allocation9_spill] sm:$0xff] }
  0x78   :  { %9976 = vmatmul.mubr.msk.bf16.gmra.mxu0 %vm243_vm1, %v12293_v44 }
  0x79   :  { %10042 = vmatmul.mubr.msk.bf16.gmra.mxu1 %vm243_vm1, %v12295_v0  ;;  %9979 = vmatprep.mubr.msk.bf16.mxu0 %vm243_vm1, %v12297_v23 }
  0x7a   :  { %10045 = vmatprep.mubr.msk.bf16.mxu1 %vm243_vm1, %v12299_v10 }
  0x80   :  { %9980 = vmatmul.mubr.msk.bf16.gmra.mxu0 %vm243_vm1, %v12321_v14 }
  0x81   :  { %10046 = vmatmul.mubr.msk.bf16.gmra.mxu1 %vm243_vm1, %v12323_v15  ;;  %10051 = vmatprep.mubr.msk.bf16.mxu0 %vm243_vm1, %v11681_v8 }
  0x82   :  { %10117 = vmatprep.mubr.msk.bf16.mxu1 %vm243_vm1, %v11683_v9 }
  0x88   :  { %10052 = vmatmul.mubr.msk.bf16.vlgmr.msra.gmra.mxu0 %vm243_vm1, %v11702_v17  ;;  %v12402_v17 = vld [vmem:[%s17070_s5] ss:$0 sm:$0xff] }
  0x89   :  { %10118 = vmatmul.mubr.msk.bf16.vlgmr.msra.gmra.mxu1 %vm243_vm1, %v11713_v21  ;;  %10055 = vmatprep.mubr.msk.bf16.mxu0 %vm243_vm1, %v11715_v22 }
  0x8a   :  { %10121 = vmatprep.mubr.msk.bf16.mxu1 %vm243_vm1, %v11727_v25 }
  0x90   :  { %10056 = vmatmul.mubr.msk.bf16.gmra.mxu0 %vm243_vm1, %v11761_v34 }
  0x91   :  { %10122 = vmatmul.mubr.msk.bf16.gmra.mxu1 %vm243_vm1, %v11763_v35  ;;  %10059 = vmatprep.mubr.msk.bf16.mxu0 %vm243_vm1, %v11765_v36 }
  0x92   :  { %10125 = vmatprep.mubr.msk.bf16.mxu1 %vm243_vm1, %v11767_v37 }
  0x98   :  { %10060 = vmatmul.mubr.msk.bf16.gmra.mxu0 %vm243_vm1, %v11801_v46 }
  0x99   :  { %10126 = vmatmul.mubr.msk.bf16.gmra.mxu1 %vm243_vm1, %v11803_v47  ;;  %10063 = vmatprep.mubr.msk.bf16.mxu0 %vm243_vm1, %v11805_v48 }
  0x9a   :  { %10129 = vmatprep.mubr.msk.bf16.mxu1 %vm243_vm1, %v11807_v49 }
  0xa0   :  { %10064 = vmatmul.mubr.msk.bf16.gmra.mxu0 %vm243_vm1, %v11841_v58 }
  0xa1   :  { %10130 = vmatmul.mubr.msk.bf16.gmra.mxu1 %vm243_vm1, %v11843_v59  ;;  %10067 = vmatprep.mubr.msk.bf16.mxu0 %vm243_vm1, %v11848_v61 }
  0xa2   :  { %10133 = vmatprep.mubr.msk.bf16.mxu1 %vm243_vm1, %v11850_v62 }
  0xa8   :  { %10068 = vmatmul.mubr.msk.bf16.gmra.mxu0 %vm243_vm1, %v11891_v16 }
  0xa9   :  { %10134 = vmatmul.mubr.msk.bf16.gmra.mxu1 %vm243_vm1, %v11893_v18  ;;  %10071 = vmatprep.mubr.msk.bf16.mxu0 %vm243_vm1, %v11895_v19 }
  0xaa   :  { %10137 = vmatprep.mubr.msk.bf16.mxu1 %vm243_vm1, %v11897_v20 }
  0xb0   :  { %10072 = vmatmul.mubr.msk.bf16.gmra.mxu0 %vm243_vm1, %v11931_v32 }
  0xb1   :  { %10138 = vmatmul.mubr.msk.bf16.gmra.mxu1 %vm243_vm1, %v11933_v33  ;;  %10075 = vmatprep.mubr.msk.bf16.mxu0 %vm243_vm1, %v11935_v38  ;;  %v17428_v33 = vmov 0.0  }
  0xb2   :  { %10141 = vmatprep.mubr.msk.bf16.mxu1 %vm243_vm1, %v11937_v39 }
  0xb8   :  { %10076 = vmatmul.mubr.msk.bf16.gmra.mxu0 %vm243_vm1, %v11971_v52 }
  0xb9   :  { %10142 = vmatmul.mubr.msk.bf16.gmra.mxu1 %vm243_vm1, %v11973_v53  ;;  %10079 = vmatprep.mubr.msk.bf16.mxu0 %vm243_vm1, %v11975_v54 }
  0xba   :  { %10145 = vmatprep.mubr.msk.bf16.mxu1 %vm243_vm1, %v11977_v55 }
  0xc0   :  { %10080 = vmatmul.mubr.msk.bf16.gmra.mxu0 %vm243_vm1, %v12011_v4 }
  0xc1   :  { %10146 = vmatmul.mubr.msk.bf16.gmra.mxu1 %vm243_vm1, %v12013_v5  ;;  %10083 = vmatprep.mubr.msk.bf16.mxu0 %vm243_vm1, %v12015_v6 }
  0xc2   :  { %10149 = vmatprep.mubr.msk.bf16.mxu1 %vm243_vm1, %v12017_v7 }
  0xc8   :  { %v12397_v8 = vpop.f32.mrf.mxu0  ;;  %10084 = vmatmul.mubr.msk.bf16.gmra.mxu0 %vm243_vm1, %v12051_v28 }
  0xc9   :  { %v9987_v9 = vpop.f32.mrf.mxu1  ;;  %10150 = vmatmul.mubr.msk.bf16.gmra.mxu1 %vm243_vm1, %v12053_v29  ;;  %10087 = vmatprep.mubr.msk.bf16.mxu0 %vm243_vm1, %v12055_v30 }
  0xca   :  { %10153 = vmatprep.mubr.msk.bf16.mxu1 %vm243_vm1, %v12057_v31  ;;  %v12412_v21 = vpop.f32.mrf.mxu0  ;;  %v784_v25 = vadd.f32 %v9987_v9, %v12402_v17 }
  0xcb   :  { %v775_v22 = vpop.f32.mrf.mxu1 }
  0xcc   :  { %v12415_v34 = vpop.f32.mrf.mxu0  ;;  %v776_v47 = vadd.f32 %v12402_v17, %v775_v22 }
  0xcd   :  { %v9988_v35 = vpop.f32.mrf.mxu1 }
  0xce   :  { %v787_v36 = vadd.f32 %v9988_v35, %v12402_v17  ;;  %v12418_v37 = vpop.f32.mrf.mxu0 }
  0xcf   :  { %v778_v46 = vpop.f32.mrf.mxu1 }
  0xd0   :  { %v12421_v48 = vpack.c.bf16 %v787_v36, %v784_v25  ;;  %v779_v49 = vadd.f32 %v12402_v17, %v778_v46  ;;  %v12424_v58 = vpop.f32.mrf.mxu0  ;;  %10088 = vmatmul.mubr.msk.bf16.gmra.mxu0 %vm243_vm1, %v12091_v56  ;;  %v17435_v25 = vld [vmem:[#allocation10_spill] sm:$0xff] }
  0xd1   :  { %v12426_v59 = vpop.f32.mrf.mxu1  ;;  %10154 = vmatmul.mubr.msk.bf16.gmra.mxu1 %vm243_vm1, %v12093_v57  ;;  %10091 = vmatprep.mubr.msk.bf16.mxu0 %vm243_vm1, %v12095_v60 }
  0xd2   :  { %17426 = vst [vmem:[#allocation11_spill] sm:$0xff] %v12421_v48  ;;  %v12432_v61 = vpack.c.bf16 %v779_v49, %v776_v47  ;;  %v12436_v62 = vpop.f32.mrf.mxu0  ;;  %v1811_v18 = vsel %vm243_vm1, %v12421_v48, 0  ;;  %10157 = vmatprep.mubr.msk.bf16.mxu1 %vm243_vm1, %v12097_v63 }
  0xd3   :  { %v12438_v16 = vpop.f32.mrf.mxu1  ;;  %10188 = vmatpush3.bf16.xpose.msra.mxu1 %v1811_v18 }
  0xd4   :  { %17427 = vst [vmem:[#allocation12_spill] sm:$0xff] %v12432_v61  ;;  %v1764_v19 = vsel %vm243_vm1, %v12432_v61, 0  ;;  %v12446_v20 = vpop.f32.mrf.mxu0  ;;  %10199 = vmatprep.subr.bf16.mxu1 %v17428_v33 }
  0xd5   :  { %v12448_v32 = vpop.f32.mrf.mxu1  ;;  %10182 = vmatpush3.bf16.xpose.msra.mxu0 %v1764_v19 }
  0xd6   :  { %10193 = vmatprep.subr.bf16.mxu0 %v17428_v33  ;;  %v12452_v38 = vpop.f32.mrf.mxu0 }
  0xd7   :  { %v794_v39 = vpop.f32.mrf.mxu1 }
  0xd8   :  { %v12454_v52 = vpop.f32.mrf.mxu0  ;;  %10092 = vmatmul.mubr.msk.bf16.gmra.mxu0 %vm243_vm1, %v12133_v24 }
  0xd9   :  { %v12456_v53 = vpop.f32.mrf.mxu1  ;;  %10158 = vmatmul.mubr.msk.bf16.gmra.mxu1 %vm243_vm1, %v12135_v26  ;;  %10095 = vmatprep.mubr.msk.bf16.mxu0 %vm243_vm1, %v12137_v27  ;;  %v17429_v27 = vld [vmem:[#allocation4_spill] sm:$0xff] }
  0xda   :  { %v12464_v54 = vpop.f32.mrf.mxu0  ;;  %10161 = vmatprep.mubr.msk.bf16.mxu1 %vm243_vm1, %v12139_v40  ;;  %v17430_v40 = vld [vmem:[#allocation5_spill] sm:$0xff] }
  0xdb   :  { %v12466_v55 = vpop.f32.mrf.mxu1 }
  0xdc   :  { %v12470_v4 = vpop.f32.mrf.mxu0 }
  0xdd   :  { %v12472_v5 = vpop.f32.mrf.mxu1 }
  0xde   :  { %v12474_v6 = vpop.f32.mrf.mxu0 }
  0xdf   :  { %v12476_v7 = vpop.f32.mrf.mxu1 }
  0xe0   :  { %v12478_v28 = vpop.f32.mrf.mxu0  ;;  %10096 = vmatmul.mubr.msk.bf16.gmra.mxu0 %vm243_vm1, %v12173_v1 }
  0xe1   :  { %v12480_v29 = vpop.f32.mrf.mxu1  ;;  %10162 = vmatmul.mubr.msk.bf16.gmra.mxu1 %vm243_vm1, %v12175_v2  ;;  %10099 = vmatprep.mubr.msk.bf16.mxu0 %vm243_vm1, %v12177_v3  ;;  %v17431_v3 = vld [vmem:[#allocation6_spill] sm:$0xff] }
  0xe2   :  { %v12488_v30 = vpop.f32.mrf.mxu0  ;;  %10165 = vmatprep.mubr.msk.bf16.mxu1 %vm243_vm1, %v12179_v12 }
  0xe3   :  { %v12490_v31 = vpop.f32.mrf.mxu1 }
  0xe4   :  { %v12494_v56 = vpop.f32.mrf.mxu0 }
  0xe5   :  { %v12496_v57 = vpop.f32.mrf.mxu1 }
  0xe6   :  { %v12498_v60 = vpop.f32.mrf.mxu0 }
  0xe7   :  { %v12500_v63 = vpop.f32.mrf.mxu1 }
  0xe8   :  { %v12502_v24 = vpop.f32.mrf.mxu0  ;;  %10100 = vmatmul.mubr.msk.bf16.gmra.mxu0 %vm243_vm1, %v12213_v50 }
  0xe9   :  { %v12504_v26 = vpop.f32.mrf.mxu1  ;;  %10166 = vmatmul.mubr.msk.bf16.gmra.mxu1 %vm243_vm1, %v17429_v27  ;;  %10103 = vmatprep.mubr.msk.bf16.mxu0 %vm243_vm1, %v17430_v40 }
  0xea   :  { %v12512_v1 = vpop.f32.mrf.mxu0  ;;  %10169 = vmatprep.mubr.msk.bf16.mxu1 %vm243_vm1, %v17431_v3 }
  0xeb   :  { %v12514_v2 = vpop.f32.mrf.mxu1 }
  0xec   :  { %v12518_v12 = vpop.f32.mrf.mxu0 }
  0xed   :  { %v12520_v45 = vpop.f32.mrf.mxu1 }
  0xee   :  { %v12522_v41 = vpop.f32.mrf.mxu0 }
  0xef   :  { %v12524_v50 = vpop.f32.mrf.mxu1 }
  0xf0   :  { %v12526_v42 = vpop.f32.mrf.mxu0  ;;  %10104 = vmatmul.mubr.msk.bf16.gmra.mxu0 %vm243_vm1, %v17432_v51 }
  0xf1   :  { %v12528_v43 = vpop.f32.mrf.mxu1  ;;  %10170 = vmatmul.mubr.msk.bf16.gmra.mxu1 %vm243_vm1, %v17433_v11  ;;  %10107 = vmatprep.mubr.msk.bf16.mxu0 %vm243_vm1, %v17434_v13  ;;  %v800_v13 = vadd.f32 %v12426_v59, %v12402_v17 }
  0xf2   :  { %v12536_v9 = vpop.f32.mrf.mxu0  ;;  %10173 = vmatprep.mubr.msk.bf16.mxu1 %vm243_vm1, %v17435_v25  ;;  %v792_v25 = vadd.f32 %v12402_v17, %v12438_v16 }
  0xf3   :  { %v12538_v22 = vpop.f32.mrf.mxu1 }
  0xf4   :  { %v12542_v35 = vpop.f32.mrf.mxu0 }
  0xf5   :  { %v12544_v36 = vpop.f32.mrf.mxu1 }
  0xf6   :  { %v12546_v46 = vpop.f32.mrf.mxu0 }
  0xf7   :  { %v12548_v47 = vpop.f32.mrf.mxu1 }
  0xf8   :  { %v12550_v49 = vpop.f32.mrf.mxu0  ;;  %10108 = vmatmul.mubr.msk.bf16.gmra.mxu0 %vm243_vm1, %v12293_v44 }
  0xf9   :  { %17436 = vst [vmem:[#allocation4_spill] sm:$0xff] %v12550_v49  ;;  %v12552_v18 = vpop.f32.mrf.mxu1  ;;  %10174 = vmatmul.mubr.msk.bf16.gmra.mxu1 %vm243_vm1, %v12295_v0  ;;  %10111 = vmatprep.mubr.msk.bf16.mxu0 %vm243_vm1, %v12297_v23  ;;  %v795_v0 = vadd.f32 %v12402_v17, %v794_v39  ;;  %v803_v39 = vadd.f32 %v12448_v32, %v12402_v17 }
  0xfa   :  { %v12560_v19 = vpop.f32.mrf.mxu0  ;;  %10177 = vmatprep.mubr.msk.bf16.mxu1 %vm243_vm1, %v12299_v10  ;;  %v12586_v10 = vld [vmem:[%s17071_s3] ss:$0 sm:$0xff] }
  0xfb   :  { %17437 = vst [vmem:[#allocation5_spill] sm:$0xff] %v12560_v19  ;;  %v12562_v27 = vpop.f32.mrf.mxu1  ;;  %v387_v59 = vadd.f32 %v12397_v8, %v12586_v10  ;;  %v379_v32 = vadd.f32 %v12586_v10, %v12412_v21  ;;  %v12616_v16 = vpack.c.bf16 %v803_v39, %v800_v13  ;;  %v819_v13 = vadd.f32 %v12472_v5, %v12402_v17 }
  0xfc   :  { %v12566_v40 = vpop.f32.mrf.mxu0  ;;  %v811_v39 = vadd.f32 %v12402_v17, %v12476_v7  ;;  %v808_v5 = vadd.f32 %v12402_v17, %v12466_v55 }
  0xfd   :  { %17438 = vst [vmem:[#allocation6_spill] sm:$0xff] %v12566_v40  ;;  %v12568_v3 = vpop.f32.mrf.mxu1  ;;  %17443 = vst [vmem:[#allocation13_spill] sm:$0xff] %v12616_v16 }
  0xfe   :  { %v12570_v51 = vpop.f32.mrf.mxu0  ;;  %v12670_v55 = vpack.c.bf16 %v811_v39, %v808_v5  ;;  %v832_v39 = vadd.f32 %v12480_v29, %v12402_v17  ;;  %v414_v5 = vadd.f32 %v12586_v10, %v12474_v6  ;;  %v422_v29 = vadd.f32 %v12470_v4, %v12586_v10 }
  0xff   :  { %v12572_v44 = vpop.f32.mrf.mxu1  ;;  %v411_v6 = vadd.f32 %v12586_v10, %v12464_v54  ;;  %v843_v54 = vadd.f32 %v12402_v17, %v12524_v50 }
 0x100   :  { %v12575_v11 = vpop.f32.mrf.mxu0  ;;  %10112 = vmatmul.mubr.msk.bf16.gmra.mxu0 %vm243_vm1, %v12321_v14  ;;  %v390_v14 = vadd.f32 %v12415_v34, %v12586_v10  ;;  %v12610_v34 = vpack.c.bf16 %v795_v0, %v792_v25  ;;  %v816_v0 = vadd.f32 %v12456_v53, %v12402_v17  ;;  %v406_v53 = vadd.f32 %v12446_v20, %v12586_v10 }
 0x101   :  { %17439 = vst [vmem:[#allocation7_spill] sm:$0xff] %v12575_v11  ;;  %v12577_v23 = vpop.f32.mrf.mxu1  ;;  %10178 = vmatmul.mubr.msk.bf16.gmra.mxu1 %vm243_vm1, %v12323_v15  ;;  %10183 = vmatprep.mubr.msk.bf16.mxu0 %vm11597_vm2, %v17428_v33  ;;  %v382_v15 = vadd.f32 %v12586_v10, %v12418_v37  ;;  %v403_v20 = vadd.f32 %v12424_v58, %v12586_v10  ;;  %17447 = vst [vmem:[#allocation17_spill] sm:$0xff] %v12670_v55 }
 0x102   :  { %v12600_v48 = vpop.f32.mrf.mxu0  ;;  %10189 = vmatprep.mubr.msk.bf16.mxu1 %vm11597_vm2, %v17428_v33  ;;  %17442 = vst [vmem:[#allocation10_spill] sm:$0xff] %v12610_v34  ;;  %v1858_v21 = vsel %vm243_vm1, %v12610_v34, 0  ;;  %v827_v58 = vadd.f32 %v12402_v17, %v12500_v63 }
 0x103   :  { %17440 = vst [vmem:[#allocation8_spill] sm:$0xff] %v12600_v48  ;;  %v12602_v61 = vpop.f32.mrf.mxu1  ;;  %v12618_v48 = vpack.c.bf16 %v390_v14, %v387_v59  ;;  %v12620_v49 = vpack.c.bf16 %v382_v15, %v379_v32  ;;  %v1905_v14 = vsel %vm243_vm1, %v12616_v16, 0  ;;  %v398_v15 = vadd.f32 %v12586_v10, %v12452_v38 }
 0x104   :  { %17441 = vst [vmem:[#allocation9_spill] sm:$0xff] %v12602_v61  ;;  %v12612_v11 = vpop.f32.mrf.mxu0  ;;  %v395_v38 = vadd.f32 %v12586_v10, %v12436_v62  ;;  %v12678_v62 = vpack.c.bf16 %v406_v53, %v403_v20 }
 0x105   :  { %v12614_v37 = vpop.f32.mrf.mxu1  ;;  %17444 = vst [vmem:[#allocation14_spill] sm:$0xff] %v12618_v48  ;;  %17445 = vst [vmem:[#allocation15_spill] sm:$0xff] %v12620_v49 }
 0x106   :  { %v12622_v19 = vpop.f32.mrf.mxu0  ;;  %17449 = vst [vmem:[#allocation19_spill] sm:$0xff] %v12678_v62 }
 0x107   :  { %v12624_v40 = vpop.f32.mrf.mxu1 }
 0x108   :  { %v12626_v8 = vpop.f32.mrf.mxu0  ;;  %10184 = vmatmul.mubr.msk.bf16.vlgmr.msra.gmra.mxu0 %vm243_vm1, %v12620_v49 }
 0x109   :  { %v12628_v61 = vpop.f32.mrf.mxu1  ;;  %10190 = vmatmul.mubr.msk.bf16.vlgmr.msra.gmra.mxu1 %vm243_vm1, %v12618_v48  ;;  %10194 = vmatpush3.bf16.xpose.msra.mxu0 %v1858_v21  ;;  %v12668_v21 = vpack.c.bf16 %v819_v13, %v816_v0  ;;  %v1952_v0 = vsel %vm243_vm1, %v12670_v55, 0  ;;  %v12730_v55 = vpack.c.bf16 %v414_v5, %v411_v6 }
 0x10a   :  { %10200 = vmatpush3.bf16.xpose.msra.mxu1 %v1905_v14  ;;  %v12646_v25 = vpop.f32.mrf.mxu0  ;;  %10195 = vmatprep.mubr.msk.bf16.mxu0 %vm11597_vm2, %v17428_v33  ;;  %v12672_v14 = vpack.c.bf16 %v398_v15, %v395_v38  ;;  %v835_v15 = vadd.f32 %v12496_v57, %v12402_v17  ;;  %v824_v38 = vadd.f32 %v12402_v17, %v12490_v31 }
 0x10b   :  { %v12648_v59 = vpop.f32.mrf.mxu1  ;;  %10201 = vmatprep.mubr.msk.bf16.mxu1 %vm11597_vm2, %v17428_v33  ;;  %10205 = vmatprep.subr.bf16.mxu0 %v17428_v33  ;;  %17446 = vst [vmem:[#allocation16_spill] sm:$0xff] %v12668_v21  ;;  %v1999_v13 = vsel %vm243_vm1, %v12668_v21, 0  ;;  %17453 = vst [vmem:[#allocation23_spill] sm:$0xff] %v12730_v55 }
 0x10c   :  { %v12661_v7 = vpop.f32.mrf.mxu0  ;;  %10211 = vmatprep.subr.bf16.mxu1 %v17428_v33  ;;  %17448 = vst [vmem:[#allocation18_spill] sm:$0xff] %v12672_v14  ;;  %v12720_v31 = vpack.c.bf16 %v827_v58, %v824_v38  ;;  %v848_v58 = vadd.f32 %v12504_v26, %v12402_v17  ;;  %v430_v38 = vadd.f32 %v12586_v10, %v12498_v60 }
 0x10d   :  { %v12663_v32 = vpop.f32.mrf.mxu1  ;;  %v840_v26 = vadd.f32 %v12402_v17, %v12514_v2  ;;  %v427_v60 = vadd.f32 %v12586_v10, %v12488_v30 }
 0x10e   :  { %v12674_v16 = vpop.f32.mrf.mxu0  ;;  %17451 = vst [vmem:[#allocation21_spill] sm:$0xff] %v12720_v31 }
 0x10f   :  { %v12676_v34 = vpop.f32.mrf.mxu1  ;;  %v12773_v2 = vpack.c.bf16 %v843_v54, %v840_v26  ;;  %v859_v54 = vadd.f32 %v12402_v17, %v12548_v47 }
 0x110   :  { %v12680_v48 = vpop.f32.mrf.mxu0  ;;  %10196 = vmatmul.mubr.msk.bf16.vlgmr.msra.gmra.mxu0 %vm243_vm1, %v12672_v14 }
 0x111   :  { %v12682_v49 = vpop.f32.mrf.mxu1  ;;  %10202 = vmatmul.mubr.msk.bf16.vlgmr.msra.gmra.mxu1 %vm243_vm1, %v12678_v62  ;;  %10206 = vmatpush3.bf16.xpose.msra.mxu0 %v1952_v0  ;;  %v419_v0 = vadd.f32 %v12454_v52, %v12586_v10  ;;  %v2046_v52 = vsel %vm243_vm1, %v12720_v31, 0  ;;  %17455 = vst [vmem:[#allocation25_spill] sm:$0xff] %v12773_v2 }
 0x112   :  { %10212 = vmatpush3.bf16.xpose.msra.mxu1 %v1999_v13  ;;  %v12698_v53 = vpop.f32.mrf.mxu0  ;;  %10207 = vmatprep.mubr.msk.bf16.mxu0 %vm11597_vm2, %v17428_v33  ;;  %v12724_v13 = vpack.c.bf16 %v835_v15, %v832_v39  ;;  %v851_v39 = vadd.f32 %v12520_v45, %v12402_v17  ;;  %v438_v45 = vadd.f32 %v12494_v56, %v12586_v10 }
 0x113   :  { %v12700_v63 = vpop.f32.mrf.mxu1  ;;  %10213 = vmatprep.mubr.msk.bf16.mxu1 %vm11597_vm2, %v17428_v33  ;;  %10217 = vmatprep.subr.bf16.mxu0 %v17428_v33  ;;  %v12732_v62 = vpack.c.bf16 %v422_v29, %v419_v0  ;;  %v435_v0 = vadd.f32 %v12478_v28, %v12586_v10  ;;  %v2140_v28 = vsel %vm243_vm1, %v12773_v2, 0 }
 0x114   :  { %v12712_v57 = vpop.f32.mrf.mxu0  ;;  %10223 = vmatprep.subr.bf16.mxu1 %v17428_v33  ;;  %17452 = vst [vmem:[#allocation22_spill] sm:$0xff] %v12724_v13  ;;  %v2093_v15 = vsel %vm243_vm1, %v12724_v13, 0  ;;  %v12778_v56 = vpack.c.bf16 %v851_v39, %v848_v58  ;;  %v12784_v13 = vpack.c.bf16 %v430_v38, %v427_v60  ;;  %v864_v58 = vadd.f32 %v12528_v43, %v12402_v17 }
 0x115   :  { %17450 = vst [vmem:[#allocation20_spill] sm:$0xff] %v12712_v57  ;;  %v12714_v20 = vpop.f32.mrf.mxu1  ;;  %17454 = vst [vmem:[#allocation24_spill] sm:$0xff] %v12732_v62  ;;  %v12786_v31 = vpack.c.bf16 %v438_v45, %v435_v0  ;;  %v867_v39 = vadd.f32 %v12544_v36, %v12402_v17  ;;  %v446_v45 = vadd.f32 %v12586_v10, %v12522_v41 }
 0x116   :  { %v12726_v21 = vpop.f32.mrf.mxu0  ;;  %17456 = vst [vmem:[#allocation26_spill] sm:$0xff] %v12778_v56  ;;  %17457 = vst [vmem:[#allocation27_spill] sm:$0xff] %v12784_v13  ;;  %v2187_v38 = vsel %vm243_vm1, %v12778_v56, 0  ;;  %v856_v43 = vadd.f32 %v12402_v17, %v12538_v22  ;;  %v454_v36 = vadd.f32 %v12518_v12, %v12586_v10  ;;  %v443_v41 = vadd.f32 %v12586_v10, %v12512_v1 }
 0x117   :  { %v12728_v4 = vpop.f32.mrf.mxu1  ;;  %17458 = vst [vmem:[#allocation28_spill] sm:$0xff] %v12786_v31  ;;  %v12832_v12 = vpack.c.bf16 %v867_v39, %v864_v58  ;;  %v880_v58 = vadd.f32 %v12552_v18, %v12402_v17  ;;  %v883_v39 = vadd.f32 %v12568_v3, %v12402_v17  ;;  %v872_v18 = vadd.f32 %v12402_v17, %v12562_v27 }
 0x118   :  { %v12734_v14 = vpop.f32.mrf.mxu0  ;;  %10208 = vmatmul.mubr.msk.bf16.vlgmr.msra.gmra.mxu0 %vm243_vm1, %v12730_v55  ;;  %v12827_v22 = vpack.c.bf16 %v859_v54, %v856_v43  ;;  %v12838_v2 = vpack.c.bf16 %v446_v45, %v443_v41  ;;  %v875_v54 = vadd.f32 %v12402_v17, %v12572_v44  ;;  %v470_v3 = vadd.f32 %v12542_v35, %v12586_v10 }
 0x119   :  { %v12736_v57 = vpop.f32.mrf.mxu1  ;;  %10214 = vmatmul.mubr.msk.bf16.vlgmr.msra.gmra.mxu1 %vm243_vm1, %v12732_v62  ;;  %10218 = vmatpush3.bf16.xpose.msra.mxu0 %v2046_v52  ;;  %17460 = vst [vmem:[#allocation30_spill] sm:$0xff] %v12832_v12  ;;  %v2281_v45 = vsel %vm243_vm1, %v12832_v12, 0  ;;  %v12886_v35 = vpack.c.bf16 %v883_v39, %v880_v58  ;;  %v896_v58 = vadd.f32 %v12577_v23, %v12402_v17 }
 0x11a   :  { %v12752_v50 = vpop.f32.mrf.mxu0  ;;  %10224 = vmatpush3.bf16.xpose.msra.mxu1 %v2093_v15  ;;  %10219 = vmatprep.mubr.msk.bf16.mxu0 %vm11597_vm2, %v17428_v33  ;;  %17459 = vst [vmem:[#allocation29_spill] sm:$0xff] %v12827_v22  ;;  %17461 = vst [vmem:[#allocation31_spill] sm:$0xff] %v12838_v2  ;;  %v12881_v27 = vpack.c.bf16 %v875_v54, %v872_v18  ;;  %v891_v54 = vadd.f32 %v12402_v17, %v12624_v40 }
 0x11b   :  { %v12754_v5 = vpop.f32.mrf.mxu1  ;;  %10225 = vmatprep.mubr.msk.bf16.mxu1 %vm11597_vm2, %v17428_v33  ;;  %10229 = vmatprep.subr.bf16.mxu0 %v17428_v33  ;;  %17464 = vst [vmem:[#allocation34_spill] sm:$0xff] %v12886_v35  ;;  %v899_v39 = vadd.f32 %v12614_v37, %v12402_v17  ;;  %v17470_v37 = vld [vmem:[#allocation6_spill] sm:$0xff] }
 0x11c   :  { %v12764_v29 = vpop.f32.mrf.mxu0  ;;  %10235 = vmatprep.subr.bf16.mxu1 %v17428_v33  ;;  %17463 = vst [vmem:[#allocation33_spill] sm:$0xff] %v12881_v27 }
 0x11d   :  { %v12766_v6 = vpop.f32.mrf.mxu1 }
 0x11e   :  { %v12780_v52 = vpop.f32.mrf.mxu0 }
 0x11f   :  { %v12782_v15 = vpop.f32.mrf.mxu1 }
 0x120   :  { %v12788_v62 = vpop.f32.mrf.mxu0  ;;  %10220 = vmatmul.mubr.msk.bf16.vlgmr.msra.gmra.mxu0 %vm243_vm1, %v12784_v13 }
 0x121   :  { %v12790_v30 = vpop.f32.mrf.mxu1  ;;  %10226 = vmatmul.mubr.msk.bf16.vlgmr.msra.gmra.mxu1 %vm243_vm1, %v12786_v31  ;;  %10230 = vmatpush3.bf16.xpose.msra.mxu0 %v2140_v28  ;;  %v451_v28 = vadd.f32 %v12502_v24, %v12586_v10  ;;  %v2234_v24 = vsel %vm243_vm1, %v12827_v22, 0 }
 0x122   :  { %v12806_v47 = vpop.f32.mrf.mxu0  ;;  %10236 = vmatpush3.bf16.xpose.msra.mxu1 %v2187_v38  ;;  %10231 = vmatprep.mubr.msk.bf16.mxu0 %vm11597_vm2, %v17428_v33 }
 0x123   :  { %v12808_v26 = vpop.f32.mrf.mxu1  ;;  %10237 = vmatprep.mubr.msk.bf16.mxu1 %vm11597_vm2, %v17428_v33  ;;  %10241 = vmatprep.subr.bf16.mxu0 %v17428_v33  ;;  %v12840_v31 = vpack.c.bf16 %v454_v36, %v451_v28  ;;  %v462_v36 = vadd.f32 %v12586_v10, %v12546_v46  ;;  %v459_v46 = vadd.f32 %v12586_v10, %v12536_v9 }
 0x124   :  { %v12818_v60 = vpop.f32.mrf.mxu0  ;;  %10247 = vmatprep.subr.bf16.mxu1 %v17428_v33 }
 0x125   :  { %v12820_v0 = vpop.f32.mrf.mxu1  ;;  %17462 = vst [vmem:[#allocation32_spill] sm:$0xff] %v12840_v31  ;;  %v12892_v22 = vpack.c.bf16 %v462_v36, %v459_v46  ;;  %v2375_v36 = vsel %vm243_vm1, %v12886_v35, 0  ;;  %v17469_v46 = vld [vmem:[#allocation9_spill] sm:$0xff] }
 0x126   :  { %v12834_v38 = vpop.f32.mrf.mxu0  ;;  %v888_v23 = vadd.f32 %v12402_v17, %v17469_v46 }
 0x127   :  { %v12836_v56 = vpop.f32.mrf.mxu1  ;;  %17465 = vst [vmem:[#allocation35_spill] sm:$0xff] %v12892_v22 }
 0x128   :  { %v12842_v13 = vpop.f32.mrf.mxu0  ;;  %10232 = vmatmul.mubr.msk.bf16.vlgmr.msra.gmra.mxu0 %vm243_vm1, %v12838_v2  ;;  %v12935_v46 = vpack.c.bf16 %v891_v54, %v888_v23  ;;  %v907_v54 = vadd.f32 %v12402_v17, %v12676_v34  ;;  %v494_v23 = vadd.f32 %v12586_v10, %v12622_v19  ;;  %v17480_v19 = vld [vmem:[#allocation8_spill] sm:$0xff] }
 0x129   :  { %v12844_v1 = vpop.f32.mrf.mxu1  ;;  %10238 = vmatmul.mubr.msk.bf16.vlgmr.msra.gmra.mxu1 %vm243_vm1, %v12840_v31  ;;  %10242 = vmatpush3.bf16.xpose.msra.mxu0 %v2234_v24  ;;  %v467_v24 = vadd.f32 %v12526_v42, %v12586_v10  ;;  %v2328_v42 = vsel %vm243_vm1, %v12881_v27, 0 }
 0x12a   :  { %v12860_v44 = vpop.f32.mrf.mxu0  ;;  %10248 = vmatpush3.bf16.xpose.msra.mxu1 %v2281_v45  ;;  %10243 = vmatprep.mubr.msk.bf16.mxu0 %vm11597_vm2, %v17428_v33  ;;  %17473 = vst [vmem:[#allocation6_spill] sm:$0xff] %v12935_v46 }
 0x12b   :  { %v12862_v43 = vpop.f32.mrf.mxu1  ;;  %10249 = vmatprep.mubr.msk.bf16.mxu1 %vm11597_vm2, %v17428_v33  ;;  %10253 = vmatprep.subr.bf16.mxu0 %v17428_v33  ;;  %v12894_v31 = vpack.c.bf16 %v470_v3, %v467_v24  ;;  %v478_v3 = vadd.f32 %v12586_v10, %v12570_v51  ;;  %v486_v24 = vadd.f32 %v17470_v37, %v12586_v10  ;;  %v17472_v51 = vld [vmem:[#allocation5_spill] sm:$0xff] }
 0x12c   :  { %v12872_v41 = vpop.f32.mrf.mxu0  ;;  %10259 = vmatprep.subr.bf16.mxu1 %v17428_v33  ;;  %v475_v27 = vadd.f32 %v12586_v10, %v17472_v51  ;;  %v12940_v37 = vpack.c.bf16 %v899_v39, %v896_v58  ;;  %v2422_v58 = vsel %vm243_vm1, %v12935_v46, 0  ;;  %v912_v39 = vadd.f32 %v12628_v61, %v12402_v17 }
 0x12d   :  { %v12874_v28 = vpop.f32.mrf.mxu1  ;;  %17466 = vst [vmem:[#allocation36_spill] sm:$0xff] %v12894_v31  ;;  %v904_v61 = vadd.f32 %v12402_v17, %v12648_v59 }
 0x12e   :  { %v12888_v45 = vpop.f32.mrf.mxu0  ;;  %17475 = vst [vmem:[#allocation5_spill] sm:$0xff] %v12940_v37 }
 0x12f   :  { %v12890_v12 = vpop.f32.mrf.mxu1  ;;  %v12989_v59 = vpack.c.bf16 %v907_v54, %v904_v61  ;;  %v923_v54 = vadd.f32 %v12402_v17, %v12728_v4 }
 0x130   :  { %v12896_v2 = vpop.f32.mrf.mxu0  ;;  %10244 = vmatmul.mubr.msk.bf16.vlgmr.msra.gmra.mxu0 %vm243_vm1, %v12892_v22 }
 0x131   :  { %17467 = vst [vmem:[#allocation37_spill] sm:$0xff] %v12896_v2  ;;  %v12898_v9 = vpop.f32.mrf.mxu1  ;;  %10250 = vmatmul.mubr.msk.bf16.vlgmr.msra.gmra.mxu1 %vm243_vm1, %v12894_v31  ;;  %10254 = vmatpush3.bf16.xpose.msra.mxu0 %v2328_v42  ;;  %17481 = vst [vmem:[#allocation8_spill] sm:$0xff] %v12989_v59 }
 0x132   :  { %v12914_v40 = vpop.f32.mrf.mxu0  ;;  %10260 = vmatpush3.bf16.xpose.msra.mxu1 %v2375_v36  ;;  %10255 = vmatprep.mubr.msk.bf16.mxu0 %vm11597_vm2, %v17428_v33  ;;  %v17474_v36 = vld [vmem:[#allocation4_spill] sm:$0xff] }
 0x133   :  { %17468 = vst [vmem:[#allocation38_spill] sm:$0xff] %v12914_v40  ;;  %v12916_v18 = vpop.f32.mrf.mxu1  ;;  %10261 = vmatprep.mubr.msk.bf16.mxu1 %vm11597_vm2, %v17428_v33  ;;  %10265 = vmatprep.subr.bf16.mxu0 %v17428_v33  ;;  %v483_v31 = vadd.f32 %v17474_v36, %v12586_v10 }
 0x134   :  { %v12926_v42 = vpop.f32.mrf.mxu0  ;;  %10271 = vmatprep.subr.bf16.mxu1 %v17428_v33 }
 0x135   :  { %17471 = vst [vmem:[#allocation9_spill] sm:$0xff] %v12926_v42  ;;  %v12928_v35 = vpop.f32.mrf.mxu1  ;;  %v12946_v42 = vpack.c.bf16 %v478_v3, %v475_v27  ;;  %v12948_v40 = vpack.c.bf16 %v486_v24, %v483_v31  ;;  %v915_v31 = vadd.f32 %v12663_v32, %v12402_v17  ;;  %v2469_v27 = vsel %vm243_vm1, %v12940_v37, 0 }
 0x136   :  { %v12942_v22 = vpop.f32.mrf.mxu0  ;;  %v502_v32 = vadd.f32 %v12612_v11, %v12586_v10 }
 0x137   :  { %v12944_v55 = vpop.f32.mrf.mxu1  ;;  %17476 = vst [vmem:[#allocation4_spill] sm:$0xff] %v12946_v42  ;;  %17477 = vst [vmem:[#allocation39_spill] sm:$0xff] %v12948_v40  ;;  %v12994_v11 = vpack.c.bf16 %v915_v31, %v912_v39  ;;  %v2516_v39 = vsel %vm243_vm1, %v12989_v59, 0  ;;  %v928_v31 = vadd.f32 %v12682_v49, %v12402_v17  ;;  %v920_v49 = vadd.f32 %v12402_v17, %v12700_v63 }
 0x138   :  { %v12950_v2 = vpop.f32.mrf.mxu0  ;;  %10256 = vmatmul.mubr.msk.bf16.vlgmr.msra.gmra.mxu0 %vm243_vm1, %v12946_v42 }
 0x139   :  { %v12952_v51 = vpop.f32.mrf.mxu1  ;;  %10262 = vmatmul.mubr.msk.bf16.vlgmr.msra.gmra.mxu1 %vm243_vm1, %v12948_v40  ;;  %10266 = vmatpush3.bf16.xpose.msra.mxu0 %v2422_v58  ;;  %v491_v58 = vadd.f32 %v12586_v10, %v17480_v19  ;;  %v13043_v63 = vpack.c.bf16 %v923_v54, %v920_v49  ;;  %v13078_v49 = vld [vmem:[%s17073_s7] ss:$0 sm:$0xff] }
 0x13a   :  { %v12968_v34 = vpop.f32.mrf.mxu0  ;;  %10272 = vmatpush3.bf16.xpose.msra.mxu1 %v2469_v27  ;;  %10267 = vmatprep.mubr.msk.bf16.mxu0 %vm11597_vm2, %v17428_v33  ;;  %v17482_v27 = vld [vmem:[#allocation7_spill] sm:$0xff] }
 0x13b   :  { %17478 = vst [vmem:[#allocation40_spill] sm:$0xff] %v12968_v34  ;;  %v12970_v3 = vpop.f32.mrf.mxu1  ;;  %10273 = vmatprep.mubr.msk.bf16.mxu1 %vm11597_vm2, %v17428_v33  ;;  %10277 = vmatprep.subr.bf16.mxu0 %v17428_v33  ;;  %v499_v37 = vadd.f32 %v17482_v27, %v12586_v10  ;;  %17483 = vst [vmem:[#allocation7_spill] sm:$0xff] %v12994_v11  ;;  %v13000_v42 = vpack.c.bf16 %v494_v23, %v491_v58  ;;  %v2563_v23 = vsel %vm243_vm1, %v12994_v11, 0 }
 0x13c   :  { %v12980_v24 = vpop.f32.mrf.mxu0  ;;  %10283 = vmatprep.subr.bf16.mxu1 %v17428_v33  ;;  %17488 = vst [vmem:[#allocation46_spill] sm:$0xff] %v13043_v63  ;;  %v2610_v54 = vsel %vm243_vm1, %v13043_v63, 0 }
 0x13d   :  { %17479 = vst [vmem:[#allocation41_spill] sm:$0xff] %v12980_v24  ;;  %v12982_v36 = vpop.f32.mrf.mxu1  ;;  %17484 = vst [vmem:[#allocation42_spill] sm:$0xff] %v13000_v42  ;;  %v13002_v24 = vpack.c.bf16 %v502_v32, %v499_v37  ;;  %v931_v37 = vadd.f32 %v12714_v20, %v12402_v17  ;;  %v510_v32 = vadd.f32 %v12586_v10, %v12674_v16 }
 0x13e   :  { %v12996_v46 = vpop.f32.mrf.mxu0  ;;  %v518_v20 = vadd.f32 %v12661_v7, %v12586_v10  ;;  %v507_v16 = vadd.f32 %v12586_v10, %v12646_v25  ;;  %v13061_v25 = vld [vmem:[%s17072_s9] ss:$0 sm:$0xff] }
 0x13f   :  { %v12998_v40 = vpop.f32.mrf.mxu1  ;;  %17485 = vst [vmem:[#allocation43_spill] sm:$0xff] %v13002_v24  ;;  %v13048_v7 = vpack.c.bf16 %v931_v37, %v928_v31  ;;  %v526_v31 = vadd.f32 %v12586_v10, %v12726_v21  ;;  %v944_v37 = vadd.f32 %v12736_v57, %v12402_v17  ;;  %v936_v57 = vadd.f32 %v12402_v17, %v12754_v5 }
 0x140   :  { %v13004_v34 = vpop.f32.mrf.mxu0  ;;  %10268 = vmatmul.mubr.msk.bf16.vlgmr.msra.gmra.mxu0 %vm243_vm1, %v13000_v42  ;;  %v13054_v59 = vpack.c.bf16 %v510_v32, %v507_v16  ;;  %v947_v32 = vadd.f32 %v12766_v6, %v12402_v17  ;;  %v531_v6 = vadd.f32 %v12680_v48, %v12586_v10 }
 0x141   :  { %17486 = vst [vmem:[#allocation44_spill] sm:$0xff] %v13004_v34  ;;  %v13006_v19 = vpop.f32.mrf.mxu1  ;;  %10274 = vmatmul.mubr.msk.bf16.vlgmr.msra.gmra.mxu1 %vm243_vm1, %v13002_v24  ;;  %10278 = vmatpush3.bf16.xpose.msra.mxu0 %v2516_v39  ;;  %v515_v39 = vadd.f32 %v12626_v8, %v12586_v10  ;;  %17489 = vst [vmem:[#allocation47_spill] sm:$0xff] %v13048_v7  ;;  %v939_v8 = vadd.f32 %v12402_v17, %v12782_v15  ;;  %v2657_v15 = vsel %vm243_vm1, %v13048_v7, 0 }
 0x142   :  { %v13022_v4 = vpop.f32.mrf.mxu0  ;;  %10284 = vmatpush3.bf16.xpose.msra.mxu1 %v2563_v23  ;;  %10279 = vmatprep.mubr.msk.bf16.mxu0 %vm11597_vm2, %v17428_v33  ;;  %17490 = vst [vmem:[#allocation48_spill] sm:$0xff] %v13054_v59 }
 0x143   :  { %v13024_v61 = vpop.f32.mrf.mxu1  ;;  %10285 = vmatprep.mubr.msk.bf16.mxu1 %vm11597_vm2, %v17428_v33  ;;  %10289 = vmatprep.subr.bf16.mxu0 %v17428_v33  ;;  %v13056_v24 = vpack.c.bf16 %v518_v20, %v515_v39  ;;  %v523_v39 = vadd.f32 %v12586_v10, %v12698_v53  ;;  %v13100_v5 = vpack.c.bf16 %v939_v8, %v936_v57 }
 0x144   :  { %v13034_v58 = vpop.f32.mrf.mxu0  ;;  %10295 = vmatprep.subr.bf16.mxu1 %v17428_v33 }
 0x145   :  { %17487 = vst [vmem:[#allocation45_spill] sm:$0xff] %v13034_v58  ;;  %v13036_v27 = vpop.f32.mrf.mxu1  ;;  %17491 = vst [vmem:[#allocation49_spill] sm:$0xff] %v13056_v24 }
 0x146   :  { %v13050_v23 = vpop.f32.mrf.mxu0 }
 0x147   :  { %v13052_v11 = vpop.f32.mrf.mxu1 }
 0x148   :  { %v10053_v42 = vpop.f32.mrf.mxu0  ;;  %10280 = vmatmul.mubr.msk.bf16.vlgmr.msra.gmra.mxu0 %vm243_vm1, %v13054_v59 }
 0x149   :  { %v10119_v34 = vpop.f32.mrf.mxu1  ;;  %10286 = vmatmul.mubr.msk.bf16.vlgmr.msra.gmra.mxu1 %vm243_vm1, %v13056_v24  ;;  %10290 = vmatpush3.bf16.xpose.msra.mxu0 %v2610_v54  ;;  %v17492_v54 = vld [vmem:[#allocation20_spill] sm:$0xff] }
 0x14a   :  { %v1076_v20 = vpop.f32.mrf.mxu0  ;;  %v13087_v16 = vadd.f32 %v10119_v34, %v13061_v25  ;;  %10296 = vmatpush3.bf16.xpose.msra.mxu1 %v2657_v15  ;;  %10291 = vmatprep.mubr.msk.bf16.mxu0 %vm11597_vm2, %v17428_v33  ;;  %v534_v7 = vadd.f32 %v17492_v54, %v12586_v10  ;;  %v13103_v34 = vadd.f32 %v10053_v42, %v13078_v49 }
 0x14b   :  { %v1377_v21 = vpop.f32.mrf.mxu1  ;;  %10297 = vmatprep.mubr.msk.bf16.mxu1 %vm11597_vm2, %v17428_v33  ;;  %10301 = vmatprep.subr.bf16.mxu0 %v17428_v33  ;;  %v13112_v15 = vpack.c.bf16 %v526_v31, %v523_v39  ;;  %v13114_v54 = vpack.c.bf16 %v947_v32, %v944_v37  ;;  %v13117_v59 = vadd.f32 %v13078_v49, %v1076_v20 }
 0x14c   :  { %v10054_v63 = vpop.f32.mrf.mxu0  ;;  %17493 = vst [vmem:[#allocation20_spill] sm:$0xff] %v13103_v34  ;;  %10307 = vmatprep.subr.bf16.mxu1 %v17428_v33  ;;  %v13120_v8 = vadd.f32 %v13061_v25, %v1377_v21  ;;  %v13132_v37 = vpack.c.bf16 %v534_v7, %v531_v6  ;;  %v955_v21 = vadd.f32 %v12402_v17, %v12836_v56 }
 0x14d   :  { %v10120_v24 = vpop.f32.mrf.mxu1  ;;  %v13106_v48 = vadd.f32 %v10054_v63, %v13078_v49  ;;  %17495 = vst [vmem:[#allocation51_spill] sm:$0xff] %v13117_v59  ;;  %v542_v7 = vadd.f32 %v12586_v10, %v12780_v52  ;;  %v960_v6 = vadd.f32 %v12790_v30, %v12402_v17  ;;  %v963_v56 = vadd.f32 %v12820_v0, %v12402_v17 }
 0x14e   :  { %v13109_v53 = vadd.f32 %v10120_v24, %v13061_v25  ;;  %v1079_v42 = vpop.f32.mrf.mxu0  ;;  %v952_v63 = vadd.f32 %v12402_v17, %v12808_v26  ;;  %v547_v30 = vadd.f32 %v12734_v14, %v12586_v10  ;;  %v539_v0 = vadd.f32 %v12586_v10, %v12752_v50 }
 0x14f   :  { %17494 = vst [vmem:[#allocation50_spill] sm:$0xff] %v13106_v48  ;;  %v1380_v57 = vpop.f32.mrf.mxu1  ;;  %v13127_v58 = vadd.f32 %v13078_v49, %v1079_v42  ;;  %v2704_v42 = vsel %vm243_vm1, %v13100_v5, 0 }
 0x150   :  { %v13130_v31 = vadd.f32 %v13061_v25, %v1380_v57  ;;  %v10057_v32 = vpop.f32.mrf.mxu0  ;;  %10292 = vmatmul.mubr.msk.bf16.vlgmr.msra.gmra.mxu0 %vm243_vm1, %v13112_v15  ;;  %v2751_v57 = vsel %vm243_vm1, %v13114_v54, 0  ;;  %v13170_v26 = vpack.c.bf16 %v955_v21, %v952_v63 }
 0x151   :  { %17496 = vst [vmem:[#allocation52_spill] sm:$0xff] %v13127_v58  ;;  %v10123_v20 = vpop.f32.mrf.mxu1  ;;  %10298 = vmatmul.mubr.msk.bf16.vlgmr.msra.gmra.mxu1 %vm243_vm1, %v13132_v37  ;;  %10302 = vmatpush3.bf16.xpose.msra.mxu0 %v2704_v42  ;;  %v550_v42 = vadd.f32 %v12764_v29, %v12586_v10  ;;  %v13182_v29 = vpack.c.bf16 %v542_v7, %v539_v0 }
 0x152   :  { %v1092_v39 = vpop.f32.mrf.mxu0  ;;  %v13157_v52 = vadd.f32 %v10123_v20, %v13061_v25  ;;  %10308 = vmatpush3.bf16.xpose.msra.mxu1 %v2751_v57  ;;  %10303 = vmatprep.mubr.msk.bf16.mxu0 %vm11597_vm2, %v17428_v33  ;;  %v13173_v20 = vadd.f32 %v10057_v32, %v13078_v49  ;;  %v13184_v57 = vpack.c.bf16 %v963_v56, %v960_v6 }
 0x153   :  { %v1393_v24 = vpop.f32.mrf.mxu1  ;;  %10309 = vmatprep.mubr.msk.bf16.mxu1 %vm11597_vm2, %v17428_v33  ;;  %10313 = vmatprep.subr.bf16.mxu0 %v17428_v33  ;;  %v13187_v59 = vadd.f32 %v13078_v49, %v1092_v39  ;;  %v13202_v6 = vpack.c.bf16 %v550_v42, %v547_v30  ;;  %v558_v30 = vadd.f32 %v12586_v10, %v12834_v38 }
 0x154   :  { %17497 = vst [vmem:[#allocation53_spill] sm:$0xff] %v13157_v52  ;;  %v10058_v34 = vpop.f32.mrf.mxu0  ;;  %17498 = vst [vmem:[#allocation54_spill] sm:$0xff] %v13173_v20  ;;  %10319 = vmatprep.subr.bf16.mxu1 %v17428_v33  ;;  %v13190_v63 = vadd.f32 %v13061_v25, %v1393_v24  ;;  %v971_v24 = vadd.f32 %v12402_v17, %v12890_v12  ;;  %v976_v42 = vadd.f32 %v12844_v1, %v12402_v17 }
 0x155   :  { %v10124_v48 = vpop.f32.mrf.mxu1  ;;  %v13176_v14 = vadd.f32 %v10058_v34, %v13078_v49  ;;  %17501 = vst [vmem:[#allocation57_spill] sm:$0xff] %v13187_v59  ;;  %v979_v12 = vadd.f32 %v12874_v28, %v12402_v17  ;;  %v968_v34 = vadd.f32 %v12402_v17, %v12862_v43  ;;  %v563_v1 = vadd.f32 %v12788_v62, %v12586_v10 }
 0x156   :  { %v13179_v50 = vadd.f32 %v10124_v48, %v13061_v25  ;;  %17502 = vst [vmem:[#allocation58_spill] sm:$0xff] %v13190_v63  ;;  %v1095_v32 = vpop.f32.mrf.mxu0  ;;  %v555_v28 = vadd.f32 %v12586_v10, %v12806_v47 }
 0x157   :  { %17499 = vst [vmem:[#allocation55_spill] sm:$0xff] %v13176_v14  ;;  %v1396_v21 = vpop.f32.mrf.mxu1  ;;  %v13197_v58 = vadd.f32 %v13078_v49, %v1095_v32  ;;  %v2798_v32 = vsel %vm243_vm1, %v13170_v26, 0  ;;  %v13240_v43 = vpack.c.bf16 %v971_v24, %v968_v34 }
 0x158   :  { %17500 = vst [vmem:[#allocation56_spill] sm:$0xff] %v13179_v50  ;;  %v13200_v7 = vadd.f32 %v13061_v25, %v1396_v21  ;;  %v10061_v39 = vpop.f32.mrf.mxu0  ;;  %10304 = vmatmul.mubr.msk.bf16.vlgmr.msra.gmra.mxu0 %vm243_vm1, %v13182_v29  ;;  %v2845_v21 = vsel %vm243_vm1, %v13184_v57, 0 }
 0x159   :  { %17503 = vst [vmem:[#allocation59_spill] sm:$0xff] %v13197_v58  ;;  %v10127_v56 = vpop.f32.mrf.mxu1  ;;  %10310 = vmatmul.mubr.msk.bf16.vlgmr.msra.gmra.mxu1 %vm243_vm1, %v13202_v6  ;;  %10314 = vmatpush3.bf16.xpose.msra.mxu0 %v2798_v32  ;;  %v566_v32 = vadd.f32 %v12818_v60, %v12586_v10  ;;  %v13252_v60 = vpack.c.bf16 %v558_v30, %v555_v28 }
 0x15a   :  { %17504 = vst [vmem:[#allocation60_spill] sm:$0xff] %v13200_v7  ;;  %v1108_v0 = vpop.f32.mrf.mxu0  ;;  %v13227_v38 = vadd.f32 %v10127_v56, %v13061_v25  ;;  %10320 = vmatpush3.bf16.xpose.msra.mxu1 %v2845_v21  ;;  %10315 = vmatprep.mubr.msk.bf16.mxu0 %vm11597_vm2, %v17428_v33  ;;  %v13243_v56 = vadd.f32 %v10061_v39, %v13078_v49 }
 0x15b   :  { %v1409_v48 = vpop.f32.mrf.mxu1  ;;  %10321 = vmatprep.mubr.msk.bf16.mxu1 %vm11597_vm2, %v17428_v33  ;;  %10325 = vmatprep.subr.bf16.mxu0 %v17428_v33  ;;  %v13254_v21 = vpack.c.bf16 %v979_v12, %v976_v42  ;;  %v13257_v59 = vadd.f32 %v13078_v49, %v1108_v0  ;;  %v13272_v42 = vpack.c.bf16 %v566_v32, %v563_v1 }
 0x15c   :  { %17505 = vst [vmem:[#allocation61_spill] sm:$0xff] %v13227_v38  ;;  %v10062_v20 = vpop.f32.mrf.mxu0  ;;  %17506 = vst [vmem:[#allocation62_spill] sm:$0xff] %v13243_v56  ;;  %10331 = vmatprep.subr.bf16.mxu1 %v17428_v33  ;;  %v13260_v34 = vadd.f32 %v13061_v25, %v1409_v48  ;;  %v987_v48 = vadd.f32 %v12402_v17, %v12944_v55  ;;  %v574_v1 = vadd.f32 %v12586_v10, %v12888_v45 }
 0x15d   :  { %v10128_v14 = vpop.f32.mrf.mxu1  ;;  %v13246_v62 = vadd.f32 %v10062_v20, %v13078_v49  ;;  %17509 = vst [vmem:[#allocation65_spill] sm:$0xff] %v13257_v59  ;;  %v992_v32 = vadd.f32 %v12898_v9, %v12402_v17  ;;  %v995_v55 = vadd.f32 %v12928_v35, %v12402_v17  ;;  %v984_v20 = vadd.f32 %v12402_v17, %v12916_v18 }
 0x15e   :  { %v13249_v47 = vadd.f32 %v10128_v14, %v13061_v25  ;;  %17510 = vst [vmem:[#allocation66_spill] sm:$0xff] %v13260_v34  ;;  %v1111_v39 = vpop.f32.mrf.mxu0  ;;  %v579_v35 = vadd.f32 %v12842_v13, %v12586_v10  ;;  %v571_v9 = vadd.f32 %v12586_v10, %v12860_v44 }
 0x15f   :  { %17507 = vst [vmem:[#allocation63_spill] sm:$0xff] %v13246_v62  ;;  %v1412_v24 = vpop.f32.mrf.mxu1  ;;  %v13267_v58 = vadd.f32 %v13078_v49, %v1111_v39  ;;  %v2892_v39 = vsel %vm243_vm1, %v13240_v43, 0  ;;  %v13310_v17 = vpack.c.bf16 %v987_v48, %v984_v20 }
 0x160   :  { %17508 = vst [vmem:[#allocation64_spill] sm:$0xff] %v13249_v47  ;;  %v13270_v30 = vadd.f32 %v13061_v25, %v1412_v24  ;;  %v10065_v0 = vpop.f32.mrf.mxu0  ;;  %10316 = vmatmul.mubr.msk.bf16.vlgmr.msra.gmra.mxu0 %vm243_vm1, %v13252_v60  ;;  %v2939_v24 = vsel %vm243_vm1, %v13254_v21, 0 }
 0x161   :  { %17511 = vst [vmem:[#allocation67_spill] sm:$0xff] %v13267_v58  ;;  %v10131_v12 = vpop.f32.mrf.mxu1  ;;  %10322 = vmatmul.mubr.msk.bf16.vlgmr.msra.gmra.mxu1 %vm243_vm1, %v13272_v42  ;;  %10326 = vmatpush3.bf16.xpose.msra.mxu0 %v2892_v39  ;;  %v582_v39 = vadd.f32 %v12872_v41, %v12586_v10  ;;  %v13313_v18 = vadd.f32 %v10065_v0, %v13078_v49 }
 0x162   :  { %17512 = vst [vmem:[#allocation68_spill] sm:$0xff] %v13270_v30  ;;  %v1124_v28 = vpop.f32.mrf.mxu0  ;;  %v13297_v45 = vadd.f32 %v10131_v12, %v13061_v25  ;;  %10332 = vmatpush3.bf16.xpose.msra.mxu1 %v2939_v24  ;;  %10327 = vmatprep.mubr.msk.bf16.mxu0 %vm11597_vm2, %v17428_v33  ;;  %v13322_v41 = vpack.c.bf16 %v574_v1, %v571_v9 }
 0x163   :  { %v1425_v14 = vpop.f32.mrf.mxu1  ;;  %10333 = vmatprep.mubr.msk.bf16.mxu1 %vm11597_vm2, %v17428_v33  ;;  %10337 = vmatprep.subr.bf16.mxu0 %v17428_v33  ;;  %17514 = vst [vmem:[#allocation70_spill] sm:$0xff] %v13313_v18  ;;  %v13324_v12 = vpack.c.bf16 %v995_v55, %v992_v32  ;;  %v13327_v24 = vadd.f32 %v13078_v49, %v1124_v28 }
 0x164   :  { %17513 = vst [vmem:[#allocation69_spill] sm:$0xff] %v13297_v45  ;;  %v10066_v56 = vpop.f32.mrf.mxu0  ;;  %10343 = vmatprep.subr.bf16.mxu1 %v17428_v33  ;;  %v13330_v20 = vadd.f32 %v13061_v25, %v1425_v14  ;;  %v13342_v32 = vpack.c.bf16 %v582_v39, %v579_v35  ;;  %v11467_v14 = vld [vmem:[%s17070_s5] ss:$0 sm:$0xff]  ;;  %v2986_v35 = vsel %vm243_vm1, %v13310_v17, 0  ;;  %v590_v39 = vadd.f32 %v12586_v10, %v12942_v22  ;;  %v17522_v22 = vld [vmem:[#allocation37_spill] sm:$0xff] }
 0x165   :  { %v10132_v62 = vpop.f32.mrf.mxu1  ;;  %v13316_v13 = vadd.f32 %v10066_v56, %v13078_v49  ;;  %17517 = vst [vmem:[#allocation73_spill] sm:$0xff] %v13327_v24  ;;  %v1003_v9 = vadd.f32 %v11467_v14, %v12998_v40  ;;  %v3033_v40 = vsel %vm243_vm1, %v13324_v12, 0  ;;  %v1000_v18 = vadd.f32 %v11467_v14, %v12970_v3  ;;  %v17524_v24 = vld [vmem:[#allocation9_spill] sm:$0xff] }
 0x166   :  { %v13319_v44 = vadd.f32 %v10132_v62, %v13061_v25  ;;  %17518 = vst [vmem:[#allocation74_spill] sm:$0xff] %v13330_v20  ;;  %v1127_v0 = vpop.f32.mrf.mxu0  ;;  %v1011_v62 = vadd.f32 %v11467_v14, %v12982_v36  ;;  %v17523_v36 = vld [vmem:[#allocation38_spill] sm:$0xff] }
 0x167   :  { %17515 = vst [vmem:[#allocation71_spill] sm:$0xff] %v13316_v13  ;;  %v1428_v48 = vpop.f32.mrf.mxu1  ;;  %v13337_v59 = vadd.f32 %v13078_v49, %v1127_v0  ;;  %v13379_v3 = vpack.c.bf16 %v1003_v9, %v1000_v18 }
 0x168   :  { %17516 = vst [vmem:[#allocation72_spill] sm:$0xff] %v13319_v44  ;;  %v13340_v1 = vadd.f32 %v13061_v25, %v1428_v48  ;;  %v10069_v28 = vpop.f32.mrf.mxu0  ;;  %10328 = vmatmul.mubr.msk.bf16.vlgmr.msra.gmra.mxu0 %vm243_vm1, %v13322_v41  ;;  %v1008_v48 = vadd.f32 %v11467_v14, %v12952_v51  ;;  %v595_v51 = vadd.f32 %v17522_v22, %v12586_v10 }
 0x169   :  { %17519 = vst [vmem:[#allocation75_spill] sm:$0xff] %v13337_v59  ;;  %v10135_v55 = vpop.f32.mrf.mxu1  ;;  %10334 = vmatmul.mubr.msk.bf16.vlgmr.msra.gmra.mxu1 %vm243_vm1, %v13342_v32  ;;  %10338 = vmatpush3.bf16.xpose.msra.mxu0 %v2986_v35  ;;  %v587_v35 = vadd.f32 %v12586_v10, %v17523_v36  ;;  %v598_v59 = vadd.f32 %v17524_v24, %v12586_v10 }
 0x16a   :  { %17520 = vst [vmem:[#allocation76_spill] sm:$0xff] %v13340_v1  ;;  %v1140_v56 = vpop.f32.mrf.mxu0  ;;  %v13366_v13 = vadd.f32 %v10135_v55, %v13061_v25  ;;  %10344 = vmatpush3.bf16.xpose.msra.mxu1 %v3033_v40  ;;  %10339 = vmatprep.mubr.msk.bf16.mxu0 %vm11597_vm2, %v17428_v33  ;;  %v13382_v55 = vadd.f32 %v10069_v28, %v13078_v49 }
 0x16b   :  { %v1441_v0 = vpop.f32.mrf.mxu1  ;;  %10345 = vmatprep.mubr.msk.bf16.mxu1 %vm11597_vm2, %v17428_v33  ;;  %10349 = vmatprep.subr.bf16.mxu0 %v17428_v33  ;;  %v13391_v24 = vpack.c.bf16 %v590_v39, %v587_v35  ;;  %v13393_v36 = vpack.c.bf16 %v1011_v62, %v1008_v48  ;;  %v13396_v44 = vadd.f32 %v13078_v49, %v1140_v56 }
 0x16c   :  { %17521 = vst [vmem:[#allocation77_spill] sm:$0xff] %v13366_v13  ;;  %v10070_v58 = vpop.f32.mrf.mxu0  ;;  %17525 = vst [vmem:[#allocation37_spill] sm:$0xff] %v13382_v55  ;;  %10355 = vmatprep.subr.bf16.mxu1 %v17428_v33  ;;  %v13399_v18 = vadd.f32 %v13061_v25, %v1441_v0  ;;  %v13411_v39 = vpack.c.bf16 %v598_v59, %v595_v51  ;;  %v1019_v0 = vadd.f32 %v11467_v14, %v13052_v11 }
 0x16d   :  { %v10136_v45 = vpop.f32.mrf.mxu1  ;;  %v13385_v40 = vadd.f32 %v10070_v58, %v13078_v49  ;;  %17528 = vst [vmem:[#allocation78_spill] sm:$0xff] %v13396_v44  ;;  %v606_v59 = vadd.f32 %v12586_v10, %v12996_v46  ;;  %v1024_v51 = vadd.f32 %v11467_v14, %v13006_v19  ;;  %v3127_v11 = vsel %vm243_vm1, %v13393_v36, 0  ;;  %v17533_v19 = vld [vmem:[#allocation40_spill] sm:$0xff] }
 0x16e   :  { %v13388_v22 = vadd.f32 %v10136_v45, %v13061_v25  ;;  %17529 = vst [vmem:[#allocation79_spill] sm:$0xff] %v13399_v18  ;;  %v1143_v28 = vpop.f32.mrf.mxu0  ;;  %v1016_v58 = vadd.f32 %v11467_v14, %v13024_v61  ;;  %v611_v46 = vadd.f32 %v12950_v2, %v12586_v10 }
 0x16f   :  { %17526 = vst [vmem:[#allocation38_spill] sm:$0xff] %v13385_v40  ;;  %v1444_v9 = vpop.f32.mrf.mxu1  ;;  %v13406_v20 = vadd.f32 %v13078_v49, %v1143_v28  ;;  %v3080_v28 = vsel %vm243_vm1, %v13379_v3, 0 }
 0x170   :  { %17527 = vst [vmem:[#allocation9_spill] sm:$0xff] %v13388_v22  ;;  %v13409_v62 = vadd.f32 %v13061_v25, %v1444_v9  ;;  %v10073_v56 = vpop.f32.mrf.mxu0  ;;  %10340 = vmatmul.mubr.msk.bf16.vlgmr.msra.gmra.mxu0 %vm243_vm1, %v13391_v24  ;;  %v1027_v9 = vadd.f32 %v11467_v14, %v13036_v27  ;;  %v603_v27 = vadd.f32 %v12586_v10, %v17533_v19 }
 0x171   :  { %17530 = vst [vmem:[#allocation80_spill] sm:$0xff] %v13406_v20  ;;  %v10139_v48 = vpop.f32.mrf.mxu1  ;;  %10346 = vmatmul.mubr.msk.bf16.vlgmr.msra.gmra.mxu1 %vm243_vm1, %v13411_v39  ;;  %10350 = vmatpush3.bf16.xpose.msra.mxu0 %v3080_v28  ;;  %v17534_v28 = vld [vmem:[#allocation41_spill] sm:$0xff]  ;;  %v13445_v61 = vpack.c.bf16 %v1019_v0, %v1016_v58  ;;  %v13448_v14 = vadd.f32 %v10073_v56, %v13078_v49 }
 0x172   :  { %17531 = vst [vmem:[#allocation81_spill] sm:$0xff] %v13409_v62  ;;  %v1156_v35 = vpop.f32.mrf.mxu0  ;;  %v13432_v55 = vadd.f32 %v10139_v48, %v13061_v25  ;;  %10356 = vmatpush3.bf16.xpose.msra.mxu1 %v3127_v11  ;;  %10351 = vmatprep.mubr.msk.bf16.mxu0 %vm11597_vm2, %v17428_v33  ;;  %v614_v40 = vadd.f32 %v17534_v28, %v12586_v10 }
 0x173   :  { %v1457_v45 = vpop.f32.mrf.mxu1  ;;  %10357 = vmatprep.mubr.msk.bf16.mxu1 %vm11597_vm2, %v17428_v33  ;;  %10361 = vmatprep.subr.bf16.mxu0 %v17428_v33  ;;  %17535 = vst [vmem:[#allocation40_spill] sm:$0xff] %v13448_v14  ;;  %v13457_v10 = vpack.c.bf16 %v606_v59, %v603_v27  ;;  %v13459_v11 = vpack.c.bf16 %v1027_v9, %v1024_v51  ;;  %v17543_v14 = vld [vmem:[#allocation45_spill] sm:$0xff] }
 0x174   :  { %17532 = vst [vmem:[#allocation82_spill] sm:$0xff] %v13432_v55  ;;  %v10074_v44 = vpop.f32.mrf.mxu0  ;;  %10367 = vmatprep.subr.bf16.mxu1 %v17428_v33  ;;  %v13462_v19 = vadd.f32 %v13078_v49, %v1156_v35  ;;  %v13465_v58 = vadd.f32 %v13061_v25, %v1457_v45  ;;  %v13477_v51 = vpack.c.bf16 %v614_v40, %v611_v46 }
 0x175   :  { %v10140_v20 = vpop.f32.mrf.mxu1  ;;  %v13451_v2 = vadd.f32 %v10074_v44, %v13078_v49  ;;  %v3221_v46 = vsel %vm243_vm1, %v13459_v11, 0 }
 0x176   :  { %v13454_v48 = vadd.f32 %v10140_v20, %v13061_v25  ;;  %17538 = vst [vmem:[#allocation84_spill] sm:$0xff] %v13462_v19  ;;  %17539 = vst [vmem:[#allocation85_spill] sm:$0xff] %v13465_v58  ;;  %v1159_v56 = vpop.f32.mrf.mxu0 }
 0x177   :  { %17536 = vst [vmem:[#allocation41_spill] sm:$0xff] %v13451_v2  ;;  %v1460_v0 = vpop.f32.mrf.mxu1  ;;  %v13472_v28 = vadd.f32 %v13078_v49, %v1159_v56  ;;  %v3174_v56 = vsel %vm243_vm1, %v13445_v61, 0 }
 0x178   :  { %17537 = vst [vmem:[#allocation83_spill] sm:$0xff] %v13454_v48  ;;  %v13475_v59 = vadd.f32 %v13061_v25, %v1460_v0  ;;  %v10077_v35 = vpop.f32.mrf.mxu0  ;;  %10352 = vmatmul.mubr.msk.bf16.vlgmr.msra.gmra.mxu0 %vm243_vm1, %v13457_v10  ;;  %v11468_v0 = vld [vmem:[%s17071_s3] ss:$0 sm:$0xff] }
 0x179   :  { %17540 = vst [vmem:[#allocation86_spill] sm:$0xff] %v13472_v28  ;;  %v10143_v9 = vpop.f32.mrf.mxu1  ;;  %v622_v40 = vadd.f32 %v11468_v0, %v13050_v23  ;;  %10358 = vmatmul.mubr.msk.bf16.vlgmr.msra.gmra.mxu1 %vm243_vm1, %v13477_v51  ;;  %10362 = vmatpush3.bf16.xpose.msra.mxu0 %v3174_v56  ;;  %v619_v27 = vadd.f32 %v11468_v0, %v13022_v4  ;;  %v17547_v4 = vld [vmem:[#allocation44_spill] sm:$0xff] }
 0x17a   :  { %17541 = vst [vmem:[#allocation87_spill] sm:$0xff] %v13475_v59  ;;  %v1172_v44 = vpop.f32.mrf.mxu0  ;;  %v13496_v20 = vadd.f32 %v10143_v9, %v13061_v25  ;;  %10368 = vmatpush3.bf16.xpose.msra.mxu1 %v3221_v46  ;;  %10363 = vmatprep.mubr.msk.bf16.mxu0 %vm11597_vm2, %v17428_v33  ;;  %v630_v23 = vadd.f32 %v11468_v0, %v17543_v14 }
 0x17b   :  { %v1473_v45 = vpop.f32.mrf.mxu1  ;;  %10369 = vmatprep.mubr.msk.bf16.mxu1 %vm11597_vm2, %v17428_v33  ;;  %10373 = vmatprep.subr.bf16.mxu0 %v17428_v33  ;;  %v13506_v56 = vadd.f32 %v10077_v35, %v13078_v49  ;;  %v627_v14 = vadd.f32 %v11468_v0, %v17547_v4  ;;  %v13516_v28 = vpack.c.bf16 %v622_v40, %v619_v27 }
 0x17c   :  { %17542 = vst [vmem:[#allocation88_spill] sm:$0xff] %v13496_v20  ;;  %v10078_v2 = vpop.f32.mrf.mxu0  ;;  %10379 = vmatprep.subr.bf16.mxu1 %v17428_v33  ;;  %v13519_v55 = vadd.f32 %v13078_v49, %v1172_v44  ;;  %v13522_v48 = vadd.f32 %v13061_v25, %v1473_v45 }
 0x17d   :  { %v10144_v19 = vpop.f32.mrf.mxu1  ;;  %17544 = vst [vmem:[#allocation45_spill] sm:$0xff] %v13506_v56  ;;  %v13509_v9 = vadd.f32 %v10078_v2, %v13078_v49  ;;  %v13534_v0 = vpack.c.bf16 %v630_v23, %v627_v14  ;;  %v17552_v2 = vld [vmem:[#allocation15_spill] sm:$0xff] }
 0x17e   :  { %v13512_v46 = vadd.f32 %v10144_v19, %v13061_v25  ;;  %17548 = vst [vmem:[#allocation44_spill] sm:$0xff] %v13519_v55  ;;  %17549 = vst [vmem:[#allocation91_spill] sm:$0xff] %v13522_v48  ;;  %v1175_v35 = vpop.f32.mrf.mxu0  ;;  %v17562_v48 = vld [vmem:[#allocation12_spill] sm:$0xff] }
 0x17f   :  { %17545 = vst [vmem:[#allocation89_spill] sm:$0xff] %v13509_v9  ;;  %v1476_v58 = vpop.f32.mrf.mxu1  ;;  %v13529_v59 = vadd.f32 %v13078_v49, %v1175_v35  ;;  %v1761_v35 = vsel %vm243_vm1, %v17552_v2, 0 }
 0x180   :  { %17546 = vst [vmem:[#allocation90_spill] sm:$0xff] %v13512_v46  ;;  %v13532_v27 = vadd.f32 %v13061_v25, %v1476_v58  ;;  %v10081_v44 = vpop.f32.mrf.mxu0  ;;  %10364 = vmatmul.mubr.msk.bf16.vlgmr.msra.gmra.mxu0 %vm243_vm1, %v13516_v28  ;;  %v17553_v58 = vld [vmem:[#allocation14_spill] sm:$0xff] }
 0x181   :  { %17550 = vst [vmem:[#allocation92_spill] sm:$0xff] %v13529_v59  ;;  %v10147_v40 = vpop.f32.mrf.mxu1  ;;  %10370 = vmatmul.mubr.msk.bf16.vlgmr.msra.gmra.mxu1 %vm243_vm1, %v13534_v0  ;;  %10374 = vmatpush3.bf16.xpose.msra.mxu0 %v1761_v35  ;;  %v1808_v23 = vsel %vm243_vm1, %v17553_v58, 0  ;;  %v13557_v2 = vadd.f32 %v10081_v44, %v13078_v49  ;;  %v17563_v44 = vld [vmem:[#allocation18_spill] sm:$0xff] }
 0x182   :  { %17551 = vst [vmem:[#allocation93_spill] sm:$0xff] %v13532_v27  ;;  %v1188_v14 = vpop.f32.mrf.mxu0  ;;  %v13549_v45 = vadd.f32 %v10147_v40, %v13061_v25  ;;  %10380 = vmatpush3.bf16.xpose.msra.mxu1 %v1808_v23  ;;  %10375 = vmatprep.mubr.msk.bf16.mxu0 %vm11597_vm2, %v17428_v33 }
 0x183   :  { %v1489_v19 = vpop.f32.mrf.mxu1  ;;  %10381 = vmatprep.mubr.msk.bf16.mxu1 %vm11597_vm2, %v17428_v33  ;;  %10385 = vmatprep.subr.bf16.mxu0 %v17428_v33  ;;  %17555 = vst [vmem:[#allocation14_spill] sm:$0xff] %v13557_v2  ;;  %v13567_v58 = vadd.f32 %v13078_v49, %v1188_v14  ;;  %v17564_v2 = vld [vmem:[#allocation11_spill] sm:$0xff] }
 0x184   :  { %17554 = vst [vmem:[#allocation15_spill] sm:$0xff] %v13549_v45  ;;  %v10082_v4 = vpop.f32.mrf.mxu0  ;;  %10391 = vmatprep.subr.bf16.mxu1 %v17428_v33  ;;  %v13570_v23 = vadd.f32 %v13061_v25, %v1489_v19 }
 0x185   :  { %v10148_v56 = vpop.f32.mrf.mxu1  ;;  %v13560_v35 = vadd.f32 %v10082_v4, %v13078_v49  ;;  %17558 = vst [vmem:[#allocation96_spill] sm:$0xff] %v13567_v58  ;;  %v1855_v4 = vsel %vm243_vm1, %v17563_v44, 0 }
 0x186   :  { %v13563_v40 = vadd.f32 %v10148_v56, %v13061_v25  ;;  %17559 = vst [vmem:[#allocation97_spill] sm:$0xff] %v13570_v23  ;;  %v1191_v9 = vpop.f32.mrf.mxu0 }
 0x187   :  { %17556 = vst [vmem:[#allocation94_spill] sm:$0xff] %v13560_v35  ;;  %v1492_v55 = vpop.f32.mrf.mxu1  ;;  %v13577_v59 = vadd.f32 %v13078_v49, %v1191_v9 }
 0x188   :  { %17557 = vst [vmem:[#allocation95_spill] sm:$0xff] %v13563_v40  ;;  %v13580_v56 = vadd.f32 %v13061_v25, %v1492_v55  ;;  %v10085_v20 = vpop.f32.mrf.mxu0  ;;  %10376 = vmatmul.mubr.msk.bf16.vlgmr.msra.gmra.mxu0 %vm243_vm1, %v17562_v48  ;;  %v17565_v55 = vld [vmem:[#allocation19_spill] sm:$0xff] }
 0x189   :  { %17560 = vst [vmem:[#allocation98_spill] sm:$0xff] %v13577_v59  ;;  %v10151_v14 = vpop.f32.mrf.mxu1  ;;  %10382 = vmatmul.mubr.msk.bf16.vlgmr.msra.gmra.mxu1 %vm243_vm1, %v17564_v2  ;;  %10386 = vmatpush3.bf16.xpose.msra.mxu0 %v1855_v4  ;;  %v1902_v9 = vsel %vm243_vm1, %v17565_v55, 0  ;;  %v13603_v2 = vadd.f32 %v10085_v20, %v13078_v49  ;;  %v17575_v20 = vld [vmem:[#allocation23_spill] sm:$0xff] }
 0x18a   :  { %17561 = vst [vmem:[#allocation99_spill] sm:$0xff] %v13580_v56  ;;  %v1204_v35 = vpop.f32.mrf.mxu0  ;;  %v13595_v19 = vadd.f32 %v10151_v14, %v13061_v25  ;;  %10392 = vmatpush3.bf16.xpose.msra.mxu1 %v1902_v9  ;;  %10387 = vmatprep.mubr.msk.bf16.mxu0 %vm11597_vm2, %v17428_v33  ;;  %v17574_v56 = vld [vmem:[#allocation10_spill] sm:$0xff] }
 0x18b   :  { %v1505_v45 = vpop.f32.mrf.mxu1  ;;  %10393 = vmatprep.mubr.msk.bf16.mxu1 %vm11597_vm2, %v17428_v33  ;;  %10397 = vmatprep.subr.bf16.mxu0 %v17428_v33  ;;  %17567 = vst [vmem:[#allocation18_spill] sm:$0xff] %v13603_v2  ;;  %v13613_v14 = vadd.f32 %v13078_v49, %v1204_v35  ;;  %v17576_v2 = vld [vmem:[#allocation13_spill] sm:$0xff] }
 0x18c   :  { %17566 = vst [vmem:[#allocation12_spill] sm:$0xff] %v13595_v19  ;;  %v10086_v48 = vpop.f32.mrf.mxu0  ;;  %10403 = vmatprep.subr.bf16.mxu1 %v17428_v33  ;;  %v13616_v55 = vadd.f32 %v13061_v25, %v1505_v45 }
 0x18d   :  { %v10152_v46 = vpop.f32.mrf.mxu1  ;;  %v13606_v44 = vadd.f32 %v10086_v48, %v13078_v49  ;;  %17570 = vst [vmem:[#allocation100_spill] sm:$0xff] %v13613_v14  ;;  %v1949_v48 = vsel %vm243_vm1, %v17575_v20, 0 }
 0x18e   :  { %v13609_v4 = vadd.f32 %v10152_v46, %v13061_v25  ;;  %17571 = vst [vmem:[#allocation101_spill] sm:$0xff] %v13616_v55  ;;  %v1207_v9 = vpop.f32.mrf.mxu0 }
 0x18f   :  { %17568 = vst [vmem:[#allocation11_spill] sm:$0xff] %v13606_v44  ;;  %v1508_v58 = vpop.f32.mrf.mxu1  ;;  %v13623_v59 = vadd.f32 %v13078_v49, %v1207_v9 }
 0x190   :  { %17569 = vst [vmem:[#allocation19_spill] sm:$0xff] %v13609_v4  ;;  %v13626_v46 = vadd.f32 %v13061_v25, %v1508_v58  ;;  %v10089_v40 = vpop.f32.mrf.mxu0  ;;  %10388 = vmatmul.mubr.msk.bf16.vlgmr.msra.gmra.mxu0 %vm243_vm1, %v17574_v56  ;;  %v17577_v58 = vld [vmem:[#allocation24_spill] sm:$0xff] }
 0x191   :  { %17572 = vst [vmem:[#allocation102_spill] sm:$0xff] %v13623_v59  ;;  %v10155_v35 = vpop.f32.mrf.mxu1  ;;  %10394 = vmatmul.mubr.msk.bf16.vlgmr.msra.gmra.mxu1 %vm243_vm1, %v17576_v2  ;;  %10398 = vmatpush3.bf16.xpose.msra.mxu0 %v1949_v48  ;;  %v1996_v9 = vsel %vm243_vm1, %v17577_v58, 0  ;;  %v13649_v2 = vadd.f32 %v10089_v40, %v13078_v49  ;;  %v17587_v40 = vld [vmem:[#allocation27_spill] sm:$0xff] }
 0x192   :  { %17573 = vst [vmem:[#allocation103_spill] sm:$0xff] %v13626_v46  ;;  %v1220_v44 = vpop.f32.mrf.mxu0  ;;  %v13641_v45 = vadd.f32 %v10155_v35, %v13061_v25  ;;  %10404 = vmatpush3.bf16.xpose.msra.mxu1 %v1996_v9  ;;  %10399 = vmatprep.mubr.msk.bf16.mxu0 %vm11597_vm2, %v17428_v33  ;;  %v17586_v46 = vld [vmem:[#allocation17_spill] sm:$0xff] }
 0x193   :  { %v1521_v19 = vpop.f32.mrf.mxu1  ;;  %10405 = vmatprep.mubr.msk.bf16.mxu1 %vm11597_vm2, %v17428_v33  ;;  %10409 = vmatprep.subr.bf16.mxu0 %v17428_v33  ;;  %17579 = vst [vmem:[#allocation23_spill] sm:$0xff] %v13649_v2  ;;  %v13659_v35 = vadd.f32 %v13078_v49, %v1220_v44  ;;  %v17588_v2 = vld [vmem:[#allocation16_spill] sm:$0xff] }
 0x194   :  { %17578 = vst [vmem:[#allocation10_spill] sm:$0xff] %v13641_v45  ;;  %v10090_v56 = vpop.f32.mrf.mxu0  ;;  %10415 = vmatprep.subr.bf16.mxu1 %v17428_v33  ;;  %v13662_v58 = vadd.f32 %v13061_v25, %v1521_v19 }
 0x195   :  { %v10156_v23 = vpop.f32.mrf.mxu1  ;;  %v13652_v20 = vadd.f32 %v10090_v56, %v13078_v49  ;;  %17582 = vst [vmem:[#allocation104_spill] sm:$0xff] %v13659_v35  ;;  %v2043_v56 = vsel %vm243_vm1, %v17587_v40, 0 }
 0x196   :  { %v13655_v48 = vadd.f32 %v10156_v23, %v13061_v25  ;;  %17583 = vst [vmem:[#allocation105_spill] sm:$0xff] %v13662_v58  ;;  %v1223_v9 = vpop.f32.mrf.mxu0 }
 0x197   :  { %17580 = vst [vmem:[#allocation13_spill] sm:$0xff] %v13652_v20  ;;  %v1524_v14 = vpop.f32.mrf.mxu1  ;;  %v13669_v59 = vadd.f32 %v13078_v49, %v1223_v9 }
 0x198   :  { %17581 = vst [vmem:[#allocation24_spill] sm:$0xff] %v13655_v48  ;;  %v13672_v23 = vadd.f32 %v13061_v25, %v1524_v14  ;;  %v10093_v4 = vpop.f32.mrf.mxu0  ;;  %10400 = vmatmul.mubr.msk.bf16.vlgmr.msra.gmra.mxu0 %vm243_vm1, %v17586_v46  ;;  %v17589_v14 = vld [vmem:[#allocation28_spill] sm:$0xff] }
 0x199   :  { %17584 = vst [vmem:[#allocation106_spill] sm:$0xff] %v13669_v59  ;;  %v10159_v44 = vpop.f32.mrf.mxu1  ;;  %10406 = vmatmul.mubr.msk.bf16.vlgmr.msra.gmra.mxu1 %vm243_vm1, %v17588_v2  ;;  %10410 = vmatpush3.bf16.xpose.msra.mxu0 %v2043_v56  ;;  %v2090_v9 = vsel %vm243_vm1, %v17589_v14, 0  ;;  %v13695_v2 = vadd.f32 %v10093_v4, %v13078_v49  ;;  %v17599_v4 = vld [vmem:[#allocation31_spill] sm:$0xff] }
 0x19a   :  { %17585 = vst [vmem:[#allocation107_spill] sm:$0xff] %v13672_v23  ;;  %v1236_v20 = vpop.f32.mrf.mxu0  ;;  %v13687_v19 = vadd.f32 %v10159_v44, %v13061_v25  ;;  %10416 = vmatpush3.bf16.xpose.msra.mxu1 %v2090_v9  ;;  %10411 = vmatprep.mubr.msk.bf16.mxu0 %vm11597_vm2, %v17428_v33  ;;  %v17598_v23 = vld [vmem:[#allocation21_spill] sm:$0xff] }
 0x19b   :  { %v1537_v45 = vpop.f32.mrf.mxu1  ;;  %10417 = vmatprep.mubr.msk.bf16.mxu1 %vm11597_vm2, %v17428_v33  ;;  %10421 = vmatprep.subr.bf16.mxu0 %v17428_v33  ;;  %17591 = vst [vmem:[#allocation27_spill] sm:$0xff] %v13695_v2  ;;  %v13705_v44 = vadd.f32 %v13078_v49, %v1236_v20  ;;  %v17600_v2 = vld [vmem:[#allocation22_spill] sm:$0xff] }
 0x19c   :  { %17590 = vst [vmem:[#allocation17_spill] sm:$0xff] %v13687_v19  ;;  %v10094_v46 = vpop.f32.mrf.mxu0  ;;  %10427 = vmatprep.subr.bf16.mxu1 %v17428_v33  ;;  %v13708_v14 = vadd.f32 %v13061_v25, %v1537_v45 }
 0x19d   :  { %v10160_v55 = vpop.f32.mrf.mxu1  ;;  %v13698_v40 = vadd.f32 %v10094_v46, %v13078_v49  ;;  %17594 = vst [vmem:[#allocation108_spill] sm:$0xff] %v13705_v44  ;;  %v2137_v46 = vsel %vm243_vm1, %v17599_v4, 0 }
 0x19e   :  { %v13701_v56 = vadd.f32 %v10160_v55, %v13061_v25  ;;  %17595 = vst [vmem:[#allocation109_spill] sm:$0xff] %v13708_v14  ;;  %v1239_v9 = vpop.f32.mrf.mxu0 }
 0x19f   :  { %17592 = vst [vmem:[#allocation16_spill] sm:$0xff] %v13698_v40  ;;  %v1540_v35 = vpop.f32.mrf.mxu1  ;;  %v13715_v59 = vadd.f32 %v13078_v49, %v1239_v9 }
 0x1a0   :  { %17593 = vst [vmem:[#allocation28_spill] sm:$0xff] %v13701_v56  ;;  %v13718_v55 = vadd.f32 %v13061_v25, %v1540_v35  ;;  %v10097_v48 = vpop.f32.mrf.mxu0  ;;  %10412 = vmatmul.mubr.msk.bf16.vlgmr.msra.gmra.mxu0 %vm243_vm1, %v17598_v23  ;;  %v17601_v35 = vld [vmem:[#allocation32_spill] sm:$0xff] }
 0x1a1   :  { %17596 = vst [vmem:[#allocation110_spill] sm:$0xff] %v13715_v59  ;;  %v10163_v20 = vpop.f32.mrf.mxu1  ;;  %10418 = vmatmul.mubr.msk.bf16.vlgmr.msra.gmra.mxu1 %vm243_vm1, %v17600_v2  ;;  %10422 = vmatpush3.bf16.xpose.msra.mxu0 %v2137_v46  ;;  %v2184_v9 = vsel %vm243_vm1, %v17601_v35, 0  ;;  %v13741_v2 = vadd.f32 %v10097_v48, %v13078_v49  ;;  %v17611_v48 = vld [vmem:[#allocation35_spill] sm:$0xff] }
 0x1a2   :  { %17597 = vst [vmem:[#allocation111_spill] sm:$0xff] %v13718_v55  ;;  %v1252_v40 = vpop.f32.mrf.mxu0  ;;  %v13733_v45 = vadd.f32 %v10163_v20, %v13061_v25  ;;  %10428 = vmatpush3.bf16.xpose.msra.mxu1 %v2184_v9  ;;  %10423 = vmatprep.mubr.msk.bf16.mxu0 %vm11597_vm2, %v17428_v33  ;;  %v17610_v55 = vld [vmem:[#allocation25_spill] sm:$0xff] }
 0x1a3   :  { %v1553_v19 = vpop.f32.mrf.mxu1  ;;  %10429 = vmatprep.mubr.msk.bf16.mxu1 %vm11597_vm2, %v17428_v33  ;;  %10433 = vmatprep.subr.bf16.mxu0 %v17428_v33  ;;  %17603 = vst [vmem:[#allocation31_spill] sm:$0xff] %v13741_v2  ;;  %v13751_v20 = vadd.f32 %v13078_v49, %v1252_v40  ;;  %v17612_v2 = vld [vmem:[#allocation26_spill] sm:$0xff] }
 0x1a4   :  { %17602 = vst [vmem:[#allocation21_spill] sm:$0xff] %v13733_v45  ;;  %v10098_v23 = vpop.f32.mrf.mxu0  ;;  %10439 = vmatprep.subr.bf16.mxu1 %v17428_v33  ;;  %v13754_v35 = vadd.f32 %v13061_v25, %v1553_v19 }
 0x1a5   :  { %v10164_v58 = vpop.f32.mrf.mxu1  ;;  %v13744_v4 = vadd.f32 %v10098_v23, %v13078_v49  ;;  %17606 = vst [vmem:[#allocation112_spill] sm:$0xff] %v13751_v20  ;;  %v2231_v23 = vsel %vm243_vm1, %v17611_v48, 0 }
 0x1a6   :  { %v13747_v46 = vadd.f32 %v10164_v58, %v13061_v25  ;;  %17607 = vst [vmem:[#allocation113_spill] sm:$0xff] %v13754_v35  ;;  %v1255_v9 = vpop.f32.mrf.mxu0 }
 0x1a7   :  { %17604 = vst [vmem:[#allocation22_spill] sm:$0xff] %v13744_v4  ;;  %v1556_v44 = vpop.f32.mrf.mxu1  ;;  %v13761_v59 = vadd.f32 %v13078_v49, %v1255_v9 }
 0x1a8   :  { %17605 = vst [vmem:[#allocation32_spill] sm:$0xff] %v13747_v46  ;;  %v13764_v58 = vadd.f32 %v13061_v25, %v1556_v44  ;;  %v10101_v56 = vpop.f32.mrf.mxu0  ;;  %10424 = vmatmul.mubr.msk.bf16.vlgmr.msra.gmra.mxu0 %vm243_vm1, %v17610_v55  ;;  %v17613_v44 = vld [vmem:[#allocation36_spill] sm:$0xff] }
 0x1a9   :  { %17608 = vst [vmem:[#allocation114_spill] sm:$0xff] %v13761_v59  ;;  %v10167_v40 = vpop.f32.mrf.mxu1  ;;  %10430 = vmatmul.mubr.msk.bf16.vlgmr.msra.gmra.mxu1 %vm243_vm1, %v17612_v2  ;;  %10434 = vmatpush3.bf16.xpose.msra.mxu0 %v2231_v23  ;;  %v2278_v9 = vsel %vm243_vm1, %v17613_v44, 0  ;;  %v13787_v2 = vadd.f32 %v10101_v56, %v13078_v49  ;;  %v17623_v56 = vld [vmem:[#allocation4_spill] sm:$0xff] }
 0x1aa   :  { %17609 = vst [vmem:[#allocation115_spill] sm:$0xff] %v13764_v58  ;;  %v1268_v4 = vpop.f32.mrf.mxu0  ;;  %v13779_v19 = vadd.f32 %v10167_v40, %v13061_v25  ;;  %10440 = vmatpush3.bf16.xpose.msra.mxu1 %v2278_v9  ;;  %10435 = vmatprep.mubr.msk.bf16.mxu0 %vm11597_vm2, %v17428_v33  ;;  %v17622_v58 = vld [vmem:[#allocation29_spill] sm:$0xff] }
 0x1ab   :  { %v1569_v45 = vpop.f32.mrf.mxu1  ;;  %10441 = vmatprep.mubr.msk.bf16.mxu1 %vm11597_vm2, %v17428_v33  ;;  %10445 = vmatprep.subr.bf16.mxu0 %v17428_v33  ;;  %17615 = vst [vmem:[#allocation35_spill] sm:$0xff] %v13787_v2  ;;  %v13797_v40 = vadd.f32 %v13078_v49, %v1268_v4  ;;  %v17624_v2 = vld [vmem:[#allocation30_spill] sm:$0xff] }
 0x1ac   :  { %17614 = vst [vmem:[#allocation25_spill] sm:$0xff] %v13779_v19  ;;  %v10102_v55 = vpop.f32.mrf.mxu0  ;;  %10451 = vmatprep.subr.bf16.mxu1 %v17428_v33  ;;  %v13800_v44 = vadd.f32 %v13061_v25, %v1569_v45 }
 0x1ad   :  { %v10168_v14 = vpop.f32.mrf.mxu1  ;;  %v13790_v48 = vadd.f32 %v10102_v55, %v13078_v49  ;;  %17618 = vst [vmem:[#allocation116_spill] sm:$0xff] %v13797_v40  ;;  %v2325_v55 = vsel %vm243_vm1, %v17623_v56, 0 }
 0x1ae   :  { %v13793_v23 = vadd.f32 %v10168_v14, %v13061_v25  ;;  %17619 = vst [vmem:[#allocation117_spill] sm:$0xff] %v13800_v44  ;;  %v1271_v9 = vpop.f32.mrf.mxu0 }
 0x1af   :  { %17616 = vst [vmem:[#allocation26_spill] sm:$0xff] %v13790_v48  ;;  %v1572_v20 = vpop.f32.mrf.mxu1  ;;  %v13807_v59 = vadd.f32 %v13078_v49, %v1271_v9 }
 0x1b0   :  { %17617 = vst [vmem:[#allocation36_spill] sm:$0xff] %v13793_v23  ;;  %v13810_v14 = vadd.f32 %v13061_v25, %v1572_v20  ;;  %v10105_v46 = vpop.f32.mrf.mxu0  ;;  %10436 = vmatmul.mubr.msk.bf16.vlgmr.msra.gmra.mxu0 %vm243_vm1, %v17622_v58  ;;  %v17625_v20 = vld [vmem:[#allocation39_spill] sm:$0xff] }
 0x1b1   :  { %17620 = vst [vmem:[#allocation118_spill] sm:$0xff] %v13807_v59  ;;  %v10171_v4 = vpop.f32.mrf.mxu1  ;;  %10442 = vmatmul.mubr.msk.bf16.vlgmr.msra.gmra.mxu1 %vm243_vm1, %v17624_v2  ;;  %10446 = vmatpush3.bf16.xpose.msra.mxu0 %v2325_v55  ;;  %v2372_v9 = vsel %vm243_vm1, %v17625_v20, 0  ;;  %v13833_v2 = vadd.f32 %v10105_v46, %v13078_v49  ;;  %v17635_v46 = vld [vmem:[#allocation42_spill] sm:$0xff] }
 0x1b2   :  { %17621 = vst [vmem:[#allocation119_spill] sm:$0xff] %v13810_v14  ;;  %v1284_v48 = vpop.f32.mrf.mxu0  ;;  %v13825_v45 = vadd.f32 %v10171_v4, %v13061_v25  ;;  %10452 = vmatpush3.bf16.xpose.msra.mxu1 %v2372_v9  ;;  %10447 = vmatprep.mubr.msk.bf16.mxu0 %vm11597_vm2, %v17428_v33  ;;  %v17634_v14 = vld [vmem:[#allocation33_spill] sm:$0xff] }
 0x1b3   :  { %v1585_v19 = vpop.f32.mrf.mxu1  ;;  %10453 = vmatprep.mubr.msk.bf16.mxu1 %vm11597_vm2, %v17428_v33  ;;  %10457 = vmatprep.subr.bf16.mxu0 %v17428_v33  ;;  %17627 = vst [vmem:[#allocation4_spill] sm:$0xff] %v13833_v2  ;;  %v13843_v4 = vadd.f32 %v13078_v49, %v1284_v48  ;;  %v17636_v2 = vld [vmem:[#allocation34_spill] sm:$0xff] }
 0x1b4   :  { %17626 = vst [vmem:[#allocation29_spill] sm:$0xff] %v13825_v45  ;;  %v10106_v58 = vpop.f32.mrf.mxu0  ;;  %10463 = vmatprep.subr.bf16.mxu1 %v17428_v33  ;;  %v13846_v20 = vadd.f32 %v13061_v25, %v1585_v19 }
 0x1b5   :  { %v10172_v35 = vpop.f32.mrf.mxu1  ;;  %v13836_v56 = vadd.f32 %v10106_v58, %v13078_v49  ;;  %17630 = vst [vmem:[#allocation120_spill] sm:$0xff] %v13843_v4  ;;  %v2419_v58 = vsel %vm243_vm1, %v17635_v46, 0 }
 0x1b6   :  { %v13839_v55 = vadd.f32 %v10172_v35, %v13061_v25  ;;  %17631 = vst [vmem:[#allocation121_spill] sm:$0xff] %v13846_v20  ;;  %v1287_v9 = vpop.f32.mrf.mxu0 }
 0x1b7   :  { %17628 = vst [vmem:[#allocation30_spill] sm:$0xff] %v13836_v56  ;;  %v1588_v40 = vpop.f32.mrf.mxu1  ;;  %v13853_v59 = vadd.f32 %v13078_v49, %v1287_v9 }
 0x1b8   :  { %17629 = vst [vmem:[#allocation39_spill] sm:$0xff] %v13839_v55  ;;  %v13856_v35 = vadd.f32 %v13061_v25, %v1588_v40  ;;  %v10109_v23 = vpop.f32.mrf.mxu0  ;;  %10448 = vmatmul.mubr.msk.bf16.vlgmr.msra.gmra.mxu0 %vm243_vm1, %v17634_v14  ;;  %v17637_v40 = vld [vmem:[#allocation43_spill] sm:$0xff] }
 0x1b9   :  { %17632 = vst [vmem:[#allocation122_spill] sm:$0xff] %v13853_v59  ;;  %v10175_v48 = vpop.f32.mrf.mxu1  ;;  %10454 = vmatmul.mubr.msk.bf16.vlgmr.msra.gmra.mxu1 %vm243_vm1, %v17636_v2  ;;  %10458 = vmatpush3.bf16.xpose.msra.mxu0 %v2419_v58  ;;  %v2466_v9 = vsel %vm243_vm1, %v17637_v40, 0  ;;  %v13879_v2 = vadd.f32 %v10109_v23, %v13078_v49  ;;  %v17646_v23 = vld [vmem:[#allocation6_spill] sm:$0xff] }
 0x1ba   :  { %17633 = vst [vmem:[#allocation123_spill] sm:$0xff] %v13856_v35  ;;  %v1300_v56 = vpop.f32.mrf.mxu0  ;;  %v13871_v19 = vadd.f32 %v10175_v48, %v13061_v25  ;;  %10464 = vmatpush3.bf16.xpose.msra.mxu1 %v2466_v9  ;;  %10459 = vmatprep.mubr.msk.bf16.mxu0 %vm11597_vm2, %v17428_v33  ;;  %v11469_v25 = vld [vmem:[%s17072_s9] ss:$0 sm:$0xff] }
 0x1bb   :  { %v1601_v45 = vpop.f32.mrf.mxu1  ;;  %10465 = vmatprep.mubr.msk.bf16.mxu1 %vm11597_vm2, %v17428_v33  ;;  %10469 = vmatprep.subr.bf16.mxu0 %v17428_v33  ;;  %17639 = vst [vmem:[#allocation42_spill] sm:$0xff] %v13879_v2  ;;  %v13891_v48 = vadd.f32 %v13078_v49, %v1300_v56 }
 0x1bc   :  { %17638 = vst [vmem:[#allocation33_spill] sm:$0xff] %v13871_v19  ;;  %v10110_v14 = vpop.f32.mrf.mxu0  ;;  %10475 = vmatprep.subr.bf16.mxu1 %v17428_v33  ;;  %v13893_v40 = vadd.f32 %v11469_v25, %v1601_v45 }
 0x1bd   :  { %v10176_v44 = vpop.f32.mrf.mxu1  ;;  %v13882_v46 = vadd.f32 %v10110_v14, %v13078_v49  ;;  %17642 = vst [vmem:[#allocation124_spill] sm:$0xff] %v13891_v48  ;;  %v17647_v14 = vld [vmem:[#allocation48_spill] sm:$0xff] }
 0x1be   :  { %v13887_v58 = vadd.f32 %v11469_v25, %v10176_v44  ;;  %17643 = vst [vmem:[#allocation125_spill] sm:$0xff] %v13893_v40  ;;  %v1303_v9 = vpop.f32.mrf.mxu0  ;;  %v11470_v44 = vld [vmem:[%s17073_s7] ss:$0 sm:$0xff]  ;;  %v2513_v2 = vsel %vm243_vm1, %v17647_v14, 0 }
 0x1bf   :  { %17640 = vst [vmem:[#allocation34_spill] sm:$0xff] %v13882_v46  ;;  %v1604_v4 = vpop.f32.mrf.mxu1  ;;  %v13902_v59 = vadd.f32 %v11470_v44, %v1303_v9  ;;  %v17648_v46 = vld [vmem:[#allocation5_spill] sm:$0xff] }
 0x1c0   :  { %17641 = vst [vmem:[#allocation43_spill] sm:$0xff] %v13887_v58  ;;  %v13904_v55 = vadd.f32 %v11469_v25, %v1604_v4  ;;  %v10113_v49 = vpop.f32.mrf.mxu0  ;;  %10460 = vmatmul.mubr.msk.bf16.vlgmr.msra.gmra.mxu0 %vm243_vm1, %v17646_v23  ;;  %v17649_v4 = vld [vmem:[#allocation49_spill] sm:$0xff] }
 0x1c1   :  { %17644 = vst [vmem:[#allocation126_spill] sm:$0xff] %v13902_v59  ;;  %v10179_v56 = vpop.f32.mrf.mxu1  ;;  %10466 = vmatmul.mubr.msk.bf16.vlgmr.msra.gmra.mxu1 %vm243_vm1, %v17648_v46  ;;  %10470 = vmatpush3.bf16.xpose.msra.mxu0 %v2513_v2  ;;  %v2560_v9 = vsel %vm243_vm1, %v17649_v4, 0  ;;  %v13925_v46 = vadd.f32 %v11470_v44, %v10113_v49 }
 0x1c2   :  { %17645 = vst [vmem:[#allocation127_spill] sm:$0xff] %v13904_v55  ;;  %v1316_v19 = vpop.f32.mrf.mxu0  ;;  %v13918_v35 = vadd.f32 %v11469_v25, %v10179_v56  ;;  %10476 = vmatpush3.bf16.xpose.msra.mxu1 %v2560_v9  ;;  %10471 = vmatprep.mubr.msk.bf16.mxu0 %vm11597_vm2, %v17428_v33 }
 0x1c3   :  { %v1617_v58 = vpop.f32.mrf.mxu1  ;;  %10477 = vmatprep.mubr.msk.bf16.mxu1 %vm11597_vm2, %v17428_v33  ;;  %10481 = vmatprep.subr.bf16.mxu0 %v17428_v33  ;;  %17651 = vst [vmem:[#allocation48_spill] sm:$0xff] %v13925_v46  ;;  %v13932_v56 = vadd.f32 %v11470_v44, %v1316_v19  ;;  %v2607_v19 = vsel %vm243_vm1, %v13112_v15, 0  ;;  %v17658_v46 = vld [vmem:[#allocation8_spill] sm:$0xff]  ;;  %v2654_v15 = vsel %vm243_vm1, %v13132_v37, 0 }
 0x1c4   :  { %17650 = vst [vmem:[#allocation6_spill] sm:$0xff] %v13918_v35  ;;  %v10114_v45 = vpop.f32.mrf.mxu0  ;;  %10487 = vmatprep.subr.bf16.mxu1 %v17428_v33  ;;  %v13934_v4 = vadd.f32 %v11469_v25, %v1617_v58 }
 0x1c5   :  { %v10180_v23 = vpop.f32.mrf.mxu1  ;;  %v13927_v2 = vadd.f32 %v11470_v44, %v10114_v45  ;;  %17654 = vst [vmem:[#allocation128_spill] sm:$0xff] %v13932_v56 }
 0x1c6   :  { %v13929_v14 = vadd.f32 %v11469_v25, %v10180_v23  ;;  %17655 = vst [vmem:[#allocation129_spill] sm:$0xff] %v13934_v4  ;;  %v1319_v9 = vpop.f32.mrf.mxu0 }
 0x1c7   :  { %17652 = vst [vmem:[#allocation5_spill] sm:$0xff] %v13927_v2  ;;  %v1620_v20 = vpop.f32.mrf.mxu1  ;;  %v13940_v59 = vadd.f32 %v11470_v44, %v1319_v9  ;;  %v17659_v44 = vld [vmem:[#allocation7_spill] sm:$0xff] }
 0x1c8   :  { %17653 = vst [vmem:[#allocation49_spill] sm:$0xff] %v13929_v14  ;;  %v13942_v45 = vadd.f32 %v11469_v25, %v1620_v20  ;;  %v13944_v23 = vpop.f32.mrf.mxu0  ;;  %10472 = vmatmul.mubr.msk.bf16.vlgmr.msra.gmra.mxu0 %vm243_vm1, %v17658_v46  ;;  %v17661_v2 = vld [vmem:[#allocation47_spill] sm:$0xff] }
 0x1c9   :  { %17656 = vst [vmem:[#allocation130_spill] sm:$0xff] %v13940_v59  ;;  %v13946_v40 = vpop.f32.mrf.mxu1  ;;  %v4577_v25 = vsel %vm4576_vm3, %v13944_v23, -inf  ;;  %10478 = vmatmul.mubr.msk.bf16.vlgmr.msra.gmra.mxu1 %vm243_vm1, %v17659_v44  ;;  %10482 = vmatpush3.bf16.xpose.msra.mxu0 %v2607_v19  ;;  %v17660_v44 = vld [vmem:[#allocation46_spill] sm:$0xff] }
 0x1ca   :  { %17657 = vst [vmem:[#allocation131_spill] sm:$0xff] %v13942_v45  ;;  %v4583_v20 = vsel %vm4576_vm3, %v13946_v40, -inf  ;;  %v10185_v58 = vpop.f32.mrf.mxu0  ;;  %10488 = vmatpush3.bf16.xpose.msra.mxu1 %v2654_v15  ;;  %4578 = vmax.xlane.f32.xlu0 %v4577_v25  ;;  %v2701_v15 = vsel %vm243_vm1, %v13182_v29, 0 }
 0x1cb   :  { %v10191_v9 = vpop.f32.mrf.mxu1  ;;  %4584 = vmax.xlane.f32.xlu1 %v4583_v20  ;;  %10483 = vmatprep.mubr.msk.bf16.mxu0 %vm11597_vm2, %v17428_v33 }
 0x1cc   :  { %v13964_v49 = vpop.f32.mrf.mxu0  ;;  %10489 = vmatprep.mubr.msk.bf16.mxu1 %vm11597_vm2, %v17428_v33  ;;  %10493 = vmatprep.subr.bf16.mxu0 %v17428_v33 }
 0x1cd   :  { %v13966_v46 = vpop.f32.mrf.mxu1  ;;  %v4580_v19 = vsel %vm4576_vm3, %v13964_v49, -inf  ;;  %10499 = vmatprep.subr.bf16.mxu1 %v17428_v33 }
 0x1ce   :  { %v4586_v48 = vsel %vm4576_vm3, %v13966_v46, -inf  ;;  %v10186_v58 = vpop.f32.mrf.mxu0  ;;  %4581 = vmax.xlane.f32.xlu0 %v4580_v19 }
 0x1cf   :  { %v10192_v37 = vpop.f32.mrf.mxu1  ;;  %4587 = vmax.xlane.f32.xlu1 %v4586_v48  ;;  %v2748_v48 = vsel %vm243_vm1, %v13202_v6, 0 }
 0x1d0   :  { %v13978_v20 = vpop.f32.mrf.mxu0  ;;  %10484 = vmatmul.mubr.msk.bf16.vlgmr.msra.gmra.mxu0 %vm243_vm1, %v17660_v44 }
 0x1d1   :  { %v13980_v25 = vpop.f32.mrf.mxu1  ;;  %v4589_v9 = vsel %vm4576_vm3, %v13978_v20, -inf  ;;  %10490 = vmatmul.mubr.msk.bf16.vlgmr.msra.gmra.mxu1 %vm243_vm1, %v17661_v2  ;;  %10494 = vmatpush3.bf16.xpose.msra.mxu0 %v2701_v15 }
 0x1d2   :  { %v10197_v19 = vpop.f32.mrf.mxu0  ;;  %10500 = vmatpush3.bf16.xpose.msra.mxu1 %v2748_v48  ;;  %10495 = vmatprep.mubr.msk.bf16.mxu0 %vm11597_vm2, %v17428_v33  ;;  %v4595_v15 = vsel %vm4576_vm3, %v13980_v25, -inf  ;;  %v2795_v48 = vsel %vm243_vm1, %v13252_v60, 0 }
 0x1d3   :  { %v10203_v37 = vpop.f32.mrf.mxu1  ;;  %4590 = vmax.xlane.f32.xlu0 %v4589_v9  ;;  %10501 = vmatprep.mubr.msk.bf16.mxu1 %vm11597_vm2, %v17428_v33 }
 0x1d4   :  { %v13994_v58 = vpop.f32.mrf.mxu0  ;;  %10505 = vmatprep.subr.bf16.mxu0 %v17428_v33  ;;  %10511 = vmatprep.subr.bf16.mxu1 %v17428_v33  ;;  %v2842_v37 = vsel %vm243_vm1, %v13272_v42, 0 }
 0x1d5   :  { %v13998_v29 = vpop.f32.mrf.mxu1  ;;  %v4592_v2 = vsel %vm4576_vm3, %v13994_v58, -inf }
 0x1d6   :  { %4593 = vmax.xlane.f32.xlu1 %v4592_v2  ;;  %v10198_v6 = vpop.f32.mrf.mxu0  ;;  %v4598_v2 = vsel %vm4576_vm3, %v13998_v29, -inf }
 0x1d7   :  { %v10204_v44 = vpop.f32.mrf.mxu1  ;;  %4596 = vmax.xlane.f32.xlu0 %v4595_v15 }
 0x1d8   :  { %v14006_v9 = vpop.f32.mrf.mxu0  ;;  %10496 = vmatmul.mubr.msk.bf16.vlgmr.msra.gmra.mxu0 %vm243_vm1, %v13100_v5 }
 0x1d9   :  { %v14012_v19 = vpop.f32.mrf.mxu1  ;;  %10502 = vmatmul.mubr.msk.bf16.vlgmr.msra.gmra.mxu1 %vm243_vm1, %v13114_v54  ;;  %10506 = vmatpush3.bf16.xpose.msra.mxu0 %v2795_v48  ;;  %v4601_v6 = vsel %vm4576_vm3, %v14006_v9, -inf }
 0x1da   :  { %10512 = vmatpush3.bf16.xpose.msra.mxu1 %v2842_v37  ;;  %4599 = vmax.xlane.f32.xlu1 %v4598_v2  ;;  %v10209_v5 = vpop.f32.mrf.mxu0  ;;  %v4607_v15 = vsel %vm4576_vm3, %v14012_v19, -inf }
 0x1db   :  { %v10215_v44 = vpop.f32.mrf.mxu1  ;;  %4602 = vmax.xlane.f32.xlu0 %v4601_v6  ;;  %10507 = vmatprep.mubr.msk.bf16.mxu0 %vm11597_vm2, %v17428_v33  ;;  %v2889_v6 = vsel %vm243_vm1, %v13322_v41, 0 }
 0x1dc   :  { %v14024_v60 = vpop.f32.mrf.mxu0  ;;  %10513 = vmatprep.mubr.msk.bf16.mxu1 %vm11597_vm2, %v17428_v33  ;;  %10517 = vmatprep.subr.bf16.mxu0 %v17428_v33  ;;  %v2936_v44 = vsel %vm243_vm1, %v13342_v32, 0 }
 0x1dd   :  { %v14029_v54 = vpop.f32.mrf.mxu1  ;;  %v4604_v42 = vsel %vm4576_vm3, %v14024_v60, -inf  ;;  %10523 = vmatprep.subr.bf16.mxu1 %v17428_v33 }
 0x1de   :  { %4605 = vmax.xlane.f32.xlu1 %v4604_v42  ;;  %v10210_v48 = vpop.f32.mrf.mxu0  ;;  %v4610_v42 = vsel %vm4576_vm3, %v14029_v54, -inf }
 0x1df   :  { %v10216_v37 = vpop.f32.mrf.mxu1  ;;  %4608 = vmax.xlane.f32.xlu0 %v4607_v15 }
 0x1e0   :  { %v14036_v2 = vpop.f32.mrf.mxu0  ;;  %10508 = vmatmul.mubr.msk.bf16.vlgmr.msra.gmra.mxu0 %vm243_vm1, %v13170_v26 }
 0x1e1   :  { %v14042_v5 = vpop.f32.mrf.mxu1  ;;  %10514 = vmatmul.mubr.msk.bf16.vlgmr.msra.gmra.mxu1 %vm243_vm1, %v13184_v57  ;;  %10518 = vmatpush3.bf16.xpose.msra.mxu0 %v2889_v6  ;;  %v4613_v15 = vsel %vm4576_vm3, %v14036_v2, -inf }
 0x1e2   :  { %10524 = vmatpush3.bf16.xpose.msra.mxu1 %v2936_v44  ;;  %4611 = vmax.xlane.f32.xlu1 %v4610_v42  ;;  %v10221_v26 = vpop.f32.mrf.mxu0  ;;  %v4619_v37 = vsel %vm4576_vm3, %v14042_v5, -inf }
 0x1e3   :  { %v10227_v48 = vpop.f32.mrf.mxu1  ;;  %4614 = vmax.xlane.f32.xlu0 %v4613_v15  ;;  %10519 = vmatprep.mubr.msk.bf16.mxu0 %vm11597_vm2, %v17428_v33  ;;  %v2983_v15 = vsel %vm243_vm1, %v13391_v24, 0 }
 0x1e4   :  { %v14054_v41 = vpop.f32.mrf.mxu0  ;;  %10525 = vmatprep.mubr.msk.bf16.mxu1 %vm11597_vm2, %v17428_v33  ;;  %10529 = vmatprep.subr.bf16.mxu0 %v17428_v33  ;;  %v3030_v48 = vsel %vm243_vm1, %v13411_v39, 0 }
 0x1e5   :  { %v14059_v57 = vpop.f32.mrf.mxu1  ;;  %v4616_v32 = vsel %vm4576_vm3, %v14054_v41, -inf  ;;  %10535 = vmatprep.subr.bf16.mxu1 %v17428_v33 }
 0x1e6   :  { %4617 = vmax.xlane.f32.xlu1 %v4616_v32  ;;  %v10222_v6 = vpop.f32.mrf.mxu0  ;;  %v4622_v32 = vsel %vm4576_vm3, %v14059_v57, -inf }
 0x1e7   :  { %v10228_v44 = vpop.f32.mrf.mxu1  ;;  %4620 = vmax.xlane.f32.xlu0 %v4619_v37 }
 0x1e8   :  { %v14066_v42 = vpop.f32.mrf.mxu0  ;;  %10520 = vmatmul.mubr.msk.bf16.vlgmr.msra.gmra.mxu0 %vm243_vm1, %v13240_v43 }
 0x1e9   :  { %v14072_v26 = vpop.f32.mrf.mxu1  ;;  %10526 = vmatmul.mubr.msk.bf16.vlgmr.msra.gmra.mxu1 %vm243_vm1, %v13254_v21  ;;  %10530 = vmatpush3.bf16.xpose.msra.mxu0 %v2983_v15  ;;  %v4625_v37 = vsel %vm4576_vm3, %v14066_v42, -inf }
 0x1ea   :  { %10536 = vmatpush3.bf16.xpose.msra.mxu1 %v3030_v48  ;;  %4623 = vmax.xlane.f32.xlu1 %v4622_v32  ;;  %v10233_v43 = vpop.f32.mrf.mxu0  ;;  %v4631_v44 = vsel %vm4576_vm3, %v14072_v26, -inf }
 0x1eb   :  { %v10239_v6 = vpop.f32.mrf.mxu1  ;;  %4626 = vmax.xlane.f32.xlu0 %v4625_v37  ;;  %10531 = vmatprep.mubr.msk.bf16.mxu0 %vm11597_vm2, %v17428_v33  ;;  %v3077_v37 = vsel %vm243_vm1, %v13457_v10, 0 }
 0x1ec   :  { %v14084_v24 = vpop.f32.mrf.mxu0  ;;  %10537 = vmatprep.mubr.msk.bf16.mxu1 %vm11597_vm2, %v17428_v33  ;;  %10541 = vmatprep.subr.bf16.mxu0 %v17428_v33  ;;  %v3124_v6 = vsel %vm243_vm1, %v13477_v51, 0 }
 0x1ed   :  { %v14089_v21 = vpop.f32.mrf.mxu1  ;;  %v4628_v39 = vsel %vm4576_vm3, %v14084_v24, -inf  ;;  %10547 = vmatprep.subr.bf16.mxu1 %v17428_v33 }
 0x1ee   :  { %4629 = vmax.xlane.f32.xlu1 %v4628_v39  ;;  %v10234_v15 = vpop.f32.mrf.mxu0  ;;  %v4634_v39 = vsel %vm4576_vm3, %v14089_v21, -inf }
 0x1ef   :  { %v10240_v48 = vpop.f32.mrf.mxu1  ;;  %4632 = vmax.xlane.f32.xlu0 %v4631_v44 }
 0x1f0   :  { %v14096_v32 = vpop.f32.mrf.mxu0  ;;  %10532 = vmatmul.mubr.msk.bf16.vlgmr.msra.gmra.mxu0 %vm243_vm1, %v13310_v17 }
 0x1f1   :  { %v14102_v43 = vpop.f32.mrf.mxu1  ;;  %10538 = vmatmul.mubr.msk.bf16.vlgmr.msra.gmra.mxu1 %vm243_vm1, %v13324_v12  ;;  %10542 = vmatpush3.bf16.xpose.msra.mxu0 %v3077_v37  ;;  %v4637_v44 = vsel %vm4576_vm3, %v14096_v32, -inf }
 0x1f2   :  { %10548 = vmatpush3.bf16.xpose.msra.mxu1 %v3124_v6  ;;  %4635 = vmax.xlane.f32.xlu1 %v4634_v39  ;;  %v10245_v17 = vpop.f32.mrf.mxu0  ;;  %v4643_v48 = vsel %vm4576_vm3, %v14102_v43, -inf }
 0x1f3   :  { %v10251_v15 = vpop.f32.mrf.mxu1  ;;  %4638 = vmax.xlane.f32.xlu0 %v4637_v44  ;;  %10543 = vmatprep.mubr.msk.bf16.mxu0 %vm11597_vm2, %v17428_v33  ;;  %v3171_v44 = vsel %vm243_vm1, %v13516_v28, 0 }
 0x1f4   :  { %v14114_v10 = vpop.f32.mrf.mxu0  ;;  %10549 = vmatprep.mubr.msk.bf16.mxu1 %vm11597_vm2, %v17428_v33  ;;  %10553 = vmatprep.subr.bf16.mxu0 %v17428_v33  ;;  %v3218_v15 = vsel %vm243_vm1, %v13534_v0, 0 }
 0x1f5   :  { %v14119_v12 = vpop.f32.mrf.mxu1  ;;  %v4640_v51 = vsel %vm4576_vm3, %v14114_v10, -inf  ;;  %10559 = vmatprep.subr.bf16.mxu1 %v17428_v33 }
 0x1f6   :  { %4641 = vmax.xlane.f32.xlu1 %v4640_v51  ;;  %v10246_v37 = vpop.f32.mrf.mxu0  ;;  %v4646_v51 = vsel %vm4576_vm3, %v14119_v12, -inf }
 0x1f7   :  { %v10252_v6 = vpop.f32.mrf.mxu1  ;;  %4644 = vmax.xlane.f32.xlu0 %v4643_v48 }
 0x1f8   :  { %v14126_v39 = vpop.f32.mrf.mxu0  ;;  %10544 = vmatmul.mubr.msk.bf16.vlgmr.msra.gmra.mxu0 %vm243_vm1, %v13379_v3 }
 0x1f9   :  { %v14132_v17 = vpop.f32.mrf.mxu1  ;;  %10550 = vmatmul.mubr.msk.bf16.vlgmr.msra.gmra.mxu1 %vm243_vm1, %v13393_v36  ;;  %10554 = vmatpush3.bf16.xpose.msra.mxu0 %v3171_v44  ;;  %v4649_v48 = vsel %vm4576_vm3, %v14126_v39, -inf }
 0x1fa   :  { %10560 = vmatpush3.bf16.xpose.msra.mxu1 %v3218_v15  ;;  %4647 = vmax.xlane.f32.xlu1 %v4646_v51  ;;  %v10257_v3 = vpop.f32.mrf.mxu0  ;;  %v4655_v6 = vsel %vm4576_vm3, %v14132_v17, -inf }
 0x1fb   :  { %v10263_v37 = vpop.f32.mrf.mxu1  ;;  %4650 = vmax.xlane.f32.xlu0 %v4649_v48  ;;  %10555 = vmatprep.mubr.msk.bf16.mxu0 %vm11597_vm2, %v17428_v33  ;;  %v17662_v3 = vpack.c.bf16 %v13130_v31, %v13120_v8 }
 0x1fc   :  { %v14144_v28 = vpop.f32.mrf.mxu0  ;;  %10561 = vmatprep.mubr.msk.bf16.mxu1 %vm11597_vm2, %v17428_v33  ;;  %10565 = vmatprep.subr.bf16.mxu0 %v17428_v33 }
 0x1fd   :  { %v14149_v36 = vpop.f32.mrf.mxu1  ;;  %v4652_v0 = vsel %vm4576_vm3, %v14144_v28, -inf  ;;  %10571 = vmatprep.subr.bf16.mxu1 %v17428_v33 }
 0x1fe   :  { %4653 = vmax.xlane.f32.xlu1 %v4652_v0  ;;  %v10258_v44 = vpop.f32.mrf.mxu0  ;;  %v4658_v37 = vsel %vm4576_vm3, %v14149_v36, -inf }
 0x1ff   :  { %v10264_v15 = vpop.f32.mrf.mxu1  ;;  %4656 = vmax.xlane.f32.xlu0 %v4655_v6  ;;  %v17663_v6 = vpack.c.bf16 %v13109_v53, %v13087_v16 }
 0x200   :  { %v14156_v51 = vpop.f32.mrf.mxu0  ;;  %10556 = vmatmul.mubr.msk.bf16.vlgmr.msra.gmra.mxu0 %vm243_vm1, %v13445_v61 }
 0x201   :  { %v14160_v48 = vpop.f32.mrf.mxu1  ;;  %10562 = vmatmul.mubr.msk.bf16.vlgmr.msra.gmra.mxu1 %vm243_vm1, %v13459_v11  ;;  %10566 = vmatpush3.bf16.msra.mxu0 %v17662_v3  ;;  %v4661_v0 = vsel %vm4576_vm3, %v14156_v51, -inf }
 0x202   :  { %10572 = vmatpush3.bf16.msra.mxu1 %v17663_v6  ;;  %4659 = vmax.xlane.f32.xlu1 %v4658_v37  ;;  %v10269_v61 = vpop.f32.mrf.mxu0  ;;  %v4667_v53 = vsel %vm4576_vm3, %v14160_v48, -inf }
 0x203   :  { %v10275_v44 = vpop.f32.mrf.mxu1  ;;  %4662 = vmax.xlane.f32.xlu0 %v4661_v0  ;;  %10567 = vmatprep.mubr.msk.bf16.mxu0 %vm11597_vm2, %v17428_v33 }
 0x204   :  { %v14176_v11 = vpop.f32.mrf.mxu0  ;;  %10577 = vmatprep.subr.bf16.mxu0 %v17428_v33  ;;  %10573 = vmatprep.mubr.msk.bf16.mxu1 %vm11597_vm2, %v17428_v33 }
 0x205   :  { %v14181_v8 = vpop.f32.mrf.mxu1  ;;  %v4664_v16 = vsel %vm4576_vm3, %v14176_v11, -inf  ;;  %10583 = vmatprep.subr.bf16.mxu1 %v17428_v33 }
 0x206   :  { %4665 = vmax.xlane.f32.xlu1 %v4664_v16  ;;  %v10270_v31 = vpop.f32.mrf.mxu0  ;;  %v4670_v0 = vsel %vm4576_vm3, %v14181_v8, -inf }
 0x207   :  { %v10276_v15 = vpop.f32.mrf.mxu1  ;;  %4668 = vmax.xlane.f32.xlu0 %v4667_v53 }
 0x208   :  { %v14188_v3 = vpop.f32.mrf.mxu0 }
 0x209   :  { %v14190_v37 = vpop.f32.mrf.mxu1  ;;  %v4673_v6 = vsel %vm4576_vm3, %v14188_v3, -inf }
 0x20a   :  { %4671 = vmax.xlane.f32.xlu1 %v4670_v0  ;;  %v10281_v61 = vpop.f32.mrf.mxu0  ;;  %v4679_v31 = vsel %vm4576_vm3, %v14190_v37, -inf }
 0x20b   :  { %v10287_v44 = vpop.f32.mrf.mxu1  ;;  %4674 = vmax.xlane.f32.xlu0 %v4673_v6 }
 0x20c   :  { %v14196_v56 = vpop.f32.mrf.mxu0 }
 0x20d   :  { %v14198_v16 = vpop.f32.mrf.mxu1  ;;  %v4676_v53 = vsel %vm4576_vm3, %v14196_v56, -inf }
 0x20e   :  { %4677 = vmax.xlane.f32.xlu1 %v4676_v53  ;;  %v10282_v15 = vpop.f32.mrf.mxu0  ;;  %v4682_v6 = vsel %vm4576_vm3, %v14198_v16, -inf }
 0x20f   :  { %v10288_v59 = vpop.f32.mrf.mxu1  ;;  %4680 = vmax.xlane.f32.xlu0 %v4679_v31 }
 0x210   :  { %v14204_v35 = vpop.f32.mrf.mxu0 }
 0x211   :  { %v14206_v0 = vpop.f32.mrf.mxu1  ;;  %v4685_v61 = vsel %vm4576_vm3, %v14204_v35, -inf }
 0x212   :  { %17664 = vst [vmem:[#allocation8_spill] sm:$0xff] %v14206_v0  ;;  %4683 = vmax.xlane.f32.xlu1 %v4682_v6  ;;  %v10293_v44 = vpop.f32.mrf.mxu0  ;;  %v4691_v31 = vsel %vm4576_vm3, %v14206_v0, -inf }
 0x213   :  { %v10299_v14 = vpop.f32.mrf.mxu1  ;;  %4686 = vmax.xlane.f32.xlu0 %v4685_v61 }
 0x214   :  { %v14212_v4 = vpop.f32.mrf.mxu0 }
 0x215   :  { %v14214_v53 = vpop.f32.mrf.mxu1  ;;  %v4688_v59 = vsel %vm4576_vm3, %v14212_v4, -inf }
 0x216   :  { %17665 = vst [vmem:[#allocation7_spill] sm:$0xff] %v14214_v53  ;;  %4689 = vmax.xlane.f32.xlu1 %v4688_v59  ;;  %v10294_v15 = vpop.f32.mrf.mxu0  ;;  %v4694_v14 = vsel %vm4576_vm3, %v14214_v53, -inf }
 0x217   :  { %v10300_v45 = vpop.f32.mrf.mxu1  ;;  %4692 = vmax.xlane.f32.xlu0 %v4691_v31 }
 0x218   :  { %v14220_v55 = vpop.f32.mrf.mxu0 }
 0x219   :  { %17666 = vst [vmem:[#allocation46_spill] sm:$0xff] %v14220_v55  ;;  %v14222_v6 = vpop.f32.mrf.mxu1  ;;  %v4697_v61 = vsel %vm4576_vm3, %v14220_v55, -inf }
 0x21a   :  { %17667 = vst [vmem:[#allocation47_spill] sm:$0xff] %v14222_v6  ;;  %4695 = vmax.xlane.f32.xlu1 %v4694_v14  ;;  %v10305_v44 = vpop.f32.mrf.mxu0  ;;  %v4703_v31 = vsel %vm4576_vm3, %v14222_v6, -inf }
 0x21b   :  { %v10311_v27 = vpop.f32.mrf.mxu1  ;;  %4698 = vmax.xlane.f32.xlu0 %v4697_v61 }
 0x21c   :  { %v14228_v13 = vpop.f32.mrf.mxu0 }
 0x21d   :  { %17668 = vst [vmem:[#allocation132_spill] sm:$0xff] %v14228_v13  ;;  %v14230_v59 = vpop.f32.mrf.mxu1  ;;  %v4700_v45 = vsel %vm4576_vm3, %v14228_v13, -inf }
 0x21e   :  { %17669 = vst [vmem:[#allocation133_spill] sm:$0xff] %v14230_v59  ;;  %4701 = vmax.xlane.f32.xlu1 %v4700_v45  ;;  %v10306_v15 = vpop.f32.mrf.mxu0  ;;  %v4706_v27 = vsel %vm4576_vm3, %v14230_v59, -inf }
 0x21f   :  { %v10312_v22 = vpop.f32.mrf.mxu1  ;;  %4704 = vmax.xlane.f32.xlu0 %v4703_v31 }
 0x220   :  { %v14236_v18 = vpop.f32.mrf.mxu0 }
 0x221   :  { %17670 = vst [vmem:[#allocation134_spill] sm:$0xff] %v14236_v18  ;;  %v14238_v14 = vpop.f32.mrf.mxu1  ;;  %v4709_v61 = vsel %vm4576_vm3, %v14236_v18, -inf }
 0x222   :  { %17671 = vst [vmem:[#allocation135_spill] sm:$0xff] %v14238_v14  ;;  %4707 = vmax.xlane.f32.xlu1 %v4706_v27  ;;  %v10317_v44 = vpop.f32.mrf.mxu0  ;;  %v4715_v31 = vsel %vm4576_vm3, %v14238_v14, -inf }
 0x223   :  { %v10323_v62 = vpop.f32.mrf.mxu1  ;;  %4710 = vmax.xlane.f32.xlu0 %v4709_v61 }
 0x224   :  { %v14244_v1 = vpop.f32.mrf.mxu0 }
 0x225   :  { %17672 = vst [vmem:[#allocation136_spill] sm:$0xff] %v14244_v1  ;;  %v14246_v45 = vpop.f32.mrf.mxu1  ;;  %v4712_v22 = vsel %vm4576_vm3, %v14244_v1, -inf }
 0x226   :  { %17673 = vst [vmem:[#allocation137_spill] sm:$0xff] %v14246_v45  ;;  %4713 = vmax.xlane.f32.xlu1 %v4712_v22  ;;  %v10318_v15 = vpop.f32.mrf.mxu0  ;;  %v4718_v62 = vsel %vm4576_vm3, %v14246_v45, -inf }
 0x227   :  { %v10324_v38 = vpop.f32.mrf.mxu1  ;;  %4716 = vmax.xlane.f32.xlu0 %v4715_v31 }
 0x228   :  { %v14252_v47 = vpop.f32.mrf.mxu0 }
 0x229   :  { %17674 = vst [vmem:[#allocation138_spill] sm:$0xff] %v14252_v47  ;;  %v14254_v27 = vpop.f32.mrf.mxu1  ;;  %v4721_v61 = vsel %vm4576_vm3, %v14252_v47, -inf }
 0x22a   :  { %17675 = vst [vmem:[#allocation139_spill] sm:$0xff] %v14254_v27  ;;  %4719 = vmax.xlane.f32.xlu1 %v4718_v62  ;;  %v10329_v44 = vpop.f32.mrf.mxu0  ;;  %v4727_v31 = vsel %vm4576_vm3, %v14254_v27, -inf }
 0x22b   :  { %v10335_v34 = vpop.f32.mrf.mxu1  ;;  %4722 = vmax.xlane.f32.xlu0 %v4721_v61 }
 0x22c   :  { %v14260_v30 = vpop.f32.mrf.mxu0 }
 0x22d   :  { %17676 = vst [vmem:[#allocation140_spill] sm:$0xff] %v14260_v30  ;;  %v14262_v22 = vpop.f32.mrf.mxu1  ;;  %v4724_v38 = vsel %vm4576_vm3, %v14260_v30, -inf }
 0x22e   :  { %17677 = vst [vmem:[#allocation141_spill] sm:$0xff] %v14262_v22  ;;  %4725 = vmax.xlane.f32.xlu1 %v4724_v38  ;;  %v10330_v15 = vpop.f32.mrf.mxu0  ;;  %v4730_v34 = vsel %vm4576_vm3, %v14262_v22, -inf }
 0x22f   :  { %v10336_v52 = vpop.f32.mrf.mxu1  ;;  %4728 = vmax.xlane.f32.xlu0 %v4727_v31 }
 0x230   :  { %v14268_v50 = vpop.f32.mrf.mxu0 }
 0x231   :  { %17678 = vst [vmem:[#allocation142_spill] sm:$0xff] %v14268_v50  ;;  %v14270_v62 = vpop.f32.mrf.mxu1  ;;  %v4733_v61 = vsel %vm4576_vm3, %v14268_v50, -inf }
 0x232   :  { %17679 = vst [vmem:[#allocation143_spill] sm:$0xff] %v14270_v62  ;;  %4731 = vmax.xlane.f32.xlu1 %v4730_v34  ;;  %v10341_v44 = vpop.f32.mrf.mxu0  ;;  %v4739_v31 = vsel %vm4576_vm3, %v14270_v62, -inf }
 0x233   :  { %v10347_v30 = vpop.f32.mrf.mxu1  ;;  %4734 = vmax.xlane.f32.xlu0 %v4733_v61 }
 0x234   :  { %v14276_v47 = vpop.f32.mrf.mxu0 }
 0x235   :  { %17680 = vst [vmem:[#allocation144_spill] sm:$0xff] %v14276_v47  ;;  %v14278_v38 = vpop.f32.mrf.mxu1  ;;  %v4736_v52 = vsel %vm4576_vm3, %v14276_v47, -inf }
 0x236   :  { %17681 = vst [vmem:[#allocation145_spill] sm:$0xff] %v14278_v38  ;;  %4737 = vmax.xlane.f32.xlu1 %v4736_v52  ;;  %v10342_v15 = vpop.f32.mrf.mxu0  ;;  %v4742_v30 = vsel %vm4576_vm3, %v14278_v38, -inf }
 0x237   :  { %v10348_v22 = vpop.f32.mrf.mxu1  ;;  %4740 = vmax.xlane.f32.xlu0 %v4739_v31 }
 0x238   :  { %v14284_v27 = vpop.f32.mrf.mxu0 }
 0x239   :  { %17682 = vst [vmem:[#allocation146_spill] sm:$0xff] %v14284_v27  ;;  %v14286_v34 = vpop.f32.mrf.mxu1  ;;  %v4745_v61 = vsel %vm4576_vm3, %v14284_v27, -inf }
 0x23a   :  { %17683 = vst [vmem:[#allocation147_spill] sm:$0xff] %v14286_v34  ;;  %4743 = vmax.xlane.f32.xlu1 %v4742_v30  ;;  %v10353_v44 = vpop.f32.mrf.mxu0  ;;  %v4751_v31 = vsel %vm4576_vm3, %v14286_v34, -inf }
 0x23b   :  { %v10359_v47 = vpop.f32.mrf.mxu1  ;;  %4746 = vmax.xlane.f32.xlu0 %v4745_v61 }
 0x23c   :  { %v14292_v50 = vpop.f32.mrf.mxu0 }
 0x23d   :  { %17684 = vst [vmem:[#allocation148_spill] sm:$0xff] %v14292_v50  ;;  %v14294_v52 = vpop.f32.mrf.mxu1  ;;  %v4748_v22 = vsel %vm4576_vm3, %v14292_v50, -inf }
 0x23e   :  { %17685 = vst [vmem:[#allocation149_spill] sm:$0xff] %v14294_v52  ;;  %4749 = vmax.xlane.f32.xlu1 %v4748_v22  ;;  %v10354_v15 = vpop.f32.mrf.mxu0  ;;  %v4754_v47 = vsel %vm4576_vm3, %v14294_v52, -inf }
 0x23f   :  { %v10360_v38 = vpop.f32.mrf.mxu1  ;;  %4752 = vmax.xlane.f32.xlu0 %v4751_v31 }
 0x240   :  { %v14300_v62 = vpop.f32.mrf.mxu0 }
 0x241   :  { %17686 = vst [vmem:[#allocation150_spill] sm:$0xff] %v14300_v62  ;;  %v14302_v30 = vpop.f32.mrf.mxu1  ;;  %v4757_v61 = vsel %vm4576_vm3, %v14300_v62, -inf }
 0x242   :  { %17687 = vst [vmem:[#allocation151_spill] sm:$0xff] %v14302_v30  ;;  %4755 = vmax.xlane.f32.xlu1 %v4754_v47  ;;  %v10365_v44 = vpop.f32.mrf.mxu0  ;;  %v4763_v31 = vsel %vm4576_vm3, %v14302_v30, -inf }
 0x243   :  { %v10371_v50 = vpop.f32.mrf.mxu1  ;;  %4758 = vmax.xlane.f32.xlu0 %v4757_v61 }
 0x244   :  { %v14308_v27 = vpop.f32.mrf.mxu0 }
 0x245   :  { %17688 = vst [vmem:[#allocation152_spill] sm:$0xff] %v14308_v27  ;;  %v14310_v22 = vpop.f32.mrf.mxu1  ;;  %v4760_v38 = vsel %vm4576_vm3, %v14308_v27, -inf }
 0x246   :  { %17689 = vst [vmem:[#allocation153_spill] sm:$0xff] %v14310_v22  ;;  %4761 = vmax.xlane.f32.xlu1 %v4760_v38  ;;  %v10366_v15 = vpop.f32.mrf.mxu0  ;;  %v4766_v50 = vsel %vm4576_vm3, %v14310_v22, -inf }
 0x247   :  { %v10372_v52 = vpop.f32.mrf.mxu1  ;;  %4764 = vmax.xlane.f32.xlu0 %v4763_v31 }
 0x248   :  { %v14316_v34 = vpop.f32.mrf.mxu0 }
 0x249   :  { %17690 = vst [vmem:[#allocation154_spill] sm:$0xff] %v14316_v34  ;;  %v14318_v47 = vpop.f32.mrf.mxu1  ;;  %v5313_v61 = vsel %vm4576_vm3, %v14316_v34, -inf }
 0x24a   :  { %17691 = vst [vmem:[#allocation155_spill] sm:$0xff] %v14318_v47  ;;  %4767 = vmax.xlane.f32.xlu1 %v4766_v50  ;;  %v10377_v44 = vpop.f32.mrf.mxu0  ;;  %v5319_v31 = vsel %vm4576_vm3, %v14318_v47, -inf }
 0x24b   :  { %v10383_v27 = vpop.f32.mrf.mxu1  ;;  %5314 = vmax.xlane.f32.xlu0 %v5313_v61 }
 0x24c   :  { %v14324_v62 = vpop.f32.mrf.mxu0 }
 0x24d   :  { %17692 = vst [vmem:[#allocation156_spill] sm:$0xff] %v14324_v62  ;;  %v14326_v38 = vpop.f32.mrf.mxu1  ;;  %v5316_v52 = vsel %vm4576_vm3, %v14324_v62, -inf }
 0x24e   :  { %17693 = vst [vmem:[#allocation157_spill] sm:$0xff] %v14326_v38  ;;  %5317 = vmax.xlane.f32.xlu1 %v5316_v52  ;;  %v10378_v15 = vpop.f32.mrf.mxu0  ;;  %v5322_v27 = vsel %vm4576_vm3, %v14326_v38, -inf }
 0x24f   :  { %v10384_v22 = vpop.f32.mrf.mxu1  ;;  %5320 = vmax.xlane.f32.xlu0 %v5319_v31 }
 0x250   :  { %v14332_v30 = vpop.f32.mrf.mxu0 }
 0x251   :  { %17694 = vst [vmem:[#allocation158_spill] sm:$0xff] %v14332_v30  ;;  %v14334_v50 = vpop.f32.mrf.mxu1  ;;  %v5325_v61 = vsel %vm4576_vm3, %v14332_v30, -inf }
 0x252   :  { %17695 = vst [vmem:[#allocation159_spill] sm:$0xff] %v14334_v50  ;;  %5323 = vmax.xlane.f32.xlu1 %v5322_v27  ;;  %v10389_v44 = vpop.f32.mrf.mxu0  ;;  %v5331_v30 = vsel %vm4576_vm3, %v14334_v50, -inf }
 0x253   :  { %v10395_v62 = vpop.f32.mrf.mxu1  ;;  %5326 = vmax.xlane.f32.xlu0 %v5325_v61  ;;  %v4579_v47 = vpop.xlane.xlu0 %4578 }
 0x254   :  { %v4585_v34 = vpop.xlane.xlu1 %4584  ;;  %v14340_v52 = vpop.f32.mrf.mxu0  ;;  %v4769_v22 = vsub.f32 %v13944_v23, %v4579_v47 }
 0x255   :  { %17696 = vst [vmem:[#allocation160_spill] sm:$0xff] %v14340_v52  ;;  %v14343_v31 = vpop.f32.mrf.mxu1  ;;  %v5328_v15 = vsel %vm4576_vm3, %v14340_v52, -inf  ;;  %v4771_v38 = vsub.f32 %v13946_v40, %v4585_v34 }
 0x256   :  { %17697 = vst [vmem:[#allocation161_spill] sm:$0xff] %v14343_v31  ;;  %5329 = vmax.xlane.f32.xlu1 %v5328_v15  ;;  %v10390_v27 = vpop.f32.mrf.mxu0  ;;  %v4833_v62 = vmul.f32 1.442695, %v4769_v22  ;;  %v5334_v40 = vsel %vm4576_vm3, %v14343_v31, -inf }
 0x257   :  { %v10396_v61 = vpop.f32.mrf.mxu1  ;;  %5332 = vmax.xlane.f32.xlu0 %v5331_v30  ;;  %v4582_v33 = vpop.xlane.xlu0 %4581  ;;  %v4837_v15 = vmul.f32 1.442695, %v4771_v38 }
 0x258   :  { %v4588_v44 = vpop.xlane.xlu1 %4587  ;;  %v14350_v63 = vpop.f32.mrf.mxu0  ;;  %v4770_v47 = vsub.f32 %v13964_v49, %v4582_v33  ;;  %10955 = vpow2.f32 %v4833_v62 }
 0x259   :  { %17698 = vst [vmem:[#allocation162_spill] sm:$0xff] %v14350_v63  ;;  %v4772_v23 = vsub.f32 %v13966_v46, %v4588_v44  ;;  %v14354_v7 = vpop.f32.mrf.mxu1  ;;  %v5337_v34 = vsel %vm4576_vm3, %v14350_v63, -inf }
 0x25a   :  { %17699 = vst [vmem:[#allocation163_spill] sm:$0xff] %v14354_v7  ;;  %5335 = vmax.xlane.f32.xlu1 %v5334_v40  ;;  %v10401_v30 = vpop.f32.mrf.mxu0  ;;  %v4835_v22 = vmul.f32 1.442695, %v4770_v47  ;;  %v5343_v38 = vsel %vm4576_vm3, %v14354_v7, -inf }
 0x25b   :  { %v10407_v27 = vpop.f32.mrf.mxu1  ;;  %5338 = vmax.xlane.f32.xlu0 %v5337_v34  ;;  %v4839_v46 = vmul.f32 1.442695, %v4772_v23 }
 0x25c   :  { %v4591_v61 = vpop.xlane.xlu0 %4590  ;;  %v14360_v50 = vpop.f32.mrf.mxu0  ;;  %10957 = vpow2.f32 %v4835_v22 }
 0x25d   :  { %17700 = vst [vmem:[#allocation164_spill] sm:$0xff] %v14360_v50  ;;  %v14362_v33 = vpop.f32.mrf.mxu1  ;;  %v5340_v49 = vsel %vm4576_vm3, %v14360_v50, -inf  ;;  %10959 = vpow2.f32 %v4837_v15  ;;  %v4773_v22 = vsub.f32 %v13978_v20, %v4591_v61 }
 0x25e   :  { %17701 = vst [vmem:[#allocation165_spill] sm:$0xff] %v14362_v33  ;;  %5341 = vmax.xlane.f32.xlu1 %v5340_v49  ;;  %v10402_v62 = vpop.f32.mrf.mxu0  ;;  %10961 = vpow2.f32 %v4839_v46  ;;  %v5346_v30 = vsel %vm4576_vm3, %v14362_v33, -inf }
 0x25f   :  { %v4594_v44 = vpop.xlane.xlu1 %4593  ;;  %v10408_v47 = vpop.f32.mrf.mxu1  ;;  %5344 = vmax.xlane.f32.xlu0 %v5343_v38  ;;  %v4841_v50 = vmul.f32 1.442695, %v4773_v22 }
 0x260   :  { %v4597_v40 = vpop.xlane.xlu0 %4596  ;;  %v14368_v34 = vpop.f32.mrf.mxu0  ;;  %v4774_v46 = vsub.f32 %v13994_v58, %v4594_v44 }
 0x261   :  { %17702 = vst [vmem:[#allocation166_spill] sm:$0xff] %v14368_v34  ;;  %v14370_v23 = vpop.f32.mrf.mxu1  ;;  %v5349_v15 = vsel %vm4576_vm3, %v14368_v34, -inf  ;;  %v4775_v34 = vsub.f32 %v13980_v25, %v4597_v40  ;;  %10963 = vpow2.f32 %v4841_v50 }
 0x262   :  { %17703 = vst [vmem:[#allocation167_spill] sm:$0xff] %v14370_v23  ;;  %5347 = vmax.xlane.f32.xlu1 %v5346_v30  ;;  %v10413_v27 = vpop.f32.mrf.mxu0  ;;  %v5355_v20 = vsel %vm4576_vm3, %v14370_v23, -inf  ;;  %v4843_v44 = vmul.f32 1.442695, %v4774_v46 }
 0x263   :  { %v10419_v49 = vpop.f32.mrf.mxu1  ;;  %5350 = vmax.xlane.f32.xlu0 %v5349_v15  ;;  %v4600_v62 = vpop.xlane.xlu1 %4599 }
 0x264   :  { %v4603_v38 = vpop.xlane.xlu0 %4602  ;;  %v14377_v47 = vpop.f32.mrf.mxu0  ;;  %10965 = vpow2.f32 %v4843_v44 }
 0x265   :  { %17704 = vst [vmem:[#allocation168_spill] sm:$0xff] %v14377_v47  ;;  %v14380_v7 = vpop.f32.mrf.mxu1  ;;  %v5352_v33 = vsel %vm4576_vm3, %v14377_v47, -inf  ;;  %v14387_v30 = vpop.eup %10955  ;;  %v4776_v47 = vsub.f32 %v13998_v29, %v4600_v62 }
 0x266   :  { %17705 = vst [vmem:[#allocation169_spill] sm:$0xff] %v14380_v7  ;;  %5353 = vmax.xlane.f32.xlu1 %v5352_v33  ;;  %v10414_v61 = vpop.f32.mrf.mxu0  ;;  %17706 = vst [vmem:[#allocation170_spill] sm:$0xff] %v14387_v30  ;;  %v5358_v25 = vsel %vm4576_vm3, %v14380_v7, -inf  ;;  %v4845_v33 = vmul.f32 1.442695, %v4775_v34 }
 0x267   :  { %v10420_v15 = vpop.f32.mrf.mxu1  ;;  %5356 = vmax.xlane.f32.xlu0 %v5355_v20  ;;  %v4606_v27 = vpop.xlane.xlu1 %4605  ;;  %v4961_v20 = vsel %vm4576_vm3, %v14387_v30, 0.0  ;;  %v4847_v7 = vmul.f32 1.442695, %v4776_v47 }
 0x268   :  { %v14389_v49 = vpop.xlane.xlu0 %4608  ;;  %v14391_v58 = vpop.f32.mrf.mxu0  ;;  %10967 = vpow2.f32 %v4845_v33  ;;  %v4777_v33 = vsub.f32 %v14006_v9, %v4603_v38 }
 0x269   :  { %17707 = vst [vmem:[#allocation171_spill] sm:$0xff] %v14391_v58  ;;  %v14394_v22 = vpop.f32.mrf.mxu1  ;;  %v14398_v40 = vpop.eup %10957  ;;  %10969 = vpow2.f32 %v4847_v7  ;;  %v4778_v7 = vsub.f32 %v14024_v60, %v4606_v27  ;;  %v4779_v38 = vsub.f32 %v14012_v19, %v14389_v49 }
 0x26a   :  { %17708 = vst [vmem:[#allocation172_spill] sm:$0xff] %v14394_v22  ;;  %17709 = vst [vmem:[#allocation173_spill] sm:$0xff] %v14398_v40  ;;  %5359 = vmax.xlane.f32.xlu1 %v5358_v25  ;;  %v10425_v61 = vpop.f32.mrf.mxu0  ;;  %v14402_v15 = vpop.eup %10959  ;;  %v4964_v50 = vsel %vm4576_vm3, %v14398_v40, 0.0 }
 0x26b   :  { %17710 = vst [vmem:[#allocation174_spill] sm:$0xff] %v14402_v15  ;;  %v10431_v23 = vpop.f32.mrf.mxu1  ;;  %4962 = vadd.xlane.f32.xlu0 %v4961_v20  ;;  %v4612_v46 = vpop.xlane.xlu1 %4611  ;;  %v4967_v25 = vsel %vm4576_vm3, %v14402_v15, 0.0 }
 0x26c   :  { %v14404_v29 = vpop.xlane.xlu0 %4614  ;;  %v14406_v62 = vpop.f32.mrf.mxu0 }
 0x26d   :  { %17711 = vst [vmem:[#allocation175_spill] sm:$0xff] %v14406_v62  ;;  %v14408_v63 = vpop.f32.mrf.mxu1  ;;  %v14412_v34 = vpop.eup %10961  ;;  %v5364_v9 = vsel %vm4576_vm3, %v14406_v62, -inf  ;;  %v4851_v62 = vmul.f32 1.442695, %v4778_v7 }
 0x26e   :  { %17712 = vst [vmem:[#allocation176_spill] sm:$0xff] %v14408_v63  ;;  %17713 = vst [vmem:[#allocation177_spill] sm:$0xff] %v14412_v34  ;;  %4965 = vadd.xlane.f32.xlu1 %v4964_v50  ;;  %v10426_v23 = vpop.f32.mrf.mxu0  ;;  %v4970_v52 = vsel %vm4576_vm3, %v14412_v34, 0.0  ;;  %v5361_v50 = vsel %vm4576_vm3, %v14391_v58, -inf  ;;  %v5370_v19 = vsel %vm4576_vm3, %v14408_v63, -inf }
 0x26f   :  { %v10432_v20 = vpop.f32.mrf.mxu1  ;;  %4968 = vadd.xlane.f32.xlu0 %v4967_v25  ;;  %v14416_v61 = vpop.xlane.xlu1 %4617 }
 0x270   :  { %v14418_v31 = vpop.xlane.xlu0 %4620  ;;  %v14420_v47 = vpop.f32.mrf.mxu0  ;;  %v4782_v1 = vsub.f32 %v14054_v41, %v14416_v61 }
 0x271   :  { %17714 = vst [vmem:[#allocation178_spill] sm:$0xff] %v14420_v47  ;;  %v14422_v44 = vpop.f32.mrf.mxu1 }
 0x272   :  { %17715 = vst [vmem:[#allocation179_spill] sm:$0xff] %v14422_v44  ;;  %4971 = vadd.xlane.f32.xlu1 %v4970_v52  ;;  %v10437_v23 = vpop.f32.mrf.mxu0  ;;  %v4849_v52 = vmul.f32 1.442695, %v4777_v33  ;;  %v4780_v33 = vsub.f32 %v14029_v54, %v4612_v46 }
 0x273   :  { %v10443_v25 = vpop.f32.mrf.mxu1  ;;  %5362 = vmax.xlane.f32.xlu0 %v5361_v50  ;;  %v14429_v20 = vpop.xlane.xlu1 %4623  ;;  %v5367_v50 = vsel %vm4576_vm3, %v14394_v22, -inf }
 0x274   :  { %v14431_v15 = vpop.xlane.xlu0 %4626  ;;  %v14433_v45 = vpop.f32.mrf.mxu0  ;;  %10971 = vpow2.f32 %v4849_v52  ;;  %v4855_v63 = vmul.f32 1.442695, %v4780_v33 }
 0x275   :  { %17716 = vst [vmem:[#allocation180_spill] sm:$0xff] %v14433_v45  ;;  %v14436_v40 = vpop.f32.mrf.mxu1  ;;  %v14444_v25 = vpop.eup %10963  ;;  %10973 = vpow2.f32 %v4851_v62 }
 0x276   :  { %17717 = vst [vmem:[#allocation181_spill] sm:$0xff] %v14436_v40  ;;  %5365 = vmax.xlane.f32.xlu1 %v5364_v9  ;;  %v10438_v23 = vpop.f32.mrf.mxu0  ;;  %17718 = vst [vmem:[#allocation182_spill] sm:$0xff] %v14444_v25  ;;  %v14457_v49 = vpop.eup %10965  ;;  %v4853_v9 = vmul.f32 1.442695, %v4779_v38 }
 0x277   :  { %v10444_v58 = vpop.f32.mrf.mxu1  ;;  %5368 = vmax.xlane.f32.xlu0 %v5367_v50  ;;  %v14446_v34 = vpop.xlane.xlu1 %4629  ;;  %17721 = vst [vmem:[#allocation185_spill] sm:$0xff] %v14457_v49  ;;  %v4976_v52 = vsel %vm4576_vm3, %v14457_v49, 0.0 }
 0x278   :  { %v14448_v60 = vpop.xlane.xlu0 %4632  ;;  %v14450_v27 = vpop.f32.mrf.mxu0  ;;  %v4973_v58 = vsel %vm4576_vm3, %v14444_v25, 0.0  ;;  %10975 = vpow2.f32 %v4853_v9  ;;  %v4781_v9 = vsub.f32 %v14036_v2, %v14404_v29  ;;  %v5376_v2 = vsel %vm4576_vm3, %v14433_v45, -inf }
 0x279   :  { %17719 = vst [vmem:[#allocation183_spill] sm:$0xff] %v14450_v27  ;;  %v14453_v30 = vpop.f32.mrf.mxu1  ;;  %v14461_v23 = vpop.eup %10967  ;;  %10977 = vpow2.f32 %v4855_v63  ;;  %v4859_v45 = vmul.f32 1.442695, %v4782_v1  ;;  %v4786_v13 = vsub.f32 %v14084_v24, %v14446_v34 }
 0x27a   :  { %17720 = vst [vmem:[#allocation184_spill] sm:$0xff] %v14453_v30  ;;  %5371 = vmax.xlane.f32.xlu1 %v5370_v19  ;;  %v10449_v50 = vpop.f32.mrf.mxu0  ;;  %17722 = vst [vmem:[#allocation186_spill] sm:$0xff] %v14461_v23  ;;  %v14473_v38 = vpop.eup %10969  ;;  %v4857_v29 = vmul.f32 1.442695, %v4781_v9  ;;  %v4784_v9 = vsub.f32 %v14059_v57, %v14429_v20 }
 0x27b   :  { %v10455_v22 = vpop.f32.mrf.mxu1  ;;  %4974 = vadd.xlane.f32.xlu0 %v4973_v58  ;;  %v14463_v7 = vpop.xlane.xlu1 %4635  ;;  %17725 = vst [vmem:[#allocation189_spill] sm:$0xff] %v14473_v38  ;;  %v4982_v49 = vsel %vm4576_vm3, %v14473_v38, 0.0 }
 0x27c   :  { %v14465_v54 = vpop.xlane.xlu0 %4638  ;;  %v14467_v46 = vpop.f32.mrf.mxu0  ;;  %v4979_v22 = vsel %vm4576_vm3, %v14461_v23, 0.0  ;;  %10979 = vpow2.f32 %v4857_v29 }
 0x27d   :  { %17723 = vst [vmem:[#allocation187_spill] sm:$0xff] %v14467_v46  ;;  %v14469_v14 = vpop.f32.mrf.mxu1  ;;  %10981 = vpow2.f32 %v4859_v45 }
 0x27e   :  { %17724 = vst [vmem:[#allocation188_spill] sm:$0xff] %v14469_v14  ;;  %4977 = vadd.xlane.f32.xlu1 %v4976_v52  ;;  %v10450_v19 = vpop.f32.mrf.mxu0  ;;  %v5373_v52 = vsel %vm4576_vm3, %v14420_v47, -inf }
 0x27f   :  { %v10456_v58 = vpop.f32.mrf.mxu1  ;;  %4980 = vadd.xlane.f32.xlu0 %v4979_v22  ;;  %v14477_v50 = vpop.xlane.xlu1 %4641 }
 0x280   :  { %v14479_v25 = vpop.xlane.xlu0 %4644  ;;  %v14481_v62 = vpop.f32.mrf.mxu0 }
 0x281   :  { %17726 = vst [vmem:[#allocation190_spill] sm:$0xff] %v14481_v62  ;;  %v14483_v33 = vpop.f32.mrf.mxu1 }
 0x282   :  { %17727 = vst [vmem:[#allocation191_spill] sm:$0xff] %v14483_v33  ;;  %4983 = vadd.xlane.f32.xlu1 %v4982_v49  ;;  %v10461_v22 = vpop.f32.mrf.mxu0  ;;  %v4783_v49 = vsub.f32 %v14042_v5, %v14418_v31  ;;  %v5382_v31 = vsel %vm4576_vm3, %v14436_v40, -inf  ;;  %v4863_v40 = vmul.f32 1.442695, %v4784_v9 }
 0x283   :  { %v10467_v19 = vpop.f32.mrf.mxu1  ;;  %5374 = vmax.xlane.f32.xlu0 %v5373_v52  ;;  %v14491_v58 = vpop.xlane.xlu1 %4647  ;;  %v5379_v52 = vsel %vm4576_vm3, %v14422_v44, -inf }
 0x284   :  { %v14493_v23 = vpop.xlane.xlu0 %4650  ;;  %v14495_v63 = vpop.f32.mrf.mxu0 }
 0x285   :  { %17728 = vst [vmem:[#allocation192_spill] sm:$0xff] %v14495_v63  ;;  %v14499_v38 = vpop.f32.mrf.mxu1  ;;  %v14507_v19 = vpop.eup %10971 }
 0x286   :  { %17729 = vst [vmem:[#allocation193_spill] sm:$0xff] %v14499_v38  ;;  %5377 = vmax.xlane.f32.xlu1 %v5376_v2  ;;  %v10462_v22 = vpop.f32.mrf.mxu0  ;;  %17730 = vst [vmem:[#allocation194_spill] sm:$0xff] %v14507_v19  ;;  %v14521_v2 = vpop.eup %10973 }
 0x287   :  { %v10468_v47 = vpop.f32.mrf.mxu1  ;;  %5380 = vmax.xlane.f32.xlu0 %v5379_v52  ;;  %v14509_v18 = vpop.xlane.xlu1 %4653  ;;  %17733 = vst [vmem:[#allocation197_spill] sm:$0xff] %v14521_v2  ;;  %v4985_v52 = vsel %vm4576_vm3, %v14507_v19, 0.0  ;;  %v4988_v29 = vsel %vm4576_vm3, %v14521_v2, 0.0 }
 0x288   :  { %v14511_v41 = vpop.xlane.xlu0 %4656  ;;  %v14513_v61 = vpop.f32.mrf.mxu0  ;;  %v4861_v47 = vmul.f32 1.442695, %v4783_v49 }
 0x289   :  { %17731 = vst [vmem:[#allocation195_spill] sm:$0xff] %v14513_v61  ;;  %v14517_v5 = vpop.f32.mrf.mxu1  ;;  %v14525_v44 = vpop.eup %10975 }
 0x28a   :  { %17732 = vst [vmem:[#allocation196_spill] sm:$0xff] %v14517_v5  ;;  %5383 = vmax.xlane.f32.xlu1 %v5382_v31  ;;  %v10473_v22 = vpop.f32.mrf.mxu0  ;;  %17734 = vst [vmem:[#allocation198_spill] sm:$0xff] %v14525_v44  ;;  %v14537_v49 = vpop.eup %10977  ;;  %10983 = vpow2.f32 %v4861_v47  ;;  %v4991_v31 = vsel %vm4576_vm3, %v14525_v44, 0.0  ;;  %v4785_v47 = vsub.f32 %v14066_v42, %v14431_v15  ;;  %v5388_v42 = vsel %vm4576_vm3, %v14467_v46, -inf }
 0x28b   :  { %v10479_v1 = vpop.f32.mrf.mxu1  ;;  %4986 = vadd.xlane.f32.xlu0 %v4985_v52  ;;  %v14527_v59 = vpop.xlane.xlu1 %4659  ;;  %17737 = vst [vmem:[#allocation201_spill] sm:$0xff] %v14537_v49  ;;  %10985 = vpow2.f32 %v4863_v40  ;;  %v4994_v2 = vsel %vm4576_vm3, %v14537_v49, 0.0  ;;  %v4867_v46 = vmul.f32 1.442695, %v4786_v13 }
 0x28c   :  { %v14529_v57 = vpop.xlane.xlu0 %4662  ;;  %v14531_v20 = vpop.f32.mrf.mxu0  ;;  %v4865_v15 = vmul.f32 1.442695, %v4785_v47  ;;  %v4788_v47 = vsub.f32 %v14089_v21, %v14463_v7 }
 0x28d   :  { %17735 = vst [vmem:[#allocation199_spill] sm:$0xff] %v14531_v20  ;;  %v14533_v6 = vpop.f32.mrf.mxu1 }
 0x28e   :  { %17736 = vst [vmem:[#allocation200_spill] sm:$0xff] %v14533_v6  ;;  %4989 = vadd.xlane.f32.xlu1 %v4988_v29  ;;  %v10474_v52 = vpop.f32.mrf.mxu0  ;;  %v5385_v29 = vsel %vm4576_vm3, %v14450_v27, -inf  ;;  %10987 = vpow2.f32 %v4865_v15 }
 0x28f   :  { %v10480_v22 = vpop.f32.mrf.mxu1  ;;  %4992 = vadd.xlane.f32.xlu0 %v4991_v31  ;;  %v14541_v1 = vpop.xlane.xlu1 %4665  ;;  %10989 = vpow2.f32 %v4867_v46 }
 0x290   :  { %v14543_v19 = vpop.xlane.xlu0 %4668  ;;  %v14545_v45 = vpop.f32.mrf.mxu0 }
 0x291   :  { %17738 = vst [vmem:[#allocation202_spill] sm:$0xff] %v14545_v45  ;;  %v14547_v9 = vpop.f32.mrf.mxu1 }
 0x292   :  { %17739 = vst [vmem:[#allocation203_spill] sm:$0xff] %v14547_v9  ;;  %4995 = vadd.xlane.f32.xlu1 %v4994_v2  ;;  %v10485_v31 = vpop.f32.mrf.mxu0  ;;  %v4787_v2 = vsub.f32 %v14072_v26, %v14448_v60  ;;  %v5394_v60 = vsel %vm4576_vm3, %v14469_v14, -inf  ;;  %v4871_v14 = vmul.f32 1.442695, %v4788_v47 }
 0x293   :  { %v10491_v52 = vpop.f32.mrf.mxu1  ;;  %5386 = vmax.xlane.f32.xlu0 %v5385_v29  ;;  %v14555_v22 = vpop.xlane.xlu1 %4671  ;;  %v5391_v29 = vsel %vm4576_vm3, %v14453_v30, -inf }
 0x294   :  { %v14557_v44 = vpop.xlane.xlu0 %4674  ;;  %v14559_v40 = vpop.f32.mrf.mxu0 }
 0x295   :  { %17740 = vst [vmem:[#allocation204_spill] sm:$0xff] %v14559_v40  ;;  %v14563_v49 = vpop.f32.mrf.mxu1  ;;  %v14571_v52 = vpop.eup %10979 }
 0x296   :  { %17741 = vst [vmem:[#allocation205_spill] sm:$0xff] %v14563_v49  ;;  %5389 = vmax.xlane.f32.xlu1 %v5388_v42  ;;  %v10486_v31 = vpop.f32.mrf.mxu0  ;;  %17742 = vst [vmem:[#allocation206_spill] sm:$0xff] %v14571_v52  ;;  %v14585_v42 = vpop.eup %10981 }
 0x297   :  { %v10492_v27 = vpop.f32.mrf.mxu1  ;;  %5392 = vmax.xlane.f32.xlu0 %v5391_v29  ;;  %v14573_v55 = vpop.xlane.xlu1 %4677  ;;  %17745 = vst [vmem:[#allocation209_spill] sm:$0xff] %v14585_v42  ;;  %v4997_v29 = vsel %vm4576_vm3, %v14571_v52, 0.0  ;;  %v5000_v15 = vsel %vm4576_vm3, %v14585_v42, 0.0 }
 0x298   :  { %v14575_v24 = vpop.xlane.xlu0 %4680  ;;  %v14577_v34 = vpop.f32.mrf.mxu0  ;;  %v4869_v27 = vmul.f32 1.442695, %v4787_v2 }
 0x299   :  { %17743 = vst [vmem:[#allocation207_spill] sm:$0xff] %v14577_v34  ;;  %v14581_v26 = vpop.f32.mrf.mxu1  ;;  %v14589_v30 = vpop.eup %10983 }
 0x29a   :  { %17744 = vst [vmem:[#allocation208_spill] sm:$0xff] %v14581_v26  ;;  %5395 = vmax.xlane.f32.xlu1 %v5394_v60  ;;  %v10497_v31 = vpop.f32.mrf.mxu0  ;;  %17746 = vst [vmem:[#allocation210_spill] sm:$0xff] %v14589_v30  ;;  %v14601_v2 = vpop.eup %10985  ;;  %10991 = vpow2.f32 %v4869_v27  ;;  %v5003_v60 = vsel %vm4576_vm3, %v14589_v30, 0.0  ;;  %v4789_v27 = vsub.f32 %v14096_v32, %v14465_v54  ;;  %v5400_v32 = vsel %vm4576_vm3, %v14495_v63, -inf }
 0x29b   :  { %v10503_v13 = vpop.f32.mrf.mxu1  ;;  %4998 = vadd.xlane.f32.xlu0 %v4997_v29  ;;  %v14591_v53 = vpop.xlane.xlu1 %4683  ;;  %17749 = vst [vmem:[#allocation213_spill] sm:$0xff] %v14601_v2  ;;  %10993 = vpow2.f32 %v4871_v14  ;;  %v5006_v42 = vsel %vm4576_vm3, %v14601_v2, 0.0 }
 0x29c   :  { %v14593_v21 = vpop.xlane.xlu0 %4686  ;;  %v14595_v7 = vpop.f32.mrf.mxu0  ;;  %v4873_v54 = vmul.f32 1.442695, %v4789_v27  ;;  %v4792_v27 = vsub.f32 %v14119_v12, %v14491_v58 }
 0x29d   :  { %17747 = vst [vmem:[#allocation211_spill] sm:$0xff] %v14595_v7  ;;  %v14597_v0 = vpop.f32.mrf.mxu1 }
 0x29e   :  { %17748 = vst [vmem:[#allocation212_spill] sm:$0xff] %v14597_v0  ;;  %5001 = vadd.xlane.f32.xlu1 %v5000_v15  ;;  %v10498_v29 = vpop.f32.mrf.mxu0  ;;  %v5397_v15 = vsel %vm4576_vm3, %v14481_v62, -inf  ;;  %10995 = vpow2.f32 %v4873_v54 }
 0x29f   :  { %v10504_v31 = vpop.f32.mrf.mxu1  ;;  %5004 = vadd.xlane.f32.xlu0 %v5003_v60  ;;  %v14605_v13 = vpop.xlane.xlu1 %4689 }
 0x2a0   :  { %v14607_v52 = vpop.xlane.xlu0 %4692  ;;  %v14609_v46 = vpop.f32.mrf.mxu0 }
 0x2a1   :  { %17750 = vst [vmem:[#allocation214_spill] sm:$0xff] %v14609_v46  ;;  %v14611_v47 = vpop.f32.mrf.mxu1 }
 0x2a2   :  { %17751 = vst [vmem:[#allocation215_spill] sm:$0xff] %v14611_v47  ;;  %5007 = vadd.xlane.f32.xlu1 %v5006_v42  ;;  %v10509_v60 = vpop.f32.mrf.mxu0  ;;  %v4790_v47 = vsub.f32 %v14114_v10, %v14477_v50  ;;  %v4791_v42 = vsub.f32 %v14102_v43, %v14479_v25  ;;  %v5406_v25 = vsel %vm4576_vm3, %v14499_v38, -inf  ;;  %v4879_v38 = vmul.f32 1.442695, %v4792_v27 }
 0x2a3   :  { %v10515_v29 = vpop.f32.mrf.mxu1  ;;  %5398 = vmax.xlane.f32.xlu0 %v5397_v15  ;;  %v14619_v31 = vpop.xlane.xlu1 %4695  ;;  %v5403_v15 = vsel %vm4576_vm3, %v14483_v33, -inf }
 0x2a4   :  { %v14621_v30 = vpop.xlane.xlu0 %4698  ;;  %v14623_v14 = vpop.f32.mrf.mxu0  ;;  %v4875_v63 = vmul.f32 1.442695, %v4790_v47 }
 0x2a5   :  { %17752 = vst [vmem:[#allocation216_spill] sm:$0xff] %v14621_v30  ;;  %17753 = vst [vmem:[#allocation217_spill] sm:$0xff] %v14623_v14  ;;  %v14627_v2 = vpop.f32.mrf.mxu1  ;;  %v14635_v29 = vpop.eup %10987 }
 0x2a6   :  { %17754 = vst [vmem:[#allocation218_spill] sm:$0xff] %v14627_v2  ;;  %5401 = vmax.xlane.f32.xlu1 %v5400_v32  ;;  %v10510_v60 = vpop.f32.mrf.mxu0  ;;  %17755 = vst [vmem:[#allocation219_spill] sm:$0xff] %v14635_v29  ;;  %v14649_v32 = vpop.eup %10989  ;;  %10997 = vpow2.f32 %v4875_v63 }
 0x2a7   :  { %v10516_v62 = vpop.f32.mrf.mxu1  ;;  %5404 = vmax.xlane.f32.xlu0 %v5403_v15  ;;  %v14637_v30 = vpop.xlane.xlu1 %4701  ;;  %17759 = vst [vmem:[#allocation223_spill] sm:$0xff] %v14649_v32  ;;  %v5009_v15 = vsel %vm4576_vm3, %v14635_v29, 0.0  ;;  %v5012_v54 = vsel %vm4576_vm3, %v14649_v32, 0.0 }
 0x2a8   :  { %v14639_v10 = vpop.xlane.xlu0 %4704  ;;  %v14641_v50 = vpop.f32.mrf.mxu0  ;;  %v4877_v62 = vmul.f32 1.442695, %v4791_v42 }
 0x2a9   :  { %17756 = vst [vmem:[#allocation220_spill] sm:$0xff] %v14639_v10  ;;  %17757 = vst [vmem:[#allocation221_spill] sm:$0xff] %v14641_v50  ;;  %v14645_v43 = vpop.f32.mrf.mxu1  ;;  %v14653_v33 = vpop.eup %10991 }
 0x2aa   :  { %17758 = vst [vmem:[#allocation222_spill] sm:$0xff] %v14645_v43  ;;  %5407 = vmax.xlane.f32.xlu1 %v5406_v25  ;;  %v10521_v60 = vpop.f32.mrf.mxu0  ;;  %17760 = vst [vmem:[#allocation224_spill] sm:$0xff] %v14653_v33  ;;  %v14665_v42 = vpop.eup %10993  ;;  %10999 = vpow2.f32 %v4877_v62  ;;  %v5015_v25 = vsel %vm4576_vm3, %v14653_v33, 0.0  ;;  %v4793_v62 = vsub.f32 %v14126_v39, %v14493_v23  ;;  %v5412_v39 = vsel %vm4576_vm3, %v14531_v20, -inf }
 0x2ab   :  { %v10527_v47 = vpop.f32.mrf.mxu1  ;;  %5010 = vadd.xlane.f32.xlu0 %v5009_v15  ;;  %v14655_v10 = vpop.xlane.xlu1 %4707  ;;  %17763 = vst [vmem:[#allocation227_spill] sm:$0xff] %v14665_v42  ;;  %11001 = vpow2.f32 %v4879_v38  ;;  %v5018_v32 = vsel %vm4576_vm3, %v14665_v42, 0.0 }
 0x2ac   :  { %v14657_v12 = vpop.xlane.xlu0 %4710  ;;  %v14659_v58 = vpop.f32.mrf.mxu0  ;;  %v4881_v23 = vmul.f32 1.442695, %v4793_v62  ;;  %v4796_v62 = vsub.f32 %v14149_v36, %v14527_v59 }
 0x2ad   :  { %17761 = vst [vmem:[#allocation225_spill] sm:$0xff] %v14659_v58  ;;  %v14661_v43 = vpop.f32.mrf.mxu1 }
 0x2ae   :  { %17762 = vst [vmem:[#allocation226_spill] sm:$0xff] %v14661_v43  ;;  %5013 = vadd.xlane.f32.xlu1 %v5012_v54  ;;  %v10522_v15 = vpop.f32.mrf.mxu0  ;;  %v5409_v54 = vsel %vm4576_vm3, %v14513_v61, -inf  ;;  %11003 = vpow2.f32 %v4881_v23 }
 0x2af   :  { %v10528_v60 = vpop.f32.mrf.mxu1  ;;  %5016 = vadd.xlane.f32.xlu0 %v5015_v25  ;;  %v14669_v47 = vpop.xlane.xlu1 %4713 }
 0x2b0   :  { %v14671_v29 = vpop.xlane.xlu0 %4716  ;;  %v14673_v63 = vpop.f32.mrf.mxu0 }
 0x2b1   :  { %17764 = vst [vmem:[#allocation228_spill] sm:$0xff] %v14673_v63  ;;  %v14675_v27 = vpop.f32.mrf.mxu1 }
 0x2b2   :  { %17765 = vst [vmem:[#allocation229_spill] sm:$0xff] %v14675_v27  ;;  %5019 = vadd.xlane.f32.xlu1 %v5018_v32  ;;  %v10533_v25 = vpop.f32.mrf.mxu0  ;;  %v4794_v27 = vsub.f32 %v14144_v28, %v14509_v18  ;;  %v4795_v32 = vsub.f32 %v14132_v17, %v14511_v41  ;;  %v5418_v41 = vsel %vm4576_vm3, %v14533_v6, -inf  ;;  %v4887_v6 = vmul.f32 1.442695, %v4796_v62 }
 0x2b3   :  { %v10539_v15 = vpop.f32.mrf.mxu1  ;;  %5410 = vmax.xlane.f32.xlu0 %v5409_v54  ;;  %v14683_v60 = vpop.xlane.xlu1 %4719  ;;  %v5415_v54 = vsel %vm4576_vm3, %v14517_v5, -inf }
 0x2b4   :  { %v14685_v33 = vpop.xlane.xlu0 %4722  ;;  %v14687_v38 = vpop.f32.mrf.mxu0  ;;  %v4883_v20 = vmul.f32 1.442695, %v4794_v27 }
 0x2b5   :  { %17766 = vst [vmem:[#allocation230_spill] sm:$0xff] %v14685_v33  ;;  %17767 = vst [vmem:[#allocation231_spill] sm:$0xff] %v14687_v38  ;;  %v14691_v42 = vpop.f32.mrf.mxu1  ;;  %v14699_v15 = vpop.eup %10995 }
 0x2b6   :  { %17768 = vst [vmem:[#allocation232_spill] sm:$0xff] %v14691_v42  ;;  %5413 = vmax.xlane.f32.xlu1 %v5412_v39  ;;  %v10534_v25 = vpop.f32.mrf.mxu0  ;;  %17769 = vst [vmem:[#allocation233_spill] sm:$0xff] %v14699_v15  ;;  %v14713_v39 = vpop.eup %10997  ;;  %11005 = vpow2.f32 %v4883_v20 }
 0x2b7   :  { %v10540_v61 = vpop.f32.mrf.mxu1  ;;  %5416 = vmax.xlane.f32.xlu0 %v5415_v54  ;;  %v14701_v33 = vpop.xlane.xlu1 %4725  ;;  %17773 = vst [vmem:[#allocation237_spill] sm:$0xff] %v14713_v39  ;;  %v5021_v54 = vsel %vm4576_vm3, %v14699_v15, 0.0  ;;  %v5024_v23 = vsel %vm4576_vm3, %v14713_v39, 0.0 }
 0x2b8   :  { %17770 = vst [vmem:[#allocation234_spill] sm:$0xff] %v14701_v33  ;;  %v14703_v18 = vpop.xlane.xlu0 %4728  ;;  %v14705_v28 = vpop.f32.mrf.mxu0  ;;  %v4885_v61 = vmul.f32 1.442695, %v4795_v32 }
 0x2b9   :  { %17771 = vst [vmem:[#allocation235_spill] sm:$0xff] %v14705_v28  ;;  %v14709_v17 = vpop.f32.mrf.mxu1  ;;  %v14717_v5 = vpop.eup %10999 }
 0x2ba   :  { %17772 = vst [vmem:[#allocation236_spill] sm:$0xff] %v14709_v17  ;;  %5419 = vmax.xlane.f32.xlu1 %v5418_v41  ;;  %v10545_v25 = vpop.f32.mrf.mxu0  ;;  %17774 = vst [vmem:[#allocation238_spill] sm:$0xff] %v14717_v5  ;;  %v14729_v32 = vpop.eup %11001  ;;  %11007 = vpow2.f32 %v4885_v61  ;;  %v5027_v41 = vsel %vm4576_vm3, %v14717_v5, 0.0  ;;  %v4797_v61 = vsub.f32 %v14156_v51, %v14529_v57  ;;  %v5424_v51 = vsel %vm4576_vm3, %v14559_v40, -inf }
 0x2bb   :  { %v10551_v27 = vpop.f32.mrf.mxu1  ;;  %5022 = vadd.xlane.f32.xlu0 %v5021_v54  ;;  %v14719_v33 = vpop.xlane.xlu1 %4731  ;;  %17776 = vst [vmem:[#allocation240_spill] sm:$0xff] %v14729_v32  ;;  %11009 = vpow2.f32 %v4887_v6  ;;  %v5030_v39 = vsel %vm4576_vm3, %v14729_v32, 0.0  ;;  %v4803_v40 = vsub.f32 %v14190_v37, %v14575_v24 }
 0x2bc   :  { %v14721_v36 = vpop.xlane.xlu0 %4734  ;;  %v14723_v59 = vpop.f32.mrf.mxu0  ;;  %v4889_v57 = vmul.f32 1.442695, %v4797_v61  ;;  %v4800_v61 = vsub.f32 %v14181_v8, %v14555_v22 }
 0x2bd   :  { %17775 = vst [vmem:[#allocation239_spill] sm:$0xff] %v14723_v59  ;;  %v14725_v17 = vpop.f32.mrf.mxu1  ;;  %v4901_v37 = vmul.f32 1.442695, %v4803_v40 }
 0x2be   :  { %5025 = vadd.xlane.f32.xlu1 %v5024_v23  ;;  %v10546_v54 = vpop.f32.mrf.mxu0  ;;  %v5421_v23 = vsel %vm4576_vm3, %v14545_v45, -inf  ;;  %11011 = vpow2.f32 %v4889_v57  ;;  %v4895_v8 = vmul.f32 1.442695, %v4800_v61  ;;  %v4801_v61 = vsub.f32 %v14188_v3, %v14557_v44 }
 0x2bf   :  { %v10552_v25 = vpop.f32.mrf.mxu1  ;;  %5028 = vadd.xlane.f32.xlu0 %v5027_v41  ;;  %v14733_v27 = vpop.xlane.xlu1 %4737  ;;  %v5439_v3 = vsel %vm4576_vm3, %v14581_v26, -inf }
 0x2c0   :  { %v14735_v15 = vpop.xlane.xlu0 %4740  ;;  %v14737_v20 = vpop.f32.mrf.mxu0 }
 0x2c1   :  { %v14739_v62 = vpop.f32.mrf.mxu1 }
 0x2c2   :  { %17777 = vst [vmem:[#allocation241_spill] sm:$0xff] %v14739_v62  ;;  %5031 = vadd.xlane.f32.xlu1 %v5030_v39  ;;  %v10557_v41 = vpop.f32.mrf.mxu0  ;;  %v4798_v62 = vsub.f32 %v14176_v11, %v14541_v1  ;;  %v4799_v39 = vsub.f32 %v14160_v48, %v14543_v19  ;;  %v5430_v48 = vsel %vm4576_vm3, %v14563_v49, -inf }
 0x2c3   :  { %v10563_v54 = vpop.f32.mrf.mxu1  ;;  %5422 = vmax.xlane.f32.xlu0 %v5421_v23  ;;  %v14747_v25 = vpop.xlane.xlu1 %4743  ;;  %v5427_v23 = vsel %vm4576_vm3, %v14547_v9, -inf  ;;  %v4897_v9 = vmul.f32 1.442695, %v4801_v61 }
 0x2c4   :  { %v14749_v5 = vpop.xlane.xlu0 %4746  ;;  %v14751_v6 = vpop.f32.mrf.mxu0  ;;  %v4891_v1 = vmul.f32 1.442695, %v4798_v62 }
 0x2c5   :  { %17778 = vst [vmem:[#allocation242_spill] sm:$0xff] %v14751_v6  ;;  %v14755_v32 = vpop.f32.mrf.mxu1  ;;  %v14763_v54 = vpop.eup %11003 }
 0x2c6   :  { %5425 = vmax.xlane.f32.xlu1 %v5424_v51  ;;  %v10558_v41 = vpop.f32.mrf.mxu0  ;;  %17779 = vst [vmem:[#allocation243_spill] sm:$0xff] %v14763_v54  ;;  %v14773_v19 = vpop.eup %11005  ;;  %v4893_v51 = vmul.f32 1.442695, %v4799_v39  ;;  %11013 = vpow2.f32 %v4891_v1 }
 0x2c7   :  { %v10564_v45 = vpop.f32.mrf.mxu1  ;;  %5428 = vmax.xlane.f32.xlu0 %v5427_v23  ;;  %v14765_v6 = vpop.xlane.xlu1 %4749  ;;  %17780 = vst [vmem:[#allocation244_spill] sm:$0xff] %v14773_v19  ;;  %v5033_v41 = vsel %vm4576_vm3, %v14763_v54, 0.0  ;;  %v5036_v22 = vsel %vm4576_vm3, %v14773_v19, 0.0  ;;  %v17835_v54 = vld [vmem:[#allocation142_spill] sm:$0xff] }
 0x2c8   :  { %v14767_v11 = vpop.xlane.xlu0 %4752  ;;  %v14777_v45 = vpop.eup %11007  ;;  %11015 = vpow2.f32 %v4893_v51  ;;  %v5433_v51 = vsel %vm4576_vm3, %v14577_v34, -inf }
 0x2c9   :  { %17781 = vst [vmem:[#allocation245_spill] sm:$0xff] %v14777_v45  ;;  %v14785_v49 = vpop.eup %11009  ;;  %v5039_v57 = vsel %vm4576_vm3, %v14777_v45, 0.0  ;;  %11017 = vpow2.f32 %v4895_v8  ;;  %v5436_v8 = vsel %vm4576_vm3, %v14595_v7, -inf  ;;  %v17787_v7 = vld [vmem:[#allocation8_spill] sm:$0xff] }
 0x2ca   :  { %5431 = vmax.xlane.f32.xlu1 %v5430_v48  ;;  %17782 = vst [vmem:[#allocation246_spill] sm:$0xff] %v14785_v49  ;;  %v5042_v1 = vsel %vm4576_vm3, %v14785_v49, 0.0  ;;  %11019 = vpow2.f32 %v4897_v9  ;;  %v17811_v49 = vld [vmem:[#allocation173_spill] sm:$0xff] }
 0x2cb   :  { %5034 = vadd.xlane.f32.xlu0 %v5033_v41  ;;  %v14779_v23 = vpop.xlane.xlu1 %4755  ;;  %v14811_v44 = vpop.eup %11011 }
 0x2cc   :  { %v14781_v62 = vpop.xlane.xlu0 %4758  ;;  %17783 = vst [vmem:[#allocation247_spill] sm:$0xff] %v14811_v44  ;;  %v5045_v24 = vsel %vm4576_vm3, %v14811_v44, 0.0  ;;  %v17799_v44 = vld [vmem:[#allocation222_spill] sm:$0xff] }
 0x2ce   :  { %5037 = vadd.xlane.f32.xlu1 %v5036_v22 }
 0x2cf   :  { %5040 = vadd.xlane.f32.xlu0 %v5039_v57  ;;  %v14789_v39 = vpop.xlane.xlu1 %4761  ;;  %v4802_v57 = vsub.f32 %v14196_v56, %v14573_v55  ;;  %v4804_v55 = vsub.f32 %v14198_v16, %v14591_v53  ;;  %v5442_v56 = vsel %vm4576_vm3, %v14597_v0, -inf }
 0x2d0   :  { %v14791_v48 = vpop.xlane.xlu0 %4764 }
 0x2d1   :  { %v4899_v34 = vmul.f32 1.442695, %v4802_v57  ;;  %v4903_v16 = vmul.f32 1.442695, %v4804_v55  ;;  %v4805_v55 = vsub.f32 %v14204_v35, %v14593_v21  ;;  %v17788_v35 = vld [vmem:[#allocation215_spill] sm:$0xff] }
 0x2d2   :  { %5043 = vadd.xlane.f32.xlu1 %v5042_v1  ;;  %v5451_v21 = vsel %vm4576_vm3, %v17788_v35, -inf }
 0x2d3   :  { %5434 = vmax.xlane.f32.xlu0 %v5433_v51  ;;  %v14799_v41 = vpop.xlane.xlu1 %4767  ;;  %v14821_v61 = vpop.eup %11013  ;;  %11021 = vpow2.f32 %v4899_v34  ;;  %v4905_v26 = vmul.f32 1.442695, %v4805_v55  ;;  %v5454_v55 = vsel %vm4576_vm3, %v14627_v2, -inf }
 0x2d4   :  { %v14801_v22 = vpop.xlane.xlu0 %5314  ;;  %17784 = vst [vmem:[#allocation248_spill] sm:$0xff] %v14821_v61  ;;  %v5048_v53 = vsel %vm4576_vm3, %v14821_v61, 0.0  ;;  %11023 = vpow2.f32 %v4901_v37  ;;  %v5445_v37 = vsel %vm4576_vm3, %v14609_v46, -inf }
 0x2d5   :  { %11025 = vpow2.f32 %v4903_v16  ;;  %v5448_v16 = vsel %vm4576_vm3, %v14623_v14, -inf }
 0x2d6   :  { %5437 = vmax.xlane.f32.xlu1 %v5436_v8  ;;  %v14825_v8 = vpop.eup %11015  ;;  %11027 = vpow2.f32 %v4905_v26  ;;  %v17794_v26 = vld [vmem:[#allocation216_spill] sm:$0xff] }
 0x2d7   :  { %5440 = vmax.xlane.f32.xlu0 %v5439_v3  ;;  %v14813_v1 = vpop.xlane.xlu1 %5317  ;;  %17785 = vst [vmem:[#allocation249_spill] sm:$0xff] %v14825_v8  ;;  %v14833_v0 = vpop.eup %11017  ;;  %v5051_v9 = vsel %vm4576_vm3, %v14825_v8, 0.0 }
 0x2d8   :  { %v14815_v51 = vpop.xlane.xlu0 %5320  ;;  %17786 = vst [vmem:[#allocation250_spill] sm:$0xff] %v14833_v0  ;;  %v5054_v34 = vsel %vm4576_vm3, %v14833_v0, 0.0  ;;  %v4807_v0 = vsub.f32 %v17787_v7, %v14607_v52 }
 0x2da   :  { %5443 = vmax.xlane.f32.xlu1 %v5442_v56  ;;  %v4909_v52 = vmul.f32 1.442695, %v4807_v0 }
 0x2db   :  { %5046 = vadd.xlane.f32.xlu0 %v5045_v24  ;;  %v14827_v3 = vpop.xlane.xlu1 %5323 }
 0x2dc   :  { %v14829_v57 = vpop.xlane.xlu0 %5326 }
 0x2de   :  { %5049 = vadd.xlane.f32.xlu1 %v5048_v53 }
 0x2df   :  { %5052 = vadd.xlane.f32.xlu0 %v5051_v9  ;;  %v14837_v40 = vpop.xlane.xlu1 %5329  ;;  %v4806_v9 = vsub.f32 %v14212_v4, %v14605_v13  ;;  %v17790_v4 = vld [vmem:[#allocation7_spill] sm:$0xff] }
 0x2e0   :  { %v14839_v56 = vpop.xlane.xlu0 %5332  ;;  %v4808_v13 = vsub.f32 %v17790_v4, %v14619_v31 }
 0x2e1   :  { %v4907_v8 = vmul.f32 1.442695, %v4806_v9 }
 0x2e2   :  { %5055 = vadd.xlane.f32.xlu1 %v5054_v34  ;;  %v14859_v34 = vpop.eup %11019  ;;  %v4911_v31 = vmul.f32 1.442695, %v4808_v13  ;;  %v5457_v13 = vsel %vm4576_vm3, %v14641_v50, -inf }
 0x2e3   :  { %5446 = vmax.xlane.f32.xlu0 %v5445_v37  ;;  %v14847_v24 = vpop.xlane.xlu1 %5335  ;;  %17789 = vst [vmem:[#allocation8_spill] sm:$0xff] %v14859_v34  ;;  %v14869_v14 = vpop.eup %11021  ;;  %v5057_v7 = vsel %vm4576_vm3, %v14859_v34, 0.0  ;;  %11029 = vpow2.f32 %v4907_v8 }
 0x2e4   :  { %v14849_v53 = vpop.xlane.xlu0 %5338  ;;  %17791 = vst [vmem:[#allocation7_spill] sm:$0xff] %v14869_v14  ;;  %v5060_v4 = vsel %vm4576_vm3, %v14869_v14, 0.0  ;;  %11031 = vpow2.f32 %v4909_v52  ;;  %v17797_v14 = vld [vmem:[#allocation220_spill] sm:$0xff] }
 0x2e5   :  { %11033 = vpow2.f32 %v4911_v31  ;;  %v17798_v31 = vld [vmem:[#allocation47_spill] sm:$0xff] }
 0x2e6   :  { %5449 = vmax.xlane.f32.xlu1 %v5448_v16  ;;  %v14873_v16 = vpop.eup %11023  ;;  %v4811_v61 = vsub.f32 %v17798_v31, %v17797_v14 }
 0x2e7   :  { %5452 = vmax.xlane.f32.xlu0 %v5451_v21  ;;  %v14861_v37 = vpop.xlane.xlu1 %5341  ;;  %17792 = vst [vmem:[#allocation251_spill] sm:$0xff] %v14873_v16  ;;  %v14881_v2 = vpop.eup %11025  ;;  %v5063_v0 = vsel %vm4576_vm3, %v14873_v16, 0.0 }
 0x2e8   :  { %v14863_v46 = vpop.xlane.xlu0 %5344  ;;  %17793 = vst [vmem:[#allocation252_spill] sm:$0xff] %v14881_v2  ;;  %v5066_v8 = vsel %vm4576_vm3, %v14881_v2, 0.0  ;;  %v14905_v2 = vpop.eup %11027  ;;  %v4917_v31 = vmul.f32 1.442695, %v4811_v61 }
 0x2e9   :  { %17800 = vst [vmem:[#allocation216_spill] sm:$0xff] %v14905_v2 }
 0x2ea   :  { %5455 = vmax.xlane.f32.xlu1 %v5454_v55  ;;  %v17795_v55 = vld [vmem:[#allocation46_spill] sm:$0xff] }
 0x2eb   :  { %5058 = vadd.xlane.f32.xlu0 %v5057_v7  ;;  %v14875_v21 = vpop.xlane.xlu1 %5347  ;;  %v4809_v35 = vsub.f32 %v17795_v55, %v17794_v26  ;;  %v17796_v26 = vld [vmem:[#allocation132_spill] sm:$0xff]  ;;  %v5460_v55 = vsel %vm4576_vm3, %v14659_v58, -inf  ;;  %v5466_v58 = vsel %vm4576_vm3, %v14661_v43, -inf }
 0x2ec   :  { %v14877_v9 = vpop.xlane.xlu0 %5350 }
 0x2ed   :  { %v4913_v52 = vmul.f32 1.442695, %v4809_v35 }
 0x2ee   :  { %5061 = vadd.xlane.f32.xlu1 %v5060_v4 }
 0x2ef   :  { %5064 = vadd.xlane.f32.xlu0 %v5063_v0  ;;  %v14887_v7 = vpop.xlane.xlu1 %5353  ;;  %v4810_v0 = vsub.f32 %v17796_v26, %v14637_v30  ;;  %11035 = vpow2.f32 %v4913_v52  ;;  %v17801_v30 = vld [vmem:[#allocation133_spill] sm:$0xff] }
 0x2f0   :  { %v14889_v34 = vpop.xlane.xlu0 %5356  ;;  %v4812_v26 = vsub.f32 %v17801_v30, %v14655_v10  ;;  %v14911_v14 = vpop.eup %11029 }
 0x2f1   :  { %v4915_v50 = vmul.f32 1.442695, %v4810_v0  ;;  %17802 = vst [vmem:[#allocation46_spill] sm:$0xff] %v14911_v14  ;;  %v14915_v52 = vpop.eup %11031 }
 0x2f2   :  { %5067 = vadd.xlane.f32.xlu1 %v5066_v8  ;;  %v5463_v8 = vsel %vm4576_vm3, %v17799_v44, -inf  ;;  %17803 = vst [vmem:[#allocation132_spill] sm:$0xff] %v14915_v52  ;;  %v4919_v10 = vmul.f32 1.442695, %v4812_v26  ;;  %v5075_v61 = vsel %vm4576_vm3, %v14915_v52, 0.0  ;;  %v5469_v26 = vsel %vm4576_vm3, %v14673_v63, -inf }
 0x2f3   :  { %5458 = vmax.xlane.f32.xlu0 %v5457_v13  ;;  %v14895_v16 = vpop.xlane.xlu1 %5359 }
 0x2f4   :  { %v4963_v4 = vpop.xlane.xlu0 %4962 }
 0x2f5   :  { %11037 = vrcp.f32 %v4963_v4 }
 0x2f6   :  { %5461 = vmax.xlane.f32.xlu1 %v5460_v55  ;;  %v5069_v55 = vsel %vm4576_vm3, %v14905_v2, 0.0  ;;  %v17810_v2 = vld [vmem:[#allocation170_spill] sm:$0xff] }
 0x2f7   :  { %5464 = vmax.xlane.f32.xlu0 %v5463_v8  ;;  %v4966_v35 = vpop.xlane.xlu1 %4965  ;;  %v5072_v8 = vsel %vm4576_vm3, %v14911_v14, 0.0  ;;  %v17809_v14 = vld [vmem:[#allocation229_spill] sm:$0xff] }
 0x2f8   :  { %v4969_v13 = vpop.xlane.xlu0 %4968 }
 0x2f9   :  { %11039 = vrcp.f32 %v4969_v13  ;;  %v14921_v13 = vpop.eup %11033 }
 0x2fa   :  { %11041 = vrcp.f32 %v4966_v35  ;;  %5467 = vmax.xlane.f32.xlu1 %v5466_v58  ;;  %17804 = vst [vmem:[#allocation220_spill] sm:$0xff] %v14921_v13  ;;  %v17805_v58 = vld [vmem:[#allocation134_spill] sm:$0xff] }
 0x2fb   :  { %5070 = vadd.xlane.f32.xlu0 %v5069_v55  ;;  %v4972_v4 = vpop.xlane.xlu1 %4971  ;;  %v4813_v35 = vsub.f32 %v17805_v58, %v14657_v12 }
 0x2fc   :  { %11043 = vrcp.f32 %v4972_v4  ;;  %v14917_v0 = vpop.xlane.xlu0 %5362  ;;  %v17806_v4 = vld [vmem:[#allocation136_spill] sm:$0xff]  ;;  %v14939_v12 = vpop.eup %11035 }
 0x2fd   :  { %11045 = vpow2.f32 %v4915_v50  ;;  %v5078_v50 = vsel %vm4576_vm3, %v14921_v13, 0.0  ;;  %17807 = vst [vmem:[#allocation47_spill] sm:$0xff] %v14939_v12 }
 0x2fe   :  { %11047 = vpow2.f32 %v4917_v31  ;;  %5073 = vadd.xlane.f32.xlu1 %v5072_v8  ;;  %v4921_v31 = vmul.f32 1.442695, %v4813_v35  ;;  %v4814_v8 = vsub.f32 %v17806_v4, %v14669_v47  ;;  %v5475_v35 = vsel %vm4576_vm3, %v17809_v14, -inf }
 0x2ff   :  { %5076 = vadd.xlane.f32.xlu0 %v5075_v61  ;;  %v14927_v30 = vpop.xlane.xlu1 %5365  ;;  %11049 = vpow2.f32 %v4919_v10  ;;  %v17808_v61 = vld [vmem:[#allocation135_spill] sm:$0xff] }
 0x300   :  { %v14929_v55 = vpop.xlane.xlu0 %5368  ;;  %v4815_v58 = vsub.f32 %v17808_v61, %v14671_v29  ;;  %11051 = vpow2.f32 %v4921_v31  ;;  %v4923_v47 = vmul.f32 1.442695, %v4814_v8  ;;  %v5478_v31 = vsel %vm4576_vm3, %v14691_v42, -inf  ;;  %v17818_v42 = vld [vmem:[#allocation58_spill] sm:$0xff] }
 0x302   :  { %5079 = vadd.xlane.f32.xlu1 %v5078_v50  ;;  %v11038_v43 = vpop.eup %11037  ;;  %v5472_v50 = vsel %vm4576_vm3, %v14687_v38, -inf  ;;  %v4925_v4 = vmul.f32 1.442695, %v4815_v58  ;;  %v17812_v38 = vld [vmem:[#allocation137_spill] sm:$0xff]  ;;  %v17814_v58 = vld [vmem:[#allocation174_spill] sm:$0xff] }
 0x303   :  { %5470 = vmax.xlane.f32.xlu0 %v5469_v26  ;;  %v14937_v52 = vpop.xlane.xlu1 %5371  ;;  %v5217_v44 = vmul.f32 %v11038_v43, %v17810_v2  ;;  %v4816_v19 = vsub.f32 %v17812_v38, %v14683_v60  ;;  %v17815_v2 = vld [vmem:[#allocation177_spill] sm:$0xff] }
 0x304   :  { %v4975_v10 = vpop.xlane.xlu0 %4974 }
 0x305   :  { %11053 = vrcp.f32 %v4975_v10 }
 0x306   :  { %v11040_v13 = vpop.eup %11039  ;;  %5473 = vmax.xlane.f32.xlu1 %v5472_v50  ;;  %v5081_v50 = vsel %vm4576_vm3, %v14939_v12, 0.0  ;;  %v17817_v12 = vld [vmem:[#allocation60_spill] sm:$0xff] }
 0x307   :  { %v11042_v63 = vpop.eup %11041  ;;  %5476 = vmax.xlane.f32.xlu0 %v5475_v35  ;;  %v4978_v26 = vpop.xlane.xlu1 %4977  ;;  %v5219_v35 = vmul.f32 %v11040_v13, %v17814_v58  ;;  %v17819_v13 = vpack.c.bf16 %v17817_v12, %v17818_v42  ;;  %v17824_v42 = vld [vmem:[#allocation56_spill] sm:$0xff]  ;;  %v17825_v12 = vld [vmem:[#allocation53_spill] sm:$0xff] }
 0x308   :  { %v5218_v29 = vmul.f32 %v11042_v63, %v17811_v49  ;;  %v4981_v61 = vpop.xlane.xlu0 %4980 }
 0x309   :  { %v11044_v45 = vpop.eup %11043  ;;  %11055 = vrcp.f32 %v4981_v61  ;;  %v4927_v61 = vmul.f32 1.442695, %v4816_v19  ;;  %v17822_v19 = vld [vmem:[#allocation230_spill] sm:$0xff] }
 0x30a   :  { %v14955_v8 = vpop.eup %11045  ;;  %v5220_v43 = vmul.f32 %v11044_v45, %v17815_v2  ;;  %11057 = vrcp.f32 %v4978_v26  ;;  %v5281_v49 = vpack.c.bf16 %v5218_v29, %v5217_v44  ;;  %5479 = vmax.xlane.f32.xlu1 %v5478_v31  ;;  %v17820_v44 = vmov 0.0  }
 0x30b   :  { %17813 = vst [vmem:[#allocation133_spill] sm:$0xff] %v14955_v8  ;;  %v14959_v63 = vpop.eup %11047  ;;  %5082 = vadd.xlane.f32.xlu0 %v5081_v50  ;;  %v4984_v60 = vpop.xlane.xlu1 %4983  ;;  %v5084_v45 = vsel %vm4576_vm3, %v14955_v8, 0.0  ;;  %v17826_v31 = vpack.c.bf16 %v17824_v42, %v17825_v12  ;;  %v5481_v2 = vsel %vm4576_vm3, %v14705_v28, -inf  ;;  %v5484_v42 = vsel %vm4576_vm3, %v14723_v59, -inf  ;;  %v17834_v8 = vld [vmem:[#allocation185_spill] sm:$0xff] }
 0x30c   :  { %17816 = vst [vmem:[#allocation134_spill] sm:$0xff] %v14959_v63  ;;  %10568 = vmatmul.mubr.msk.bf16.vlgmr.msra.gmra.mxu0 %vm4576_vm3, %v5281_v49  ;;  %11059 = vrcp.f32 %v4984_v60  ;;  %v14962_v38 = vpop.xlane.xlu0 %5374  ;;  %v5282_v10 = vpack.c.bf16 %v5220_v43, %v5219_v35  ;;  %v14971_v26 = vpop.eup %11049  ;;  %v5087_v29 = vsel %vm4576_vm3, %v14959_v63, 0.0  ;;  %v17827_v49 = vld [vmem:[#allocation139_spill] sm:$0xff] }
 0x30d   :  { %11061 = vpow2.f32 %v4923_v47  ;;  %10578 = vmatpush3.bf16.msra.mxu0 %v17819_v13  ;;  %10579 = vmatprep.mubr.msk.bf16.mxu0 %vm11597_vm2, %v17820_v44  ;;  %17821 = vst [vmem:[#allocation136_spill] sm:$0xff] %v14971_v26  ;;  %v17823_v47 = vld [vmem:[#allocation138_spill] sm:$0xff]  ;;  %v4819_v60 = vsub.f32 %v17827_v49, %v14703_v18  ;;  %v17829_v13 = vld [vmem:[#allocation140_spill] sm:$0xff] }
 0x30e   :  { %11063 = vpow2.f32 %v4925_v4  ;;  %10574 = vmatmul.mubr.msk.bf16.vlgmr.msra.gmra.mxu1 %vm4576_vm3, %v5282_v10  ;;  %5085 = vadd.xlane.f32.xlu1 %v5084_v45  ;;  %v4817_v50 = vsub.f32 %v17823_v47, %v17822_v19  ;;  %v5090_v4 = vsel %vm4576_vm3, %v14971_v26, 0.0  ;;  %v17828_v10 = vld [vmem:[#allocation234_spill] sm:$0xff] }
 0x30f   :  { %10584 = vmatpush3.bf16.msra.mxu1 %v17826_v31  ;;  %5088 = vadd.xlane.f32.xlu0 %v5087_v29  ;;  %v14981_v58 = vpop.xlane.xlu1 %5377  ;;  %11065 = vpow2.f32 %v4927_v61  ;;  %v4818_v45 = vsub.f32 %v17829_v13, %v17828_v10  ;;  %v14999_v61 = vpop.eup %11051  ;;  %v17831_v31 = vld [vmem:[#allocation236_spill] sm:$0xff]  ;;  %v4933_v18 = vmul.f32 1.442695, %v4819_v60  ;;  %v17832_v10 = vld [vmem:[#allocation141_spill] sm:$0xff]  ;;  %v17833_v26 = vld [vmem:[#allocation182_spill] sm:$0xff]  ;;  %v5490_v60 = vsel %vm4576_vm3, %v14725_v17, -inf }
 0x310   :  { %v14983_v35 = vpop.xlane.xlu0 %5380  ;;  %10589 = vmatprep.subr.bf16.mxu0 %v17820_v44  ;;  %10585 = vmatprep.mubr.msk.bf16.mxu1 %vm11597_vm2, %v17820_v44  ;;  %v4929_v43 = vmul.f32 1.442695, %v4817_v50  ;;  %17830 = vst [vmem:[#allocation135_spill] sm:$0xff] %v14999_v61  ;;  %v5487_v50 = vsel %vm4576_vm3, %v17831_v31, -inf  ;;  %v4820_v13 = vsub.f32 %v17832_v10, %v14719_v33  ;;  %v4821_v31 = vsub.f32 %v17835_v54, %v14721_v36  ;;  %v17837_v33 = vld [vmem:[#allocation186_spill] sm:$0xff] }
 0x311   :  { %10595 = vmatprep.subr.bf16.mxu1 %v17820_v44  ;;  %v4931_v49 = vmul.f32 1.442695, %v4818_v45 }
 0x312   :  { %5091 = vadd.xlane.f32.xlu1 %v5090_v4  ;;  %v11054_v47 = vpop.eup %11053  ;;  %11067 = vpow2.f32 %v4929_v43  ;;  %v5093_v43 = vsel %vm4576_vm3, %v14999_v61, 0.0 }
 0x313   :  { %5482 = vmax.xlane.f32.xlu0 %v5481_v2  ;;  %v14997_v29 = vpop.xlane.xlu1 %5383  ;;  %v5221_v63 = vmul.f32 %v11054_v47, %v17833_v26  ;;  %v17838_v26 = vld [vmem:[#allocation189_spill] sm:$0xff] }
 0x314   :  { %v4987_v19 = vpop.xlane.xlu0 %4986 }
 0x315   :  { %11069 = vrcp.f32 %v4987_v19 }
 0x316   :  { %v11056_v12 = vpop.eup %11055  ;;  %5485 = vmax.xlane.f32.xlu1 %v5484_v42 }
 0x317   :  { %v11058_v4 = vpop.eup %11057  ;;  %5488 = vmax.xlane.f32.xlu0 %v5487_v50  ;;  %v4990_v2 = vpop.xlane.xlu1 %4989  ;;  %v5223_v42 = vmul.f32 %v11056_v12, %v17837_v33  ;;  %v4935_v12 = vmul.f32 1.442695, %v4820_v13  ;;  %v17847_v33 = vld [vmem:[#allocation146_spill] sm:$0xff] }
 0x318   :  { %v5222_v28 = vmul.f32 %v11058_v4, %v17834_v8  ;;  %v4993_v59 = vpop.xlane.xlu0 %4992 }
 0x319   :  { %v11060_v14 = vpop.eup %11059  ;;  %11071 = vrcp.f32 %v4993_v59  ;;  %v17840_v59 = vld [vmem:[#allocation144_spill] sm:$0xff] }
 0x31a   :  { %v15015_v45 = vpop.eup %11061  ;;  %v5224_v47 = vmul.f32 %v11060_v14, %v17838_v26  ;;  %11073 = vrcp.f32 %v4990_v2  ;;  %v5283_v8 = vpack.c.bf16 %v5222_v28, %v5221_v63  ;;  %5491 = vmax.xlane.f32.xlu1 %v5490_v60  ;;  %v4822_v54 = vsub.f32 %v17840_v59, %v14733_v27  ;;  %v17841_v14 = vld [vmem:[#allocation143_spill] sm:$0xff]  ;;  %v17842_v28 = vld [vmem:[#allocation68_spill] sm:$0xff]  ;;  %v17843_v63 = vld [vmem:[#allocation66_spill] sm:$0xff] }
 0x31b   :  { %17836 = vst [vmem:[#allocation170_spill] sm:$0xff] %v15015_v45  ;;  %v15019_v19 = vpop.eup %11063  ;;  %5094 = vadd.xlane.f32.xlu0 %v5093_v43  ;;  %v4996_v36 = vpop.xlane.xlu1 %4995  ;;  %v4823_v2 = vsub.f32 %v17841_v14, %v14735_v15  ;;  %v17844_v10 = vpack.c.bf16 %v17842_v28, %v17843_v63  ;;  %v5096_v43 = vsel %vm4576_vm3, %v15015_v45, 0.0  ;;  %v4937_v60 = vmul.f32 1.442695, %v4821_v31  ;;  %v17848_v26 = vld [vmem:[#allocation64_spill] sm:$0xff] }
 0x31c   :  { %17839 = vst [vmem:[#allocation173_spill] sm:$0xff] %v15019_v19  ;;  %10580 = vmatmul.mubr.msk.bf16.vlgmr.msra.gmra.mxu0 %vm4576_vm3, %v5283_v8  ;;  %11075 = vrcp.f32 %v4996_v36  ;;  %v15024_v50 = vpop.xlane.xlu0 %5386  ;;  %v5284_v4 = vpack.c.bf16 %v5224_v47, %v5223_v42  ;;  %v15035_v27 = vpop.eup %11065  ;;  %v5099_v15 = vsel %vm4576_vm3, %v15019_v19, 0.0  ;;  %v4825_v42 = vsub.f32 %v17847_v33, %v14749_v5  ;;  %v17849_v47 = vld [vmem:[#allocation61_spill] sm:$0xff]  ;;  %v17860_v19 = vld [vmem:[#allocation198_spill] sm:$0xff] }
 0x31d   :  { %11077 = vpow2.f32 %v4931_v49  ;;  %10590 = vmatpush3.bf16.msra.mxu0 %v17844_v10  ;;  %10591 = vmatprep.mubr.msk.bf16.mxu0 %vm11597_vm2, %v17820_v44  ;;  %17845 = vst [vmem:[#allocation137_spill] sm:$0xff] %v15035_v27  ;;  %v17846_v49 = vld [vmem:[#allocation145_spill] sm:$0xff]  ;;  %v17850_v8 = vpack.c.bf16 %v17848_v26, %v17849_v47  ;;  %v4939_v31 = vmul.f32 1.442695, %v4822_v54  ;;  %v5102_v5 = vsel %vm4576_vm3, %v15035_v27, 0.0 }
 0x31e   :  { %11079 = vpow2.f32 %v4933_v18  ;;  %v4824_v13 = vsub.f32 %v17846_v49, %v14747_v25  ;;  %10586 = vmatmul.mubr.msk.bf16.vlgmr.msra.gmra.mxu1 %vm4576_vm3, %v5284_v4  ;;  %5097 = vadd.xlane.f32.xlu1 %v5096_v43  ;;  %v4941_v25 = vmul.f32 1.442695, %v4823_v2  ;;  %v5493_v54 = vsel %vm4576_vm3, %v14737_v20, -inf  ;;  %v17853_v43 = vld [vmem:[#allocation147_spill] sm:$0xff]  ;;  %v17854_v49 = vld [vmem:[#allocation242_spill] sm:$0xff]  ;;  %v17855_v33 = vld [vmem:[#allocation241_spill] sm:$0xff] }
 0x31f   :  { %10596 = vmatpush3.bf16.msra.mxu1 %v17850_v8  ;;  %5100 = vadd.xlane.f32.xlu0 %v5099_v15  ;;  %v15047_v36 = vpop.xlane.xlu1 %5389  ;;  %11081 = vpow2.f32 %v4935_v12  ;;  %v4945_v4 = vmul.f32 1.442695, %v4825_v42  ;;  %v15061_v28 = vpop.eup %11067  ;;  %v17852_v12 = vld [vmem:[#allocation148_spill] sm:$0xff]  ;;  %v5499_v42 = vsel %vm4576_vm3, %v17855_v33, -inf  ;;  %v5502_v8 = vsel %vm4576_vm3, %v14755_v32, -inf }
 0x320   :  { %v15049_v18 = vpop.xlane.xlu0 %5392  ;;  %10601 = vmatprep.subr.bf16.mxu0 %v17820_v44  ;;  %10597 = vmatprep.mubr.msk.bf16.mxu1 %vm11597_vm2, %v17820_v44  ;;  %11083 = vpow2.f32 %v4937_v60  ;;  %v4943_v59 = vmul.f32 1.442695, %v4824_v13  ;;  %17851 = vst [vmem:[#allocation174_spill] sm:$0xff] %v15061_v28  ;;  %v4826_v2 = vsub.f32 %v17852_v12, %v14765_v6  ;;  %v4827_v60 = vsub.f32 %v17853_v43, %v14767_v11 }
 0x321   :  { %10607 = vmatprep.subr.bf16.mxu1 %v17820_v44  ;;  %11085 = vpow2.f32 %v4939_v31  ;;  %v5496_v13 = vsel %vm4576_vm3, %v17854_v49, -inf  ;;  %v5105_v6 = vsel %vm4576_vm3, %v15061_v28, 0.0  ;;  %v17856_v31 = vld [vmem:[#allocation194_spill] sm:$0xff] }
 0x322   :  { %5103 = vadd.xlane.f32.xlu1 %v5102_v5  ;;  %v11070_v10 = vpop.eup %11069  ;;  %11087 = vpow2.f32 %v4941_v25  ;;  %v4947_v11 = vmul.f32 1.442695, %v4826_v2  ;;  %v17857_v5 = vld [vmem:[#allocation197_spill] sm:$0xff]  ;;  %v4949_v43 = vmul.f32 1.442695, %v4827_v60 }
 0x323   :  { %5494 = vmax.xlane.f32.xlu0 %v5493_v54  ;;  %v15059_v14 = vpop.xlane.xlu1 %5395  ;;  %11089 = vpow2.f32 %v4943_v59  ;;  %v5225_v25 = vmul.f32 %v11070_v10, %v17856_v31  ;;  %v17861_v2 = vld [vmem:[#allocation201_spill] sm:$0xff] }
 0x324   :  { %v4999_v63 = vpop.xlane.xlu0 %4998  ;;  %11091 = vpow2.f32 %v4945_v4 }
 0x325   :  { %11093 = vrcp.f32 %v4999_v63 }
 0x326   :  { %v11072_v15 = vpop.eup %11071  ;;  %5497 = vmax.xlane.f32.xlu1 %v5496_v13  ;;  %v17858_v13 = vld [vmem:[#allocation149_spill] sm:$0xff] }
 0x327   :  { %v11074_v26 = vpop.eup %11073  ;;  %5500 = vmax.xlane.f32.xlu0 %v5499_v42  ;;  %v5002_v47 = vpop.xlane.xlu1 %5001  ;;  %v4828_v4 = vsub.f32 %v17858_v13, %v14779_v23  ;;  %v17859_v42 = vld [vmem:[#allocation150_spill] sm:$0xff]  ;;  %v5227_v45 = vmul.f32 %v11072_v15, %v17860_v19  ;;  %v17863_v15 = vld [vmem:[#allocation151_spill] sm:$0xff]  ;;  %v17869_v13 = vld [vmem:[#allocation72_spill] sm:$0xff] }
 0x328   :  { %v5226_v54 = vmul.f32 %v11074_v26, %v17857_v5  ;;  %v5005_v59 = vpop.xlane.xlu0 %5004  ;;  %v4829_v27 = vsub.f32 %v17859_v42, %v14781_v62  ;;  %v17862_v26 = vld [vmem:[#allocation152_spill] sm:$0xff] }
 0x329   :  { %v11076_v12 = vpop.eup %11075  ;;  %11095 = vrcp.f32 %v5005_v59  ;;  %v4830_v23 = vsub.f32 %v17862_v26, %v14789_v39  ;;  %v4951_v19 = vmul.f32 1.442695, %v4828_v4  ;;  %v17868_v59 = vld [vmem:[#allocation154_spill] sm:$0xff]  ;;  %v17870_v4 = vld [vmem:[#allocation69_spill] sm:$0xff] }
 0x32a   :  { %v15081_v28 = vpop.eup %11077  ;;  %v5228_v61 = vmul.f32 %v11076_v12, %v17861_v2  ;;  %11097 = vrcp.f32 %v5002_v47  ;;  %v5285_v10 = vpack.c.bf16 %v5226_v54, %v5225_v25  ;;  %5503 = vmax.xlane.f32.xlu1 %v5502_v8  ;;  %v4831_v47 = vsub.f32 %v17863_v15, %v14791_v48  ;;  %v17864_v25 = vld [vmem:[#allocation76_spill] sm:$0xff]  ;;  %v17865_v8 = vld [vmem:[#allocation74_spill] sm:$0xff] }
 0x32b   :  { %v15085_v63 = vpop.eup %11079  ;;  %5106 = vadd.xlane.f32.xlu0 %v5105_v6  ;;  %v5008_v60 = vpop.xlane.xlu1 %5007  ;;  %v17866_v5 = vpack.c.bf16 %v17864_v25, %v17865_v8  ;;  %v5108_v6 = vsel %vm4576_vm3, %v15081_v28, 0.0  ;;  %v4953_v54 = vmul.f32 1.442695, %v4829_v27  ;;  %v5505_v12 = vsub.f32 %v17868_v59, %v14801_v22 }
 0x32c   :  { %10592 = vmatmul.mubr.msk.bf16.vlgmr.msra.gmra.mxu0 %vm4576_vm3, %v5285_v10  ;;  %11099 = vrcp.f32 %v5008_v60  ;;  %v15090_v62 = vpop.xlane.xlu0 %5398  ;;  %v5286_v31 = vpack.c.bf16 %v5228_v61, %v5227_v45  ;;  %v15101_v39 = vpop.eup %11081  ;;  %v17867_v61 = vld [vmem:[#allocation153_spill] sm:$0xff]  ;;  %v5111_v48 = vsel %vm4576_vm3, %v15085_v63, 0.0  ;;  %v17871_v42 = vpack.c.bf16 %v17869_v13, %v17870_v4 }
 0x32d   :  { %11101 = vpow2.f32 %v4947_v11  ;;  %10602 = vmatpush3.bf16.msra.mxu0 %v17866_v5  ;;  %10603 = vmatprep.mubr.msk.bf16.mxu0 %vm11597_vm2, %v17820_v44  ;;  %v4832_v45 = vsub.f32 %v17867_v61, %v14799_v41  ;;  %v15108_v11 = vpop.eup %11083  ;;  %v4957_v10 = vmul.f32 1.442695, %v4831_v47  ;;  %v5114_v22 = vsel %vm4576_vm3, %v15101_v39, 0.0  ;;  %v17876_v47 = vld [vmem:[#allocation156_spill] sm:$0xff] }
 0x32e   :  { %11103 = vpow2.f32 %v4949_v43  ;;  %10598 = vmatmul.mubr.msk.bf16.vlgmr.msra.gmra.mxu1 %vm4576_vm3, %v5286_v31  ;;  %5109 = vadd.xlane.f32.xlu1 %v5108_v6  ;;  %v4955_v43 = vmul.f32 1.442695, %v4830_v23  ;;  %v15122_v2 = vpop.eup %11085  ;;  %v5117_v23 = vsel %vm4576_vm3, %v15108_v11, 0.0  ;;  %v5569_v15 = vmul.f32 1.442695, %v5505_v12 }
 0x32f   :  { %10608 = vmatpush3.bf16.msra.mxu1 %v17871_v42  ;;  %5112 = vadd.xlane.f32.xlu0 %v5111_v48  ;;  %v15115_v27 = vpop.xlane.xlu1 %5401  ;;  %17872 = vst [vmem:[#allocation177_spill] sm:$0xff] %v15122_v2  ;;  %11105 = vpow2.f32 %v4951_v19  ;;  %v15127_v60 = vpop.eup %11087  ;;  %v4959_v26 = vmul.f32 1.442695, %v4832_v45  ;;  %v5506_v8 = vsub.f32 %v17876_v47, %v14813_v1  ;;  %v5120_v45 = vsel %vm4576_vm3, %v15122_v2, 0.0  ;;  %v17878_v42 = vld [vmem:[#allocation206_spill] sm:$0xff] }
 0x330   :  { %v15117_v41 = vpop.xlane.xlu0 %5404  ;;  %10613 = vmatprep.subr.bf16.mxu0 %v17820_v44  ;;  %10609 = vmatprep.mubr.msk.bf16.mxu1 %vm11597_vm2, %v17820_v44  ;;  %17873 = vst [vmem:[#allocation60_spill] sm:$0xff] %v15127_v60  ;;  %11107 = vpow2.f32 %v4953_v54  ;;  %v15131_v31 = vpop.eup %11089  ;;  %v17877_v54 = vld [vmem:[#allocation155_spill] sm:$0xff]  ;;  %v5123_v59 = vsel %vm4576_vm3, %v15127_v60, 0.0  ;;  %v17882_v60 = vld [vmem:[#allocation210_spill] sm:$0xff] }
 0x331   :  { %10619 = vmatprep.subr.bf16.mxu1 %v17820_v44  ;;  %17874 = vst [vmem:[#allocation58_spill] sm:$0xff] %v15131_v31  ;;  %v15135_v19 = vpop.eup %11091  ;;  %11109 = vpow2.f32 %v4955_v43  ;;  %v5507_v61 = vsub.f32 %v17877_v54, %v14815_v51  ;;  %v5126_v4 = vsel %vm4576_vm3, %v15131_v31, 0.0  ;;  %v5571_v51 = vmul.f32 1.442695, %v5506_v8  ;;  %v17880_v54 = vld [vmem:[#allocation157_spill] sm:$0xff] }
 0x332   :  { %5115 = vadd.xlane.f32.xlu1 %v5114_v22  ;;  %17875 = vst [vmem:[#allocation230_spill] sm:$0xff] %v15135_v19  ;;  %v11094_v6 = vpop.eup %11093  ;;  %11111 = vpow2.f32 %v4957_v10  ;;  %v5129_v1 = vsel %vm4576_vm3, %v15135_v19, 0.0  ;;  %v17879_v10 = vld [vmem:[#allocation209_spill] sm:$0xff] }
 0x333   :  { %5118 = vadd.xlane.f32.xlu0 %v5117_v23  ;;  %v15133_v25 = vpop.xlane.xlu1 %5407  ;;  %11113 = vpow2.f32 %v4959_v26  ;;  %v5229_v43 = vmul.f32 %v11094_v6, %v17878_v42  ;;  %v5573_v47 = vmul.f32 1.442695, %v5507_v61  ;;  %v17883_v8 = vld [vmem:[#allocation213_spill] sm:$0xff] }
 0x334   :  { %v5011_v5 = vpop.xlane.xlu0 %5010  ;;  %11115 = vpow2.f32 %v5569_v15  ;;  %v5508_v15 = vsub.f32 %v17880_v54, %v14827_v3  ;;  %v17891_v54 = vld [vmem:[#allocation9_spill] sm:$0xff] }
 0x335   :  { %11117 = vrcp.f32 %v5011_v5 }
 0x336   :  { %v11096_v48 = vpop.eup %11095  ;;  %5121 = vadd.xlane.f32.xlu1 %v5120_v45  ;;  %v17881_v45 = vld [vmem:[#allocation158_spill] sm:$0xff] }
 0x337   :  { %v11098_v12 = vpop.eup %11097  ;;  %5124 = vadd.xlane.f32.xlu0 %v5123_v59  ;;  %v5014_v13 = vpop.xlane.xlu1 %5013  ;;  %v5509_v59 = vsub.f32 %v17881_v45, %v14829_v57  ;;  %v5231_v31 = vmul.f32 %v11096_v48, %v17882_v60  ;;  %v5575_v60 = vmul.f32 1.442695, %v5508_v15  ;;  %v17885_v48 = vld [vmem:[#allocation159_spill] sm:$0xff]  ;;  %v17892_v15 = vld [vmem:[#allocation77_spill] sm:$0xff] }
 0x338   :  { %v5230_v22 = vmul.f32 %v11098_v12, %v17879_v10  ;;  %v5017_v26 = vpop.xlane.xlu0 %5016  ;;  %v17884_v12 = vld [vmem:[#allocation160_spill] sm:$0xff]  ;;  %v17893_v45 = vpack.c.bf16 %v17891_v54, %v17892_v15 }
 0x339   :  { %v11100_v23 = vpop.eup %11099  ;;  %11119 = vrcp.f32 %v5017_v26  ;;  %v5510_v3 = vsub.f32 %v17884_v12, %v14837_v40  ;;  %v17890_v26 = vld [vmem:[#allocation162_spill] sm:$0xff] }
 0x33a   :  { %v15155_v19 = vpop.eup %11101  ;;  %v5232_v2 = vmul.f32 %v11100_v23, %v17883_v8  ;;  %11121 = vrcp.f32 %v5014_v13  ;;  %v5287_v6 = vpack.c.bf16 %v5230_v22, %v5229_v43  ;;  %5127 = vadd.xlane.f32.xlu1 %v5126_v4  ;;  %v5511_v13 = vsub.f32 %v17885_v48, %v14839_v56  ;;  %v17886_v43 = vld [vmem:[#allocation81_spill] sm:$0xff]  ;;  %v17887_v4 = vld [vmem:[#allocation79_spill] sm:$0xff] }
 0x33b   :  { %v15159_v5 = vpop.eup %11103  ;;  %5130 = vadd.xlane.f32.xlu0 %v5129_v1  ;;  %v5020_v61 = vpop.xlane.xlu1 %5019  ;;  %v17888_v10 = vpack.c.bf16 %v17886_v43, %v17887_v4  ;;  %v5132_v1 = vsel %vm4576_vm3, %v15155_v19, 0.0  ;;  %v5577_v22 = vmul.f32 1.442695, %v5509_v59  ;;  %v5513_v23 = vsub.f32 %v17890_v26, %v14849_v53 }
 0x33c   :  { %10604 = vmatmul.mubr.msk.bf16.vlgmr.msra.gmra.mxu0 %vm4576_vm3, %v5287_v6  ;;  %11123 = vrcp.f32 %v5020_v61  ;;  %v15164_v57 = vpop.xlane.xlu0 %5410  ;;  %v5288_v42 = vpack.c.bf16 %v5232_v2, %v5231_v31  ;;  %v15175_v40 = vpop.eup %11105  ;;  %v17889_v2 = vld [vmem:[#allocation161_spill] sm:$0xff]  ;;  %v5135_v56 = vsel %vm4576_vm3, %v15159_v5, 0.0  ;;  %v5579_v59 = vmul.f32 1.442695, %v5510_v3 }
 0x33d   :  { %11125 = vpow2.f32 %v5571_v51  ;;  %10614 = vmatpush3.bf16.msra.mxu0 %v17888_v10  ;;  %10615 = vmatprep.mubr.msk.bf16.mxu0 %vm11597_vm2, %v17820_v44  ;;  %v5512_v31 = vsub.f32 %v17889_v2, %v14847_v24  ;;  %v15182_v51 = vpop.eup %11107  ;;  %v5581_v6 = vmul.f32 1.442695, %v5511_v13  ;;  %v5138_v53 = vsel %vm4576_vm3, %v15175_v40, 0.0  ;;  %v17898_v13 = vld [vmem:[#allocation164_spill] sm:$0xff] }
 0x33e   :  { %11127 = vpow2.f32 %v5573_v47  ;;  %10610 = vmatmul.mubr.msk.bf16.vlgmr.msra.gmra.mxu1 %vm4576_vm3, %v5288_v42  ;;  %5133 = vadd.xlane.f32.xlu1 %v5132_v1  ;;  %v15196_v8 = vpop.eup %11109  ;;  %v5141_v3 = vsel %vm4576_vm3, %v15182_v51, 0.0  ;;  %v5585_v48 = vmul.f32 1.442695, %v5513_v23  ;;  %v5514_v4 = vsub.f32 %v17898_v13, %v14861_v37 }
 0x33f   :  { %10620 = vmatpush3.bf16.msra.mxu1 %v17893_v45  ;;  %5136 = vadd.xlane.f32.xlu0 %v5135_v56  ;;  %v15189_v47 = vpop.xlane.xlu1 %5413  ;;  %17894 = vst [vmem:[#allocation138_spill] sm:$0xff] %v15196_v8  ;;  %11129 = vpow2.f32 %v5575_v60  ;;  %v15201_v61 = vpop.eup %11111  ;;  %v5583_v12 = vmul.f32 1.442695, %v5512_v31  ;;  %v5144_v31 = vsel %vm4576_vm3, %v15196_v8, 0.0  ;;  %v17900_v45 = vld [vmem:[#allocation219_spill] sm:$0xff] }
 0x340   :  { %v15191_v24 = vpop.xlane.xlu0 %5416  ;;  %10625 = vmatprep.subr.bf16.mxu0 %v17820_v44  ;;  %10621 = vmatprep.mubr.msk.bf16.mxu1 %vm11597_vm2, %v17820_v44  ;;  %17895 = vst [vmem:[#allocation56_spill] sm:$0xff] %v15201_v61  ;;  %11131 = vpow2.f32 %v5577_v22  ;;  %v15205_v42 = vpop.eup %11113  ;;  %v17899_v22 = vld [vmem:[#allocation163_spill] sm:$0xff]  ;;  %v5147_v26 = vsel %vm4576_vm3, %v15201_v61, 0.0  ;;  %v17904_v61 = vld [vmem:[#allocation224_spill] sm:$0xff] }
 0x341   :  { %10631 = vmatprep.subr.bf16.mxu1 %v17820_v44  ;;  %17896 = vst [vmem:[#allocation53_spill] sm:$0xff] %v15205_v42  ;;  %v15209_v60 = vpop.eup %11115  ;;  %11133 = vpow2.f32 %v5579_v59  ;;  %v5515_v2 = vsub.f32 %v17899_v22, %v14863_v46  ;;  %v5150_v15 = vsel %vm4576_vm3, %v15205_v42, 0.0  ;;  %v5587_v46 = vmul.f32 1.442695, %v5514_v4  ;;  %v17902_v22 = vld [vmem:[#allocation165_spill] sm:$0xff]  ;;  %v17905_v4 = vld [vmem:[#allocation227_spill] sm:$0xff] }
 0x342   :  { %5139 = vadd.xlane.f32.xlu1 %v5138_v53  ;;  %17897 = vst [vmem:[#allocation139_spill] sm:$0xff] %v15209_v60  ;;  %v11118_v1 = vpop.eup %11117  ;;  %11135 = vpow2.f32 %v5581_v6  ;;  %v5697_v37 = vsel %vm4576_vm3, %v15209_v60, 0.0  ;;  %v17901_v6 = vld [vmem:[#allocation223_spill] sm:$0xff] }
 0x343   :  { %5142 = vadd.xlane.f32.xlu0 %v5141_v3  ;;  %v15207_v43 = vpop.xlane.xlu1 %5419  ;;  %11137 = vpow2.f32 %v5583_v12  ;;  %v5233_v59 = vmul.f32 %v11118_v1, %v17900_v45  ;;  %v5589_v13 = vmul.f32 1.442695, %v5515_v2 }
 0x344   :  { %v5023_v10 = vpop.xlane.xlu0 %5022  ;;  %11139 = vpow2.f32 %v5585_v48  ;;  %v5516_v48 = vsub.f32 %v17902_v22, %v14875_v21  ;;  %v17913_v22 = vld [vmem:[#allocation83_spill] sm:$0xff] }
 0x345   :  { %11141 = vrcp.f32 %v5023_v10 }
 0x346   :  { %v11120_v56 = vpop.eup %11119  ;;  %5145 = vadd.xlane.f32.xlu1 %v5144_v31  ;;  %v17903_v31 = vld [vmem:[#allocation166_spill] sm:$0xff] }
 0x347   :  { %v11122_v23 = vpop.eup %11121  ;;  %5148 = vadd.xlane.f32.xlu0 %v5147_v26  ;;  %v5026_v54 = vpop.xlane.xlu1 %5025  ;;  %v5517_v26 = vsub.f32 %v17903_v31, %v14877_v9  ;;  %v5235_v42 = vmul.f32 %v11120_v56, %v17904_v61  ;;  %v5591_v61 = vmul.f32 1.442695, %v5516_v48  ;;  %v17907_v56 = vld [vmem:[#allocation167_spill] sm:$0xff]  ;;  %v17914_v48 = vld [vmem:[#allocation82_spill] sm:$0xff] }
 0x348   :  { %v5234_v53 = vmul.f32 %v11122_v23, %v17901_v6  ;;  %v5029_v12 = vpop.xlane.xlu0 %5028  ;;  %v17906_v23 = vld [vmem:[#allocation168_spill] sm:$0xff]  ;;  %v17915_v31 = vpack.c.bf16 %v17913_v22, %v17914_v48 }
 0x349   :  { %v11124_v3 = vpop.eup %11123  ;;  %11143 = vrcp.f32 %v5029_v12  ;;  %v5518_v21 = vsub.f32 %v17906_v23, %v14887_v7  ;;  %v17912_v12 = vld [vmem:[#allocation171_spill] sm:$0xff] }
 0x34a   :  { %v15229_v60 = vpop.eup %11125  ;;  %v5236_v8 = vmul.f32 %v11124_v3, %v17905_v4  ;;  %11145 = vrcp.f32 %v5026_v54  ;;  %v5289_v1 = vpack.c.bf16 %v5234_v53, %v5233_v59  ;;  %5151 = vadd.xlane.f32.xlu1 %v5150_v15  ;;  %v5519_v54 = vsub.f32 %v17907_v56, %v14889_v34  ;;  %v17908_v59 = vld [vmem:[#allocation87_spill] sm:$0xff]  ;;  %v17909_v15 = vld [vmem:[#allocation85_spill] sm:$0xff] }
 0x34b   :  { %v15233_v10 = vpop.eup %11127  ;;  %5698 = vadd.xlane.f32.xlu0 %v5697_v37  ;;  %v5032_v2 = vpop.xlane.xlu1 %5031  ;;  %v17910_v6 = vpack.c.bf16 %v17908_v59, %v17909_v15  ;;  %v5700_v37 = vsel %vm4576_vm3, %v15229_v60, 0.0  ;;  %v5593_v53 = vmul.f32 1.442695, %v5517_v26  ;;  %v5521_v3 = vsub.f32 %v17912_v12, %v14917_v0 }
 0x34c   :  { %10616 = vmatmul.mubr.msk.bf16.vlgmr.msra.gmra.mxu0 %vm4576_vm3, %v5289_v1  ;;  %11147 = vrcp.f32 %v5032_v2  ;;  %v15238_v9 = vpop.xlane.xlu0 %5422  ;;  %v5290_v45 = vpack.c.bf16 %v5236_v8, %v5235_v42  ;;  %v15249_v7 = vpop.eup %11129  ;;  %v17911_v8 = vld [vmem:[#allocation169_spill] sm:$0xff]  ;;  %v5703_v34 = vsel %vm4576_vm3, %v15233_v10, 0.0  ;;  %v5595_v26 = vmul.f32 1.442695, %v5518_v21 }
 0x34d   :  { %11149 = vpow2.f32 %v5587_v46  ;;  %10626 = vmatpush3.bf16.msra.mxu0 %v17910_v6  ;;  %10627 = vmatprep.mubr.msk.bf16.mxu0 %vm11597_vm2, %v17820_v44  ;;  %v5520_v42 = vsub.f32 %v17911_v8, %v14895_v16  ;;  %v15256_v46 = vpop.eup %11131  ;;  %v5597_v1 = vmul.f32 1.442695, %v5519_v54  ;;  %v5706_v0 = vsel %vm4576_vm3, %v15249_v7, 0.0  ;;  %v17920_v54 = vld [vmem:[#allocation175_spill] sm:$0xff] }
 0x34e   :  { %11151 = vpow2.f32 %v5589_v13  ;;  %10622 = vmatmul.mubr.msk.bf16.vlgmr.msra.gmra.mxu1 %vm4576_vm3, %v5290_v45  ;;  %5701 = vadd.xlane.f32.xlu1 %v5700_v37  ;;  %v15270_v4 = vpop.eup %11133  ;;  %v5709_v21 = vsel %vm4576_vm3, %v15256_v46, 0.0  ;;  %v5601_v56 = vmul.f32 1.442695, %v5521_v3  ;;  %v5522_v15 = vsub.f32 %v17920_v54, %v14927_v30 }
 0x34f   :  { %10632 = vmatpush3.bf16.msra.mxu1 %v17915_v31  ;;  %5704 = vadd.xlane.f32.xlu0 %v5703_v34  ;;  %v15263_v13 = vpop.xlane.xlu1 %5425  ;;  %17916 = vst [vmem:[#allocation234_spill] sm:$0xff] %v15270_v4  ;;  %11153 = vpow2.f32 %v5591_v61  ;;  %v15275_v2 = vpop.eup %11135  ;;  %v5599_v23 = vmul.f32 1.442695, %v5520_v42  ;;  %v5712_v42 = vsel %vm4576_vm3, %v15270_v4, 0.0  ;;  %v17922_v31 = vld [vmem:[#allocation233_spill] sm:$0xff] }
 0x350   :  { %v15265_v16 = vpop.xlane.xlu0 %5428  ;;  %10637 = vmatprep.subr.bf16.mxu0 %v17820_v44  ;;  %10633 = vmatprep.mubr.msk.bf16.mxu1 %vm11597_vm2, %v17820_v44  ;;  %17917 = vst [vmem:[#allocation140_spill] sm:$0xff] %v15275_v2  ;;  %11155 = vpow2.f32 %v5593_v53  ;;  %v15279_v45 = vpop.eup %11137  ;;  %v17921_v53 = vld [vmem:[#allocation172_spill] sm:$0xff]  ;;  %v5715_v12 = vsel %vm4576_vm3, %v15275_v2, 0.0  ;;  %v17926_v2 = vld [vmem:[#allocation238_spill] sm:$0xff] }
 0x351   :  { %10643 = vmatprep.subr.bf16.mxu1 %v17820_v44  ;;  %17918 = vst [vmem:[#allocation141_spill] sm:$0xff] %v15279_v45  ;;  %v15283_v61 = vpop.eup %11139  ;;  %11157 = vpow2.f32 %v5595_v26  ;;  %v5523_v8 = vsub.f32 %v17921_v53, %v14929_v55  ;;  %v5718_v48 = vsel %vm4576_vm3, %v15279_v45, 0.0  ;;  %v5603_v55 = vmul.f32 1.442695, %v5522_v15  ;;  %v17924_v53 = vld [vmem:[#allocation176_spill] sm:$0xff] }
 0x352   :  { %5707 = vadd.xlane.f32.xlu1 %v5706_v0  ;;  %17919 = vst [vmem:[#allocation182_spill] sm:$0xff] %v15283_v61  ;;  %v11142_v37 = vpop.eup %11141  ;;  %11159 = vpow2.f32 %v5597_v1  ;;  %v5721_v30 = vsel %vm4576_vm3, %v15283_v61, 0.0  ;;  %v17923_v1 = vld [vmem:[#allocation237_spill] sm:$0xff]  ;;  %v17927_v15 = vld [vmem:[#allocation240_spill] sm:$0xff] }
 0x353   :  { %5710 = vadd.xlane.f32.xlu0 %v5709_v21  ;;  %v15281_v59 = vpop.xlane.xlu1 %5431  ;;  %11161 = vpow2.f32 %v5599_v23  ;;  %v5237_v26 = vmul.f32 %v11142_v37, %v17922_v31  ;;  %v5605_v54 = vmul.f32 1.442695, %v5523_v8 }
 0x354   :  { %v5035_v6 = vpop.xlane.xlu0 %5034  ;;  %11163 = vpow2.f32 %v5601_v56  ;;  %v5524_v56 = vsub.f32 %v17924_v53, %v14937_v52  ;;  %v17935_v53 = vld [vmem:[#allocation90_spill] sm:$0xff] }
 0x355   :  { %11165 = vrcp.f32 %v5035_v6 }
 0x356   :  { %v11144_v34 = vpop.eup %11143  ;;  %5713 = vadd.xlane.f32.xlu1 %v5712_v42  ;;  %v17925_v42 = vld [vmem:[#allocation178_spill] sm:$0xff] }
 0x357   :  { %v11146_v3 = vpop.eup %11145  ;;  %5716 = vadd.xlane.f32.xlu0 %v5715_v12  ;;  %v5038_v22 = vpop.xlane.xlu1 %5037  ;;  %v5525_v12 = vsub.f32 %v17925_v42, %v14962_v38  ;;  %v5239_v45 = vmul.f32 %v11144_v34, %v17926_v2  ;;  %v5607_v2 = vmul.f32 1.442695, %v5524_v56  ;;  %v17929_v34 = vld [vmem:[#allocation179_spill] sm:$0xff]  ;;  %v17936_v56 = vld [vmem:[#allocation88_spill] sm:$0xff] }
 0x358   :  { %v5238_v0 = vmul.f32 %v11146_v3, %v17923_v1  ;;  %v5041_v23 = vpop.xlane.xlu0 %5040  ;;  %v17928_v3 = vld [vmem:[#allocation180_spill] sm:$0xff]  ;;  %v17937_v42 = vpack.c.bf16 %v17935_v53, %v17936_v56 }
 0x359   :  { %v11148_v21 = vpop.eup %11147  ;;  %11167 = vrcp.f32 %v5041_v23  ;;  %v5526_v52 = vsub.f32 %v17928_v3, %v14981_v58  ;;  %v17934_v23 = vld [vmem:[#allocation183_spill] sm:$0xff] }
 0x35a   :  { %v15303_v61 = vpop.eup %11149  ;;  %v5240_v4 = vmul.f32 %v11148_v21, %v17927_v15  ;;  %11169 = vrcp.f32 %v5038_v22  ;;  %v5291_v37 = vpack.c.bf16 %v5238_v0, %v5237_v26  ;;  %5719 = vadd.xlane.f32.xlu1 %v5718_v48  ;;  %v5527_v22 = vsub.f32 %v17929_v34, %v14983_v35  ;;  %v17930_v26 = vld [vmem:[#allocation93_spill] sm:$0xff]  ;;  %v17931_v48 = vld [vmem:[#allocation91_spill] sm:$0xff] }
 0x35b   :  { %v15307_v6 = vpop.eup %11151  ;;  %5722 = vadd.xlane.f32.xlu0 %v5721_v30  ;;  %v5044_v8 = vpop.xlane.xlu1 %5043  ;;  %v17932_v1 = vpack.c.bf16 %v17930_v26, %v17931_v48  ;;  %v5724_v30 = vsel %vm4576_vm3, %v15303_v61, 0.0  ;;  %v5609_v0 = vmul.f32 1.442695, %v5525_v12  ;;  %v5529_v21 = vsub.f32 %v17934_v23, %v15024_v50 }
 0x35c   :  { %10628 = vmatmul.mubr.msk.bf16.vlgmr.msra.gmra.mxu0 %vm4576_vm3, %v5291_v37  ;;  %11171 = vrcp.f32 %v5044_v8  ;;  %v15312_v38 = vpop.xlane.xlu0 %5434  ;;  %v5292_v31 = vpack.c.bf16 %v5240_v4, %v5239_v45  ;;  %v15323_v58 = vpop.eup %11153  ;;  %v17933_v4 = vld [vmem:[#allocation181_spill] sm:$0xff]  ;;  %v5727_v35 = vsel %vm4576_vm3, %v15307_v6, 0.0  ;;  %v5611_v12 = vmul.f32 1.442695, %v5526_v52 }
 0x35d   :  { %11173 = vpow2.f32 %v5603_v55  ;;  %10638 = vmatpush3.bf16.msra.mxu0 %v17932_v1  ;;  %10639 = vmatprep.mubr.msk.bf16.mxu0 %vm11597_vm2, %v17820_v44  ;;  %v5528_v45 = vsub.f32 %v17933_v4, %v14997_v29  ;;  %v15330_v55 = vpop.eup %11155  ;;  %v5613_v37 = vmul.f32 1.442695, %v5527_v22  ;;  %v5730_v50 = vsel %vm4576_vm3, %v15323_v58, 0.0  ;;  %v17942_v22 = vld [vmem:[#allocation187_spill] sm:$0xff] }
 0x35e   :  { %11175 = vpow2.f32 %v5605_v54  ;;  %10634 = vmatmul.mubr.msk.bf16.vlgmr.msra.gmra.mxu1 %vm4576_vm3, %v5292_v31  ;;  %5725 = vadd.xlane.f32.xlu1 %v5724_v30  ;;  %v15344_v15 = vpop.eup %11157  ;;  %v5733_v52 = vsel %vm4576_vm3, %v15330_v55, 0.0  ;;  %v5617_v34 = vmul.f32 1.442695, %v5529_v21  ;;  %v5530_v48 = vsub.f32 %v17942_v22, %v15047_v36 }
 0x35f   :  { %10644 = vmatpush3.bf16.msra.mxu1 %v17937_v42  ;;  %5728 = vadd.xlane.f32.xlu0 %v5727_v35  ;;  %v15337_v54 = vpop.xlane.xlu1 %5437  ;;  %17938 = vst [vmem:[#allocation185_spill] sm:$0xff] %v15344_v15  ;;  %11177 = vpow2.f32 %v5607_v2  ;;  %v15349_v8 = vpop.eup %11159  ;;  %v5615_v3 = vmul.f32 1.442695, %v5528_v45  ;;  %v5736_v45 = vsel %vm4576_vm3, %v15344_v15, 0.0  ;;  %v17944_v42 = vld [vmem:[#allocation243_spill] sm:$0xff] }
 0x360   :  { %v15339_v29 = vpop.xlane.xlu0 %5440  ;;  %10649 = vmatprep.subr.bf16.mxu0 %v17820_v44  ;;  %10645 = vmatprep.mubr.msk.bf16.mxu1 %vm11597_vm2, %v17820_v44  ;;  %17939 = vst [vmem:[#allocation142_spill] sm:$0xff] %v15349_v8  ;;  %11179 = vpow2.f32 %v5609_v0  ;;  %v15353_v31 = vpop.eup %11161  ;;  %v17943_v0 = vld [vmem:[#allocation184_spill] sm:$0xff]  ;;  %v5739_v23 = vsel %vm4576_vm3, %v15349_v8, 0.0  ;;  %v17948_v8 = vld [vmem:[#allocation245_spill] sm:$0xff] }
 0x361   :  { %10655 = vmatprep.subr.bf16.mxu1 %v17820_v44  ;;  %17940 = vst [vmem:[#allocation186_spill] sm:$0xff] %v15353_v31  ;;  %v15357_v2 = vpop.eup %11163  ;;  %11181 = vpow2.f32 %v5611_v12  ;;  %v5531_v4 = vsub.f32 %v17943_v0, %v15049_v18  ;;  %v5742_v56 = vsel %vm4576_vm3, %v15353_v31, 0.0  ;;  %v5619_v18 = vmul.f32 1.442695, %v5530_v48  ;;  %v17946_v0 = vld [vmem:[#allocation188_spill] sm:$0xff]  ;;  %v17949_v48 = vld [vmem:[#allocation246_spill] sm:$0xff] }
 0x362   :  { %5731 = vadd.xlane.f32.xlu1 %v5730_v50  ;;  %17941 = vst [vmem:[#allocation189_spill] sm:$0xff] %v15357_v2  ;;  %v11166_v30 = vpop.eup %11165  ;;  %11183 = vpow2.f32 %v5613_v37  ;;  %v5745_v36 = vsel %vm4576_vm3, %v15357_v2, 0.0  ;;  %v17945_v37 = vld [vmem:[#allocation244_spill] sm:$0xff] }
 0x363   :  { %5734 = vadd.xlane.f32.xlu0 %v5733_v52  ;;  %v15355_v26 = vpop.xlane.xlu1 %5443  ;;  %11185 = vpow2.f32 %v5615_v3  ;;  %v5241_v12 = vmul.f32 %v11166_v30, %v17944_v42  ;;  %v5621_v22 = vmul.f32 1.442695, %v5531_v4 }
 0x364   :  { %v5047_v1 = vpop.xlane.xlu0 %5046  ;;  %11187 = vpow2.f32 %v5617_v34  ;;  %v5532_v34 = vsub.f32 %v17946_v0, %v15059_v14  ;;  %v17957_v0 = vld [vmem:[#allocation95_spill] sm:$0xff] }
 0x365   :  { %11189 = vrcp.f32 %v5047_v1 }
 0x366   :  { %v11168_v35 = vpop.eup %11167  ;;  %5737 = vadd.xlane.f32.xlu1 %v5736_v45  ;;  %v17947_v45 = vld [vmem:[#allocation190_spill] sm:$0xff] }
 0x367   :  { %v11170_v21 = vpop.eup %11169  ;;  %5740 = vadd.xlane.f32.xlu0 %v5739_v23  ;;  %v5050_v53 = vpop.xlane.xlu1 %5049  ;;  %v5533_v23 = vsub.f32 %v17947_v45, %v15090_v62  ;;  %v5243_v31 = vmul.f32 %v11168_v35, %v17948_v8  ;;  %v5623_v8 = vmul.f32 1.442695, %v5532_v34  ;;  %v17951_v35 = vld [vmem:[#allocation191_spill] sm:$0xff] }
 0x368   :  { %v5242_v50 = vmul.f32 %v11170_v21, %v17945_v37  ;;  %v5053_v3 = vpop.xlane.xlu0 %5052  ;;  %v17950_v21 = vld [vmem:[#allocation192_spill] sm:$0xff]  ;;  %v17958_v34 = vld [vmem:[#allocation15_spill] sm:$0xff] }
 0x369   :  { %v11172_v52 = vpop.eup %11171  ;;  %11191 = vrcp.f32 %v5053_v3  ;;  %v5534_v14 = vsub.f32 %v17950_v21, %v15115_v27  ;;  %v17956_v3 = vld [vmem:[#allocation195_spill] sm:$0xff]  ;;  %v17959_v45 = vpack.c.bf16 %v17957_v0, %v17958_v34 }
 0x36a   :  { %v15377_v2 = vpop.eup %11173  ;;  %v5244_v15 = vmul.f32 %v11172_v52, %v17949_v48  ;;  %11193 = vrcp.f32 %v5050_v53  ;;  %v5293_v30 = vpack.c.bf16 %v5242_v50, %v5241_v12  ;;  %5743 = vadd.xlane.f32.xlu1 %v5742_v56  ;;  %v5535_v53 = vsub.f32 %v17951_v35, %v15117_v41  ;;  %v17952_v12 = vld [vmem:[#allocation99_spill] sm:$0xff]  ;;  %v17953_v56 = vld [vmem:[#allocation97_spill] sm:$0xff] }
 0x36b   :  { %v15381_v1 = vpop.eup %11175  ;;  %5746 = vadd.xlane.f32.xlu0 %v5745_v36  ;;  %v5056_v4 = vpop.xlane.xlu1 %5055  ;;  %v17954_v37 = vpack.c.bf16 %v17952_v12, %v17953_v56  ;;  %v5748_v36 = vsel %vm4576_vm3, %v15377_v2, 0.0  ;;  %v5625_v50 = vmul.f32 1.442695, %v5533_v23  ;;  %v5537_v52 = vsub.f32 %v17956_v3, %v15164_v57 }
 0x36c   :  { %10640 = vmatmul.mubr.msk.bf16.vlgmr.msra.gmra.mxu0 %vm4576_vm3, %v5293_v30  ;;  %11195 = vrcp.f32 %v5056_v4  ;;  %v15386_v62 = vpop.xlane.xlu0 %5446  ;;  %v5294_v42 = vpack.c.bf16 %v5244_v15, %v5243_v31  ;;  %v15397_v27 = vpop.eup %11177  ;;  %v17955_v15 = vld [vmem:[#allocation193_spill] sm:$0xff]  ;;  %v5751_v41 = vsel %vm4576_vm3, %v15381_v1, 0.0  ;;  %v5627_v23 = vmul.f32 1.442695, %v5534_v14 }
 0x36d   :  { %11197 = vpow2.f32 %v5619_v18  ;;  %10650 = vmatpush3.bf16.msra.mxu0 %v17954_v37  ;;  %10651 = vmatprep.mubr.msk.bf16.mxu0 %vm11597_vm2, %v17820_v44  ;;  %v5536_v31 = vsub.f32 %v17955_v15, %v15133_v25  ;;  %v15404_v18 = vpop.eup %11179  ;;  %v5629_v30 = vmul.f32 1.442695, %v5535_v53  ;;  %v5754_v57 = vsel %vm4576_vm3, %v15397_v27, 0.0  ;;  %v17964_v53 = vld [vmem:[#allocation199_spill] sm:$0xff] }
 0x36e   :  { %11199 = vpow2.f32 %v5621_v22  ;;  %10646 = vmatmul.mubr.msk.bf16.vlgmr.msra.gmra.mxu1 %vm4576_vm3, %v5294_v42  ;;  %5749 = vadd.xlane.f32.xlu1 %v5748_v36  ;;  %v15418_v48 = vpop.eup %11181  ;;  %v5757_v14 = vsel %vm4576_vm3, %v15404_v18, 0.0  ;;  %v5633_v35 = vmul.f32 1.442695, %v5537_v52  ;;  %v5538_v56 = vsub.f32 %v17964_v53, %v15189_v47 }
 0x36f   :  { %10656 = vmatpush3.bf16.msra.mxu1 %v17959_v45  ;;  %5752 = vadd.xlane.f32.xlu0 %v5751_v41  ;;  %v15411_v22 = vpop.xlane.xlu1 %5449  ;;  %17960 = vst [vmem:[#allocation144_spill] sm:$0xff] %v15418_v48  ;;  %11201 = vpow2.f32 %v5623_v8  ;;  %v15423_v4 = vpop.eup %11183  ;;  %v5631_v21 = vmul.f32 1.442695, %v5536_v31  ;;  %v5760_v31 = vsel %vm4576_vm3, %v15418_v48, 0.0  ;;  %v17966_v45 = vld [vmem:[#allocation247_spill] sm:$0xff] }
 0x370   :  { %v15413_v25 = vpop.xlane.xlu0 %5452  ;;  %10661 = vmatprep.subr.bf16.mxu0 %v17820_v44  ;;  %10657 = vmatprep.mubr.msk.bf16.mxu1 %vm11597_vm2, %v17820_v44  ;;  %17961 = vst [vmem:[#allocation143_spill] sm:$0xff] %v15423_v4  ;;  %11203 = vpow2.f32 %v5625_v50  ;;  %v15427_v42 = vpop.eup %11185  ;;  %v17965_v50 = vld [vmem:[#allocation196_spill] sm:$0xff]  ;;  %v5763_v3 = vsel %vm4576_vm3, %v15423_v4, 0.0  ;;  %v17970_v4 = vld [vmem:[#allocation249_spill] sm:$0xff] }
 0x371   :  { %10667 = vmatprep.subr.bf16.mxu1 %v17820_v44  ;;  %17962 = vst [vmem:[#allocation68_spill] sm:$0xff] %v15427_v42  ;;  %v15431_v8 = vpop.eup %11187  ;;  %11205 = vpow2.f32 %v5627_v23  ;;  %v5539_v15 = vsub.f32 %v17965_v50, %v15191_v24  ;;  %v5766_v34 = vsel %vm4576_vm3, %v15427_v42, 0.0  ;;  %v5635_v24 = vmul.f32 1.442695, %v5538_v56  ;;  %v17968_v50 = vld [vmem:[#allocation200_spill] sm:$0xff]  ;;  %v17971_v56 = vld [vmem:[#allocation250_spill] sm:$0xff] }
 0x372   :  { %5755 = vadd.xlane.f32.xlu1 %v5754_v57  ;;  %17963 = vst [vmem:[#allocation66_spill] sm:$0xff] %v15431_v8  ;;  %v11190_v36 = vpop.eup %11189  ;;  %11207 = vpow2.f32 %v5629_v30  ;;  %v5769_v47 = vsel %vm4576_vm3, %v15431_v8, 0.0  ;;  %v17967_v30 = vld [vmem:[#allocation248_spill] sm:$0xff] }
 0x373   :  { %5758 = vadd.xlane.f32.xlu0 %v5757_v14  ;;  %v15429_v12 = vpop.xlane.xlu1 %5455  ;;  %11209 = vpow2.f32 %v5631_v21  ;;  %v5245_v23 = vmul.f32 %v11190_v36, %v17966_v45  ;;  %v5637_v53 = vmul.f32 1.442695, %v5539_v15 }
 0x374   :  { %v5059_v37 = vpop.xlane.xlu0 %5058  ;;  %11211 = vpow2.f32 %v5633_v35  ;;  %v5540_v35 = vsub.f32 %v17968_v50, %v15207_v43  ;;  %v17979_v50 = vld [vmem:[#allocation19_spill] sm:$0xff] }
 0x375   :  { %11213 = vrcp.f32 %v5059_v37 }
 0x376   :  { %v11192_v41 = vpop.eup %11191  ;;  %5761 = vadd.xlane.f32.xlu1 %v5760_v31  ;;  %v17969_v31 = vld [vmem:[#allocation202_spill] sm:$0xff] }
 0x377   :  { %v11194_v52 = vpop.eup %11193  ;;  %5764 = vadd.xlane.f32.xlu0 %v5763_v3  ;;  %v5062_v0 = vpop.xlane.xlu1 %5061  ;;  %v5541_v3 = vsub.f32 %v17969_v31, %v15238_v9  ;;  %v5247_v42 = vmul.f32 %v11192_v41, %v17970_v4  ;;  %v5639_v4 = vmul.f32 1.442695, %v5540_v35  ;;  %v17973_v41 = vld [vmem:[#allocation203_spill] sm:$0xff]  ;;  %v17980_v35 = vld [vmem:[#allocation12_spill] sm:$0xff] }
 0x378   :  { %v5246_v57 = vmul.f32 %v11194_v52, %v17967_v30  ;;  %v5065_v21 = vpop.xlane.xlu0 %5064  ;;  %v17972_v52 = vld [vmem:[#allocation204_spill] sm:$0xff]  ;;  %v17981_v31 = vpack.c.bf16 %v17979_v50, %v17980_v35 }
 0x379   :  { %v11196_v14 = vpop.eup %11195  ;;  %11215 = vrcp.f32 %v5065_v21  ;;  %v5542_v43 = vsub.f32 %v17972_v52, %v15263_v13  ;;  %v17978_v21 = vld [vmem:[#allocation207_spill] sm:$0xff] }
 0x37a   :  { %v15451_v8 = vpop.eup %11197  ;;  %v5248_v48 = vmul.f32 %v11196_v14, %v17971_v56  ;;  %11217 = vrcp.f32 %v5062_v0  ;;  %v5295_v36 = vpack.c.bf16 %v5246_v57, %v5245_v23  ;;  %5767 = vadd.xlane.f32.xlu1 %v5766_v34  ;;  %v5543_v0 = vsub.f32 %v17973_v41, %v15265_v16  ;;  %v17974_v23 = vld [vmem:[#allocation103_spill] sm:$0xff]  ;;  %v17975_v34 = vld [vmem:[#allocation101_spill] sm:$0xff] }
 0x37b   :  { %v15455_v37 = vpop.eup %11199  ;;  %5770 = vadd.xlane.f32.xlu0 %v5769_v47  ;;  %v5068_v15 = vpop.xlane.xlu1 %5067  ;;  %v17976_v30 = vpack.c.bf16 %v17974_v23, %v17975_v34  ;;  %v5772_v47 = vsel %vm4576_vm3, %v15451_v8, 0.0  ;;  %v5641_v57 = vmul.f32 1.442695, %v5541_v3  ;;  %v5545_v14 = vsub.f32 %v17978_v21, %v15312_v38 }
 0x37c   :  { %10652 = vmatmul.mubr.msk.bf16.vlgmr.msra.gmra.mxu0 %vm4576_vm3, %v5295_v36  ;;  %11219 = vrcp.f32 %v5068_v15  ;;  %v15460_v9 = vpop.xlane.xlu0 %5458  ;;  %v5296_v45 = vpack.c.bf16 %v5248_v48, %v5247_v42  ;;  %v15471_v13 = vpop.eup %11201  ;;  %v17977_v48 = vld [vmem:[#allocation205_spill] sm:$0xff]  ;;  %v5775_v16 = vsel %vm4576_vm3, %v15455_v37, 0.0  ;;  %v5643_v3 = vmul.f32 1.442695, %v5542_v43 }
 0x37d   :  { %11221 = vpow2.f32 %v5635_v24  ;;  %10662 = vmatpush3.bf16.msra.mxu0 %v17976_v30  ;;  %10663 = vmatprep.mubr.msk.bf16.mxu0 %vm11597_vm2, %v17820_v44  ;;  %v5544_v42 = vsub.f32 %v17977_v48, %v15281_v59  ;;  %v15478_v24 = vpop.eup %11203  ;;  %v5645_v36 = vmul.f32 1.442695, %v5543_v0  ;;  %v5778_v38 = vsel %vm4576_vm3, %v15471_v13, 0.0  ;;  %v17986_v0 = vld [vmem:[#allocation211_spill] sm:$0xff] }
 0x37e   :  { %11223 = vpow2.f32 %v5637_v53  ;;  %10658 = vmatmul.mubr.msk.bf16.vlgmr.msra.gmra.mxu1 %vm4576_vm3, %v5296_v45  ;;  %5773 = vadd.xlane.f32.xlu1 %v5772_v47  ;;  %v15492_v56 = vpop.eup %11205  ;;  %v5781_v43 = vsel %vm4576_vm3, %v15478_v24, 0.0  ;;  %v5649_v41 = vmul.f32 1.442695, %v5545_v14  ;;  %v5546_v34 = vsub.f32 %v17986_v0, %v15337_v54 }
 0x37f   :  { %10668 = vmatpush3.bf16.msra.mxu1 %v17981_v31  ;;  %5776 = vadd.xlane.f32.xlu0 %v5775_v16  ;;  %v15485_v53 = vpop.xlane.xlu1 %5461  ;;  %17982 = vst [vmem:[#allocation145_spill] sm:$0xff] %v15492_v56  ;;  %11225 = vpow2.f32 %v5639_v4  ;;  %v15497_v15 = vpop.eup %11207  ;;  %v5647_v52 = vmul.f32 1.442695, %v5544_v42  ;;  %v5784_v42 = vsel %vm4576_vm3, %v15492_v56, 0.0  ;;  %v17988_v31 = vld [vmem:[#allocation8_spill] sm:$0xff] }
 0x380   :  { %v15487_v59 = vpop.xlane.xlu0 %5464  ;;  %10673 = vmatprep.subr.bf16.mxu0 %v17820_v44  ;;  %10669 = vmatprep.mubr.msk.bf16.mxu1 %vm11597_vm2, %v17820_v44  ;;  %17983 = vst [vmem:[#allocation146_spill] sm:$0xff] %v15497_v15  ;;  %11227 = vpow2.f32 %v5641_v57  ;;  %v15501_v45 = vpop.eup %11209  ;;  %v17987_v57 = vld [vmem:[#allocation208_spill] sm:$0xff]  ;;  %v5787_v21 = vsel %vm4576_vm3, %v15497_v15, 0.0  ;;  %v17992_v15 = vld [vmem:[#allocation251_spill] sm:$0xff] }
 0x381   :  { %10679 = vmatprep.subr.bf16.mxu1 %v17820_v44  ;;  %17984 = vst [vmem:[#allocation64_spill] sm:$0xff] %v15501_v45  ;;  %v15505_v4 = vpop.eup %11211  ;;  %11229 = vpow2.f32 %v5643_v3  ;;  %v5547_v48 = vsub.f32 %v17987_v57, %v15339_v29  ;;  %v5790_v35 = vsel %vm4576_vm3, %v15501_v45, 0.0  ;;  %v5651_v29 = vmul.f32 1.442695, %v5546_v34  ;;  %v17990_v57 = vld [vmem:[#allocation212_spill] sm:$0xff] }
 0x382   :  { %5779 = vadd.xlane.f32.xlu1 %v5778_v38  ;;  %17985 = vst [vmem:[#allocation61_spill] sm:$0xff] %v15505_v4  ;;  %v11214_v47 = vpop.eup %11213  ;;  %11231 = vpow2.f32 %v5645_v36  ;;  %v5793_v54 = vsel %vm4576_vm3, %v15505_v4, 0.0  ;;  %v17989_v36 = vld [vmem:[#allocation7_spill] sm:$0xff]  ;;  %v17993_v34 = vld [vmem:[#allocation252_spill] sm:$0xff] }
 0x383   :  { %5782 = vadd.xlane.f32.xlu0 %v5781_v43  ;;  %v15503_v23 = vpop.xlane.xlu1 %5467  ;;  %11233 = vpow2.f32 %v5647_v52  ;;  %v5249_v3 = vmul.f32 %v11214_v47, %v17988_v31  ;;  %v5653_v0 = vmul.f32 1.442695, %v5547_v48 }
 0x384   :  { %v5071_v30 = vpop.xlane.xlu0 %5070  ;;  %11235 = vpow2.f32 %v5649_v41  ;;  %v5548_v41 = vsub.f32 %v17990_v57, %v15355_v26  ;;  %v18001_v57 = vld [vmem:[#allocation24_spill] sm:$0xff] }
 0x385   :  { %11237 = vrcp.f32 %v5071_v30 }
 0x386   :  { %v11216_v16 = vpop.eup %11215  ;;  %5785 = vadd.xlane.f32.xlu1 %v5784_v42  ;;  %v17991_v42 = vld [vmem:[#allocation214_spill] sm:$0xff] }
 0x387   :  { %v11218_v14 = vpop.eup %11217  ;;  %5788 = vadd.xlane.f32.xlu0 %v5787_v21  ;;  %v5074_v50 = vpop.xlane.xlu1 %5073  ;;  %v5549_v21 = vsub.f32 %v17991_v42, %v15386_v62  ;;  %v5251_v45 = vmul.f32 %v11216_v16, %v17992_v15  ;;  %v5655_v15 = vmul.f32 1.442695, %v5548_v41  ;;  %v17995_v16 = vld [vmem:[#allocation215_spill] sm:$0xff]  ;;  %v18002_v41 = vld [vmem:[#allocation10_spill] sm:$0xff] }
 0x388   :  { %v5250_v38 = vmul.f32 %v11218_v14, %v17989_v36  ;;  %v5077_v52 = vpop.xlane.xlu0 %5076  ;;  %v17994_v14 = vld [vmem:[#allocation217_spill] sm:$0xff]  ;;  %v18003_v42 = vpack.c.bf16 %v18001_v57, %v18002_v41 }
 0x389   :  { %v11220_v43 = vpop.eup %11219  ;;  %11239 = vrcp.f32 %v5077_v52  ;;  %v5550_v26 = vsub.f32 %v17994_v14, %v15411_v22  ;;  %v18000_v52 = vld [vmem:[#allocation221_spill] sm:$0xff] }
 0x38a   :  { %v15525_v4 = vpop.eup %11221  ;;  %v5252_v56 = vmul.f32 %v11220_v43, %v17993_v34  ;;  %11241 = vrcp.f32 %v5074_v50  ;;  %v5297_v47 = vpack.c.bf16 %v5250_v38, %v5249_v3  ;;  %5791 = vadd.xlane.f32.xlu1 %v5790_v35  ;;  %v5551_v50 = vsub.f32 %v17995_v16, %v15413_v25  ;;  %v17996_v3 = vld [vmem:[#allocation107_spill] sm:$0xff]  ;;  %v17997_v35 = vld [vmem:[#allocation105_spill] sm:$0xff] }
 0x38b   :  { %v15529_v30 = vpop.eup %11223  ;;  %5794 = vadd.xlane.f32.xlu0 %v5793_v54  ;;  %v5080_v48 = vpop.xlane.xlu1 %5079  ;;  %v17998_v36 = vpack.c.bf16 %v17996_v3, %v17997_v35  ;;  %v5796_v54 = vsel %vm4576_vm3, %v15525_v4, 0.0  ;;  %v5657_v38 = vmul.f32 1.442695, %v5549_v21  ;;  %v5553_v43 = vsub.f32 %v18000_v52, %v15460_v9 }
 0x38c   :  { %10664 = vmatmul.mubr.msk.bf16.vlgmr.msra.gmra.mxu0 %vm4576_vm3, %v5297_v47  ;;  %11243 = vrcp.f32 %v5080_v48  ;;  %v15534_v62 = vpop.xlane.xlu0 %5470  ;;  %v5298_v31 = vpack.c.bf16 %v5252_v56, %v5251_v45  ;;  %v15545_v22 = vpop.eup %11225  ;;  %v17999_v56 = vld [vmem:[#allocation218_spill] sm:$0xff]  ;;  %v5799_v25 = vsel %vm4576_vm3, %v15529_v30, 0.0  ;;  %v5659_v21 = vmul.f32 1.442695, %v5550_v26 }
 0x38d   :  { %11245 = vpow2.f32 %v5651_v29  ;;  %10674 = vmatpush3.bf16.msra.mxu0 %v17998_v36  ;;  %10675 = vmatprep.mubr.msk.bf16.mxu0 %vm11597_vm2, %v17820_v44  ;;  %v5552_v45 = vsub.f32 %v17999_v56, %v15429_v12  ;;  %v15552_v29 = vpop.eup %11227  ;;  %v5661_v47 = vmul.f32 1.442695, %v5551_v50  ;;  %v5802_v9 = vsel %vm4576_vm3, %v15545_v22, 0.0  ;;  %v18008_v50 = vld [vmem:[#allocation225_spill] sm:$0xff] }
 0x38e   :  { %11247 = vpow2.f32 %v5653_v0  ;;  %10670 = vmatmul.mubr.msk.bf16.vlgmr.msra.gmra.mxu1 %vm4576_vm3, %v5298_v31  ;;  %5797 = vadd.xlane.f32.xlu1 %v5796_v54  ;;  %v15566_v34 = vpop.eup %11229  ;;  %v5805_v26 = vsel %vm4576_vm3, %v15552_v29, 0.0  ;;  %v5665_v16 = vmul.f32 1.442695, %v5553_v43  ;;  %v5554_v35 = vsub.f32 %v18008_v50, %v15485_v53 }
 0x38f   :  { %10680 = vmatpush3.bf16.msra.mxu1 %v18003_v42  ;;  %5800 = vadd.xlane.f32.xlu0 %v5799_v25  ;;  %v15559_v0 = vpop.xlane.xlu1 %5473  ;;  %18004 = vst [vmem:[#allocation148_spill] sm:$0xff] %v15566_v34  ;;  %11249 = vpow2.f32 %v5655_v15  ;;  %v15571_v48 = vpop.eup %11231  ;;  %v5663_v14 = vmul.f32 1.442695, %v5552_v45  ;;  %v5808_v45 = vsel %vm4576_vm3, %v15566_v34, 0.0  ;;  %v18010_v42 = vld [vmem:[#allocation216_spill] sm:$0xff] }
 0x390   :  { %v15561_v12 = vpop.xlane.xlu0 %5476  ;;  %10685 = vmatprep.subr.bf16.mxu0 %v17820_v44  ;;  %10681 = vmatprep.mubr.msk.bf16.mxu1 %vm11597_vm2, %v17820_v44  ;;  %18005 = vst [vmem:[#allocation147_spill] sm:$0xff] %v15571_v48  ;;  %11251 = vpow2.f32 %v5657_v38  ;;  %v15575_v31 = vpop.eup %11233  ;;  %v18009_v38 = vld [vmem:[#allocation222_spill] sm:$0xff]  ;;  %v5811_v52 = vsel %vm4576_vm3, %v15571_v48, 0.0  ;;  %v18014_v48 = vld [vmem:[#allocation132_spill] sm:$0xff] }
 0x391   :  { %10691 = vmatprep.subr.bf16.mxu1 %v17820_v44  ;;  %18006 = vst [vmem:[#allocation242_spill] sm:$0xff] %v15575_v31  ;;  %v15579_v15 = vpop.eup %11235  ;;  %11253 = vpow2.f32 %v5659_v21  ;;  %v5555_v56 = vsub.f32 %v18009_v38, %v15487_v59  ;;  %v5814_v41 = vsel %vm4576_vm3, %v15575_v31, 0.0  ;;  %v5667_v59 = vmul.f32 1.442695, %v5554_v35  ;;  %v18012_v38 = vld [vmem:[#allocation226_spill] sm:$0xff]  ;;  %v18015_v35 = vld [vmem:[#allocation220_spill] sm:$0xff] }
 0x392   :  { %5803 = vadd.xlane.f32.xlu1 %v5802_v9  ;;  %18007 = vst [vmem:[#allocation241_spill] sm:$0xff] %v15579_v15  ;;  %v11238_v54 = vpop.eup %11237  ;;  %11255 = vpow2.f32 %v5661_v47  ;;  %v5817_v53 = vsel %vm4576_vm3, %v15579_v15, 0.0  ;;  %v18011_v47 = vld [vmem:[#allocation46_spill] sm:$0xff] }
 0x393   :  { %5806 = vadd.xlane.f32.xlu0 %v5805_v26  ;;  %v15577_v3 = vpop.xlane.xlu1 %5479  ;;  %11257 = vpow2.f32 %v5663_v14  ;;  %v5253_v21 = vmul.f32 %v11238_v54, %v18010_v42  ;;  %v5669_v50 = vmul.f32 1.442695, %v5555_v56 }
 0x394   :  { %v5083_v36 = vpop.xlane.xlu0 %5082  ;;  %11259 = vpow2.f32 %v5665_v16  ;;  %v5556_v16 = vsub.f32 %v18012_v38, %v15503_v23  ;;  %v18023_v38 = vld [vmem:[#allocation28_spill] sm:$0xff] }
 0x395   :  { %11261 = vrcp.f32 %v5083_v36 }
 0x396   :  { %v11240_v25 = vpop.eup %11239  ;;  %5809 = vadd.xlane.f32.xlu1 %v5808_v45  ;;  %v18013_v45 = vld [vmem:[#allocation228_spill] sm:$0xff] }
 0x397   :  { %v11242_v43 = vpop.eup %11241  ;;  %5812 = vadd.xlane.f32.xlu0 %v5811_v52  ;;  %v5086_v57 = vpop.xlane.xlu1 %5085  ;;  %v5557_v52 = vsub.f32 %v18013_v45, %v15534_v62  ;;  %v5255_v31 = vmul.f32 %v11240_v25, %v18014_v48  ;;  %v18017_v48 = vld [vmem:[#allocation229_spill] sm:$0xff] }
 0x398   :  { %v5254_v9 = vmul.f32 %v11242_v43, %v18011_v47  ;;  %v5089_v14 = vpop.xlane.xlu0 %5088  ;;  %v18016_v43 = vld [vmem:[#allocation231_spill] sm:$0xff]  ;;  %v5671_v47 = vmul.f32 1.442695, %v5556_v16  ;;  %v5559_v25 = vsub.f32 %v18017_v48, %v15561_v12  ;;  %v18024_v16 = vld [vmem:[#allocation17_spill] sm:$0xff] }
 0x399   :  { %v11244_v26 = vpop.eup %11243  ;;  %11263 = vrcp.f32 %v5089_v14  ;;  %v5558_v23 = vsub.f32 %v18016_v43, %v15559_v0  ;;  %v18022_v14 = vld [vmem:[#allocation235_spill] sm:$0xff]  ;;  %v18025_v45 = vpack.c.bf16 %v18023_v38, %v18024_v16 }
 0x39a   :  { %v15599_v15 = vpop.eup %11245  ;;  %v5256_v34 = vmul.f32 %v11244_v26, %v18015_v35  ;;  %11265 = vrcp.f32 %v5086_v57  ;;  %v5299_v54 = vpack.c.bf16 %v5254_v9, %v5253_v21  ;;  %5815 = vadd.xlane.f32.xlu1 %v5814_v41  ;;  %v18018_v57 = vld [vmem:[#allocation111_spill] sm:$0xff]  ;;  %v18019_v21 = vld [vmem:[#allocation109_spill] sm:$0xff]  ;;  %v5673_v9 = vmul.f32 1.442695, %v5557_v52 }
 0x39b   :  { %v15603_v36 = vpop.eup %11247  ;;  %5818 = vadd.xlane.f32.xlu0 %v5817_v53  ;;  %v5092_v56 = vpop.xlane.xlu1 %5091  ;;  %v18020_v41 = vpack.c.bf16 %v18018_v57, %v18019_v21  ;;  %v5820_v53 = vsel %vm4576_vm3, %v15599_v15, 0.0  ;;  %v5675_v52 = vmul.f32 1.442695, %v5558_v23 }
 0x39c   :  { %10676 = vmatmul.mubr.msk.bf16.vlgmr.msra.gmra.mxu0 %vm4576_vm3, %v5299_v54  ;;  %11267 = vrcp.f32 %v5092_v56  ;;  %v5483_v62 = vpop.xlane.xlu0 %5482  ;;  %v5300_v42 = vpack.c.bf16 %v5256_v34, %v5255_v31  ;;  %v15617_v0 = vpop.eup %11249  ;;  %v18021_v34 = vld [vmem:[#allocation232_spill] sm:$0xff]  ;;  %v5823_v12 = vsel %vm4576_vm3, %v15603_v36, 0.0  ;;  %v5677_v54 = vmul.f32 1.442695, %v5559_v25 }
 0x39d   :  { %11269 = vpow2.f32 %v5667_v59  ;;  %10686 = vmatpush3.bf16.msra.mxu0 %v18020_v41  ;;  %10687 = vmatprep.mubr.msk.bf16.mxu0 %vm11597_vm2, %v17820_v44  ;;  %v5560_v31 = vsub.f32 %v18021_v34, %v15577_v3  ;;  %v15624_v59 = vpop.eup %11251  ;;  %v5561_v26 = vsub.f32 %v18022_v14, %v5483_v62  ;;  %v5826_v56 = vsel %vm4576_vm3, %v15617_v0, 0.0  ;;  %v18028_v41 = vld [vmem:[#allocation236_spill] sm:$0xff]  ;;  %v18029_v34 = vld [vmem:[#allocation239_spill] sm:$0xff] }
 0x39e   :  { %11271 = vpow2.f32 %v5669_v50  ;;  %10682 = vmatmul.mubr.msk.bf16.vlgmr.msra.gmra.mxu1 %vm4576_vm3, %v5300_v42  ;;  %5821 = vadd.xlane.f32.xlu1 %v5820_v53  ;;  %v15633_v3 = vpop.eup %11253  ;;  %v5829_v23 = vsel %vm4576_vm3, %v15624_v59, 0.0 }
 0x39f   :  { %10692 = vmatpush3.bf16.msra.mxu1 %v18025_v45  ;;  %5824 = vadd.xlane.f32.xlu0 %v5823_v12  ;;  %v5486_v50 = vpop.xlane.xlu1 %5485  ;;  %11273 = vpow2.f32 %v5671_v47  ;;  %v15638_v43 = vpop.eup %11255  ;;  %v5679_v62 = vmul.f32 1.442695, %v5560_v31  ;;  %v5681_v48 = vmul.f32 1.442695, %v5561_v26  ;;  %v5832_v31 = vsel %vm4576_vm3, %v15633_v3, 0.0  ;;  %v18030_v45 = vld [vmem:[#allocation47_spill] sm:$0xff] }
 0x3a0   :  { %v5489_v35 = vpop.xlane.xlu0 %5488  ;;  %10697 = vmatprep.subr.bf16.mxu0 %v17820_v44  ;;  %10693 = vmatprep.mubr.msk.bf16.mxu1 %vm11597_vm2, %v17820_v44  ;;  %18026 = vst [vmem:[#allocation194_spill] sm:$0xff] %v15638_v43  ;;  %11275 = vpow2.f32 %v5673_v9  ;;  %v15642_v42 = vpop.eup %11257  ;;  %v5562_v9 = vsub.f32 %v18029_v34, %v5486_v50  ;;  %v5835_v14 = vsel %vm4576_vm3, %v15638_v43, 0.0  ;;  %v18033_v43 = vld [vmem:[#allocation136_spill] sm:$0xff] }
 0x3a1   :  { %10703 = vmatprep.subr.bf16.mxu1 %v17820_v44  ;;  %18027 = vst [vmem:[#allocation197_spill] sm:$0xff] %v15642_v42  ;;  %v15644_v47 = vpop.eup %11259  ;;  %11277 = vpow2.f32 %v5675_v52  ;;  %v5563_v53 = vsub.f32 %v18028_v41, %v5489_v35  ;;  %v5838_v16 = vsel %vm4576_vm3, %v15642_v42, 0.0  ;;  %v18031_v35 = vld [vmem:[#allocation133_spill] sm:$0xff] }
 0x3a2   :  { %5827 = vadd.xlane.f32.xlu1 %v5826_v56  ;;  %v11262_v21 = vpop.eup %11261  ;;  %11279 = vpow2.f32 %v5677_v54  ;;  %v5841_v56 = vsel %vm4576_vm3, %v15644_v47, 0.0  ;;  %v5683_v41 = vmul.f32 1.442695, %v5562_v9  ;;  %v18035_v9 = vld [vmem:[#allocation113_spill] sm:$0xff] }
 0x3a3   :  { %5830 = vadd.xlane.f32.xlu0 %v5829_v23  ;;  %v5492_v57 = vpop.xlane.xlu1 %5491  ;;  %11281 = vpow2.f32 %v5679_v62  ;;  %v5257_v52 = vmul.f32 %v11262_v21, %v18030_v45  ;;  %v5685_v23 = vmul.f32 1.442695, %v5563_v53 }
 0x3a4   :  { %v5095_v25 = vpop.xlane.xlu0 %5094  ;;  %11283 = vpow2.f32 %v5681_v48  ;;  %v5564_v34 = vsub.f32 %v14725_v17, %v5492_v57  ;;  %v18034_v57 = vld [vmem:[#allocation115_spill] sm:$0xff] }
 0x3a5   :  { %11285 = vrcp.f32 %v5095_v25 }
 0x3a6   :  { %v11264_v12 = vpop.eup %11263  ;;  %5833 = vadd.xlane.f32.xlu1 %v5832_v31  ;;  %v18032_v31 = vld [vmem:[#allocation134_spill] sm:$0xff]  ;;  %v5687_v17 = vmul.f32 1.442695, %v5564_v34 }
 0x3a7   :  { %v11266_v26 = vpop.eup %11265  ;;  %5836 = vadd.xlane.f32.xlu0 %v5835_v14  ;;  %v5098_v38 = vpop.xlane.xlu1 %5097  ;;  %v5259_v14 = vmul.f32 %v11264_v12, %v18032_v31 }
 0x3a8   :  { %v5258_v50 = vmul.f32 %v11266_v26, %v18031_v35  ;;  %v5101_v54 = vpop.xlane.xlu0 %5100  ;;  %v18036_v35 = vpack.c.bf16 %v18034_v57, %v18035_v9 }
 0x3a9   :  { %v11268_v62 = vpop.eup %11267  ;;  %11287 = vrcp.f32 %v5101_v54 }
 0x3aa   :  { %v15659_v48 = vpop.eup %11269  ;;  %v5301_v42 = vpack.c.bf16 %v5258_v50, %v5257_v52  ;;  %v5260_v21 = vmul.f32 %v11268_v62, %v18033_v43  ;;  %11289 = vrcp.f32 %v5098_v38  ;;  %5839 = vadd.xlane.f32.xlu1 %v5838_v16  ;;  %v18037_v50 = vld [vmem:[#allocation32_spill] sm:$0xff] }
 0x3ab   :  { %v15663_v25 = vpop.eup %11271  ;;  %5842 = vadd.xlane.f32.xlu0 %v5841_v56  ;;  %v5104_v26 = vpop.xlane.xlu1 %5103  ;;  %v5844_v43 = vsel %vm4576_vm3, %v15659_v48, 0.0 }
 0x3ac   :  { %v5302_v45 = vpack.c.bf16 %v5260_v21, %v5259_v14  ;;  %10688 = vmatmul.mubr.msk.bf16.vlgmr.msra.gmra.mxu0 %vm4576_vm3, %v5301_v42  ;;  %11291 = vrcp.f32 %v5104_v26  ;;  %v5495_v53 = vpop.xlane.xlu0 %5494  ;;  %v15674_v38 = vpop.eup %11273  ;;  %v5847_v42 = vsel %vm4576_vm3, %v15663_v25, 0.0 }
 0x3ad   :  { %11293 = vpow2.f32 %v5683_v41  ;;  %10698 = vmatpush3.bf16.msra.mxu0 %v18036_v35  ;;  %v5565_v12 = vsub.f32 %v14737_v20, %v5495_v53  ;;  %10699 = vmatprep.mubr.msk.bf16.mxu0 %vm11597_vm2, %v17820_v44  ;;  %v15679_v16 = vpop.eup %11275  ;;  %v18038_v20 = vld [vmem:[#allocation21_spill] sm:$0xff]  ;;  %v5850_v31 = vsel %vm4576_vm3, %v15674_v38, 0.0 }
 0x3ae   :  { %11295 = vpow2.f32 %v5685_v23  ;;  %10694 = vmatmul.mubr.msk.bf16.vlgmr.msra.gmra.mxu1 %vm4576_vm3, %v5302_v45  ;;  %5845 = vadd.xlane.f32.xlu1 %v5844_v43  ;;  %v18039_v54 = vpack.c.bf16 %v18037_v50, %v18038_v20  ;;  %v15688_v23 = vpop.eup %11277  ;;  %v18040_v20 = vld [vmem:[#allocation135_spill] sm:$0xff] }
 0x3af   :  { %v5689_v52 = vmul.f32 1.442695, %v5565_v12  ;;  %5848 = vadd.xlane.f32.xlu0 %v5847_v42  ;;  %v5498_v56 = vpop.xlane.xlu1 %5497  ;;  %10709 = vmatprep.subr.bf16.mxu0 %v17820_v44  ;;  %11297 = vpow2.f32 %v5687_v17  ;;  %v15694_v14 = vpop.eup %11279  ;;  %v5856_v35 = vsel %vm4576_vm3, %v15688_v23, 0.0 }
 0x3b0   :  { %10704 = vmatpush3.bf16.msra.mxu1 %v18039_v54  ;;  %v5501_v62 = vpop.xlane.xlu0 %5500  ;;  %v5566_v41 = vsub.f32 %v17854_v49, %v5498_v56  ;;  %10705 = vmatprep.mubr.msk.bf16.mxu1 %vm11597_vm2, %v17820_v44  ;;  %v5853_v49 = vsel %vm4576_vm3, %v15679_v16, 0.0  ;;  %v15698_v26 = vpop.eup %11281  ;;  %v5859_v42 = vsel %vm4576_vm3, %v15694_v14, 0.0  ;;  %v18041_v56 = vld [vmem:[#allocation170_spill] sm:$0xff] }
 0x3b1   :  { %v5567_v34 = vsub.f32 %v17855_v33, %v5501_v62  ;;  %10715 = vmatprep.subr.bf16.mxu1 %v17820_v44  ;;  %11299 = vpow2.f32 %v5689_v52  ;;  %v15700_v17 = vpop.eup %11283 }
 0x3b2   :  { %v5691_v21 = vmul.f32 1.442695, %v5566_v41  ;;  %5851 = vadd.xlane.f32.xlu1 %v5850_v31  ;;  %v11286_v9 = vpop.eup %11285  ;;  %v5862_v31 = vsel %vm4576_vm3, %v15698_v26, 0.0 }
 0x3b3   :  { %v5693_v45 = vmul.f32 1.442695, %v5567_v34  ;;  %5854 = vadd.xlane.f32.xlu0 %v5853_v49  ;;  %v5504_v53 = vpop.xlane.xlu1 %5503  ;;  %v5261_v54 = vmul.f32 %v11286_v9, %v18040_v20  ;;  %v5865_v34 = vsel %vm4576_vm3, %v15700_v17, 0.0  ;;  %v18042_v49 = vld [vmem:[#allocation173_spill] sm:$0xff] }
 0x3b4   :  { %v5107_v33 = vpop.xlane.xlu0 %5106  ;;  %v5568_v57 = vsub.f32 %v14755_v32, %v5504_v53  ;;  %11301 = vpow2.f32 %v5691_v21  ;;  %v18045_v20 = vld [vmem:[#allocation117_spill] sm:$0xff] }
 0x3b5   :  { %11303 = vpow2.f32 %v5693_v45 }
 0x3b6   :  { %v11288_v12 = vpop.eup %11287  ;;  %v5695_v43 = vmul.f32 1.442695, %v5568_v57  ;;  %5857 = vadd.xlane.f32.xlu1 %v5856_v35  ;;  %11305 = vrcp.f32 %v5107_v33  ;;  %v18043_v33 = vld [vmem:[#allocation137_spill] sm:$0xff] }
 0x3b7   :  { %v11290_v52 = vpop.eup %11289  ;;  %5860 = vadd.xlane.f32.xlu0 %v5859_v42  ;;  %v5110_v50 = vpop.xlane.xlu1 %5109  ;;  %v5263_v45 = vmul.f32 %v11288_v12, %v18042_v49 }
 0x3b8   :  { %v5262_v32 = vmul.f32 %v11290_v52, %v18041_v56  ;;  %11307 = vpow2.f32 %v5695_v43  ;;  %v5113_v62 = vpop.xlane.xlu0 %5112  ;;  %v18044_v52 = vld [vmem:[#allocation119_spill] sm:$0xff] }
 0x3b9   :  { %v11292_v41 = vpop.eup %11291  ;;  %11309 = vrcp.f32 %v5113_v62  ;;  %v18046_v56 = vpack.c.bf16 %v18044_v52, %v18045_v20  ;;  %v18047_v62 = vld [vmem:[#allocation36_spill] sm:$0xff] }
 0x3ba   :  { %v15713_v21 = vpop.eup %11293  ;;  %v5303_v53 = vpack.c.bf16 %v5262_v32, %v5261_v54  ;;  %v5264_v57 = vmul.f32 %v11292_v41, %v18043_v33  ;;  %11311 = vrcp.f32 %v5110_v50  ;;  %5863 = vadd.xlane.f32.xlu1 %v5862_v31  ;;  %v18048_v41 = vld [vmem:[#allocation25_spill] sm:$0xff] }
 0x3bb   :  { %v15717_v9 = vpop.eup %11295  ;;  %5866 = vadd.xlane.f32.xlu0 %v5865_v34  ;;  %v5116_v35 = vpop.xlane.xlu1 %5115  ;;  %v5868_v12 = vsel %vm4576_vm3, %v15713_v21, 0.0  ;;  %v18049_v34 = vpack.c.bf16 %v18047_v62, %v18048_v41  ;;  %v18052_v41 = vld [vmem:[#allocation174_spill] sm:$0xff] }
 0x3bc   :  { %v5304_v43 = vpack.c.bf16 %v5264_v57, %v5263_v45  ;;  %10700 = vmatmul.mubr.msk.bf16.vlgmr.msra.gmra.mxu0 %vm4576_vm3, %v5303_v53  ;;  %v5119_v42 = vpop.xlane.xlu0 %5118  ;;  %11313 = vrcp.f32 %v5116_v35  ;;  %v15727_v50 = vpop.eup %11297  ;;  %v5871_v54 = vsel %vm4576_vm3, %v15717_v9, 0.0 }
 0x3bd   :  { %10710 = vmatpush3.bf16.msra.mxu0 %v18046_v56  ;;  %10711 = vmatprep.mubr.msk.bf16.mxu0 %vm11597_vm2, %v17820_v44  ;;  %11315 = vrcp.f32 %v5119_v42  ;;  %v5874_v45 = vsel %vm4576_vm3, %v15727_v50, 0.0 }
 0x3be   :  { %10706 = vmatmul.mubr.msk.bf16.vlgmr.msra.gmra.mxu1 %vm4576_vm3, %v5304_v43  ;;  %5869 = vadd.xlane.f32.xlu1 %v5868_v12  ;;  %v15732_v32 = vpop.eup %11299 }
 0x3bf   :  { %10716 = vmatpush3.bf16.msra.mxu1 %v18049_v34  ;;  %5872 = vadd.xlane.f32.xlu0 %v5871_v54  ;;  %v5122_v31 = vpop.xlane.xlu1 %5121  ;;  %v5877_v33 = vsel %vm4576_vm3, %v15732_v32, 0.0 }
 0x3c0   :  { %v5125_v49 = vpop.xlane.xlu0 %5124  ;;  %11317 = vrcp.f32 %v5122_v31  ;;  %10721 = vmatprep.subr.bf16.mxu0 %v17820_v44  ;;  %10717 = vmatprep.mubr.msk.bf16.mxu1 %vm11597_vm2, %v17820_v44 }
 0x3c1   :  { %10727 = vmatprep.subr.bf16.mxu1 %v17820_v44  ;;  %v15743_v53 = vpop.eup %11301  ;;  %11319 = vrcp.f32 %v5125_v49 }
 0x3c2   :  { %18050 = vst [vmem:[#allocation149_spill] sm:$0xff] %v15743_v53  ;;  %5875 = vadd.xlane.f32.xlu1 %v5874_v45  ;;  %v15747_v57 = vpop.eup %11303  ;;  %v5880_v20 = vsel %vm4576_vm3, %v15743_v53, 0.0 }
 0x3c3   :  { %5878 = vadd.xlane.f32.xlu0 %v5877_v33  ;;  %v5128_v35 = vpop.xlane.xlu1 %5127  ;;  %v11306_v43 = vpop.eup %11305  ;;  %v5883_v12 = vsel %vm4576_vm3, %v15747_v57, 0.0 }
 0x3c4   :  { %v5131_v42 = vpop.xlane.xlu0 %5130  ;;  %11321 = vrcp.f32 %v5128_v35  ;;  %v5265_v34 = vmul.f32 %v11306_v43, %v18052_v41 }
 0x3c5   :  { %v15749_v52 = vpop.eup %11307  ;;  %11323 = vrcp.f32 %v5131_v42 }
 0x3c6   :  { %18051 = vst [vmem:[#allocation150_spill] sm:$0xff] %v15749_v52  ;;  %v11310_v56 = vpop.eup %11309  ;;  %5881 = vadd.xlane.f32.xlu1 %v5880_v20  ;;  %v5886_v33 = vsel %vm4576_vm3, %v15749_v52, 0.0  ;;  %v9527_v20 = vld [vmem:[%s17074_s10] ss:$0 sm:$0xff] }
 0x3c7   :  { %v11312_v54 = vpop.eup %11311  ;;  %5884 = vadd.xlane.f32.xlu0 %v5883_v12  ;;  %v5134_v62 = vpop.xlane.xlu1 %5133  ;;  %v5267_v35 = vmul.f32 %v11310_v56, %v15085_v63  ;;  %v18053_v63 = vld [vmem:[#allocation123_spill] sm:$0xff]  ;;  %v18054_v56 = vld [vmem:[#allocation121_spill] sm:$0xff] }
 0x3c8   :  { %v5266_v31 = vmul.f32 %v11312_v54, %v15081_v28  ;;  %v5137_v49 = vpop.xlane.xlu0 %5136  ;;  %11325 = vrcp.f32 %v5134_v62 }
 0x3c9   :  { %v11314_v45 = vpop.eup %11313  ;;  %11327 = vrcp.f32 %v5137_v49 }
 0x3ca   :  { %v5305_v42 = vpack.c.bf16 %v5266_v31, %v5265_v34  ;;  %v5268_v53 = vmul.f32 %v11314_v45, %v15101_v39  ;;  %5887 = vadd.xlane.f32.xlu1 %v5886_v33  ;;  %v11316_v43 = vpop.eup %11315  ;;  %v18055_v34 = vpack.c.bf16 %v18053_v63, %v18054_v56  ;;  %v18056_v31 = vld [vmem:[#allocation177_spill] sm:$0xff] }
 0x3cb   :  { %v5140_v12 = vpop.xlane.xlu1 %5139  ;;  %v5269_v39 = vmul.f32 %v11316_v43, %v15108_v11 }
 0x3cc   :  { %v5306_v28 = vpack.c.bf16 %v5268_v53, %v5267_v35  ;;  %v6086_v54 = vpop.f32.mrf.mxu0  ;;  %10712 = vmatmul.mubr.msk.bf16.vlgmr.msra.gmra.mxu0 %vm4576_vm3, %v5305_v42  ;;  %v5143_v62 = vpop.xlane.xlu0 %5142  ;;  %11329 = vrcp.f32 %v5140_v12  ;;  %v18058_v35 = vld [vmem:[#allocation2_spill] sm:$0xff]  ;;  %v18060_v12 = vld [vmem:[#allocation39_spill] sm:$0xff] }
 0x3cd   :  { %v11318_v41 = vpop.eup %11317  ;;  %v8936_v52 = vmul.f32 %v9527_v20, %v6086_v54  ;;  %10722 = vmatpush3.bf16.msra.mxu0 %v18055_v34  ;;  %10723 = vmatprep.mubr.msk.bf16.mxu0 %vm11597_vm2, %v17820_v44  ;;  %11331 = vrcp.f32 %v5143_v62  ;;  %v18061_v54 = vld [vmem:[#allocation29_spill] sm:$0xff] }
 0x3ce   :  { %v5270_v49 = vmul.f32 %v11318_v41, %v18056_v31  ;;  %v10569_v53 = vpop.f32.mrf.mxu0  ;;  %v15772_v45 = vpop.f32.mrf.mxu1  ;;  %10718 = vmatmul.mubr.msk.bf16.vlgmr.msra.gmra.mxu1 %vm4576_vm3, %v5306_v28  ;;  %10733 = vmatprep.subr.bf16.mxu0 %v17820_v44  ;;  %v18062_v63 = vpack.c.bf16 %v18060_v12, %v18061_v54  ;;  %v18063_v31 = vld [vmem:[#allocation60_spill] sm:$0xff] }
 0x3cf   :  { %18057 = vst [vmem:[#allocation198_spill] sm:$0xff] %v15772_v45  ;;  %v11320_v33 = vpop.eup %11319  ;;  %v15777_v42 = vadd.f32 %v8936_v52, %v18058_v35  ;;  %v5146_v56 = vpop.xlane.xlu1 %5145  ;;  %10729 = vmatprep.mubr.msk.bf16.mxu1 %vm11597_vm2, %v17820_v44  ;;  %v18064_v53 = vld [vmem:[#allocation58_spill] sm:$0xff] }
 0x3d0   :  { %10728 = vmatpush3.bf16.msra.mxu1 %v18062_v63  ;;  %v5307_v11 = vpack.c.bf16 %v5270_v49, %v5269_v39  ;;  %v6089_v43 = vpop.f32.mrf.mxu0  ;;  %v5149_v62 = vpop.xlane.xlu0 %5148  ;;  %11333 = vrcp.f32 %v5146_v56  ;;  %v5271_v52 = vmul.f32 %v11320_v33, %v18063_v31  ;;  %v18065_v63 = vld [vmem:[#allocation3_spill] sm:$0xff] }
 0x3d1   :  { %18059 = vst [vmem:[#allocation201_spill] sm:$0xff] %v15777_v42  ;;  %10739 = vmatprep.subr.bf16.mxu1 %v17820_v44  ;;  %v11322_v28 = vpop.eup %11321  ;;  %v8937_v41 = vmul.f32 %v9527_v20, %v6089_v43  ;;  %v10575_v34 = vpop.f32.mrf.mxu1  ;;  %11335 = vrcp.f32 %v5149_v62  ;;  %v18066_v43 = vld [vmem:[#allocation127_spill] sm:$0xff]  ;;  %v18069_v62 = vld [vmem:[#allocation230_spill] sm:$0xff] }
 0x3d2   :  { %v5272_v35 = vmul.f32 %v11322_v28, %v18064_v53  ;;  %v10570_v12 = vpop.f32.mrf.mxu0  ;;  %v11324_v54 = vpop.eup %11323  ;;  %v18067_v34 = vld [vmem:[#allocation125_spill] sm:$0xff] }
 0x3d3   :  { %v15788_v42 = vadd.f32 %v8937_v41, %v18065_v63  ;;  %v15790_v45 = vpop.f32.mrf.mxu1  ;;  %v5152_v39 = vpop.xlane.xlu1 %5151  ;;  %v18068_v33 = vpack.c.bf16 %v18066_v43, %v18067_v34  ;;  %v5273_v41 = vmul.f32 %v11324_v54, %v18069_v62  ;;  %v18071_v53 = vld [vmem:[#allocation33_spill] sm:$0xff]  ;;  %v18073_v62 = vld [vmem:[#allocation131_spill] sm:$0xff] }
 0x3d4   :  { %v5308_v49 = vpack.c.bf16 %v5272_v35, %v5271_v52  ;;  %10724 = vmatmul.mubr.msk.bf16.vlgmr.msra.gmra.mxu0 %vm4576_vm3, %v5307_v11  ;;  %v5699_v56 = vpop.xlane.xlu0 %5698  ;;  %11337 = vrcp.f32 %v5152_v39  ;;  %v18070_v52 = vld [vmem:[#allocation43_spill] sm:$0xff] }
 0x3d5   :  { %v11326_v20 = vpop.eup %11325  ;;  %10734 = vmatpush3.bf16.msra.mxu0 %v18068_v33  ;;  %v10576_v28 = vpop.f32.mrf.mxu1  ;;  %10735 = vmatprep.mubr.msk.bf16.mxu0 %vm11597_vm2, %v17820_v44  ;;  %11339 = vrcp.f32 %v5699_v56  ;;  %v18072_v35 = vpack.c.bf16 %v18070_v52, %v18071_v53 }
 0x3d6   :  { %v5274_v31 = vmul.f32 %v11326_v20, %v15155_v19  ;;  %10730 = vmatmul.mubr.msk.bf16.vlgmr.msra.gmra.mxu1 %vm4576_vm3, %v5308_v49  ;;  %10745 = vmatprep.subr.bf16.mxu0 %v17820_v44  ;;  %v11328_v11 = vpop.eup %11327 }
 0x3d7   :  { %10740 = vmatpush3.bf16.msra.mxu1 %v18072_v35  ;;  %v5702_v12 = vpop.xlane.xlu1 %5701  ;;  %10741 = vmatprep.mubr.msk.bf16.mxu1 %vm11597_vm2, %v17820_v44  ;;  %v5275_v54 = vmul.f32 %v11328_v11, %v15159_v5 }
 0x3d8   :  { %v5309_v63 = vpack.c.bf16 %v5274_v31, %v5273_v41  ;;  %v5705_v39 = vpop.xlane.xlu0 %5704  ;;  %11341 = vrcp.f32 %v5702_v12  ;;  %10751 = vmatprep.subr.bf16.mxu1 %v17820_v44  ;;  %v18074_v41 = vld [vmem:[#allocation129_spill] sm:$0xff] }
 0x3d9   :  { %v11330_v19 = vpop.eup %11329  ;;  %11343 = vrcp.f32 %v5705_v39  ;;  %v18075_v31 = vpack.c.bf16 %v18073_v62, %v18074_v41  ;;  %v18077_v12 = vld [vmem:[#allocation49_spill] sm:$0xff] }
 0x3da   :  { %v5276_v49 = vmul.f32 %v11330_v19, %v15175_v40  ;;  %v11332_v56 = vpop.eup %11331  ;;  %v18076_v40 = vld [vmem:[#allocation138_spill] sm:$0xff] }
 0x3db   :  { %v5708_v20 = vpop.xlane.xlu1 %5707  ;;  %v5277_v5 = vmul.f32 %v11332_v56, %v15182_v51 }
 0x3dc   :  { %v5310_v43 = vpack.c.bf16 %v5276_v49, %v5275_v54  ;;  %v15810_v34 = vpop.f32.mrf.mxu0  ;;  %10736 = vmatmul.mubr.msk.bf16.vlgmr.msra.gmra.mxu0 %vm4576_vm3, %v5309_v63  ;;  %v5711_v33 = vpop.xlane.xlu0 %5710  ;;  %11345 = vrcp.f32 %v5708_v20  ;;  %v18078_v63 = vld [vmem:[#allocation6_spill] sm:$0xff] }
 0x3dd   :  { %v11334_v28 = vpop.eup %11333  ;;  %10746 = vmatpush3.bf16.msra.mxu0 %v18075_v31  ;;  %10747 = vmatprep.mubr.msk.bf16.mxu0 %vm11597_vm2, %v17820_v44  ;;  %11347 = vrcp.f32 %v5711_v33  ;;  %v18079_v39 = vpack.c.bf16 %v18077_v12, %v18078_v63  ;;  %v18082_v63 = vld [vmem:[#allocation52_spill] sm:$0xff] }
 0x3de   :  { %v5278_v11 = vmul.f32 %v11334_v28, %v18076_v40  ;;  %v10581_v52 = vpop.f32.mrf.mxu0  ;;  %v15820_v53 = vpop.f32.mrf.mxu1  ;;  %10742 = vmatmul.mubr.msk.bf16.vlgmr.msra.gmra.mxu1 %vm4576_vm3, %v5310_v43  ;;  %10757 = vmatprep.subr.bf16.mxu0 %v17820_v44  ;;  %v18080_v43 = vld [vmem:[#allocation56_spill] sm:$0xff]  ;;  %v18081_v28 = vld [vmem:[#allocation53_spill] sm:$0xff] }
 0x3df   :  { %v11336_v35 = vpop.eup %11335  ;;  %10752 = vmatpush3.bf16.msra.mxu1 %v18079_v39  ;;  %v5714_v19 = vpop.xlane.xlu1 %5713  ;;  %10753 = vmatprep.mubr.msk.bf16.mxu1 %vm11597_vm2, %v17820_v44  ;;  %v18083_v39 = vld [vmem:[#allocation51_spill] sm:$0xff] }
 0x3e0   :  { %v5311_v51 = vpack.c.bf16 %v5278_v11, %v5277_v5  ;;  %v15829_v54 = vpop.f32.mrf.mxu0  ;;  %v5717_v49 = vpop.xlane.xlu0 %5716  ;;  %11349 = vrcp.f32 %v5714_v19  ;;  %10763 = vmatprep.subr.bf16.mxu1 %v17820_v44  ;;  %v5279_v33 = vmul.f32 %v11336_v35, %v18080_v43  ;;  %v18084_v19 = vpack.c.bf16 %v18082_v63, %v18083_v39  ;;  %v18085_v35 = vld [vmem:[#allocation139_spill] sm:$0xff]  ;;  %v18086_v43 = vld [vmem:[#allocation50_spill] sm:$0xff] }
 0x3e1   :  { %v11338_v56 = vpop.eup %11337  ;;  %v10587_v20 = vpop.f32.mrf.mxu1  ;;  %11351 = vrcp.f32 %v5717_v49 }
 0x3e2   :  { %v5280_v62 = vmul.f32 %v11338_v56, %v18081_v28  ;;  %v10582_v41 = vpop.f32.mrf.mxu0  ;;  %v11340_v31 = vpop.eup %11339 }
 0x3e3   :  { %v15834_v40 = vpop.f32.mrf.mxu1  ;;  %v5720_v52 = vpop.xlane.xlu1 %5719  ;;  %v5953_v49 = vmul.f32 %v11340_v31, %v18085_v35  ;;  %v18089_v35 = vld [vmem:[#allocation59_spill] sm:$0xff] }
 0x3e4   :  { %v5312_v12 = vpack.c.bf16 %v5280_v62, %v5279_v33  ;;  %10748 = vmatmul.mubr.msk.bf16.vlgmr.msra.gmra.mxu0 %vm4576_vm3, %v5311_v51  ;;  %v5723_v5 = vpop.xlane.xlu0 %5722  ;;  %11353 = vrcp.f32 %v5720_v52  ;;  %v18087_v33 = vld [vmem:[#allocation20_spill] sm:$0xff] }
 0x3e5   :  { %v11342_v11 = vpop.eup %11341  ;;  %10758 = vmatpush3.bf16.msra.mxu0 %v18084_v19  ;;  %v10588_v20 = vpop.f32.mrf.mxu1  ;;  %10759 = vmatprep.mubr.msk.bf16.mxu0 %vm11597_vm2, %v17820_v44  ;;  %11355 = vrcp.f32 %v5723_v5  ;;  %v18088_v28 = vpack.c.bf16 %v18086_v43, %v18087_v33 }
 0x3e6   :  { %v5954_v56 = vmul.f32 %v11342_v11, %v15229_v60  ;;  %10754 = vmatmul.mubr.msk.bf16.vlgmr.msra.gmra.mxu1 %vm4576_vm3, %v5312_v12  ;;  %10769 = vmatprep.subr.bf16.mxu0 %v17820_v44  ;;  %v11344_v51 = vpop.eup %11343 }
 0x3e7   :  { %10764 = vmatpush3.bf16.msra.mxu1 %v18088_v28  ;;  %v5726_v62 = vpop.xlane.xlu1 %5725  ;;  %10765 = vmatprep.mubr.msk.bf16.mxu1 %vm11597_vm2, %v17820_v44  ;;  %v5955_v31 = vmul.f32 %v11344_v51, %v15233_v10 }
 0x3e8   :  { %v6017_v41 = vpack.c.bf16 %v5954_v56, %v5953_v49  ;;  %v5729_v52 = vpop.xlane.xlu0 %5728  ;;  %11357 = vrcp.f32 %v5726_v62  ;;  %10775 = vmatprep.subr.bf16.mxu1 %v17820_v44  ;;  %v18090_v49 = vld [vmem:[#allocation57_spill] sm:$0xff]  ;;  %v18093_v62 = vld [vmem:[#allocation55_spill] sm:$0xff] }
 0x3e9   :  { %v11346_v60 = vpop.eup %11345  ;;  %11359 = vrcp.f32 %v5729_v52  ;;  %v18091_v56 = vpack.c.bf16 %v18089_v35, %v18090_v49 }
 0x3ea   :  { %v5956_v12 = vmul.f32 %v11346_v60, %v15249_v7  ;;  %v11348_v5 = vpop.eup %11347  ;;  %v18092_v7 = vld [vmem:[#allocation234_spill] sm:$0xff] }
 0x3eb   :  { %v5732_v11 = vpop.xlane.xlu1 %5731  ;;  %v5957_v10 = vmul.f32 %v11348_v5, %v15256_v46 }
 0x3ec   :  { %v6018_v63 = vpack.c.bf16 %v5956_v12, %v5955_v31  ;;  %v15854_v39 = vpop.f32.mrf.mxu0  ;;  %10760 = vmatmul.mubr.msk.bf16.vlgmr.msra.gmra.mxu0 %vm4576_vm3, %v6017_v41  ;;  %v5735_v19 = vpop.xlane.xlu0 %5734  ;;  %11361 = vrcp.f32 %v5732_v11  ;;  %v18094_v41 = vld [vmem:[#allocation54_spill] sm:$0xff] }
 0x3ed   :  { %v11350_v20 = vpop.eup %11349  ;;  %10770 = vmatpush3.bf16.msra.mxu0 %v18091_v56  ;;  %10771 = vmatprep.mubr.msk.bf16.mxu0 %vm11597_vm2, %v17820_v44  ;;  %11363 = vrcp.f32 %v5735_v19  ;;  %v18095_v52 = vpack.c.bf16 %v18093_v62, %v18094_v41  ;;  %v18098_v41 = vld [vmem:[#allocation67_spill] sm:$0xff] }
 0x3ee   :  { %v5958_v51 = vmul.f32 %v11350_v20, %v18092_v7  ;;  %v10593_v43 = vpop.f32.mrf.mxu0  ;;  %v15864_v33 = vpop.f32.mrf.mxu1  ;;  %10766 = vmatmul.mubr.msk.bf16.vlgmr.msra.gmra.mxu1 %vm4576_vm3, %v6018_v63  ;;  %10781 = vmatprep.subr.bf16.mxu0 %v17820_v44  ;;  %v18096_v63 = vld [vmem:[#allocation140_spill] sm:$0xff]  ;;  %v18097_v20 = vld [vmem:[#allocation141_spill] sm:$0xff] }
 0x3ef   :  { %v11352_v28 = vpop.eup %11351  ;;  %10776 = vmatpush3.bf16.msra.mxu1 %v18095_v52  ;;  %v5738_v60 = vpop.xlane.xlu1 %5737  ;;  %10777 = vmatprep.mubr.msk.bf16.mxu1 %vm11597_vm2, %v17820_v44  ;;  %v18099_v52 = vld [vmem:[#allocation65_spill] sm:$0xff] }
 0x3f0   :  { %v6019_v46 = vpack.c.bf16 %v5958_v51, %v5957_v10  ;;  %v15873_v31 = vpop.f32.mrf.mxu0  ;;  %v5741_v12 = vpop.xlane.xlu0 %5740  ;;  %11365 = vrcp.f32 %v5738_v60  ;;  %10787 = vmatprep.subr.bf16.mxu1 %v17820_v44  ;;  %v5959_v19 = vmul.f32 %v11352_v28, %v18096_v63  ;;  %v18100_v60 = vpack.c.bf16 %v18098_v41, %v18099_v52  ;;  %v18101_v28 = vld [vmem:[#allocation182_spill] sm:$0xff]  ;;  %v18102_v63 = vld [vmem:[#allocation63_spill] sm:$0xff] }
 0x3f1   :  { %v11354_v5 = vpop.eup %11353  ;;  %v10599_v11 = vpop.f32.mrf.mxu1  ;;  %11367 = vrcp.f32 %v5741_v12 }
 0x3f2   :  { %v5960_v35 = vmul.f32 %v11354_v5, %v18097_v20  ;;  %v10594_v49 = vpop.f32.mrf.mxu0  ;;  %v11356_v56 = vpop.eup %11355 }
 0x3f3   :  { %v15878_v7 = vpop.f32.mrf.mxu1  ;;  %v5744_v43 = vpop.xlane.xlu1 %5743  ;;  %v5961_v12 = vmul.f32 %v11356_v56, %v18101_v28  ;;  %v18105_v28 = vld [vmem:[#allocation75_spill] sm:$0xff] }
 0x3f4   :  { %v6020_v62 = vpack.c.bf16 %v5960_v35, %v5959_v19  ;;  %10772 = vmatmul.mubr.msk.bf16.vlgmr.msra.gmra.mxu0 %vm4576_vm3, %v6019_v46  ;;  %v5747_v10 = vpop.xlane.xlu0 %5746  ;;  %11369 = vrcp.f32 %v5744_v43  ;;  %v18103_v19 = vld [vmem:[#allocation62_spill] sm:$0xff] }
 0x3f5   :  { %v11358_v51 = vpop.eup %11357  ;;  %10782 = vmatpush3.bf16.msra.mxu0 %v18100_v60  ;;  %v10600_v11 = vpop.f32.mrf.mxu1  ;;  %10783 = vmatprep.mubr.msk.bf16.mxu0 %vm11597_vm2, %v17820_v44  ;;  %11371 = vrcp.f32 %v5747_v10  ;;  %v18104_v20 = vpack.c.bf16 %v18102_v63, %v18103_v19 }
 0x3f6   :  { %v5962_v5 = vmul.f32 %v11358_v51, %v15303_v61  ;;  %10778 = vmatmul.mubr.msk.bf16.vlgmr.msra.gmra.mxu1 %vm4576_vm3, %v6020_v62  ;;  %10793 = vmatprep.subr.bf16.mxu0 %v17820_v44  ;;  %v11360_v46 = vpop.eup %11359 }
 0x3f7   :  { %10788 = vmatpush3.bf16.msra.mxu1 %v18104_v20  ;;  %v5750_v35 = vpop.xlane.xlu1 %5749  ;;  %10789 = vmatprep.mubr.msk.bf16.mxu1 %vm11597_vm2, %v17820_v44  ;;  %v5963_v56 = vmul.f32 %v11360_v46, %v15307_v6 }
 0x3f8   :  { %v6021_v49 = vpack.c.bf16 %v5962_v5, %v5961_v12  ;;  %v5753_v43 = vpop.xlane.xlu0 %5752  ;;  %11373 = vrcp.f32 %v5750_v35  ;;  %10799 = vmatprep.subr.bf16.mxu1 %v17820_v44  ;;  %v18106_v12 = vld [vmem:[#allocation73_spill] sm:$0xff]  ;;  %v18109_v35 = vld [vmem:[#allocation71_spill] sm:$0xff] }
 0x3f9   :  { %v11362_v61 = vpop.eup %11361  ;;  %11375 = vrcp.f32 %v5753_v43  ;;  %v18107_v5 = vpack.c.bf16 %v18105_v28, %v18106_v12 }
 0x3fa   :  { %v5964_v62 = vmul.f32 %v11362_v61, %v15323_v58  ;;  %v11364_v10 = vpop.eup %11363  ;;  %v18108_v58 = vld [vmem:[#allocation185_spill] sm:$0xff] }
 0x3fb   :  { %v5756_v51 = vpop.xlane.xlu1 %5755  ;;  %v5965_v6 = vmul.f32 %v11364_v10, %v15330_v55 }
 0x3fc   :  { %v6022_v41 = vpack.c.bf16 %v5964_v62, %v5963_v56  ;;  %v15898_v52 = vpop.f32.mrf.mxu0  ;;  %10784 = vmatmul.mubr.msk.bf16.vlgmr.msra.gmra.mxu0 %vm4576_vm3, %v6021_v49  ;;  %v5759_v60 = vpop.xlane.xlu0 %5758  ;;  %11377 = vrcp.f32 %v5756_v51  ;;  %v18110_v49 = vld [vmem:[#allocation70_spill] sm:$0xff] }
 0x3fd   :  { %v11366_v11 = vpop.eup %11365  ;;  %10794 = vmatpush3.bf16.msra.mxu0 %v18107_v5  ;;  %10795 = vmatprep.mubr.msk.bf16.mxu0 %vm11597_vm2, %v17820_v44  ;;  %11379 = vrcp.f32 %v5759_v60  ;;  %v18111_v43 = vpack.c.bf16 %v18109_v35, %v18110_v49  ;;  %v18114_v49 = vld [vmem:[#allocation80_spill] sm:$0xff] }
 0x3fe   :  { %v5966_v46 = vmul.f32 %v11366_v11, %v18108_v58  ;;  %v10605_v63 = vpop.f32.mrf.mxu0  ;;  %v15908_v19 = vpop.f32.mrf.mxu1  ;;  %10790 = vmatmul.mubr.msk.bf16.vlgmr.msra.gmra.mxu1 %vm4576_vm3, %v6022_v41  ;;  %10805 = vmatprep.subr.bf16.mxu0 %v17820_v44  ;;  %v18112_v41 = vld [vmem:[#allocation142_spill] sm:$0xff] }
 0x3ff   :  { %v11368_v20 = vpop.eup %11367  ;;  %10800 = vmatpush3.bf16.msra.mxu1 %v18111_v43  ;;  %v5762_v61 = vpop.xlane.xlu1 %5761  ;;  %10801 = vmatprep.mubr.msk.bf16.mxu1 %vm11597_vm2, %v17820_v44  ;;  %v18113_v11 = vld [vmem:[#allocation186_spill] sm:$0xff] }
 0x400   :  { %v6023_v55 = vpack.c.bf16 %v5966_v46, %v5965_v6  ;;  %v15917_v56 = vpop.f32.mrf.mxu0  ;;  %v5765_v62 = vpop.xlane.xlu0 %5764  ;;  %11381 = vrcp.f32 %v5762_v61  ;;  %10811 = vmatprep.subr.bf16.mxu1 %v17820_v44  ;;  %v5967_v60 = vmul.f32 %v11368_v20, %v18112_v41  ;;  %v18115_v43 = vld [vmem:[#allocation78_spill] sm:$0xff]  ;;  %v18117_v20 = vld [vmem:[#allocation189_spill] sm:$0xff] }
 0x401   :  { %v11370_v10 = vpop.eup %11369  ;;  %v10611_v51 = vpop.f32.mrf.mxu1  ;;  %11383 = vrcp.f32 %v5765_v62  ;;  %v18116_v61 = vpack.c.bf16 %v18114_v49, %v18115_v43  ;;  %v18118_v41 = vld [vmem:[#allocation38_spill] sm:$0xff] }
 0x402   :  { %v5968_v28 = vmul.f32 %v11370_v10, %v18113_v11  ;;  %v10606_v12 = vpop.f32.mrf.mxu0  ;;  %v11372_v5 = vpop.eup %11371 }
 0x403   :  { %v15922_v58 = vpop.f32.mrf.mxu1  ;;  %v5768_v63 = vpop.xlane.xlu1 %5767  ;;  %v5969_v62 = vmul.f32 %v11372_v5, %v18117_v20  ;;  %v18121_v20 = vld [vmem:[#allocation86_spill] sm:$0xff] }
 0x404   :  { %v6024_v35 = vpack.c.bf16 %v5968_v28, %v5967_v60  ;;  %10796 = vmatmul.mubr.msk.bf16.vlgmr.msra.gmra.mxu0 %vm4576_vm3, %v6023_v55  ;;  %v5771_v6 = vpop.xlane.xlu0 %5770  ;;  %11385 = vrcp.f32 %v5768_v63  ;;  %v18119_v60 = vld [vmem:[#allocation37_spill] sm:$0xff] }
 0x405   :  { %v11374_v46 = vpop.eup %11373  ;;  %10806 = vmatpush3.bf16.msra.mxu0 %v18116_v61  ;;  %v10612_v51 = vpop.f32.mrf.mxu1  ;;  %10807 = vmatprep.mubr.msk.bf16.mxu0 %vm11597_vm2, %v17820_v44  ;;  %11387 = vrcp.f32 %v5771_v6  ;;  %v18120_v11 = vpack.c.bf16 %v18118_v41, %v18119_v60 }
 0x406   :  { %v5970_v10 = vmul.f32 %v11374_v46, %v15377_v2  ;;  %10802 = vmatmul.mubr.msk.bf16.vlgmr.msra.gmra.mxu1 %vm4576_vm3, %v6024_v35  ;;  %10817 = vmatprep.subr.bf16.mxu0 %v17820_v44  ;;  %v11376_v55 = vpop.eup %11375 }
 0x407   :  { %10812 = vmatpush3.bf16.msra.mxu1 %v18120_v11  ;;  %v5774_v28 = vpop.xlane.xlu1 %5773  ;;  %10813 = vmatprep.mubr.msk.bf16.mxu1 %vm11597_vm2, %v17820_v44  ;;  %v5971_v5 = vmul.f32 %v11376_v55, %v15381_v1 }
 0x408   :  { %v6025_v12 = vpack.c.bf16 %v5970_v10, %v5969_v62  ;;  %v5777_v63 = vpop.xlane.xlu0 %5776  ;;  %11389 = vrcp.f32 %v5774_v28  ;;  %10823 = vmatprep.subr.bf16.mxu1 %v17820_v44  ;;  %v18122_v62 = vld [vmem:[#allocation84_spill] sm:$0xff]  ;;  %v18125_v28 = vld [vmem:[#allocation41_spill] sm:$0xff] }
 0x409   :  { %v11378_v2 = vpop.eup %11377  ;;  %11391 = vrcp.f32 %v5777_v63  ;;  %v18123_v10 = vpack.c.bf16 %v18121_v20, %v18122_v62 }
 0x40a   :  { %v5972_v35 = vmul.f32 %v11378_v2, %v15397_v27  ;;  %v11380_v6 = vpop.eup %11379  ;;  %v18124_v27 = vld [vmem:[#allocation144_spill] sm:$0xff] }
 0x40b   :  { %v5780_v46 = vpop.xlane.xlu1 %5779  ;;  %v5973_v1 = vmul.f32 %v11380_v6, %v15404_v18 }
 0x40c   :  { %v6026_v49 = vpack.c.bf16 %v5972_v35, %v5971_v5  ;;  %v15942_v43 = vpop.f32.mrf.mxu0  ;;  %10808 = vmatmul.mubr.msk.bf16.vlgmr.msra.gmra.mxu0 %vm4576_vm3, %v6025_v12  ;;  %v5783_v61 = vpop.xlane.xlu0 %5782  ;;  %11393 = vrcp.f32 %v5780_v46  ;;  %v18126_v12 = vld [vmem:[#allocation40_spill] sm:$0xff] }
 0x40d   :  { %v11382_v51 = vpop.eup %11381  ;;  %10818 = vmatpush3.bf16.msra.mxu0 %v18123_v10  ;;  %10819 = vmatprep.mubr.msk.bf16.mxu0 %vm11597_vm2, %v17820_v44  ;;  %11395 = vrcp.f32 %v5783_v61  ;;  %v18127_v63 = vpack.c.bf16 %v18125_v28, %v18126_v12  ;;  %v18130_v12 = vld [vmem:[#allocation92_spill] sm:$0xff] }
 0x40e   :  { %v5974_v55 = vmul.f32 %v11382_v51, %v18124_v27  ;;  %v10617_v41 = vpop.f32.mrf.mxu0  ;;  %v15952_v60 = vpop.f32.mrf.mxu1  ;;  %10814 = vmatmul.mubr.msk.bf16.vlgmr.msra.gmra.mxu1 %vm4576_vm3, %v6026_v49  ;;  %10829 = vmatprep.subr.bf16.mxu0 %v17820_v44  ;;  %v18128_v49 = vld [vmem:[#allocation143_spill] sm:$0xff]  ;;  %v18129_v51 = vld [vmem:[#allocation68_spill] sm:$0xff] }
 0x40f   :  { %v11384_v11 = vpop.eup %11383  ;;  %10824 = vmatpush3.bf16.msra.mxu1 %v18127_v63  ;;  %v5786_v2 = vpop.xlane.xlu1 %5785  ;;  %10825 = vmatprep.mubr.msk.bf16.mxu1 %vm11597_vm2, %v17820_v44  ;;  %v18131_v63 = vld [vmem:[#allocation44_spill] sm:$0xff] }
 0x410   :  { %v6027_v18 = vpack.c.bf16 %v5974_v55, %v5973_v1  ;;  %v15961_v5 = vpop.f32.mrf.mxu0  ;;  %v5789_v35 = vpop.xlane.xlu0 %5788  ;;  %11397 = vrcp.f32 %v5786_v2  ;;  %10835 = vmatprep.subr.bf16.mxu1 %v17820_v44  ;;  %v5975_v61 = vmul.f32 %v11384_v11, %v18128_v49  ;;  %v18132_v2 = vpack.c.bf16 %v18130_v12, %v18131_v63  ;;  %v18133_v11 = vld [vmem:[#allocation66_spill] sm:$0xff]  ;;  %v18134_v49 = vld [vmem:[#allocation89_spill] sm:$0xff] }
 0x411   :  { %v11386_v6 = vpop.eup %11385  ;;  %v10623_v46 = vpop.f32.mrf.mxu1  ;;  %11399 = vrcp.f32 %v5789_v35 }
 0x412   :  { %v5976_v20 = vmul.f32 %v11386_v6, %v18129_v51  ;;  %v10618_v62 = vpop.f32.mrf.mxu0  ;;  %v11388_v10 = vpop.eup %11387 }
 0x413   :  { %v15966_v27 = vpop.f32.mrf.mxu1  ;;  %v5792_v41 = vpop.xlane.xlu1 %5791  ;;  %v5977_v35 = vmul.f32 %v11388_v10, %v18133_v11  ;;  %v18137_v11 = vld [vmem:[#allocation98_spill] sm:$0xff] }
 0x414   :  { %v6028_v28 = vpack.c.bf16 %v5976_v20, %v5975_v61  ;;  %10820 = vmatmul.mubr.msk.bf16.vlgmr.msra.gmra.mxu0 %vm4576_vm3, %v6027_v18  ;;  %v5795_v1 = vpop.xlane.xlu0 %5794  ;;  %11401 = vrcp.f32 %v5792_v41  ;;  %v18135_v61 = vld [vmem:[#allocation45_spill] sm:$0xff] }
 0x415   :  { %v11390_v55 = vpop.eup %11389  ;;  %10830 = vmatpush3.bf16.msra.mxu0 %v18132_v2  ;;  %v10624_v46 = vpop.f32.mrf.mxu1  ;;  %10831 = vmatprep.mubr.msk.bf16.mxu0 %vm11597_vm2, %v17820_v44  ;;  %11403 = vrcp.f32 %v5795_v1  ;;  %v18136_v51 = vpack.c.bf16 %v18134_v49, %v18135_v61 }
 0x416   :  { %v5978_v6 = vmul.f32 %v11390_v55, %v15451_v8  ;;  %10826 = vmatmul.mubr.msk.bf16.vlgmr.msra.gmra.mxu1 %vm4576_vm3, %v6028_v28  ;;  %10841 = vmatprep.subr.bf16.mxu0 %v17820_v44  ;;  %v11392_v18 = vpop.eup %11391 }
 0x417   :  { %10836 = vmatpush3.bf16.msra.mxu1 %v18136_v51  ;;  %v5798_v20 = vpop.xlane.xlu1 %5797  ;;  %10837 = vmatprep.mubr.msk.bf16.mxu1 %vm11597_vm2, %v17820_v44  ;;  %v5979_v10 = vmul.f32 %v11392_v18, %v15455_v37 }
 0x418   :  { %v6029_v62 = vpack.c.bf16 %v5978_v6, %v5977_v35  ;;  %v5801_v41 = vpop.xlane.xlu0 %5800  ;;  %11405 = vrcp.f32 %v5798_v20  ;;  %10847 = vmatprep.subr.bf16.mxu1 %v17820_v44  ;;  %v18138_v35 = vld [vmem:[#allocation96_spill] sm:$0xff]  ;;  %v18141_v20 = vld [vmem:[#allocation94_spill] sm:$0xff] }
 0x419   :  { %v11394_v8 = vpop.eup %11393  ;;  %11407 = vrcp.f32 %v5801_v41  ;;  %v18139_v6 = vpack.c.bf16 %v18137_v11, %v18138_v35 }
 0x41a   :  { %v5980_v28 = vmul.f32 %v11394_v8, %v15471_v13  ;;  %v11396_v1 = vpop.eup %11395  ;;  %v18140_v13 = vld [vmem:[#allocation145_spill] sm:$0xff] }
 0x41b   :  { %v5804_v55 = vpop.xlane.xlu1 %5803  ;;  %v5981_v37 = vmul.f32 %v11396_v1, %v15478_v24 }
 0x41c   :  { %v6030_v12 = vpack.c.bf16 %v5980_v28, %v5979_v10  ;;  %v15986_v63 = vpop.f32.mrf.mxu0  ;;  %10832 = vmatmul.mubr.msk.bf16.vlgmr.msra.gmra.mxu0 %vm4576_vm3, %v6029_v62  ;;  %v5807_v2 = vpop.xlane.xlu0 %5806  ;;  %11409 = vrcp.f32 %v5804_v55  ;;  %v18142_v62 = vld [vmem:[#allocation14_spill] sm:$0xff] }
 0x41d   :  { %v11398_v46 = vpop.eup %11397  ;;  %10842 = vmatpush3.bf16.msra.mxu0 %v18139_v6  ;;  %10843 = vmatprep.mubr.msk.bf16.mxu0 %vm11597_vm2, %v17820_v44  ;;  %11411 = vrcp.f32 %v5807_v2  ;;  %v18143_v41 = vpack.c.bf16 %v18141_v20, %v18142_v62  ;;  %v18146_v62 = vld [vmem:[#allocation102_spill] sm:$0xff] }
 0x41e   :  { %v5982_v18 = vmul.f32 %v11398_v46, %v18140_v13  ;;  %v10629_v49 = vpop.f32.mrf.mxu0  ;;  %v15996_v61 = vpop.f32.mrf.mxu1  ;;  %10838 = vmatmul.mubr.msk.bf16.vlgmr.msra.gmra.mxu1 %vm4576_vm3, %v6030_v12  ;;  %10853 = vmatprep.subr.bf16.mxu0 %v17820_v44  ;;  %v18144_v12 = vld [vmem:[#allocation146_spill] sm:$0xff]  ;;  %v18145_v46 = vld [vmem:[#allocation64_spill] sm:$0xff] }
 0x41f   :  { %v11400_v51 = vpop.eup %11399  ;;  %10848 = vmatpush3.bf16.msra.mxu1 %v18143_v41  ;;  %v5810_v8 = vpop.xlane.xlu1 %5809  ;;  %10849 = vmatprep.mubr.msk.bf16.mxu1 %vm11597_vm2, %v17820_v44  ;;  %v18147_v41 = vld [vmem:[#allocation100_spill] sm:$0xff] }
 0x420   :  { %v6031_v24 = vpack.c.bf16 %v5982_v18, %v5981_v37  ;;  %v16005_v10 = vpop.f32.mrf.mxu0  ;;  %v5813_v28 = vpop.xlane.xlu0 %5812  ;;  %11413 = vrcp.f32 %v5810_v8  ;;  %10859 = vmatprep.subr.bf16.mxu1 %v17820_v44  ;;  %v5983_v2 = vmul.f32 %v11400_v51, %v18144_v12  ;;  %v18148_v8 = vpack.c.bf16 %v18146_v62, %v18147_v41  ;;  %v18149_v51 = vld [vmem:[#allocation61_spill] sm:$0xff]  ;;  %v18150_v12 = vld [vmem:[#allocation11_spill] sm:$0xff] }
 0x421   :  { %v11402_v1 = vpop.eup %11401  ;;  %v10635_v55 = vpop.f32.mrf.mxu1  ;;  %11415 = vrcp.f32 %v5813_v28 }
 0x422   :  { %v5984_v11 = vmul.f32 %v11402_v1, %v18145_v46  ;;  %v10630_v35 = vpop.f32.mrf.mxu0  ;;  %v11404_v6 = vpop.eup %11403 }
 0x423   :  { %v16010_v13 = vpop.f32.mrf.mxu1  ;;  %v5816_v49 = vpop.xlane.xlu1 %5815  ;;  %v5985_v28 = vmul.f32 %v11404_v6, %v18149_v51  ;;  %v18153_v51 = vld [vmem:[#allocation106_spill] sm:$0xff] }
 0x424   :  { %v6032_v20 = vpack.c.bf16 %v5984_v11, %v5983_v2  ;;  %10844 = vmatmul.mubr.msk.bf16.vlgmr.msra.gmra.mxu0 %vm4576_vm3, %v6031_v24  ;;  %v5819_v37 = vpop.xlane.xlu0 %5818  ;;  %11417 = vrcp.f32 %v5816_v49  ;;  %v18151_v2 = vld [vmem:[#allocation18_spill] sm:$0xff] }
 0x425   :  { %v11406_v18 = vpop.eup %11405  ;;  %10854 = vmatpush3.bf16.msra.mxu0 %v18148_v8  ;;  %v10636_v55 = vpop.f32.mrf.mxu1  ;;  %10855 = vmatprep.mubr.msk.bf16.mxu0 %vm11597_vm2, %v17820_v44  ;;  %11419 = vrcp.f32 %v5819_v37  ;;  %v18152_v46 = vpack.c.bf16 %v18150_v12, %v18151_v2 }
 0x426   :  { %v5986_v1 = vmul.f32 %v11406_v18, %v15525_v4  ;;  %10850 = vmatmul.mubr.msk.bf16.vlgmr.msra.gmra.mxu1 %vm4576_vm3, %v6032_v20  ;;  %10865 = vmatprep.subr.bf16.mxu0 %v17820_v44  ;;  %v11408_v24 = vpop.eup %11407 }
 0x427   :  { %10860 = vmatpush3.bf16.msra.mxu1 %v18152_v46  ;;  %v5822_v11 = vpop.xlane.xlu1 %5821  ;;  %10861 = vmatprep.mubr.msk.bf16.mxu1 %vm11597_vm2, %v17820_v44  ;;  %v5987_v6 = vmul.f32 %v11408_v24, %v15529_v30 }
 0x428   :  { %v6033_v35 = vpack.c.bf16 %v5986_v1, %v5985_v28  ;;  %v5825_v49 = vpop.xlane.xlu0 %5824  ;;  %11421 = vrcp.f32 %v5822_v11  ;;  %10871 = vmatprep.subr.bf16.mxu1 %v17820_v44  ;;  %v18154_v28 = vld [vmem:[#allocation104_spill] sm:$0xff]  ;;  %v18157_v11 = vld [vmem:[#allocation13_spill] sm:$0xff] }
 0x429   :  { %v11410_v4 = vpop.eup %11409  ;;  %11423 = vrcp.f32 %v5825_v49  ;;  %v18155_v1 = vpack.c.bf16 %v18153_v51, %v18154_v28 }
 0x42a   :  { %v5988_v20 = vmul.f32 %v11410_v4, %v15545_v22  ;;  %v11412_v37 = vpop.eup %11411  ;;  %v18156_v22 = vld [vmem:[#allocation148_spill] sm:$0xff] }
 0x42b   :  { %v5828_v18 = vpop.xlane.xlu1 %5827  ;;  %v5989_v30 = vmul.f32 %v11412_v37, %v15552_v29 }
 0x42c   :  { %v6034_v62 = vpack.c.bf16 %v5988_v20, %v5987_v6  ;;  %v16030_v41 = vpop.f32.mrf.mxu0  ;;  %10856 = vmatmul.mubr.msk.bf16.vlgmr.msra.gmra.mxu0 %vm4576_vm3, %v6033_v35  ;;  %v5831_v8 = vpop.xlane.xlu0 %5830  ;;  %11425 = vrcp.f32 %v5828_v18  ;;  %v18158_v35 = vld [vmem:[#allocation23_spill] sm:$0xff] }
 0x42d   :  { %v11414_v55 = vpop.eup %11413  ;;  %10866 = vmatpush3.bf16.msra.mxu0 %v18155_v1  ;;  %10867 = vmatprep.mubr.msk.bf16.mxu0 %vm11597_vm2, %v17820_v44  ;;  %11427 = vrcp.f32 %v5831_v8  ;;  %v18159_v49 = vpack.c.bf16 %v18157_v11, %v18158_v35  ;;  %v18162_v35 = vld [vmem:[#allocation110_spill] sm:$0xff] }
 0x42e   :  { %v5990_v24 = vmul.f32 %v11414_v55, %v18156_v22  ;;  %v10641_v12 = vpop.f32.mrf.mxu0  ;;  %v16040_v2 = vpop.f32.mrf.mxu1  ;;  %10862 = vmatmul.mubr.msk.bf16.vlgmr.msra.gmra.mxu1 %vm4576_vm3, %v6034_v62  ;;  %10877 = vmatprep.subr.bf16.mxu0 %v17820_v44  ;;  %v18160_v62 = vld [vmem:[#allocation147_spill] sm:$0xff]  ;;  %v18161_v55 = vld [vmem:[#allocation242_spill] sm:$0xff] }
 0x42f   :  { %v11416_v46 = vpop.eup %11415  ;;  %10872 = vmatpush3.bf16.msra.mxu1 %v18159_v49  ;;  %v5834_v4 = vpop.xlane.xlu1 %5833  ;;  %10873 = vmatprep.mubr.msk.bf16.mxu1 %vm11597_vm2, %v17820_v44  ;;  %v18163_v49 = vld [vmem:[#allocation108_spill] sm:$0xff] }
 0x430   :  { %v6035_v29 = vpack.c.bf16 %v5990_v24, %v5989_v30  ;;  %v16049_v6 = vpop.f32.mrf.mxu0  ;;  %v5837_v20 = vpop.xlane.xlu0 %5836  ;;  %11429 = vrcp.f32 %v5834_v4  ;;  %10883 = vmatprep.subr.bf16.mxu1 %v17820_v44  ;;  %v5991_v8 = vmul.f32 %v11416_v46, %v18160_v62  ;;  %v18164_v4 = vpack.c.bf16 %v18162_v35, %v18163_v49  ;;  %v18165_v46 = vld [vmem:[#allocation241_spill] sm:$0xff]  ;;  %v18166_v62 = vld [vmem:[#allocation16_spill] sm:$0xff] }
 0x431   :  { %v11418_v37 = vpop.eup %11417  ;;  %v10647_v18 = vpop.f32.mrf.mxu1  ;;  %11431 = vrcp.f32 %v5837_v20 }
 0x432   :  { %v5992_v51 = vmul.f32 %v11418_v37, %v18161_v55  ;;  %v10642_v28 = vpop.f32.mrf.mxu0  ;;  %v11420_v1 = vpop.eup %11419 }
 0x433   :  { %v16054_v22 = vpop.f32.mrf.mxu1  ;;  %v5840_v12 = vpop.xlane.xlu1 %5839  ;;  %v5993_v20 = vmul.f32 %v11420_v1, %v18165_v46  ;;  %v18169_v46 = vld [vmem:[#allocation114_spill] sm:$0xff] }
 0x434   :  { %v6036_v11 = vpack.c.bf16 %v5992_v51, %v5991_v8  ;;  %10868 = vmatmul.mubr.msk.bf16.vlgmr.msra.gmra.mxu0 %vm4576_vm3, %v6035_v29  ;;  %v5843_v30 = vpop.xlane.xlu0 %5842  ;;  %11433 = vrcp.f32 %v5840_v12  ;;  %v18167_v8 = vld [vmem:[#allocation27_spill] sm:$0xff] }
 0x435   :  { %v11422_v24 = vpop.eup %11421  ;;  %10878 = vmatpush3.bf16.msra.mxu0 %v18164_v4  ;;  %v10648_v18 = vpop.f32.mrf.mxu1  ;;  %10879 = vmatprep.mubr.msk.bf16.mxu0 %vm11597_vm2, %v17820_v44  ;;  %11435 = vrcp.f32 %v5843_v30  ;;  %v18168_v55 = vpack.c.bf16 %v18166_v62, %v18167_v8 }
 0x436   :  { %v5994_v37 = vmul.f32 %v11422_v24, %v15599_v15  ;;  %10874 = vmatmul.mubr.msk.bf16.vlgmr.msra.gmra.mxu1 %vm4576_vm3, %v6036_v11  ;;  %10889 = vmatprep.subr.bf16.mxu0 %v17820_v44  ;;  %v11424_v29 = vpop.eup %11423 }
 0x437   :  { %10884 = vmatpush3.bf16.msra.mxu1 %v18168_v55  ;;  %v5846_v51 = vpop.xlane.xlu1 %5845  ;;  %10885 = vmatprep.mubr.msk.bf16.mxu1 %vm11597_vm2, %v17820_v44  ;;  %v5995_v1 = vmul.f32 %v11424_v29, %v15603_v36  ;;  %v18172_v55 = vld [vmem:[#allocation22_spill] sm:$0xff] }
 0x438   :  { %v6037_v28 = vpack.c.bf16 %v5994_v37, %v5993_v20  ;;  %v5849_v12 = vpop.xlane.xlu0 %5848  ;;  %11437 = vrcp.f32 %v5846_v51  ;;  %10895 = vmatprep.subr.bf16.mxu1 %v17820_v44  ;;  %v18170_v20 = vld [vmem:[#allocation112_spill] sm:$0xff]  ;;  %v18173_v51 = vld [vmem:[#allocation31_spill] sm:$0xff] }
 0x439   :  { %v11426_v15 = vpop.eup %11425  ;;  %11439 = vrcp.f32 %v5849_v12  ;;  %v18171_v37 = vpack.c.bf16 %v18169_v46, %v18170_v20 }
 0x43a   :  { %v5996_v11 = vmul.f32 %v11426_v15, %v15617_v0  ;;  %v11428_v30 = vpop.eup %11427 }
 0x43b   :  { %v5852_v24 = vpop.xlane.xlu1 %5851  ;;  %v5997_v36 = vmul.f32 %v11428_v30, %v15624_v59  ;;  %v18175_v30 = vld [vmem:[#allocation194_spill] sm:$0xff] }
 0x43c   :  { %v6038_v35 = vpack.c.bf16 %v5996_v11, %v5995_v1  ;;  %v16074_v49 = vpop.f32.mrf.mxu0  ;;  %10880 = vmatmul.mubr.msk.bf16.vlgmr.msra.gmra.mxu0 %vm4576_vm3, %v6037_v28  ;;  %v5855_v4 = vpop.xlane.xlu0 %5854  ;;  %11441 = vrcp.f32 %v5852_v24  ;;  %v18174_v28 = vpack.c.bf16 %v18172_v55, %v18173_v51  ;;  %v18177_v55 = vld [vmem:[#allocation118_spill] sm:$0xff]  ;;  %v18178_v51 = vld [vmem:[#allocation116_spill] sm:$0xff] }
 0x43d   :  { %v11430_v18 = vpop.eup %11429  ;;  %10890 = vmatpush3.bf16.msra.mxu0 %v18171_v37  ;;  %10891 = vmatprep.mubr.msk.bf16.mxu0 %vm11597_vm2, %v17820_v44  ;;  %11443 = vrcp.f32 %v5855_v4 }
 0x43e   :  { %v5998_v0 = vmul.f32 %v11430_v18, %v15633_v3  ;;  %v10653_v29 = vpop.f32.mrf.mxu0  ;;  %v16084_v62 = vpop.f32.mrf.mxu1  ;;  %10886 = vmatmul.mubr.msk.bf16.vlgmr.msra.gmra.mxu1 %vm4576_vm3, %v6038_v35  ;;  %10901 = vmatprep.subr.bf16.mxu0 %v17820_v44  ;;  %v18176_v35 = vld [vmem:[#allocation197_spill] sm:$0xff] }
 0x43f   :  { %v11432_v8 = vpop.eup %11431  ;;  %10896 = vmatpush3.bf16.msra.mxu1 %v18174_v28  ;;  %v5858_v12 = vpop.xlane.xlu1 %5857  ;;  %10897 = vmatprep.mubr.msk.bf16.mxu1 %vm11597_vm2, %v17820_v44  ;;  %v18179_v28 = vpack.c.bf16 %v18177_v55, %v18178_v51  ;;  %v18183_v51 = vld [vmem:[#allocation122_spill] sm:$0xff] }
 0x440   :  { %v6039_v59 = vpack.c.bf16 %v5998_v0, %v5997_v36  ;;  %v16093_v15 = vpop.f32.mrf.mxu0  ;;  %v5861_v3 = vpop.xlane.xlu0 %5860  ;;  %11445 = vrcp.f32 %v5858_v12  ;;  %10907 = vmatprep.subr.bf16.mxu1 %v17820_v44  ;;  %v5999_v24 = vmul.f32 %v11432_v8, %v18175_v30 }
 0x441   :  { %v11434_v1 = vpop.eup %11433  ;;  %v10659_v11 = vpop.f32.mrf.mxu1  ;;  %11447 = vrcp.f32 %v5861_v3 }
 0x442   :  { %v6000_v4 = vmul.f32 %v11434_v1, %v18176_v35  ;;  %v10654_v18 = vpop.f32.mrf.mxu0  ;;  %v11436_v46 = vpop.eup %11435  ;;  %v18180_v1 = vld [vmem:[#allocation26_spill] sm:$0xff]  ;;  %v18181_v11 = vld [vmem:[#allocation35_spill] sm:$0xff] }
 0x443   :  { %v16098_v20 = vpop.f32.mrf.mxu1  ;;  %v5864_v37 = vpop.xlane.xlu1 %5863  ;;  %v6001_v8 = vmul.f32 %v11436_v46, %v15644_v47  ;;  %v18182_v30 = vpack.c.bf16 %v18180_v1, %v18181_v11  ;;  %v18186_v1 = vld [vmem:[#allocation30_spill] sm:$0xff]  ;;  %v18187_v11 = vld [vmem:[#allocation4_spill] sm:$0xff] }
 0x444   :  { %v6040_v29 = vpack.c.bf16 %v6000_v4, %v5999_v24  ;;  %10892 = vmatmul.mubr.msk.bf16.vlgmr.msra.gmra.mxu0 %vm4576_vm3, %v6039_v59  ;;  %v5867_v36 = vpop.xlane.xlu0 %5866  ;;  %11449 = vrcp.f32 %v5864_v37 }
 0x445   :  { %v11438_v0 = vpop.eup %11437  ;;  %10902 = vmatpush3.bf16.msra.mxu0 %v18179_v28  ;;  %v10660_v12 = vpop.f32.mrf.mxu1  ;;  %10903 = vmatprep.mubr.msk.bf16.mxu0 %vm11597_vm2, %v17820_v44  ;;  %11451 = vrcp.f32 %v5867_v36  ;;  %v18184_v28 = vld [vmem:[#allocation120_spill] sm:$0xff] }
 0x446   :  { %v6002_v3 = vmul.f32 %v11438_v0, %v15659_v48  ;;  %10898 = vmatmul.mubr.msk.bf16.vlgmr.msra.gmra.mxu1 %vm4576_vm3, %v6040_v29  ;;  %10913 = vmatprep.subr.bf16.mxu0 %v17820_v44  ;;  %v11440_v59 = vpop.eup %11439  ;;  %v18185_v12 = vpack.c.bf16 %v18183_v51, %v18184_v28  ;;  %v18189_v28 = vld [vmem:[#allocation126_spill] sm:$0xff] }
 0x447   :  { %10908 = vmatpush3.bf16.msra.mxu1 %v18182_v30  ;;  %v5870_v24 = vpop.xlane.xlu1 %5869  ;;  %10909 = vmatprep.mubr.msk.bf16.mxu1 %vm11597_vm2, %v17820_v44  ;;  %v6003_v48 = vmul.f32 %v11440_v59, %v15663_v25  ;;  %v18188_v30 = vpack.c.bf16 %v18186_v1, %v18187_v11  ;;  %v18193_v1 = vld [vmem:[#allocation42_spill] sm:$0xff] }
 0x448   :  { %v6041_v35 = vpack.c.bf16 %v6002_v3, %v6001_v8  ;;  %v5873_v4 = vpop.xlane.xlu0 %5872  ;;  %11453 = vrcp.f32 %v5870_v24  ;;  %10919 = vmatprep.subr.bf16.mxu1 %v17820_v44 }
 0x449   :  { %v11442_v47 = vpop.eup %11441  ;;  %11455 = vrcp.f32 %v5873_v4 }
 0x44a   :  { %v6004_v18 = vmul.f32 %v11442_v47, %v15674_v38  ;;  %v11444_v46 = vpop.eup %11443 }
 0x44b   :  { %v5876_v37 = vpop.xlane.xlu1 %5875  ;;  %v6005_v25 = vmul.f32 %v11444_v46, %v15679_v16 }
 0x44c   :  { %v6042_v29 = vpack.c.bf16 %v6004_v18, %v6003_v48  ;;  %v16118_v36 = vpop.f32.mrf.mxu0  ;;  %10904 = vmatmul.mubr.msk.bf16.vlgmr.msra.gmra.mxu0 %vm4576_vm3, %v6041_v35  ;;  %v5879_v0 = vpop.xlane.xlu0 %5878  ;;  %11457 = vrcp.f32 %v5876_v37 }
 0x44d   :  { %v11446_v55 = vpop.eup %11445  ;;  %10914 = vmatpush3.bf16.msra.mxu0 %v18185_v12  ;;  %10915 = vmatprep.mubr.msk.bf16.mxu0 %vm11597_vm2, %v17820_v44  ;;  %11459 = vrcp.f32 %v5879_v0  ;;  %v18190_v12 = vld [vmem:[#allocation124_spill] sm:$0xff] }
 0x44e   :  { %v6006_v38 = vmul.f32 %v11446_v55, %v15688_v23  ;;  %v10665_v8 = vpop.f32.mrf.mxu0  ;;  %v16128_v3 = vpop.f32.mrf.mxu1  ;;  %10910 = vmatmul.mubr.msk.bf16.vlgmr.msra.gmra.mxu1 %vm4576_vm3, %v6042_v29  ;;  %10925 = vmatprep.subr.bf16.mxu0 %v17820_v44 }
 0x44f   :  { %v11448_v59 = vpop.eup %11447  ;;  %10920 = vmatpush3.bf16.msra.mxu1 %v18188_v30  ;;  %v5882_v24 = vpop.xlane.xlu1 %5881  ;;  %10921 = vmatprep.mubr.msk.bf16.mxu1 %vm11597_vm2, %v17820_v44 }
 0x450   :  { %v6043_v16 = vpack.c.bf16 %v6006_v38, %v6005_v25  ;;  %v16137_v35 = vpop.f32.mrf.mxu0  ;;  %v5885_v23 = vpop.xlane.xlu0 %5884  ;;  %11461 = vrcp.f32 %v5882_v24  ;;  %10931 = vmatprep.subr.bf16.mxu1 %v17820_v44  ;;  %v6007_v48 = vmul.f32 %v11448_v59, %v15694_v14  ;;  %v18191_v25 = vpack.c.bf16 %v18189_v28, %v18190_v12  ;;  %v18192_v59 = vld [vmem:[#allocation34_spill] sm:$0xff]  ;;  %v18199_v28 = vld [vmem:[#allocation5_spill] sm:$0xff]  ;;  %v18200_v12 = vld [vmem:[#allocation48_spill] sm:$0xff] }
 0x451   :  { %v11450_v4 = vpop.eup %11449  ;;  %v10671_v47 = vpop.f32.mrf.mxu1  ;;  %11463 = vrcp.f32 %v5885_v23  ;;  %v18194_v11 = vpack.c.bf16 %v18192_v59, %v18193_v1  ;;  %v18202_v59 = vld [vmem:[#allocation150_spill] sm:$0xff] }
 0x452   :  { %v6008_v18 = vmul.f32 %v11450_v4, %v15698_v26  ;;  %v10666_v46 = vpop.f32.mrf.mxu0  ;;  %v11452_v37 = vpop.eup %11451 }
 0x453   :  { %v16142_v29 = vpop.f32.mrf.mxu1  ;;  %v5888_v0 = vpop.xlane.xlu1 %5887  ;;  %v6009_v14 = vmul.f32 %v11452_v37, %v15700_v17 }
 0x454   :  { %v6044_v55 = vpack.c.bf16 %v6008_v18, %v6007_v48  ;;  %10916 = vmatmul.mubr.msk.bf16.vlgmr.msra.gmra.mxu0 %vm4576_vm3, %v6043_v16  ;;  %11465 = vrcp.f32 %v5888_v0  ;;  %v18195_v48 = vld [vmem:[#allocation130_spill] sm:$0xff]  ;;  %v18196_v18 = vld [vmem:[#allocation128_spill] sm:$0xff]  ;;  %v18198_v0 = vld [vmem:[#allocation149_spill] sm:$0xff] }
 0x455   :  { %v11454_v51 = vpop.eup %11453  ;;  %10926 = vmatpush3.bf16.msra.mxu0 %v18191_v25  ;;  %v10672_v38 = vpop.f32.mrf.mxu1  ;;  %10927 = vmatprep.mubr.msk.bf16.mxu0 %vm11597_vm2, %v17820_v44  ;;  %v18197_v46 = vpack.c.bf16 %v18195_v48, %v18196_v18  ;;  %v18201_v25 = vpack.c.bf16 %v18199_v28, %v18200_v12 }
 0x456   :  { %v6010_v26 = vmul.f32 %v11454_v51, %v15713_v21  ;;  %10922 = vmatmul.mubr.msk.bf16.vlgmr.msra.gmra.mxu1 %vm4576_vm3, %v6044_v55  ;;  %10937 = vmatprep.subr.bf16.mxu0 %v17820_v44  ;;  %v11456_v8 = vpop.eup %11455 }
 0x457   :  { %10932 = vmatpush3.bf16.msra.mxu1 %v18194_v11  ;;  %10933 = vmatprep.mubr.msk.bf16.mxu1 %vm11597_vm2, %v17820_v44  ;;  %v6011_v17 = vmul.f32 %v11456_v8, %v15717_v9 }
 0x458   :  { %v6045_v30 = vpack.c.bf16 %v6010_v26, %v6009_v14  ;;  %10943 = vmatprep.subr.bf16.mxu1 %v17820_v44 }
 0x459   :  { %v11458_v24 = vpop.eup %11457 }
 0x45a   :  { %v6012_v21 = vmul.f32 %v11458_v24, %v15727_v50  ;;  %v11460_v16 = vpop.eup %11459 }
 0x45b   :  { %v6013_v37 = vmul.f32 %v11460_v16, %v15732_v32 }
 0x45c   :  { %v6046_v23 = vpack.c.bf16 %v6012_v21, %v6011_v17  ;;  %v16162_v4 = vpop.f32.mrf.mxu0  ;;  %10928 = vmatmul.mubr.msk.bf16.vlgmr.msra.gmra.mxu0 %vm4576_vm3, %v6045_v30 }
 0x45d   :  { %v11462_v47 = vpop.eup %11461  ;;  %10938 = vmatpush3.bf16.msra.mxu0 %v18197_v46  ;;  %10939 = vmatprep.mubr.msk.bf16.mxu0 %vm11597_vm2, %v17820_v44 }
 0x45e   :  { %v6014_v9 = vmul.f32 %v11462_v47, %v18198_v0  ;;  %v10677_v55 = vpop.f32.mrf.mxu0  ;;  %v16172_v50 = vpop.f32.mrf.mxu1  ;;  %10934 = vmatmul.mubr.msk.bf16.vlgmr.msra.gmra.mxu1 %vm4576_vm3, %v6046_v23 }
 0x45f   :  { %v11464_v51 = vpop.eup %11463  ;;  %10944 = vmatpush3.bf16.msra.mxu1 %v18201_v25  ;;  %10945 = vmatprep.mubr.msk.bf16.mxu1 %vm11597_vm2, %v17820_v44 }
 0x460   :  { %v6047_v38 = vpack.c.bf16 %v6014_v9, %v6013_v37  ;;  %v16180_v14 = vpop.f32.mrf.mxu0  ;;  %v10683_v26 = vpop.f32.mrf.mxu1  ;;  %v6015_v8 = vmul.f32 %v11464_v51, %v15747_v57 }
 0x461   :  { %v11466_v32 = vpop.eup %11465 }
 0x462   :  { %v6016_v1 = vmul.f32 %v11466_v32, %v18202_v59  ;;  %v10678_v11 = vpop.f32.mrf.mxu0  ;;  %v16184_v30 = vpop.f32.mrf.mxu1 }
 0x464   :  { %v6048_v24 = vpack.c.bf16 %v6016_v1, %v6015_v8  ;;  %10940 = vmatmul.mubr.msk.bf16.vlgmr.msra.gmra.mxu0 %vm4576_vm3, %v6047_v38  ;;  %v10684_v17 = vpop.f32.mrf.mxu1 }
 0x466   :  { %10946 = vmatmul.mubr.msk.bf16.vlgmr.msra.gmra.mxu1 %vm4576_vm3, %v6048_v24 }
 0x46c   :  { %v16188_v21 = vpop.f32.mrf.mxu0 }
 0x46e   :  { %v10689_v44 = vpop.f32.mrf.mxu0  ;;  %v16190_v16 = vpop.f32.mrf.mxu1 }
 0x470   :  { %v16192_v23 = vpop.f32.mrf.mxu0  ;;  %v10695_v47 = vpop.f32.mrf.mxu1 }
 0x472   :  { %v10690_v57 = vpop.f32.mrf.mxu0  ;;  %v16194_v48 = vpop.f32.mrf.mxu1 }
 0x474   :  { %v10696_v18 = vpop.f32.mrf.mxu1 }
 0x47c   :  { %v16196_v46 = vpop.f32.mrf.mxu0 }
 0x47e   :  { %v10701_v37 = vpop.f32.mrf.mxu0  ;;  %v16198_v0 = vpop.f32.mrf.mxu1 }
 0x480   :  { %v16200_v9 = vpop.f32.mrf.mxu0  ;;  %v10707_v55 = vpop.f32.mrf.mxu1 }
 0x482   :  { %v10702_v51 = vpop.f32.mrf.mxu0  ;;  %v16202_v28 = vpop.f32.mrf.mxu1 }
 0x484   :  { %v10708_v12 = vpop.f32.mrf.mxu1 }
 0x48c   :  { %v16204_v25 = vpop.f32.mrf.mxu0 }
 0x48d   :  { %18203 = vst [vmem:[#allocation152_spill] sm:$0xff] %v16204_v25  ;;  %v11476_v25 = vld [vmem:[%s17066_s0 + $0x20] sm:$0xff] }
 0x48e   :  { %v10713_v38 = vpop.f32.mrf.mxu0  ;;  %v16206_v26 = vpop.f32.mrf.mxu1 }
 0x48f   :  { %18204 = vst [vmem:[#allocation151_spill] sm:$0xff] %v16206_v26 }
 0x490   :  { %v16208_v32 = vpop.f32.mrf.mxu0  ;;  %v10719_v8 = vpop.f32.mrf.mxu1 }
 0x491   :  { %18205 = vst [vmem:[#allocation76_spill] sm:$0xff] %v16208_v32 }
 0x492   :  { %v10714_v59 = vpop.f32.mrf.mxu0  ;;  %v16210_v1 = vpop.f32.mrf.mxu1 }
 0x493   :  { %18206 = vst [vmem:[#allocation74_spill] sm:$0xff] %v16210_v1 }
 0x494   :  { %v16212_v11 = vpop.f32.mrf.mxu0  ;;  %v10720_v24 = vpop.f32.mrf.mxu1 }
 0x495   :  { %18207 = vst [vmem:[#allocation153_spill] sm:$0xff] %v16212_v11 }
 0x496   :  { %v10725_v17 = vpop.f32.mrf.mxu0  ;;  %v16214_v44 = vpop.f32.mrf.mxu1 }
 0x497   :  { %18208 = vst [vmem:[#allocation154_spill] sm:$0xff] %v16214_v44 }
 0x498   :  { %v16216_v47 = vpop.f32.mrf.mxu0  ;;  %v10731_v57 = vpop.f32.mrf.mxu1 }
 0x499   :  { %18209 = vst [vmem:[#allocation72_spill] sm:$0xff] %v16216_v47 }
 0x49a   :  { %v10726_v18 = vpop.f32.mrf.mxu0  ;;  %v16218_v37 = vpop.f32.mrf.mxu1 }
 0x49b   :  { %18210 = vst [vmem:[#allocation69_spill] sm:$0xff] %v16218_v37 }
 0x49c   :  { %v16220_v55 = vpop.f32.mrf.mxu0  ;;  %v10732_v51 = vpop.f32.mrf.mxu1 }
 0x49d   :  { %18211 = vst [vmem:[#allocation156_spill] sm:$0xff] %v16220_v55 }
 0x49e   :  { %v10737_v12 = vpop.f32.mrf.mxu0  ;;  %v16222_v38 = vpop.f32.mrf.mxu1 }
 0x49f   :  { %18212 = vst [vmem:[#allocation155_spill] sm:$0xff] %v16222_v38  ;;  %v16239_v12 = vld [vmem:[%s17075_s11] ss:$0 sm:$0xff] }
 0x4a0   :  { %v16224_v8 = vpop.f32.mrf.mxu0  ;;  %v10743_v59 = vpop.f32.mrf.mxu1 }
 0x4a1   :  { %18213 = vst [vmem:[#allocation206_spill] sm:$0xff] %v16224_v8 }
 0x4a2   :  { %v10738_v11 = vpop.f32.mrf.mxu0  ;;  %v16226_v24 = vpop.f32.mrf.mxu1 }
 0x4a3   :  { %18214 = vst [vmem:[#allocation209_spill] sm:$0xff] %v16226_v24  ;;  %v11471_v11 = vld [vmem:[%s17066_s0 + $0x10] sm:$0xff] }
 0x4a4   :  { %v16228_v17 = vpop.f32.mrf.mxu0  ;;  %v10744_v44 = vpop.f32.mrf.mxu1 }
 0x4a5   :  { %18215 = vst [vmem:[#allocation157_spill] sm:$0xff] %v16228_v17  ;;  %v11472_v44 = vld [vmem:[%s17067_s1 + $0x10] sm:$0xff]  ;;  %v11474_v17 = vld [vmem:[%s17066_s0 + $0x18] sm:$0xff] }
 0x4a6   :  { %v10749_v47 = vpop.f32.mrf.mxu0  ;;  %v16230_v57 = vpop.f32.mrf.mxu1 }
 0x4a7   :  { %18216 = vst [vmem:[#allocation158_spill] sm:$0xff] %v16230_v57  ;;  %v8867_v47 = vadd.f32 %v11472_v44, %v11471_v11  ;;  %v11475_v11 = vld [vmem:[%s17067_s1 + $0x18] sm:$0xff] }
 0x4a8   :  { %v16232_v18 = vpop.f32.mrf.mxu0  ;;  %v10755_v37 = vpop.f32.mrf.mxu1  ;;  %v8868_v44 = vadd.f32 %v11475_v11, %v11474_v17  ;;  %v11477_v17 = vld [vmem:[%s17067_s1 + $0x20] sm:$0xff] }
 0x4a9   :  { %18217 = vst [vmem:[#allocation210_spill] sm:$0xff] %v16232_v18  ;;  %v16250_v37 = vld [vmem:[%s17074_s10] ss:$0 sm:$0xff] }
 0x4aa   :  { %v10750_v55 = vpop.f32.mrf.mxu0  ;;  %v16234_v51 = vpop.f32.mrf.mxu1  ;;  %v8939_v1 = vmul.f32 %v16250_v37, %v15790_v45 }
 0x4ab   :  { %18218 = vst [vmem:[#allocation213_spill] sm:$0xff] %v16234_v51  ;;  %v18219_v55 = vld [vmem:[#allocation198_spill] sm:$0xff] }
 0x4ac   :  { %v8938_v59 = vmul.f32 %v16250_v37, %v18219_v55  ;;  %v7494_v51 = vpop.f32.mrf.mxu0  ;;  %v10756_v18 = vpop.f32.mrf.mxu1  ;;  %v18220_v55 = vld [vmem:[#allocation201_spill] sm:$0xff] }
 0x4ad   :  { %v9071_v57 = vmul.f32 %v16239_v12, %v7494_v51 }
 0x4ae   :  { %v10761_v24 = vpop.f32.mrf.mxu0  ;;  %v7538_v8 = vpop.f32.mrf.mxu1  ;;  %v9002_v38 = vadd.f32 %v8938_v59, %v8867_v47  ;;  %v8940_v47 = vmul.f32 %v16250_v37, %v15810_v34  ;;  %v9003_v34 = vadd.f32 %v8939_v1, %v8868_v44  ;;  %v11481_v1 = vld [vmem:[%s17067_s1 + $0x28] sm:$0xff] }
 0x4af   :  { %v9135_v32 = vadd.f32 %v9071_v57, %v18220_v55  ;;  %v9073_v18 = vmul.f32 %v16239_v12, %v7538_v8  ;;  %v8869_v24 = vadd.f32 %v11477_v17, %v11476_v25  ;;  %v11478_v8 = vld [vmem:[%s17066_s0 + $0x30] sm:$0xff]  ;;  %v8942_v55 = vmul.f32 %v16250_v37, %v15820_v53 }
 0x4b0   :  { %v7497_v51 = vpop.f32.mrf.mxu0  ;;  %v10767_v26 = vpop.f32.mrf.mxu1  ;;  %v11479_v57 = vld [vmem:[%s17067_s1 + $0x30] sm:$0xff] }
 0x4b1   :  { %9199 = vst.msk [vmem:[%s17076_s12] sm:$0xff] %vm243_vm1, %v9135_v32  ;;  %v9072_v45 = vmul.f32 %v16239_v12, %v7497_v51  ;;  %v9137_v26 = vadd.f32 %v9073_v18, %v9002_v38  ;;  %v8871_v25 = vadd.f32 %v11479_v57, %v11478_v8  ;;  %v11480_v18 = vld [vmem:[%s17066_s0 + $0x28] sm:$0xff]  ;;  %v9004_v17 = vadd.f32 %v8940_v47, %v8869_v24  ;;  %v11482_v8 = vld [vmem:[%s17066_s0 + $0x38] sm:$0xff] }
 0x4b2   :  { %v10762_v59 = vpop.f32.mrf.mxu0  ;;  %v7541_v11 = vpop.f32.mrf.mxu1  ;;  %v8870_v44 = vadd.f32 %v11481_v1, %v11480_v18  ;;  %v11483_v57 = vld [vmem:[%s17067_s1 + $0x38] sm:$0xff]  ;;  %v11485_v18 = vld [vmem:[%s17067_s1 + $0x40] sm:$0xff] }
 0x4b3   :  { %v9136_v32 = vadd.f32 %v9072_v45, %v15788_v42  ;;  %9201 = vst.msk [vmem:[%s17076_s12 + $0x10] sm:$0xff] %vm243_vm1, %v9137_v26  ;;  %v9074_v38 = vmul.f32 %v16239_v12, %v7541_v11  ;;  %v8941_v42 = vmul.f32 %v16250_v37, %v15829_v54  ;;  %v8872_v24 = vadd.f32 %v11483_v57, %v11482_v8 }
 0x4b4   :  { %v7582_v51 = vpop.f32.mrf.mxu0  ;;  %v10768_v53 = vpop.f32.mrf.mxu1  ;;  %v9006_v54 = vadd.f32 %v8942_v55, %v8871_v25  ;;  %v8943_v11 = vmul.f32 %v16250_v37, %v15834_v40  ;;  %v8946_v57 = vmul.f32 %v16250_v37, %v15864_v33 }
 0x4b5   :  { %9200 = vst.msk [vmem:[%s17076_s12 + $0x8] sm:$0xff] %vm243_vm1, %v9136_v32  ;;  %v9138_v45 = vadd.f32 %v9074_v38, %v9003_v34  ;;  %v9075_v26 = vmul.f32 %v16239_v12, %v7582_v51  ;;  %v11484_v38 = vld [vmem:[%s17066_s0 + $0x40] sm:$0xff]  ;;  %v9005_v40 = vadd.f32 %v8941_v42, %v8870_v44  ;;  %v8944_v51 = vmul.f32 %v16250_v37, %v15854_v39 }
 0x4b6   :  { %v10773_v47 = vpop.f32.mrf.mxu0  ;;  %v7626_v59 = vpop.f32.mrf.mxu1  ;;  %v8873_v25 = vadd.f32 %v11485_v18, %v11484_v38  ;;  %v9007_v39 = vadd.f32 %v8943_v11, %v8872_v24  ;;  %v8945_v38 = vmul.f32 %v16250_v37, %v15873_v31 }
 0x4b7   :  { %9202 = vst.msk [vmem:[%s17076_s12 + $0x18] sm:$0xff] %vm243_vm1, %v9138_v45  ;;  %v9139_v34 = vadd.f32 %v9075_v26, %v9004_v17  ;;  %v9077_v32 = vmul.f32 %v16239_v12, %v7626_v59  ;;  %v11486_v45 = vld [vmem:[%s17066_s0 + $0x50] sm:$0xff] }
 0x4b8   :  { %v7585_v55 = vpop.f32.mrf.mxu0  ;;  %v10779_v1 = vpop.f32.mrf.mxu1  ;;  %v11487_v26 = vld [vmem:[%s17067_s1 + $0x50] sm:$0xff]  ;;  %v9008_v33 = vadd.f32 %v8944_v51, %v8873_v25 }
 0x4b9   :  { %9203 = vst.msk [vmem:[%s17076_s12 + $0x20] sm:$0xff] %vm243_vm1, %v9139_v34  ;;  %v9076_v53 = vmul.f32 %v16239_v12, %v7585_v55  ;;  %v9141_v17 = vadd.f32 %v9077_v32, %v9006_v54  ;;  %v8875_v44 = vadd.f32 %v11487_v26, %v11486_v45  ;;  %v11488_v54 = vld [vmem:[%s17066_s0 + $0x48] sm:$0xff]  ;;  %v11490_v1 = vld [vmem:[%s17066_s0 + $0x58] sm:$0xff] }
 0x4ba   :  { %v10774_v42 = vpop.f32.mrf.mxu0  ;;  %v7629_v8 = vpop.f32.mrf.mxu1  ;;  %v11489_v34 = vld [vmem:[%s17067_s1 + $0x48] sm:$0xff] }
 0x4bb   :  { %v9140_v47 = vadd.f32 %v9076_v53, %v9005_v40  ;;  %9205 = vst.msk [vmem:[%s17076_s12 + $0x30] sm:$0xff] %vm243_vm1, %v9141_v17  ;;  %v9078_v59 = vmul.f32 %v16239_v12, %v7629_v8  ;;  %v8874_v24 = vadd.f32 %v11489_v34, %v11488_v54  ;;  %v11491_v40 = vld [vmem:[%s17067_s1 + $0x58] sm:$0xff]  ;;  %v9010_v31 = vadd.f32 %v8946_v57, %v8875_v44  ;;  %v11492_v42 = vld [vmem:[%s17066_s0 + $0x60] sm:$0xff]  ;;  %v11494_v34 = vld [vmem:[%s17066_s0 + $0x70] sm:$0xff] }
 0x4bc   :  { %v7670_v11 = vpop.f32.mrf.mxu0  ;;  %v10780_v32 = vpop.f32.mrf.mxu1  ;;  %v8876_v25 = vadd.f32 %v11491_v40, %v11490_v1  ;;  %v8947_v17 = vmul.f32 %v16250_v37, %v15878_v7  ;;  %v11493_v8 = vld [vmem:[%s17067_s1 + $0x60] sm:$0xff]  ;;  %v11496_v1 = vld [vmem:[%s17066_s0 + $0x68] sm:$0xff] }
 0x4bd   :  { %9204 = vst.msk [vmem:[%s17076_s12 + $0x28] sm:$0xff] %vm243_vm1, %v9140_v47  ;;  %v9142_v18 = vadd.f32 %v9078_v59, %v9007_v39  ;;  %v9079_v55 = vmul.f32 %v16239_v12, %v7670_v11  ;;  %v8877_v44 = vadd.f32 %v11493_v8, %v11492_v42  ;;  %v9009_v7 = vadd.f32 %v8945_v38, %v8874_v24  ;;  %v11495_v11 = vld [vmem:[%s17067_s1 + $0x70] sm:$0xff]  ;;  %v11497_v40 = vld [vmem:[%s17067_s1 + $0x68] sm:$0xff]  ;;  %v11499_v42 = vld [vmem:[%s17067_s1 + $0x78] sm:$0xff] }
 0x4be   :  { %v10785_v51 = vpop.f32.mrf.mxu0  ;;  %v7714_v53 = vpop.f32.mrf.mxu1  ;;  %v8948_v47 = vmul.f32 %v16250_v37, %v15898_v52  ;;  %v8879_v24 = vadd.f32 %v11495_v11, %v11494_v34  ;;  %v9011_v52 = vadd.f32 %v8947_v17, %v8876_v25  ;;  %v8950_v38 = vmul.f32 %v16250_v37, %v15908_v19 }
 0x4bf   :  { %9206 = vst.msk [vmem:[%s17076_s12 + $0x38] sm:$0xff] %vm243_vm1, %v9142_v18  ;;  %v9143_v45 = vadd.f32 %v9079_v55, %v9008_v33  ;;  %v9081_v26 = vmul.f32 %v16239_v12, %v7714_v53  ;;  %v8878_v25 = vadd.f32 %v11497_v40, %v11496_v1 }
 0x4c0   :  { %v7673_v39 = vpop.f32.mrf.mxu0  ;;  %v10791_v57 = vpop.f32.mrf.mxu1  ;;  %v9012_v19 = vadd.f32 %v8948_v47, %v8877_v44 }
 0x4c1   :  { %9207 = vst.msk [vmem:[%s17076_s12 + $0x40] sm:$0xff] %vm243_vm1, %v9143_v45  ;;  %v9080_v59 = vmul.f32 %v16239_v12, %v7673_v39  ;;  %v9145_v54 = vadd.f32 %v9081_v26, %v9010_v31  ;;  %v8949_v31 = vmul.f32 %v16250_v37, %v15917_v56  ;;  %v11498_v26 = vld [vmem:[%s17066_s0 + $0x78] sm:$0xff]  ;;  %v9014_v56 = vadd.f32 %v8950_v38, %v8879_v24  ;;  %v11502_v38 = vld [vmem:[%s17066_s0 + $0x90] sm:$0xff] }
 0x4c2   :  { %v10786_v32 = vpop.f32.mrf.mxu0  ;;  %v7717_v33 = vpop.f32.mrf.mxu1  ;;  %v8880_v8 = vadd.f32 %v11499_v42, %v11498_v26  ;;  %v8951_v57 = vmul.f32 %v16250_v37, %v15922_v58  ;;  %v8953_v42 = vmul.f32 %v16250_v37, %v15961_v5 }
 0x4c3   :  { %v9144_v18 = vadd.f32 %v9080_v59, %v9009_v7  ;;  %9209 = vst.msk [vmem:[%s17076_s12 + $0x50] sm:$0xff] %vm243_vm1, %v9145_v54  ;;  %v9082_v55 = vmul.f32 %v16239_v12, %v7717_v33  ;;  %v11500_v59 = vld [vmem:[%s17066_s0 + $0x80] sm:$0xff]  ;;  %v9013_v58 = vadd.f32 %v8949_v31, %v8878_v25  ;;  %v8952_v32 = vmul.f32 %v16250_v37, %v15942_v43  ;;  %v11505_v31 = vld [vmem:[%s17067_s1 + $0x88] sm:$0xff] }
 0x4c4   :  { %v7758_v51 = vpop.f32.mrf.mxu0  ;;  %v10792_v53 = vpop.f32.mrf.mxu1  ;;  %v11501_v54 = vld [vmem:[%s17067_s1 + $0x80] sm:$0xff]  ;;  %v9015_v43 = vadd.f32 %v8951_v57, %v8880_v8  ;;  %v8954_v25 = vmul.f32 %v16250_v37, %v15952_v60 }
 0x4c5   :  { %9208 = vst.msk [vmem:[%s17076_s12 + $0x48] sm:$0xff] %vm243_vm1, %v9144_v18  ;;  %v9146_v17 = vadd.f32 %v9082_v55, %v9011_v52  ;;  %v9083_v45 = vmul.f32 %v16239_v12, %v7758_v51  ;;  %v8881_v34 = vadd.f32 %v11501_v54, %v11500_v59  ;;  %v11503_v18 = vld [vmem:[%s17067_s1 + $0x90] sm:$0xff]  ;;  %v8955_v59 = vmul.f32 %v16250_v37, %v15966_v27 }
 0x4c6   :  { %v10797_v44 = vpop.f32.mrf.mxu0  ;;  %v7802_v39 = vpop.f32.mrf.mxu1  ;;  %v8883_v55 = vadd.f32 %v11503_v18, %v11502_v38 }
 0x4c7   :  { %9210 = vst.msk [vmem:[%s17076_s12 + $0x58] sm:$0xff] %vm243_vm1, %v9146_v17  ;;  %v9147_v7 = vadd.f32 %v9083_v45, %v9012_v19  ;;  %v9085_v47 = vmul.f32 %v16239_v12, %v7802_v39  ;;  %v11504_v19 = vld [vmem:[%s17066_s0 + $0x88] sm:$0xff]  ;;  %v9016_v60 = vadd.f32 %v8952_v32, %v8881_v34  ;;  %v11506_v39 = vld [vmem:[%s17066_s0 + $0x98] sm:$0xff] }
 0x4c8   :  { %v7761_v11 = vpop.f32.mrf.mxu0  ;;  %v10803_v24 = vpop.f32.mrf.mxu1  ;;  %v8882_v17 = vadd.f32 %v11505_v31, %v11504_v19  ;;  %v9018_v5 = vadd.f32 %v8954_v25, %v8883_v55  ;;  %v11510_v55 = vld [vmem:[%s17066_s0 + $0xb0] sm:$0xff]  ;;  %v11512_v31 = vld [vmem:[%s17066_s0 + $0xa8] sm:$0xff] }
 0x4c9   :  { %9211 = vst.msk [vmem:[%s17076_s12 + $0x60] sm:$0xff] %vm243_vm1, %v9147_v7  ;;  %v9084_v33 = vmul.f32 %v16239_v12, %v7761_v11  ;;  %v9149_v52 = vadd.f32 %v9085_v47, %v9014_v56  ;;  %v11507_v56 = vld [vmem:[%s17067_s1 + $0x98] sm:$0xff]  ;;  %v11508_v11 = vld [vmem:[%s17066_s0 + $0xa0] sm:$0xff] }
 0x4ca   :  { %v10798_v1 = vpop.f32.mrf.mxu0  ;;  %v7805_v40 = vpop.f32.mrf.mxu1  ;;  %v8884_v57 = vadd.f32 %v11507_v56, %v11506_v39  ;;  %v11509_v24 = vld [vmem:[%s17067_s1 + $0xa0] sm:$0xff]  ;;  %v9017_v27 = vadd.f32 %v8953_v42, %v8882_v17  ;;  %v11513_v17 = vld [vmem:[%s17067_s1 + $0xa8] sm:$0xff]  ;;  %v8957_v42 = vmul.f32 %v16250_v37, %v16005_v10  ;;  %v11514_v39 = vld [vmem:[%s17066_s0 + $0xb8] sm:$0xff] }
 0x4cb   :  { %v9148_v51 = vadd.f32 %v9084_v33, %v9013_v58  ;;  %9213 = vst.msk [vmem:[%s17076_s12 + $0x70] sm:$0xff] %vm243_vm1, %v9149_v52  ;;  %v9086_v53 = vmul.f32 %v16239_v12, %v7805_v40  ;;  %v8885_v58 = vadd.f32 %v11509_v24, %v11508_v11  ;;  %v8956_v52 = vmul.f32 %v16250_v37, %v15986_v63  ;;  %v11511_v1 = vld [vmem:[%s17067_s1 + $0xb0] sm:$0xff]  ;;  %v11515_v56 = vld [vmem:[%s17067_s1 + $0xb8] sm:$0xff]  ;;  %v11517_v11 = vld [vmem:[%s17067_s1 + $0xc0] sm:$0xff] }
 0x4cc   :  { %v7846_v45 = vpop.f32.mrf.mxu0  ;;  %v10804_v26 = vpop.f32.mrf.mxu1  ;;  %v8887_v40 = vadd.f32 %v11511_v1, %v11510_v55  ;;  %v9019_v63 = vadd.f32 %v8955_v59, %v8884_v57  ;;  %v8888_v57 = vadd.f32 %v11515_v56, %v11514_v39  ;;  %v8963_v56 = vmul.f32 %v16250_v37, %v16054_v22 }
 0x4cd   :  { %9212 = vst.msk [vmem:[%s17076_s12 + $0x68] sm:$0xff] %vm243_vm1, %v9148_v51  ;;  %v9150_v8 = vadd.f32 %v9086_v53, %v9015_v43  ;;  %v9087_v44 = vmul.f32 %v16239_v12, %v7846_v45  ;;  %v8958_v51 = vmul.f32 %v16250_v37, %v15996_v61  ;;  %v8886_v45 = vadd.f32 %v11513_v17, %v11512_v31 }
 0x4ce   :  { %v10809_v7 = vpop.f32.mrf.mxu0  ;;  %v7890_v47 = vpop.f32.mrf.mxu1  ;;  %v9020_v61 = vadd.f32 %v8956_v52, %v8885_v58 }
 0x4cf   :  { %9214 = vst.msk [vmem:[%s17076_s12 + $0x78] sm:$0xff] %vm243_vm1, %v9150_v8  ;;  %v9151_v54 = vadd.f32 %v9087_v44, %v9016_v60  ;;  %v9089_v34 = vmul.f32 %v16239_v12, %v7890_v47  ;;  %v9022_v10 = vadd.f32 %v8958_v51, %v8887_v40  ;;  %v11520_v51 = vld [vmem:[%s17066_s0 + $0xc8] sm:$0xff] }
 0x4d0   :  { %v7849_v32 = vpop.f32.mrf.mxu0  ;;  %v10815_v33 = vpop.f32.mrf.mxu1 }
 0x4d1   :  { %9215 = vst.msk [vmem:[%s17076_s12 + $0x80] sm:$0xff] %vm243_vm1, %v9151_v54  ;;  %v9088_v38 = vmul.f32 %v16239_v12, %v7849_v32  ;;  %v9153_v18 = vadd.f32 %v9089_v34, %v9018_v5  ;;  %v8959_v5 = vmul.f32 %v16250_v37, %v16010_v13  ;;  %v11516_v34 = vld [vmem:[%s17066_s0 + $0xc0] sm:$0xff]  ;;  %v9021_v13 = vadd.f32 %v8957_v42, %v8886_v45  ;;  %v11523_v42 = vld [vmem:[%s17067_s1 + $0xd8] sm:$0xff] }
 0x4d2   :  { %v10810_v43 = vpop.f32.mrf.mxu0  ;;  %v7893_v25 = vpop.f32.mrf.mxu1  ;;  %v8889_v24 = vadd.f32 %v11517_v11, %v11516_v34  ;;  %v8960_v33 = vmul.f32 %v16250_v37, %v16030_v41  ;;  %v8961_v45 = vmul.f32 %v16250_v37, %v16049_v6  ;;  %v8964_v34 = vmul.f32 %v16250_v37, %v16074_v49 }
 0x4d3   :  { %v9152_v53 = vadd.f32 %v9088_v38, %v9017_v27  ;;  %9217 = vst.msk [vmem:[%s17076_s12 + $0x90] sm:$0xff] %vm243_vm1, %v9153_v18  ;;  %v9090_v19 = vmul.f32 %v16239_v12, %v7893_v25  ;;  %v11518_v38 = vld [vmem:[%s17066_s0 + $0xd0] sm:$0xff]  ;;  %v9023_v41 = vadd.f32 %v8959_v5, %v8888_v57  ;;  %v8962_v43 = vmul.f32 %v16250_v37, %v16040_v2 }
 0x4d4   :  { %v7934_v26 = vpop.f32.mrf.mxu0  ;;  %v10816_v60 = vpop.f32.mrf.mxu1  ;;  %v11519_v18 = vld [vmem:[%s17067_s1 + $0xd0] sm:$0xff]  ;;  %v9024_v2 = vadd.f32 %v8960_v33, %v8889_v24 }
 0x4d5   :  { %9216 = vst.msk [vmem:[%s17076_s12 + $0x88] sm:$0xff] %vm243_vm1, %v9152_v53  ;;  %v9154_v8 = vadd.f32 %v9090_v19, %v9019_v63  ;;  %v9091_v44 = vmul.f32 %v16239_v12, %v7934_v26  ;;  %v8891_v55 = vadd.f32 %v11519_v18, %v11518_v38  ;;  %v11521_v53 = vld [vmem:[%s17067_s1 + $0xc8] sm:$0xff] }
 0x4d6   :  { %v10821_v7 = vpop.f32.mrf.mxu0  ;;  %v7978_v47 = vpop.f32.mrf.mxu1  ;;  %v8890_v19 = vadd.f32 %v11521_v53, %v11520_v51  ;;  %v11530_v53 = vld [vmem:[%s17066_s0 + $0xf8] sm:$0xff] }
 0x4d7   :  { %9218 = vst.msk [vmem:[%s17076_s12 + $0x98] sm:$0xff] %vm243_vm1, %v9154_v8  ;;  %v9155_v59 = vadd.f32 %v9091_v44, %v9020_v61  ;;  %v9093_v54 = vmul.f32 %v16239_v12, %v7978_v47  ;;  %v11522_v61 = vld [vmem:[%s17066_s0 + $0xd8] sm:$0xff]  ;;  %v9026_v6 = vadd.f32 %v8962_v43, %v8891_v55  ;;  %v11524_v47 = vld [vmem:[%s17066_s0 + $0xe0] sm:$0xff]  ;;  %v11528_v55 = vld [vmem:[%s17066_s0 + $0xe8] sm:$0xff] }
 0x4d8   :  { %v7937_v58 = vpop.f32.mrf.mxu0  ;;  %v10827_v32 = vpop.f32.mrf.mxu1  ;;  %v8892_v8 = vadd.f32 %v11523_v42, %v11522_v61  ;;  %v9025_v22 = vadd.f32 %v8961_v45, %v8890_v19  ;;  %v11531_v19 = vld [vmem:[%s17067_s1 + $0xf8] sm:$0xff]  ;;  %v8967_v45 = vmul.f32 %v16250_v37, %v16098_v20  ;;  %v11532_v61 = vld [vmem:[%s17066_s0 + $0x100] sm:$0xff] }
 0x4d9   :  { %9219 = vst.msk [vmem:[%s17076_s12 + $0xa0] sm:$0xff] %vm243_vm1, %v9155_v59  ;;  %v9092_v27 = vmul.f32 %v16239_v12, %v7937_v58  ;;  %v9157_v52 = vadd.f32 %v9093_v54, %v9022_v10  ;;  %v11525_v10 = vld [vmem:[%s17067_s1 + $0xe0] sm:$0xff]  ;;  %v11526_v58 = vld [vmem:[%s17066_s0 + $0xf0] sm:$0xff] }
 0x4da   :  { %v10822_v1 = vpop.f32.mrf.mxu0  ;;  %v7981_v40 = vpop.f32.mrf.mxu1  ;;  %v8893_v5 = vadd.f32 %v11525_v10, %v11524_v47  ;;  %v11527_v32 = vld [vmem:[%s17067_s1 + $0xf0] sm:$0xff]  ;;  %v9027_v49 = vadd.f32 %v8963_v56, %v8892_v8  ;;  %v11533_v42 = vld [vmem:[%s17067_s1 + $0x100] sm:$0xff] }
 0x4db   :  { %v9156_v25 = vadd.f32 %v9092_v27, %v9021_v13  ;;  %9221 = vst.msk [vmem:[%s17076_s12 + $0xb0] sm:$0xff] %vm243_vm1, %v9157_v52  ;;  %v9094_v63 = vmul.f32 %v16239_v12, %v7981_v40  ;;  %v8895_v13 = vadd.f32 %v11527_v32, %v11526_v58  ;;  %v8966_v52 = vmul.f32 %v16250_v37, %v16084_v62  ;;  %v11529_v1 = vld [vmem:[%s17067_s1 + $0xe8] sm:$0xff]  ;;  %v11535_v47 = vld [vmem:[%s17067_s1 + $0x110] sm:$0xff] }
 0x4dc   :  { %v8022_v31 = vpop.f32.mrf.mxu0  ;;  %v10828_v17 = vpop.f32.mrf.mxu1  ;;  %v8894_v40 = vadd.f32 %v11529_v1, %v11528_v55  ;;  %v9028_v62 = vadd.f32 %v8964_v34, %v8893_v5  ;;  %v8897_v8 = vadd.f32 %v11533_v42, %v11532_v61  ;;  %v8974_v61 = vmul.f32 %v16250_v37, %v16172_v50 }
 0x4dd   :  { %9220 = vst.msk [vmem:[%s17076_s12 + $0xa8] sm:$0xff] %vm243_vm1, %v9156_v25  ;;  %v9158_v26 = vadd.f32 %v9094_v63, %v9023_v41  ;;  %v9095_v60 = vmul.f32 %v16239_v12, %v8022_v31  ;;  %v8965_v25 = vmul.f32 %v16250_v37, %v16093_v15  ;;  %v8896_v31 = vadd.f32 %v11531_v19, %v11530_v53 }
 0x4de   :  { %v10833_v44 = vpop.f32.mrf.mxu0  ;;  %v8066_v39 = vpop.f32.mrf.mxu1  ;;  %v9030_v15 = vadd.f32 %v8966_v52, %v8895_v13  ;;  %v11538_v52 = vld [vmem:[%s17066_s0 + $0x118] sm:$0xff]  ;;  %v8972_v19 = vmul.f32 %v16250_v37, %v16162_v4 }
 0x4df   :  { %9222 = vst.msk [vmem:[%s17076_s12 + $0xb8] sm:$0xff] %vm243_vm1, %v9158_v26  ;;  %v9159_v57 = vadd.f32 %v9095_v60, %v9024_v2  ;;  %v9097_v7 = vmul.f32 %v16239_v12, %v8066_v39  ;;  %v9029_v20 = vadd.f32 %v8965_v25, %v8894_v40  ;;  %v8971_v40 = vmul.f32 %v16250_v37, %v16142_v29  ;;  %v11541_v25 = vld [vmem:[%s17067_s1 + $0x120] sm:$0xff] }
 0x4e0   :  { %v8025_v59 = vpop.f32.mrf.mxu0  ;;  %v10839_v54 = vpop.f32.mrf.mxu1 }
 0x4e1   :  { %9223 = vst.msk [vmem:[%s17076_s12 + $0xc0] sm:$0xff] %vm243_vm1, %v9159_v57  ;;  %v9096_v11 = vmul.f32 %v16239_v12, %v8025_v59  ;;  %v9161_v24 = vadd.f32 %v9097_v7, %v9026_v6  ;;  %v8968_v6 = vmul.f32 %v16250_v37, %v16118_v36  ;;  %v11534_v7 = vld [vmem:[%s17066_s0 + $0x110] sm:$0xff]  ;;  %v9031_v36 = vadd.f32 %v8967_v45, %v8896_v31 }
 0x4e2   :  { %v10834_v33 = vpop.f32.mrf.mxu0  ;;  %v8069_v27 = vpop.f32.mrf.mxu1  ;;  %v8899_v10 = vadd.f32 %v11535_v47, %v11534_v7  ;;  %v8970_v54 = vmul.f32 %v16250_v37, %v16128_v3 }
 0x4e3   :  { %v9160_v38 = vadd.f32 %v9096_v11, %v9025_v22  ;;  %9225 = vst.msk [vmem:[%s17076_s12 + $0xd0] sm:$0xff] %vm243_vm1, %v9161_v24  ;;  %v9098_v18 = vmul.f32 %v16239_v12, %v8069_v27  ;;  %v11536_v11 = vld [vmem:[%s17066_s0 + $0x108] sm:$0xff]  ;;  %v9032_v3 = vadd.f32 %v8968_v6, %v8897_v8  ;;  %v8969_v33 = vmul.f32 %v16250_v37, %v16137_v35 }
 0x4e4   :  { %v8110_v41 = vpop.f32.mrf.mxu0  ;;  %v10840_v43 = vpop.f32.mrf.mxu1  ;;  %v11537_v24 = vld [vmem:[%s17067_s1 + $0x108] sm:$0xff]  ;;  %v9034_v35 = vadd.f32 %v8970_v54, %v8899_v10  ;;  %v11546_v10 = vld [vmem:[%s17066_s0 + $0x138] sm:$0xff] }
 0x4e5   :  { %9224 = vst.msk [vmem:[%s17076_s12 + $0xc8] sm:$0xff] %vm243_vm1, %v9160_v38  ;;  %v9162_v63 = vadd.f32 %v9098_v18, %v9027_v49  ;;  %v9099_v51 = vmul.f32 %v16239_v12, %v8110_v41  ;;  %v8898_v58 = vadd.f32 %v11537_v24, %v11536_v11  ;;  %v11539_v38 = vld [vmem:[%s17067_s1 + $0x118] sm:$0xff]  ;;  %v11548_v24 = vld [vmem:[%s17066_s0 + $0x140] sm:$0xff] }
 0x4e6   :  { %v10845_v17 = vpop.f32.mrf.mxu0  ;;  %v8154_v2 = vpop.f32.mrf.mxu1  ;;  %v8900_v18 = vadd.f32 %v11539_v38, %v11538_v52  ;;  %v11550_v52 = vld [vmem:[%s17066_s0 + $0x150] sm:$0xff] }
 0x4e7   :  { %9226 = vst.msk [vmem:[%s17076_s12 + $0xd8] sm:$0xff] %vm243_vm1, %v9162_v63  ;;  %v9163_v26 = vadd.f32 %v9099_v51, %v9028_v62  ;;  %v9101_v60 = vmul.f32 %v16239_v12, %v8154_v2  ;;  %v11540_v62 = vld [vmem:[%s17066_s0 + $0x120] sm:$0xff]  ;;  %v9033_v29 = vadd.f32 %v8969_v33, %v8898_v58  ;;  %v11542_v2 = vld [vmem:[%s17066_s0 + $0x130] sm:$0xff]  ;;  %v8976_v33 = vmul.f32 %v16250_v37, %v16188_v21 }
 0x4e8   :  { %v8113_v44 = vpop.f32.mrf.mxu0  ;;  %v10851_v39 = vpop.f32.mrf.mxu1  ;;  %v8901_v63 = vadd.f32 %v11541_v25, %v11540_v62  ;;  %v9035_v4 = vadd.f32 %v8971_v40, %v8900_v18  ;;  %v11549_v58 = vld [vmem:[%s17067_s1 + $0x140] sm:$0xff]  ;;  %v11551_v38 = vld [vmem:[%s17067_s1 + $0x150] sm:$0xff]  ;;  %v11553_v62 = vld [vmem:[%s17067_s1 + $0x148] sm:$0xff] }
 0x4e9   :  { %9227 = vst.msk [vmem:[%s17076_s12 + $0xe0] sm:$0xff] %vm243_vm1, %v9163_v26  ;;  %v9100_v56 = vmul.f32 %v16239_v12, %v8113_v44  ;;  %v9165_v57 = vadd.f32 %v9101_v60, %v9030_v15  ;;  %v11543_v15 = vld [vmem:[%s17067_s1 + $0x130] sm:$0xff]  ;;  %v11544_v44 = vld [vmem:[%s17066_s0 + $0x128] sm:$0xff]  ;;  %v8907_v18 = vadd.f32 %v11551_v38, %v11550_v52 }
 0x4ea   :  { %v10846_v5 = vpop.f32.mrf.mxu0  ;;  %v8157_v59 = vpop.f32.mrf.mxu1  ;;  %v8903_v45 = vadd.f32 %v11543_v15, %v11542_v2  ;;  %v11545_v39 = vld [vmem:[%s17067_s1 + $0x128] sm:$0xff]  ;;  %v9036_v50 = vadd.f32 %v8972_v19, %v8901_v63 }
 0x4eb   :  { %v9164_v22 = vadd.f32 %v9100_v56, %v9029_v20  ;;  %9229 = vst.msk [vmem:[%s17076_s12 + $0xf0] sm:$0xff] %vm243_vm1, %v9165_v57  ;;  %v9102_v34 = vmul.f32 %v16239_v12, %v8157_v59  ;;  %v8902_v20 = vadd.f32 %v11545_v39, %v11544_v44  ;;  %v8973_v57 = vmul.f32 %v16250_v37, %v16180_v14  ;;  %v11547_v5 = vld [vmem:[%s17067_s1 + $0x138] sm:$0xff] }
 0x4ec   :  { %v8198_v32 = vpop.f32.mrf.mxu0  ;;  %v10852_v13 = vpop.f32.mrf.mxu1  ;;  %v8904_v59 = vadd.f32 %v11547_v5, %v11546_v10  ;;  %v9038_v14 = vadd.f32 %v8974_v61, %v8903_v45  ;;  %v11556_v61 = vld [vmem:[%s17066_s0 + $0x160] sm:$0xff]  ;;  %v8982_v5 = vmul.f32 %v16250_v37, %v16198_v0 }
 0x4ed   :  { %9228 = vst.msk [vmem:[%s17076_s12 + $0xe8] sm:$0xff] %vm243_vm1, %v9164_v22  ;;  %v9166_v27 = vadd.f32 %v9102_v34, %v9031_v36  ;;  %v9103_v49 = vmul.f32 %v16239_v12, %v8198_v32  ;;  %v8975_v22 = vmul.f32 %v16250_v37, %v16184_v30  ;;  %v8905_v32 = vadd.f32 %v11549_v58, %v11548_v24 }
 0x4ee   :  { %v10857_v55 = vpop.f32.mrf.mxu0  ;;  %v8242_v1 = vpop.f32.mrf.mxu1  ;;  %v9037_v30 = vadd.f32 %v8973_v57, %v8902_v20  ;;  %v8980_v20 = vmul.f32 %v16250_v37, %v16196_v46  ;;  %v11559_v57 = vld [vmem:[%s17067_s1 + $0x170] sm:$0xff]  ;;  %v8981_v24 = vmul.f32 %v16250_v37, %v16200_v9 }
 0x4ef   :  { %9230 = vst.msk [vmem:[%s17076_s12 + $0xf8] sm:$0xff] %vm243_vm1, %v9166_v27  ;;  %v9167_v41 = vadd.f32 %v9103_v49, %v9032_v3  ;;  %v9105_v43 = vmul.f32 %v16239_v12, %v8242_v1  ;;  %v9039_v21 = vadd.f32 %v8975_v22, %v8904_v59 }
 0x4f0   :  { %v8201_v51 = vpop.f32.mrf.mxu0  ;;  %v10863_v53 = vpop.f32.mrf.mxu1 }
 0x4f1   :  { %9231 = vst.msk [vmem:[%s17076_s12 + $0x100] sm:$0xff] %vm243_vm1, %v9167_v41  ;;  %v9104_v31 = vmul.f32 %v16239_v12, %v8201_v51  ;;  %v9169_v17 = vadd.f32 %v9105_v43, %v9034_v35  ;;  %v8978_v35 = vmul.f32 %v16250_v37, %v16190_v16  ;;  %v11552_v43 = vld [vmem:[%s17066_s0 + $0x148] sm:$0xff]  ;;  %v9040_v16 = vadd.f32 %v8976_v33, %v8905_v32 }
 0x4f2   :  { %v10858_v26 = vpop.f32.mrf.mxu0  ;;  %v8245_v60 = vpop.f32.mrf.mxu1  ;;  %v8906_v25 = vadd.f32 %v11553_v62, %v11552_v43  ;;  %v8977_v53 = vmul.f32 %v16250_v37, %v16192_v23 }
 0x4f3   :  { %v9168_v42 = vadd.f32 %v9104_v31, %v9033_v29  ;;  %9233 = vst.msk [vmem:[%s17076_s12 + $0x110] sm:$0xff] %vm243_vm1, %v9169_v17  ;;  %v9106_v8 = vmul.f32 %v16239_v12, %v8245_v60  ;;  %v11554_v31 = vld [vmem:[%s17066_s0 + $0x158] sm:$0xff]  ;;  %v9042_v23 = vadd.f32 %v8978_v35, %v8907_v18  ;;  %v8979_v26 = vmul.f32 %v16250_v37, %v16194_v48  ;;  %v11564_v18 = vld [vmem:[%s17066_s0 + $0x180] sm:$0xff] }
 0x4f4   :  { %v8286_v6 = vpop.f32.mrf.mxu0  ;;  %v10864_v56 = vpop.f32.mrf.mxu1  ;;  %v11555_v17 = vld [vmem:[%s17067_s1 + $0x158] sm:$0xff]  ;;  %v9041_v48 = vadd.f32 %v8977_v53, %v8906_v25  ;;  %v11566_v25 = vld [vmem:[%s17066_s0 + $0x190] sm:$0xff] }
 0x4f5   :  { %9232 = vst.msk [vmem:[%s17076_s12 + $0x108] sm:$0xff] %vm243_vm1, %v9168_v42  ;;  %v9170_v7 = vadd.f32 %v9106_v8, %v9035_v4  ;;  %v9107_v47 = vmul.f32 %v16239_v12, %v8286_v6  ;;  %v8908_v2 = vadd.f32 %v11555_v17, %v11554_v31  ;;  %v11557_v42 = vld [vmem:[%s17067_s1 + $0x160] sm:$0xff] }
 0x4f6   :  { %v10869_v36 = vpop.f32.mrf.mxu0  ;;  %v8330_v54 = vpop.f32.mrf.mxu1  ;;  %v8909_v8 = vadd.f32 %v11557_v42, %v11556_v61  ;;  %v18223_v61 = vld [vmem:[#allocation76_spill] sm:$0xff] }
 0x4f7   :  { %9234 = vst.msk [vmem:[%s17076_s12 + $0x118] sm:$0xff] %vm243_vm1, %v9170_v7  ;;  %v9171_v34 = vadd.f32 %v9107_v47, %v9036_v50  ;;  %v9109_v11 = vmul.f32 %v16239_v12, %v8330_v54  ;;  %v11558_v50 = vld [vmem:[%s17066_s0 + $0x170] sm:$0xff]  ;;  %v9043_v46 = vadd.f32 %v8979_v26, %v8908_v2  ;;  %v11560_v54 = vld [vmem:[%s17066_s0 + $0x168] sm:$0xff]  ;;  %v8985_v42 = vmul.f32 %v16250_v37, %v18223_v61 }
 0x4f8   :  { %v8289_v13 = vpop.f32.mrf.mxu0  ;;  %v10875_v3 = vpop.f32.mrf.mxu1  ;;  %v8911_v7 = vadd.f32 %v11559_v57, %v11558_v50  ;;  %v9044_v0 = vadd.f32 %v8980_v20, %v8909_v8  ;;  %v18224_v57 = vld [vmem:[#allocation74_spill] sm:$0xff] }
 0x4f9   :  { %9235 = vst.msk [vmem:[%s17076_s12 + $0x120] sm:$0xff] %vm243_vm1, %v9171_v34  ;;  %v9108_v27 = vmul.f32 %v16239_v12, %v8289_v13  ;;  %v9173_v49 = vadd.f32 %v9109_v11, %v9038_v14  ;;  %v11561_v14 = vld [vmem:[%s17067_s1 + $0x168] sm:$0xff]  ;;  %v11562_v13 = vld [vmem:[%s17066_s0 + $0x178] sm:$0xff] }
 0x4fa   :  { %v10870_v55 = vpop.f32.mrf.mxu0  ;;  %v8333_v1 = vpop.f32.mrf.mxu1  ;;  %v8910_v22 = vadd.f32 %v11561_v14, %v11560_v54  ;;  %v11563_v3 = vld [vmem:[%s17067_s1 + $0x178] sm:$0xff]  ;;  %v9046_v9 = vadd.f32 %v8982_v5, %v8911_v7  ;;  %v8987_v7 = vmul.f32 %v16250_v37, %v18224_v57  ;;  %v11573_v5 = vld [vmem:[%s17067_s1 + $0x1a0] sm:$0xff] }
 0x4fb   :  { %v9172_v40 = vadd.f32 %v9108_v27, %v9037_v30  ;;  %9237 = vst.msk [vmem:[%s17076_s12 + $0x130] sm:$0xff] %vm243_vm1, %v9173_v49  ;;  %v9110_v41 = vmul.f32 %v16239_v12, %v8333_v1  ;;  %v8912_v30 = vadd.f32 %v11563_v3, %v11562_v13  ;;  %v8983_v49 = vmul.f32 %v16250_v37, %v16202_v28  ;;  %v11565_v55 = vld [vmem:[%s17067_s1 + $0x180] sm:$0xff] }
 0x4fc   :  { %v8374_v63 = vpop.f32.mrf.mxu0  ;;  %v10876_v51 = vpop.f32.mrf.mxu1  ;;  %v8913_v1 = vadd.f32 %v11565_v55, %v11564_v18  ;;  %v9045_v28 = vadd.f32 %v8981_v24, %v8910_v22  ;;  %v18225_v22 = vld [vmem:[#allocation153_spill] sm:$0xff]  ;;  %v11574_v24 = vld [vmem:[%s17066_s0 + $0x1b0] sm:$0xff] }
 0x4fd   :  { %9236 = vst.msk [vmem:[%s17076_s12 + $0x128] sm:$0xff] %vm243_vm1, %v9172_v40  ;;  %v9174_v29 = vadd.f32 %v9110_v41, %v9039_v21  ;;  %v9111_v19 = vmul.f32 %v16239_v12, %v8374_v63  ;;  %v18221_v40 = vld [vmem:[#allocation152_spill] sm:$0xff] }
 0x4fe   :  { %v10881_v15 = vpop.f32.mrf.mxu0  ;;  %v8418_v45 = vpop.f32.mrf.mxu1  ;;  %v8984_v41 = vmul.f32 %v16250_v37, %v18221_v40  ;;  %v11567_v63 = vld [vmem:[%s17067_s1 + $0x190] sm:$0xff] }
 0x4ff   :  { %9238 = vst.msk [vmem:[%s17076_s12 + $0x138] sm:$0xff] %vm243_vm1, %v9174_v29  ;;  %v9175_v60 = vadd.f32 %v9111_v19, %v9040_v16  ;;  %v9113_v4 = vmul.f32 %v16239_v12, %v8418_v45  ;;  %v8915_v51 = vadd.f32 %v11567_v63, %v11566_v25  ;;  %v9047_v29 = vadd.f32 %v8983_v49, %v8912_v30  ;;  %v18222_v19 = vld [vmem:[#allocation151_spill] sm:$0xff] }
 0x500   :  { %v8377_v44 = vpop.f32.mrf.mxu0  ;;  %v10887_v39 = vpop.f32.mrf.mxu1  ;;  %v8986_v31 = vmul.f32 %v16250_v37, %v18222_v19  ;;  %v11568_v15 = vld [vmem:[%s17066_s0 + $0x188] sm:$0xff] }
 0x501   :  { %9239 = vst.msk [vmem:[%s17076_s12 + $0x140] sm:$0xff] %vm243_vm1, %v9175_v60  ;;  %v9112_v6 = vmul.f32 %v16239_v12, %v8377_v44  ;;  %v9177_v56 = vadd.f32 %v9113_v4, %v9042_v23  ;;  %v11569_v45 = vld [vmem:[%s17067_s1 + $0x188] sm:$0xff]  ;;  %v9048_v4 = vadd.f32 %v8984_v41, %v8913_v1  ;;  %v11570_v39 = vld [vmem:[%s17066_s0 + $0x198] sm:$0xff] }
 0x502   :  { %v10882_v47 = vpop.f32.mrf.mxu0  ;;  %v8421_v10 = vpop.f32.mrf.mxu1  ;;  %v8914_v23 = vadd.f32 %v11569_v45, %v11568_v15  ;;  %v9050_v50 = vadd.f32 %v8986_v31, %v8915_v51 }
 0x503   :  { %v9176_v59 = vadd.f32 %v9112_v6, %v9041_v48  ;;  %9241 = vst.msk [vmem:[%s17076_s12 + $0x150] sm:$0xff] %vm243_vm1, %v9177_v56  ;;  %v9114_v36 = vmul.f32 %v16239_v12, %v8421_v10  ;;  %v11571_v48 = vld [vmem:[%s17067_s1 + $0x198] sm:$0xff] }
 0x504   :  { %v8462_v34 = vpop.f32.mrf.mxu0  ;;  %v10888_v11 = vpop.f32.mrf.mxu1  ;;  %v8916_v20 = vadd.f32 %v11571_v48, %v11570_v39  ;;  %v9049_v14 = vadd.f32 %v8985_v42, %v8914_v23 }
 0x505   :  { %9240 = vst.msk [vmem:[%s17076_s12 + $0x148] sm:$0xff] %vm243_vm1, %v9176_v59  ;;  %v9178_v58 = vadd.f32 %v9114_v36, %v9043_v46  ;;  %v9115_v32 = vmul.f32 %v16239_v12, %v8462_v34  ;;  %v11572_v46 = vld [vmem:[%s17066_s0 + $0x1a0] sm:$0xff]  ;;  %v8988_v34 = vmul.f32 %v16250_v37, %v18225_v22 }
 0x506   :  { %v10893_v33 = vpop.f32.mrf.mxu0  ;;  %v8506_v27 = vpop.f32.mrf.mxu1  ;;  %v8917_v59 = vadd.f32 %v11573_v5, %v11572_v46  ;;  %v9051_v30 = vadd.f32 %v8987_v7, %v8916_v20 }
 0x507   :  { %9242 = vst.msk [vmem:[%s17076_s12 + $0x158] sm:$0xff] %vm243_vm1, %v9178_v58  ;;  %v9179_v52 = vadd.f32 %v9115_v32, %v9044_v0  ;;  %v9117_v38 = vmul.f32 %v16239_v12, %v8506_v27  ;;  %v11575_v58 = vld [vmem:[%s17067_s1 + $0x1b0] sm:$0xff]  ;;  %v18226_v33 = vld [vmem:[#allocation154_spill] sm:$0xff] }
 0x508   :  { %v8465_v21 = vpop.f32.mrf.mxu0  ;;  %v10899_v35 = vpop.f32.mrf.mxu1  ;;  %v8919_v32 = vadd.f32 %v11575_v58, %v11574_v24  ;;  %v8990_v27 = vmul.f32 %v16250_v37, %v18226_v33 }
 0x509   :  { %9243 = vst.msk [vmem:[%s17076_s12 + $0x160] sm:$0xff] %vm243_vm1, %v9179_v52  ;;  %v9116_v43 = vmul.f32 %v16239_v12, %v8465_v21  ;;  %v9181_v62 = vadd.f32 %v9117_v38, %v9046_v9  ;;  %v11576_v52 = vld [vmem:[%s17066_s0 + $0x1a8] sm:$0xff]  ;;  %v9052_v21 = vadd.f32 %v8988_v34, %v8917_v59  ;;  %v18227_v35 = vld [vmem:[#allocation72_spill] sm:$0xff] }
 0x50a   :  { %v10894_v16 = vpop.f32.mrf.mxu0  ;;  %v8509_v53 = vpop.f32.mrf.mxu1  ;;  %v11577_v38 = vld [vmem:[%s17067_s1 + $0x1a8] sm:$0xff] }
 0x50b   :  { %v9180_v17 = vadd.f32 %v9116_v43, %v9045_v28  ;;  %9245 = vst.msk [vmem:[%s17076_s12 + $0x170] sm:$0xff] %vm243_vm1, %v9181_v62  ;;  %v9118_v2 = vmul.f32 %v16239_v12, %v8509_v53  ;;  %v8918_v18 = vadd.f32 %v11577_v38, %v11576_v52  ;;  %v8989_v28 = vmul.f32 %v16250_v37, %v18227_v35  ;;  %v11578_v43 = vld [vmem:[%s17066_s0 + $0x1b8] sm:$0xff] }
 0x50c   :  { %v8550_v26 = vpop.f32.mrf.mxu0  ;;  %v10900_v60 = vpop.f32.mrf.mxu1  ;;  %v11579_v62 = vld [vmem:[%s17067_s1 + $0x1b8] sm:$0xff]  ;;  %v9054_v16 = vadd.f32 %v8990_v27, %v8919_v32 }
 0x50d   :  { %9244 = vst.msk [vmem:[%s17076_s12 + $0x168] sm:$0xff] %vm243_vm1, %v9180_v17  ;;  %v9182_v8 = vadd.f32 %v9118_v2, %v9047_v29  ;;  %v9119_v44 = vmul.f32 %v16239_v12, %v8550_v26  ;;  %v8920_v25 = vadd.f32 %v11579_v62, %v11578_v43  ;;  %v18228_v53 = vld [vmem:[#allocation69_spill] sm:$0xff]  ;;  %v11580_v17 = vld [vmem:[%s17066_s0 + $0x1c0] sm:$0xff]  ;;  %v9053_v26 = vadd.f32 %v8989_v28, %v8918_v18  ;;  %v18229_v60 = vld [vmem:[#allocation156_spill] sm:$0xff] }
 0x50e   :  { %v10905_v6 = vpop.f32.mrf.mxu0  ;;  %v8594_v56 = vpop.f32.mrf.mxu1  ;;  %v8991_v29 = vmul.f32 %v16250_v37, %v18228_v53  ;;  %v11581_v2 = vld [vmem:[%s17067_s1 + $0x1c0] sm:$0xff] }
 0x50f   :  { %9246 = vst.msk [vmem:[%s17076_s12 + $0x178] sm:$0xff] %vm243_vm1, %v9182_v8  ;;  %v9183_v47 = vadd.f32 %v9119_v44, %v9048_v4  ;;  %v9121_v10 = vmul.f32 %v16239_v12, %v8594_v56  ;;  %v8921_v15 = vadd.f32 %v11581_v2, %v11580_v17  ;;  %v8992_v4 = vmul.f32 %v16250_v37, %v18229_v60  ;;  %v11582_v8 = vld [vmem:[%s17066_s0 + $0x1d0] sm:$0xff]  ;;  %v18230_v56 = vld [vmem:[#allocation155_spill] sm:$0xff] }
 0x510   :  { %v8553_v36 = vpop.f32.mrf.mxu0  ;;  %v10911_v54 = vpop.f32.mrf.mxu1  ;;  %v11583_v44 = vld [vmem:[%s17067_s1 + $0x1d0] sm:$0xff]  ;;  %v9055_v6 = vadd.f32 %v8991_v29, %v8920_v25 }
 0x511   :  { %9247 = vst.msk [vmem:[%s17076_s12 + $0x180] sm:$0xff] %vm243_vm1, %v9183_v47  ;;  %v9120_v11 = vmul.f32 %v16239_v12, %v8553_v36  ;;  %v9185_v0 = vadd.f32 %v9121_v10, %v9050_v50  ;;  %v8923_v39 = vadd.f32 %v11583_v44, %v11582_v8  ;;  %v8994_v50 = vmul.f32 %v16250_v37, %v18230_v56  ;;  %v11584_v47 = vld [vmem:[%s17066_s0 + $0x1c8] sm:$0xff]  ;;  %v18231_v54 = vld [vmem:[#allocation206_spill] sm:$0xff] }
 0x512   :  { %v10906_v13 = vpop.f32.mrf.mxu0  ;;  %v8597_v3 = vpop.f32.mrf.mxu1  ;;  %v11585_v10 = vld [vmem:[%s17067_s1 + $0x1c8] sm:$0xff]  ;;  %v9056_v36 = vadd.f32 %v8992_v4, %v8921_v15 }
 0x513   :  { %v9184_v9 = vadd.f32 %v9120_v11, %v9049_v14  ;;  %9249 = vst.msk [vmem:[%s17076_s12 + $0x190] sm:$0xff] %vm243_vm1, %v9185_v0  ;;  %v9122_v49 = vmul.f32 %v16239_v12, %v8597_v3  ;;  %v8922_v46 = vadd.f32 %v11585_v10, %v11584_v47  ;;  %v8993_v14 = vmul.f32 %v16250_v37, %v18231_v54  ;;  %v11586_v11 = vld [vmem:[%s17066_s0 + $0x1d8] sm:$0xff] }
 0x514   :  { %v8638_v55 = vpop.f32.mrf.mxu0  ;;  %v10912_v1 = vpop.f32.mrf.mxu1  ;;  %v11587_v0 = vld [vmem:[%s17067_s1 + $0x1d8] sm:$0xff]  ;;  %v9058_v13 = vadd.f32 %v8994_v50, %v8923_v39 }
 0x515   :  { %9248 = vst.msk [vmem:[%s17076_s12 + $0x188] sm:$0xff] %vm243_vm1, %v9184_v9  ;;  %v9186_v40 = vadd.f32 %v9122_v49, %v9051_v30  ;;  %v9123_v41 = vmul.f32 %v16239_v12, %v8638_v55  ;;  %v8924_v24 = vadd.f32 %v11587_v0, %v11586_v11  ;;  %v18232_v3 = vld [vmem:[#allocation209_spill] sm:$0xff]  ;;  %v11588_v9 = vld [vmem:[%s17066_s0 + $0x1e0] sm:$0xff]  ;;  %v9057_v55 = vadd.f32 %v8993_v14, %v8922_v46 }
 0x516   :  { %v10917_v63 = vpop.f32.mrf.mxu0  ;;  %v8682_v51 = vpop.f32.mrf.mxu1  ;;  %v8995_v30 = vmul.f32 %v16250_v37, %v18232_v3  ;;  %v11589_v49 = vld [vmem:[%s17067_s1 + $0x1e0] sm:$0xff]  ;;  %v18233_v1 = vld [vmem:[#allocation157_spill] sm:$0xff] }
 0x517   :  { %9250 = vst.msk [vmem:[%s17076_s12 + $0x198] sm:$0xff] %vm243_vm1, %v9186_v40  ;;  %v9187_v19 = vadd.f32 %v9123_v41, %v9052_v21  ;;  %v9125_v31 = vmul.f32 %v16239_v12, %v8682_v51  ;;  %v8925_v52 = vadd.f32 %v11589_v49, %v11588_v9  ;;  %v8996_v21 = vmul.f32 %v16250_v37, %v18233_v1  ;;  %v11590_v40 = vld [vmem:[%s17066_s0 + $0x1f0] sm:$0xff]  ;;  %v18234_v51 = vld [vmem:[#allocation158_spill] sm:$0xff] }
 0x518   :  { %v8641_v45 = vpop.f32.mrf.mxu0  ;;  %v10923_v23 = vpop.f32.mrf.mxu1  ;;  %v11591_v41 = vld [vmem:[%s17067_s1 + $0x1f0] sm:$0xff]  ;;  %v9059_v63 = vadd.f32 %v8995_v30, %v8924_v24 }
 0x519   :  { %9251 = vst.msk [vmem:[%s17076_s12 + $0x1a0] sm:$0xff] %vm243_vm1, %v9187_v19  ;;  %v9124_v61 = vmul.f32 %v16239_v12, %v8641_v45  ;;  %v9189_v42 = vadd.f32 %v9125_v31, %v9054_v16  ;;  %v8927_v43 = vadd.f32 %v11591_v41, %v11590_v40  ;;  %v8998_v16 = vmul.f32 %v16250_v37, %v18234_v51  ;;  %v11592_v19 = vld [vmem:[%s17066_s0 + $0x1e8] sm:$0xff]  ;;  %v18235_v23 = vld [vmem:[#allocation210_spill] sm:$0xff] }
 0x51a   :  { %v10918_v48 = vpop.f32.mrf.mxu0  ;;  %v8685_v20 = vpop.f32.mrf.mxu1  ;;  %v11593_v31 = vld [vmem:[%s17067_s1 + $0x1e8] sm:$0xff]  ;;  %v9060_v45 = vadd.f32 %v8996_v21, %v8925_v52 }
 0x51b   :  { %v9188_v57 = vadd.f32 %v9124_v61, %v9053_v26  ;;  %9253 = vst.msk [vmem:[%s17076_s12 + $0x1b0] sm:$0xff] %vm243_vm1, %v9189_v42  ;;  %v9126_v7 = vmul.f32 %v16239_v12, %v8685_v20  ;;  %v8926_v17 = vadd.f32 %v11593_v31, %v11592_v19  ;;  %v8997_v26 = vmul.f32 %v16250_v37, %v18235_v23  ;;  %v11594_v61 = vld [vmem:[%s17066_s0 + $0x1f8] sm:$0xff] }
 0x51c   :  { %v8726_v5 = vpop.f32.mrf.mxu0  ;;  %v10924_v59 = vpop.f32.mrf.mxu1  ;;  %v11595_v42 = vld [vmem:[%s17067_s1 + $0x1f8] sm:$0xff]  ;;  %v9062_v48 = vadd.f32 %v8998_v16, %v8927_v43 }
 0x51d   :  { %9252 = vst.msk [vmem:[%s17076_s12 + $0x1a8] sm:$0xff] %vm243_vm1, %v9188_v57  ;;  %v9190_v22 = vadd.f32 %v9126_v7, %v9055_v6  ;;  %v9127_v34 = vmul.f32 %v16239_v12, %v8726_v5  ;;  %v8928_v8 = vadd.f32 %v11595_v42, %v11594_v61  ;;  %v18236_v20 = vld [vmem:[#allocation213_spill] sm:$0xff]  ;;  %v9061_v47 = vadd.f32 %v8997_v26, %v8926_v17 }
 0x51e   :  { %v10929_v58 = vpop.f32.mrf.mxu0  ;;  %v8770_v32 = vpop.f32.mrf.mxu1  ;;  %v8999_v6 = vmul.f32 %v16250_v37, %v18236_v20 }
 0x51f   :  { %9254 = vst.msk [vmem:[%s17076_s12 + $0x1b8] sm:$0xff] %vm243_vm1, %v9190_v22  ;;  %v9191_v33 = vadd.f32 %v9127_v34, %v9056_v36  ;;  %v9129_v27 = vmul.f32 %v16239_v12, %v8770_v32 }
 0x520   :  { %v8729_v38 = vpop.f32.mrf.mxu0  ;;  %v10935_v18 = vpop.f32.mrf.mxu1  ;;  %v9063_v59 = vadd.f32 %v8999_v6, %v8928_v8 }
 0x521   :  { %9255 = vst.msk [vmem:[%s17076_s12 + $0x1c0] sm:$0xff] %vm243_vm1, %v9191_v33  ;;  %v9128_v35 = vmul.f32 %v16239_v12, %v8729_v38  ;;  %v9193_v28 = vadd.f32 %v9129_v27, %v9058_v13 }
 0x522   :  { %v10930_v62 = vpop.f32.mrf.mxu0  ;;  %v8773_v25 = vpop.f32.mrf.mxu1 }
 0x523   :  { %v9192_v53 = vadd.f32 %v9128_v35, %v9057_v55  ;;  %9257 = vst.msk [vmem:[%s17076_s12 + $0x1d0] sm:$0xff] %vm243_vm1, %v9193_v28  ;;  %v9130_v29 = vmul.f32 %v16239_v12, %v8773_v25 }
 0x524   :  { %v8814_v2 = vpop.f32.mrf.mxu0  ;;  %v10936_v15 = vpop.f32.mrf.mxu1 }
 0x525   :  { %9256 = vst.msk [vmem:[%s17076_s12 + $0x1c8] sm:$0xff] %vm243_vm1, %v9192_v53  ;;  %v9194_v60 = vadd.f32 %v9130_v29, %v9059_v63  ;;  %v9131_v4 = vmul.f32 %v16239_v12, %v8814_v2 }
 0x526   :  { %v10941_v44 = vpop.f32.mrf.mxu0  ;;  %v8858_v39 = vpop.f32.mrf.mxu1 }
 0x527   :  { %9258 = vst.msk [vmem:[%s17076_s12 + $0x1d8] sm:$0xff] %vm243_vm1, %v9194_v60  ;;  %v9195_v56 = vadd.f32 %v9131_v4, %v9060_v45  ;;  %v9133_v50 = vmul.f32 %v16239_v12, %v8858_v39 }
 0x528   :  { %v8817_v57 = vpop.f32.mrf.mxu0  ;;  %v10947_v7 = vpop.f32.mrf.mxu1 }
 0x529   :  { %9259 = vst.msk [vmem:[%s17076_s12 + $0x1e0] sm:$0xff] %vm243_vm1, %v9195_v56  ;;  %v9132_v10 = vmul.f32 %v16239_v12, %v8817_v57  ;;  %v9197_v46 = vadd.f32 %v9133_v50, %v9062_v48 }
 0x52a   :  { %v10942_v37 = vpop.f32.mrf.mxu0  ;;  %v8861_v5 = vpop.f32.mrf.mxu1 }
 0x52b   :  { %v9196_v36 = vadd.f32 %v9132_v10, %v9061_v47  ;;  %9261 = vst.msk [vmem:[%s17076_s12 + $0x1f0] sm:$0xff] %vm243_vm1, %v9197_v46  ;;  %v9134_v54 = vmul.f32 %v16239_v12, %v8861_v5 }
 0x52c   :  { %v10948_v14 = vpop.f32.mrf.mxu1 }
 0x52d   :  { %9260 = vst.msk [vmem:[%s17076_s12 + $0x1e8] sm:$0xff] %vm243_vm1, %v9196_v36  ;;  %v9198_v22 = vadd.f32 %v9134_v54, %v9063_v59 }
 0x52f   :  { %9262 = vst.msk [vmem:[%s17076_s12 + $0x1f8] sm:$0xff] %vm243_vm1, %v9198_v22 }

</bundles_post_ra>
